<compile_context>
chip_gen: v7x
topology: tpu7x:2x2x1
jax: 0.10.0
libtpu: 0.0.40
codegen_flags: <defaults>
</compile_context>

<pallas_src>
import jax
import jax.numpy as jnp
from jax import lax
from jax.experimental import pallas as pl
from jax.experimental.pallas import tpu as pltpu

_HIGHEST = lax.Precision.HIGHEST


# ----------------------------------------------------------------------------
# Wrapper-side weight preprocessing (tiny, once per call):
#   out[m, w*Cout+co] = sum_{kd,kh} sum_{w',ci}
#       x_shift[kd,kh][m, w'*Cin+ci] * B[kd*3+kh][w'*Cin+ci, w*Cout+co]
#   with B[..][w'*Cin+ci, w*Cout+co] = Wt[kd, kh, w'-w+1, ci, co]
#   (zero outside tap range [0,3) -> implicit 'same' zero padding along W).
# ----------------------------------------------------------------------------
def _build_band_weights(w_dhwio, W):
    kD, kH, kW, Cin, Cout = w_dhwio.shape
    wp = jnp.arange(W)[:, None]                 # input w'
    wo = jnp.arange(W)[None, :]                 # output w
    kw = wp - wo + 1                            # (W, W) tap index
    valid = (kw >= 0) & (kw < kW)
    kw_c = jnp.clip(kw, 0, kW - 1)
    band = w_dhwio[:, :, kw_c]                  # (kD, kH, W(wp), W(wo), Cin, Cout)
    band = band * valid[None, None, :, :, None, None].astype(w_dhwio.dtype)
    band = band.transpose(0, 1, 2, 4, 3, 5)     # (kD, kH, Wp, Cin, Wo, Cout)
    return band.reshape(kD * kH, W * Cin, W * Cout)


def _build_pool_select(W, Cout):
    """0/1 matrices selecting even / odd w-groups: shape (2, W*Cout, (W//2)*Cout)."""
    Wp = W // 2
    j_in = jnp.arange(W * Cout)[:, None]
    j_out = jnp.arange(Wp * Cout)[None, :]
    co_match = (j_in % Cout) == (j_out % Cout)
    w_in, wp_out = j_in // Cout, j_out // Cout
    even = co_match & (w_in == 2 * wp_out)
    odd = co_match & (w_in == 2 * wp_out + 1)
    return jnp.stack([even, odd]).astype(jnp.float32)


# ----------------------------------------------------------------------------
# Fused conv(+ReLU)(+2x2x2 maxpool) kernel.  One grid step = (batch n, D-tile dt).
# ----------------------------------------------------------------------------
def _make_conv_relu_kernel(TD, H, W, Cin, Cout, pool):
    WCin, WCout = W * Cin, W * Cout
    Hh = H // 2
    WpCout = (W // 2) * Cout

    def kernel(*refs):
        if pool:
            (xlo_ref, xhi_ref, bmat_ref, bias_ref, sel_ref,
             o_ref, xin_ref, pool_ref) = refs
        else:
            xlo_ref, xhi_ref, bmat_ref, bias_ref, o_ref, xin_ref = refs

        # Stage the TD+2 halo'd D-slices (already H-padded) into one scratch.
        xin_ref[0:TD] = xlo_ref[0]               # (TD, H+2, W*Cin)
        xin_ref[TD:TD + 2] = xhi_ref[0]          # (2,  H+2, W*Cin) halo rows

        acc = jnp.zeros((TD * H, WCout), jnp.float32)
        for kh in range(3):
            # One sublane-shifted slab per kh (3 total); kd offsets below are
            # cheap contiguous leading-dim slices of that slab.
            sh = xin_ref[:, kh:kh + H, :]        # (TD+2, H, W*Cin)
            for kd in range(3):
                patch = sh[kd:kd + TD].reshape(TD * H, WCin)
                acc = acc + jnp.dot(patch, bmat_ref[kd * 3 + kh],
                                    preferred_element_type=jnp.float32,
                                    precision=_HIGHEST)
        acc = jnp.maximum(acc + bias_ref[...], 0.0)          # bias + ReLU

        if not pool:
            o_ref[...] = acc.reshape(1, TD, H, WCout).astype(o_ref.dtype)
            return

        # MaxPool3d(2, 2), separable: H pairs first (strided sublane reads from
        # a VMEM scratch), then D pairs (contiguous row blocks), then W pairs
        # (lane-dense 0/1 selection matmuls on the 4x-reduced rows).
        pool_ref[...] = acc                                   # (TD*H, W*Cout)
        ev = pool_ref[pl.ds(0, TD * Hh, 2), :]                # rows h even
        od = pool_ref[pl.ds(1, TD * Hh, 2), :]                # rows h odd
        yh = jnp.maximum(ev, od)                              # (TD*Hh, W*Cout)
        for i in range(TD // 2):
            a = yh[(2 * i) * Hh:(2 * i + 1) * Hh]             # d = 2i
            b = yh[(2 * i + 1) * Hh:(2 * i + 2) * Hh]         # d = 2i+1
            yd = jnp.maximum(a, b)                            # (Hh, W*Cout)
            ye = jnp.dot(yd, sel_ref[0], preferred_element_type=jnp.float32,
                         precision=_HIGHEST)
            yo = jnp.dot(yd, sel_ref[1], preferred_element_type=jnp.float32,
                         precision=_HIGHEST)
            o_ref[0, i] = jnp.maximum(ye, yo).astype(o_ref.dtype)

    return kernel


def conv3d_relu(x_ndhwc, w_dhwio, b, *, pool=False):
    """3x3x3 'same' conv + bias + ReLU (+ fused 2x2x2 maxpool if pool=True).

    x: (N, D, H, W, Cin) f32; w: (3, 3, 3, Cin, Cout); b: (Cout,).
    Returns (N, D, H, W, Cout) or, with pool, (N, D//2, H//2, W//2, Cout).
    """
    N, D, H, W, Cin = x_ndhwc.shape
    Cout = w_dhwio.shape[-1]
    TD = 4 if D % 4 == 0 else 2
    assert D % TD == 0, "D must be even"
    if pool:
        assert D % 2 == 0 and H % 2 == 0 and W % 2 == 0, "MaxPool3d(2,2) needs even D/H/W"

    WCin, WCout = W * Cin, W * Cout
    Hp = H + 2

    bmat = _build_band_weights(w_dhwio, W)                 # (9, W*Cin, W*Cout)
    bias = jnp.tile(b, (W,)).reshape(1, WCout)             # lane w*Cout+co -> b[co]

    # Merge (W, Cin) onto the lane axis; zero-pad only the D / H halos
    # (W 'same'-padding lives inside the band matrices, so no W pad).
    x2 = x_ndhwc.reshape(N, D, H, WCin)
    xp = jnp.pad(x2, ((0, 0), (1, 1), (1, 1), (0, 0)))     # (N, D+2, H+2, W*Cin)
    # TODO(synk): generate the D/H halos inside the kernel (zero-filled scratch
    # borders) to avoid this extra HBM pass over the activation.

    nd = D // TD
    halo_idx = TD // 2   # block index stride for the 2-row halo BlockSpec
    in_specs = [
        # low part of the D window: padded rows [dt*TD, dt*TD + TD)
        pl.BlockSpec((1, TD, Hp, WCin), lambda n, dt: (n, dt, 0, 0)),
        # halo rows: padded rows [(dt+1)*TD, (dt+1)*TD + 2)
        pl.BlockSpec((1, 2, Hp, WCin),
                     lambda n, dt: (n, (dt + 1) * halo_idx, 0, 0)),
        pl.BlockSpec((9, WCin, WCout), lambda n, dt: (0, 0, 0)),
        pl.BlockSpec((1, WCout), lambda n, dt: (0, 0)),
    ]
    args = [xp, xp, bmat, bias]
    scratch = [pltpu.VMEM((TD + 2, Hp, WCin), jnp.float32)]

    if pool:
        WpCout = (W // 2) * Cout
        sel = _build_pool_select(W, Cout)                  # (2, W*Cout, Wp*Cout)
        in_specs.append(pl.BlockSpec((2, WCout, WpCout), lambda n, dt: (0, 0, 0)))
        args.append(sel)
        out_shape = jax.ShapeDtypeStruct((N, D // 2, H // 2, WpCout), x_ndhwc.dtype)
        out_spec = pl.BlockSpec((1, TD // 2, H // 2, WpCout),
                                lambda n, dt: (n, dt, 0, 0))
        scratch.append(pltpu.VMEM((TD * H, WCout), jnp.float32))
    else:
        out_shape = jax.ShapeDtypeStruct((N, D, H, WCout), x_ndhwc.dtype)
        out_spec = pl.BlockSpec((1, TD, H, WCout), lambda n, dt: (n, dt, 0, 0))

    kernel = _make_conv_relu_kernel(TD, H, W, Cin, Cout, pool)
    y = pl.pallas_call(
        kernel,
        out_shape=out_shape,
        grid=(N, nd),
        in_specs=in_specs,
        out_specs=out_spec,
        scratch_shapes=scratch,
        compiler_params=pltpu.CompilerParams(
            dimension_semantics=("parallel", "parallel")),
    )(*args)

    if pool:
        return y.reshape(N, D // 2, H // 2, W // 2, Cout)
    return y.reshape(N, D, H, W, Cout)


# ----------------------------------------------------------------------------
# LunaBlock forward (NCDHW in / NCDHW out, matching PyTorch).
# ----------------------------------------------------------------------------
def luna_block_forward(x_ncdhw, params, dropout_rate=0.0):
    x = jnp.transpose(x_ncdhw, (0, 2, 3, 4, 1))                 # NCDHW -> NDHWC
    x = conv3d_relu(x, params["w1"], params["b1"], pool=False)  # conv1 + relu1
    x = conv3d_relu(x, params["w2"], params["b2"], pool=True)   # conv2+relu2+maxpool
    # Dropout3d(p=0.0) is the identity (and identity in eval mode anyway).
    # TODO(synk): for dropout_rate > 0 in training mode, draw a per-(N, C)
    # channel mask with pltpu.prng_seed / pltpu.prng_random_bits and rescale.
    del dropout_rate
    return jnp.transpose(x, (0, 4, 1, 2, 3))                    # NDHWC -> NCDHW


def init_params(key, in_channels, conv_channels):
    k1, k2, k3, k4 = jax.random.split(key, 4)
    lim1 = 1.0 / jnp.sqrt(in_channels * 27.0)
    lim2 = 1.0 / jnp.sqrt(conv_channels * 27.0)
    return {
        # weights stored as (3,3,3,Cin,Cout) i.e. DHWIO
        "w1": jax.random.uniform(k1, (3, 3, 3, in_channels, conv_channels),
                                 jnp.float32, -lim1, lim1),
        "b1": jax.random.uniform(k2, (conv_channels,), jnp.float32, -lim1, lim1),
        "w2": jax.random.uniform(k3, (3, 3, 3, conv_channels, conv_channels),
                                 jnp.float32, -lim2, lim2),
        "b2": jax.random.uniform(k4, (conv_channels,), jnp.float32, -lim2, lim2),
    }


# ----------------------------------------------------------------------------
# Pure-JAX reference for verification.
# ----------------------------------------------------------------------------
def _ref_luna_block(x_ncdhw, params):
    def conv(x, w, b):
        w_oidhw = jnp.transpose(w, (4, 3, 0, 1, 2))
        y = lax.conv_general_dilated(
            x, w_oidhw, window_strides=(1, 1, 1),
            padding=((1, 1), (1, 1), (1, 1)),
            dimension_numbers=("NCDHW", "OIDHW", "NCDHW"),
            precision=_HIGHEST)
        return jnp.maximum(y + b[None, :, None, None, None], 0.0)

    y = conv(x_ncdhw, params["w1"], params["b1"])
    y = conv(y, params["w2"], params["b2"])
    y = lax.reduce_window(y, -jnp.inf, lax.max,
                          window_dimensions=(1, 1, 2, 2, 2),
                          window_strides=(1, 1, 2, 2, 2),
                          padding="VALID")
    return y


if __name__ == "__main__":
    key = jax.random.PRNGKey(0)
    k_x, k_p = jax.random.split(key)

    N, C_IN, C_CONV = 2, 4, 8
    D = H = W = 16
    x = jax.random.normal(k_x, (N, C_IN, D, H, W), jnp.float32)   # NCDHW
    params = init_params(k_p, C_IN, C_CONV)

    fwd = jax.jit(luna_block_forward)
    out = jax.block_until_ready(fwd(x, params))
    ref = jax.block_until_ready(_ref_luna_block(x, params))

    assert out.shape == (N, C_CONV, D // 2, H // 2, W // 2), out.shape
    max_err = float(jnp.max(jnp.abs(out - ref)))
    assert jnp.allclose(out, ref, atol=2e-3, rtol=2e-3), f"max_err={max_err}"

    print("KERNEL_OK")
</pallas_src>

<mosaic_0001>
module attributes {stable_mosaic.version = 11 : i64} {
  func.func @kernel(%arg0: i32, %arg1: i32, %arg2: memref<1x4x18x64xf32, #tpu.memory_space<vmem>>, %arg3: memref<1x2x18x64xf32, #tpu.memory_space<vmem>>, %arg4: memref<9x64x128xf32, #tpu.memory_space<vmem>>, %arg5: memref<1x128xf32, #tpu.memory_space<vmem>>, %arg6: memref<1x4x16x128xf32, #tpu.memory_space<vmem>>, %arg7: memref<6x18x64xf32, #tpu.memory_space<vmem>>) attributes {dimension_semantics = [#tpu.dimension_semantics<parallel>, #tpu.dimension_semantics<parallel>], iteration_bounds = array<i64: 2, 4>, scalar_prefetch = 0 : i64, scratch_operands = 1 : i64, tpu.core_type = #tpu.core_type<tc>, window_params = [{transform_indices = @transform_0, window_bounds = array<i64: 1, 4, 18, 64>}, {transform_indices = @transform_1, window_bounds = array<i64: 1, 2, 18, 64>}, {pipeline_mode = #tpu.pipeline_mode<synchronous>, transform_indices = @transform_2, window_bounds = array<i64: 9, 64, 128>}, {pipeline_mode = #tpu.pipeline_mode<synchronous>, transform_indices = @transform_3, window_bounds = array<i64: 1, 128>}, {transform_indices = @transform_4, window_bounds = array<i64: 1, 4, 16, 128>}]} {
    %c0 = arith.constant 0 : index
    %c0_0 = arith.constant 0 : index
    %c0_1 = arith.constant 0 : index
    %c0_2 = arith.constant 0 : index
    %0 = vector.load %arg2[%c0, %c0_0, %c0_1, %c0_2] : memref<1x4x18x64xf32, #tpu.memory_space<vmem>>, vector<1x4x18x64xf32>
    %1 = vector.shape_cast %0 : vector<1x4x18x64xf32> to vector<4x18x64xf32>
    %c0_3 = arith.constant 0 : index
    %c0_4 = arith.constant 0 : index
    %c0_5 = arith.constant 0 : index
    %2 = vector.load %arg7[%c0_3, %c0_4, %c0_5] : memref<6x18x64xf32, #tpu.memory_space<vmem>>, vector<4x18x64xf32>
    tpu.vector_store %arg7[%c0_3, %c0_4, %c0_5], %1 {strides = array<i32>} : memref<6x18x64xf32, #tpu.memory_space<vmem>>, vector<4x18x64xf32>,
    %c0_6 = arith.constant 0 : index
    %c0_7 = arith.constant 0 : index
    %c0_8 = arith.constant 0 : index
    %c0_9 = arith.constant 0 : index
    %3 = vector.load %arg3[%c0_6, %c0_7, %c0_8, %c0_9] : memref<1x2x18x64xf32, #tpu.memory_space<vmem>>, vector<1x2x18x64xf32>
    %4 = vector.shape_cast %3 : vector<1x2x18x64xf32> to vector<2x18x64xf32>
    %c4 = arith.constant 4 : index
    %c0_10 = arith.constant 0 : index
    %c0_11 = arith.constant 0 : index
    %5 = vector.load %arg7[%c4, %c0_10, %c0_11] : memref<6x18x64xf32, #tpu.memory_space<vmem>>, vector<2x18x64xf32>
    tpu.vector_store %arg7[%c4, %c0_10, %c0_11], %4 {strides = array<i32>} : memref<6x18x64xf32, #tpu.memory_space<vmem>>, vector<2x18x64xf32>,
    %cst = arith.constant 0.000000e+00 : f32
    %6 = vector.broadcast %cst : f32 to vector<64x128xf32>
    %c0_12 = arith.constant 0 : index
    %c0_13 = arith.constant 0 : index
    %c0_14 = arith.constant 0 : index
    %7 = vector.load %arg7[%c0_12, %c0_13, %c0_14] : memref<6x18x64xf32, #tpu.memory_space<vmem>>, vector<6x16x64xf32>
    %8 = vector.extract_strided_slice %7 {offsets = [0, 0, 0], sizes = [4, 16, 64], strides = [1, 1, 1]} : vector<6x16x64xf32> to vector<4x16x64xf32>
    %9 = vector.shape_cast %8 : vector<4x16x64xf32> to vector<64x64xf32>
    %c0_15 = arith.constant 0 : index
    %c0_16 = arith.constant 0 : index
    %c0_17 = arith.constant 0 : index
    %10 = vector.load %arg4[%c0_15, %c0_16, %c0_17] : memref<9x64x128xf32, #tpu.memory_space<vmem>>, vector<1x64x128xf32>
    %11 = vector.shape_cast %10 : vector<1x64x128xf32> to vector<64x128xf32>
    %cst_18 = arith.constant dense<0.000000e+00> : vector<64x128xf32>
    %12 = tpu.matmul %9, %11, %cst_18 {dimension_numbers = #tpu.dot_dimension_numbers<[1], [0], [0], [1], [0, 0, 1, 1], [], []>, precision = #tpu.contract_precision<fp32>} : vector<64x64xf32>, vector<64x128xf32>, vector<64x128xf32> -> vector<64x128xf32>
    %13 = arith.addf %6, %12 : vector<64x128xf32>
    %14 = vector.extract_strided_slice %7 {offsets = [1, 0, 0], sizes = [4, 16, 64], strides = [1, 1, 1]} : vector<6x16x64xf32> to vector<4x16x64xf32>
    %15 = vector.shape_cast %14 : vector<4x16x64xf32> to vector<64x64xf32>
    %c3 = arith.constant 3 : index
    %c0_19 = arith.constant 0 : index
    %c0_20 = arith.constant 0 : index
    %16 = vector.load %arg4[%c3, %c0_19, %c0_20] : memref<9x64x128xf32, #tpu.memory_space<vmem>>, vector<1x64x128xf32>
    %17 = vector.shape_cast %16 : vector<1x64x128xf32> to vector<64x128xf32>
    %cst_21 = arith.constant dense<0.000000e+00> : vector<64x128xf32>
    %18 = tpu.matmul %15, %17, %cst_21 {dimension_numbers = #tpu.dot_dimension_numbers<[1], [0], [0], [1], [0, 0, 1, 1], [], []>, precision = #tpu.contract_precision<fp32>} : vector<64x64xf32>, vector<64x128xf32>, vector<64x128xf32> -> vector<64x128xf32>
    %19 = arith.addf %13, %18 : vector<64x128xf32>
    %20 = vector.extract_strided_slice %7 {offsets = [2, 0, 0], sizes = [4, 16, 64], strides = [1, 1, 1]} : vector<6x16x64xf32> to vector<4x16x64xf32>
    %21 = vector.shape_cast %20 : vector<4x16x64xf32> to vector<64x64xf32>
    %c6 = arith.constant 6 : index
    %c0_22 = arith.constant 0 : index
    %c0_23 = arith.constant 0 : index
    %22 = vector.load %arg4[%c6, %c0_22, %c0_23] : memref<9x64x128xf32, #tpu.memory_space<vmem>>, vector<1x64x128xf32>
    %23 = vector.shape_cast %22 : vector<1x64x128xf32> to vector<64x128xf32>
    %cst_24 = arith.constant dense<0.000000e+00> : vector<64x128xf32>
    %24 = tpu.matmul %21, %23, %cst_24 {dimension_numbers = #tpu.dot_dimension_numbers<[1], [0], [0], [1], [0, 0, 1, 1], [], []>, precision = #tpu.contract_precision<fp32>} : vector<64x64xf32>, vector<64x128xf32>, vector<64x128xf32> -> vector<64x128xf32>
    %25 = arith.addf %19, %24 : vector<64x128xf32>
    %c0_25 = arith.constant 0 : index
    %c1 = arith.constant 1 : index
    %c0_26 = arith.constant 0 : index
    %26 = vector.load %arg7[%c0_25, %c1, %c0_26] : memref<6x18x64xf32, #tpu.memory_space<vmem>>, vector<6x16x64xf32>
    %27 = vector.extract_strided_slice %26 {offsets = [0, 0, 0], sizes = [4, 16, 64], strides = [1, 1, 1]} : vector<6x16x64xf32> to vector<4x16x64xf32>
    %28 = vector.shape_cast %27 : vector<4x16x64xf32> to vector<64x64xf32>
    %c1_27 = arith.constant 1 : index
    %c0_28 = arith.constant 0 : index
    %c0_29 = arith.constant 0 : index
    %29 = vector.load %arg4[%c1_27, %c0_28, %c0_29] : memref<9x64x128xf32, #tpu.memory_space<vmem>>, vector<1x64x128xf32>
    %30 = vector.shape_cast %29 : vector<1x64x128xf32> to vector<64x128xf32>
    %cst_30 = arith.constant dense<0.000000e+00> : vector<64x128xf32>
    %31 = tpu.matmul %28, %30, %cst_30 {dimension_numbers = #tpu.dot_dimension_numbers<[1], [0], [0], [1], [0, 0, 1, 1], [], []>, precision = #tpu.contract_precision<fp32>} : vector<64x64xf32>, vector<64x128xf32>, vector<64x128xf32> -> vector<64x128xf32>
    %32 = arith.addf %25, %31 : vector<64x128xf32>
    %33 = vector.extract_strided_slice %26 {offsets = [1, 0, 0], sizes = [4, 16, 64], strides = [1, 1, 1]} : vector<6x16x64xf32> to vector<4x16x64xf32>
    %34 = vector.shape_cast %33 : vector<4x16x64xf32> to vector<64x64xf32>
    %c4_31 = arith.constant 4 : index
    %c0_32 = arith.constant 0 : index
    %c0_33 = arith.constant 0 : index
    %35 = vector.load %arg4[%c4_31, %c0_32, %c0_33] : memref<9x64x128xf32, #tpu.memory_space<vmem>>, vector<1x64x128xf32>
    %36 = vector.shape_cast %35 : vector<1x64x128xf32> to vector<64x128xf32>
    %cst_34 = arith.constant dense<0.000000e+00> : vector<64x128xf32>
    %37 = tpu.matmul %34, %36, %cst_34 {dimension_numbers = #tpu.dot_dimension_numbers<[1], [0], [0], [1], [0, 0, 1, 1], [], []>, precision = #tpu.contract_precision<fp32>} : vector<64x64xf32>, vector<64x128xf32>, vector<64x128xf32> -> vector<64x128xf32>
    %38 = arith.addf %32, %37 : vector<64x128xf32>
    %39 = vector.extract_strided_slice %26 {offsets = [2, 0, 0], sizes = [4, 16, 64], strides = [1, 1, 1]} : vector<6x16x64xf32> to vector<4x16x64xf32>
    %40 = vector.shape_cast %39 : vector<4x16x64xf32> to vector<64x64xf32>
    %c7 = arith.constant 7 : index
    %c0_35 = arith.constant 0 : index
    %c0_36 = arith.constant 0 : index
    %41 = vector.load %arg4[%c7, %c0_35, %c0_36] : memref<9x64x128xf32, #tpu.memory_space<vmem>>, vector<1x64x128xf32>
    %42 = vector.shape_cast %41 : vector<1x64x128xf32> to vector<64x128xf32>
    %cst_37 = arith.constant dense<0.000000e+00> : vector<64x128xf32>
    %43 = tpu.matmul %40, %42, %cst_37 {dimension_numbers = #tpu.dot_dimension_numbers<[1], [0], [0], [1], [0, 0, 1, 1], [], []>, precision = #tpu.contract_precision<fp32>} : vector<64x64xf32>, vector<64x128xf32>, vector<64x128xf32> -> vector<64x128xf32>
    %44 = arith.addf %38, %43 : vector<64x128xf32>
    %c0_38 = arith.constant 0 : index
    %c2 = arith.constant 2 : index
    %c0_39 = arith.constant 0 : index
    %45 = vector.load %arg7[%c0_38, %c2, %c0_39] : memref<6x18x64xf32, #tpu.memory_space<vmem>>, vector<6x16x64xf32>
    %46 = vector.extract_strided_slice %45 {offsets = [0, 0, 0], sizes = [4, 16, 64], strides = [1, 1, 1]} : vector<6x16x64xf32> to vector<4x16x64xf32>
    %47 = vector.shape_cast %46 : vector<4x16x64xf32> to vector<64x64xf32>
    %c2_40 = arith.constant 2 : index
    %c0_41 = arith.constant 0 : index
    %c0_42 = arith.constant 0 : index
    %48 = vector.load %arg4[%c2_40, %c0_41, %c0_42] : memref<9x64x128xf32, #tpu.memory_space<vmem>>, vector<1x64x128xf32>
    %49 = vector.shape_cast %48 : vector<1x64x128xf32> to vector<64x128xf32>
    %cst_43 = arith.constant dense<0.000000e+00> : vector<64x128xf32>
    %50 = tpu.matmul %47, %49, %cst_43 {dimension_numbers = #tpu.dot_dimension_numbers<[1], [0], [0], [1], [0, 0, 1, 1], [], []>, precision = #tpu.contract_precision<fp32>} : vector<64x64xf32>, vector<64x128xf32>, vector<64x128xf32> -> vector<64x128xf32>
    %51 = arith.addf %44, %50 : vector<64x128xf32>
    %52 = vector.extract_strided_slice %45 {offsets = [1, 0, 0], sizes = [4, 16, 64], strides = [1, 1, 1]} : vector<6x16x64xf32> to vector<4x16x64xf32>
    %53 = vector.shape_cast %52 : vector<4x16x64xf32> to vector<64x64xf32>
    %c5 = arith.constant 5 : index
    %c0_44 = arith.constant 0 : index
    %c0_45 = arith.constant 0 : index
    %54 = vector.load %arg4[%c5, %c0_44, %c0_45] : memref<9x64x128xf32, #tpu.memory_space<vmem>>, vector<1x64x128xf32>
    %55 = vector.shape_cast %54 : vector<1x64x128xf32> to vector<64x128xf32>
    %cst_46 = arith.constant dense<0.000000e+00> : vector<64x128xf32>
    %56 = tpu.matmul %53, %55, %cst_46 {dimension_numbers = #tpu.dot_dimension_numbers<[1], [0], [0], [1], [0, 0, 1, 1], [], []>, precision = #tpu.contract_precision<fp32>} : vector<64x64xf32>, vector<64x128xf32>, vector<64x128xf32> -> vector<64x128xf32>
    %57 = arith.addf %51, %56 : vector<64x128xf32>
    %58 = vector.extract_strided_slice %45 {offsets = [2, 0, 0], sizes = [4, 16, 64], strides = [1, 1, 1]} : vector<6x16x64xf32> to vector<4x16x64xf32>
    %59 = vector.shape_cast %58 : vector<4x16x64xf32> to vector<64x64xf32>
    %c8 = arith.constant 8 : index
    %c0_47 = arith.constant 0 : index
    %c0_48 = arith.constant 0 : index
    %60 = vector.load %arg4[%c8, %c0_47, %c0_48] : memref<9x64x128xf32, #tpu.memory_space<vmem>>, vector<1x64x128xf32>
    %61 = vector.shape_cast %60 : vector<1x64x128xf32> to vector<64x128xf32>
    %cst_49 = arith.constant dense<0.000000e+00> : vector<64x128xf32>
    %62 = tpu.matmul %59, %61, %cst_49 {dimension_numbers = #tpu.dot_dimension_numbers<[1], [0], [0], [1], [0, 0, 1, 1], [], []>, precision = #tpu.contract_precision<fp32>} : vector<64x64xf32>, vector<64x128xf32>, vector<64x128xf32> -> vector<64x128xf32>
    %63 = arith.addf %57, %62 : vector<64x128xf32>
    %c0_50 = arith.constant 0 : index
    %c0_51 = arith.constant 0 : index
    %64 = vector.load %arg5[%c0_50, %c0_51] : memref<1x128xf32, #tpu.memory_space<vmem>>, vector<1x128xf32>
    %65 = vector.broadcast %64 : vector<1x128xf32> to vector<64x128xf32>
    %66 = arith.addf %63, %65 : vector<64x128xf32>
    %cst_52 = arith.constant 0.000000e+00 : f32
    %67 = vector.broadcast %cst_52 : f32 to vector<64x128xf32>
    %68 = arith.maximumf %66, %67 : vector<64x128xf32>
    %69 = vector.shape_cast %68 : vector<64x128xf32> to vector<1x4x16x128xf32>
    %c0_53 = arith.constant 0 : index
    %c0_54 = arith.constant 0 : index
    %c0_55 = arith.constant 0 : index
    %c0_56 = arith.constant 0 : index
    %70 = vector.load %arg6[%c0_53, %c0_54, %c0_55, %c0_56] : memref<1x4x16x128xf32, #tpu.memory_space<vmem>>, vector<1x4x16x128xf32>
    tpu.vector_store %arg6[%c0_53, %c0_54, %c0_55, %c0_56], %69 {strides = array<i32>} : memref<1x4x16x128xf32, #tpu.memory_space<vmem>>, vector<1x4x16x128xf32>,
    return
  }
  func.func @transform_0(%arg0: i32, %arg1: i32) -> (i32, i32, i32, i32) {
    %c0_i32 = arith.constant 0 : i32
    %c0_i32_0 = arith.constant 0 : i32
    %c0_i32_1 = arith.constant 0 : i32
    return %arg0, %arg1, %c0_i32, %c0_i32_0 : i32, i32, i32, i32
  }
  func.func @transform_1(%arg0: i32, %arg1: i32) -> (i32, i32, i32, i32) {
    %c1_i32 = arith.constant 1 : i32
    %0 = arith.addi %arg1, %c1_i32 : i32
    %c2_i32 = arith.constant 2 : i32
    %1 = arith.muli %0, %c2_i32 : i32
    %c0_i32 = arith.constant 0 : i32
    %c0_i32_0 = arith.constant 0 : i32
    %c0_i32_1 = arith.constant 0 : i32
    return %arg0, %1, %c0_i32, %c0_i32_0 : i32, i32, i32, i32
  }
  func.func @transform_2(%arg0: i32, %arg1: i32) -> (i32, i32, i32) {
    %c0_i32 = arith.constant 0 : i32
    %c0_i32_0 = arith.constant 0 : i32
    %c0_i32_1 = arith.constant 0 : i32
    %c0_i32_2 = arith.constant 0 : i32
    return %c0_i32, %c0_i32_0, %c0_i32_1 : i32, i32, i32
  }
  func.func @transform_3(%arg0: i32, %arg1: i32) -> (i32, i32) {
    %c0_i32 = arith.constant 0 : i32
    %c0_i32_0 = arith.constant 0 : i32
    %c0_i32_1 = arith.constant 0 : i32
    return %c0_i32, %c0_i32_0 : i32, i32
  }
  func.func @transform_4(%arg0: i32, %arg1: i32) -> (i32, i32, i32, i32) {
    %c0_i32 = arith.constant 0 : i32
    %c0_i32_0 = arith.constant 0 : i32
    %c0_i32_1 = arith.constant 0 : i32
    return %arg0, %arg1, %c0_i32, %c0_i32_0 : i32, i32, i32, i32
  }
}

module attributes {stable_mosaic.version = 11 : i64} {
  func.func @kernel(%arg0: i32, %arg1: i32, %arg2: memref<1x4x18x128xf32, #tpu.memory_space<vmem>>, %arg3: memref<1x2x18x128xf32, #tpu.memory_space<vmem>>, %arg4: memref<9x128x128xf32, #tpu.memory_space<vmem>>, %arg5: memref<1x128xf32, #tpu.memory_space<vmem>>, %arg6: memref<2x128x64xf32, #tpu.memory_space<vmem>>, %arg7: memref<1x2x8x64xf32, #tpu.memory_space<vmem>>, %arg8: memref<6x18x128xf32, #tpu.memory_space<vmem>>, %arg9: memref<64x128xf32, #tpu.memory_space<vmem>>) attributes {dimension_semantics = [#tpu.dimension_semantics<parallel>, #tpu.dimension_semantics<parallel>], iteration_bounds = array<i64: 2, 4>, scalar_prefetch = 0 : i64, scratch_operands = 2 : i64, tpu.core_type = #tpu.core_type<tc>, window_params = [{transform_indices = @transform_0, window_bounds = array<i64: 1, 4, 18, 128>}, {transform_indices = @transform_1, window_bounds = array<i64: 1, 2, 18, 128>}, {pipeline_mode = #tpu.pipeline_mode<synchronous>, transform_indices = @transform_2, window_bounds = array<i64: 9, 128, 128>}, {pipeline_mode = #tpu.pipeline_mode<synchronous>, transform_indices = @transform_3, window_bounds = array<i64: 1, 128>}, {pipeline_mode = #tpu.pipeline_mode<synchronous>, transform_indices = @transform_4, window_bounds = array<i64: 2, 128, 64>}, {transform_indices = @transform_5, window_bounds = array<i64: 1, 2, 8, 64>}]} {
    %c0 = arith.constant 0 : index
    %c0_0 = arith.constant 0 : index
    %c0_1 = arith.constant 0 : index
    %c0_2 = arith.constant 0 : index
    %0 = vector.load %arg2[%c0, %c0_0, %c0_1, %c0_2] : memref<1x4x18x128xf32, #tpu.memory_space<vmem>>, vector<1x4x18x128xf32>
    %1 = vector.shape_cast %0 : vector<1x4x18x128xf32> to vector<4x18x128xf32>
    %c0_3 = arith.constant 0 : index
    %c0_4 = arith.constant 0 : index
    %c0_5 = arith.constant 0 : index
    %2 = vector.load %arg8[%c0_3, %c0_4, %c0_5] : memref<6x18x128xf32, #tpu.memory_space<vmem>>, vector<4x18x128xf32>
    tpu.vector_store %arg8[%c0_3, %c0_4, %c0_5], %1 {strides = array<i32>} : memref<6x18x128xf32, #tpu.memory_space<vmem>>, vector<4x18x128xf32>,
    %c0_6 = arith.constant 0 : index
    %c0_7 = arith.constant 0 : index
    %c0_8 = arith.constant 0 : index
    %c0_9 = arith.constant 0 : index
    %3 = vector.load %arg3[%c0_6, %c0_7, %c0_8, %c0_9] : memref<1x2x18x128xf32, #tpu.memory_space<vmem>>, vector<1x2x18x128xf32>
    %4 = vector.shape_cast %3 : vector<1x2x18x128xf32> to vector<2x18x128xf32>
    %c4 = arith.constant 4 : index
    %c0_10 = arith.constant 0 : index
    %c0_11 = arith.constant 0 : index
    %5 = vector.load %arg8[%c4, %c0_10, %c0_11] : memref<6x18x128xf32, #tpu.memory_space<vmem>>, vector<2x18x128xf32>
    tpu.vector_store %arg8[%c4, %c0_10, %c0_11], %4 {strides = array<i32>} : memref<6x18x128xf32, #tpu.memory_space<vmem>>, vector<2x18x128xf32>,
    %cst = arith.constant 0.000000e+00 : f32
    %6 = vector.broadcast %cst : f32 to vector<64x128xf32>
    %c0_12 = arith.constant 0 : index
    %c0_13 = arith.constant 0 : index
    %c0_14 = arith.constant 0 : index
    %7 = vector.load %arg8[%c0_12, %c0_13, %c0_14] : memref<6x18x128xf32, #tpu.memory_space<vmem>>, vector<6x16x128xf32>
    %8 = vector.extract_strided_slice %7 {offsets = [0, 0, 0], sizes = [4, 16, 128], strides = [1, 1, 1]} : vector<6x16x128xf32> to vector<4x16x128xf32>
    %9 = vector.shape_cast %8 : vector<4x16x128xf32> to vector<64x128xf32>
    %c0_15 = arith.constant 0 : index
    %c0_16 = arith.constant 0 : index
    %c0_17 = arith.constant 0 : index
    %10 = vector.load %arg4[%c0_15, %c0_16, %c0_17] : memref<9x128x128xf32, #tpu.memory_space<vmem>>, vector<1x128x128xf32>
    %11 = vector.shape_cast %10 : vector<1x128x128xf32> to vector<128x128xf32>
    %cst_18 = arith.constant dense<0.000000e+00> : vector<64x128xf32>
    %12 = tpu.matmul %9, %11, %cst_18 {dimension_numbers = #tpu.dot_dimension_numbers<[1], [0], [0], [1], [0, 0, 1, 1], [], []>, precision = #tpu.contract_precision<fp32>} : vector<64x128xf32>, vector<128x128xf32>, vector<64x128xf32> -> vector<64x128xf32>
    %13 = arith.addf %6, %12 : vector<64x128xf32>
    %14 = vector.extract_strided_slice %7 {offsets = [1, 0, 0], sizes = [4, 16, 128], strides = [1, 1, 1]} : vector<6x16x128xf32> to vector<4x16x128xf32>
    %15 = vector.shape_cast %14 : vector<4x16x128xf32> to vector<64x128xf32>
    %c3 = arith.constant 3 : index
    %c0_19 = arith.constant 0 : index
    %c0_20 = arith.constant 0 : index
    %16 = vector.load %arg4[%c3, %c0_19, %c0_20] : memref<9x128x128xf32, #tpu.memory_space<vmem>>, vector<1x128x128xf32>
    %17 = vector.shape_cast %16 : vector<1x128x128xf32> to vector<128x128xf32>
    %cst_21 = arith.constant dense<0.000000e+00> : vector<64x128xf32>
    %18 = tpu.matmul %15, %17, %cst_21 {dimension_numbers = #tpu.dot_dimension_numbers<[1], [0], [0], [1], [0, 0, 1, 1], [], []>, precision = #tpu.contract_precision<fp32>} : vector<64x128xf32>, vector<128x128xf32>, vector<64x128xf32> -> vector<64x128xf32>
    %19 = arith.addf %13, %18 : vector<64x128xf32>
    %20 = vector.extract_strided_slice %7 {offsets = [2, 0, 0], sizes = [4, 16, 128], strides = [1, 1, 1]} : vector<6x16x128xf32> to vector<4x16x128xf32>
    %21 = vector.shape_cast %20 : vector<4x16x128xf32> to vector<64x128xf32>
    %c6 = arith.constant 6 : index
    %c0_22 = arith.constant 0 : index
    %c0_23 = arith.constant 0 : index
    %22 = vector.load %arg4[%c6, %c0_22, %c0_23] : memref<9x128x128xf32, #tpu.memory_space<vmem>>, vector<1x128x128xf32>
    %23 = vector.shape_cast %22 : vector<1x128x128xf32> to vector<128x128xf32>
    %cst_24 = arith.constant dense<0.000000e+00> : vector<64x128xf32>
    %24 = tpu.matmul %21, %23, %cst_24 {dimension_numbers = #tpu.dot_dimension_numbers<[1], [0], [0], [1], [0, 0, 1, 1], [], []>, precision = #tpu.contract_precision<fp32>} : vector<64x128xf32>, vector<128x128xf32>, vector<64x128xf32> -> vector<64x128xf32>
    %25 = arith.addf %19, %24 : vector<64x128xf32>
    %c0_25 = arith.constant 0 : index
    %c1 = arith.constant 1 : index
    %c0_26 = arith.constant 0 : index
    %26 = vector.load %arg8[%c0_25, %c1, %c0_26] : memref<6x18x128xf32, #tpu.memory_space<vmem>>, vector<6x16x128xf32>
    %27 = vector.extract_strided_slice %26 {offsets = [0, 0, 0], sizes = [4, 16, 128], strides = [1, 1, 1]} : vector<6x16x128xf32> to vector<4x16x128xf32>
    %28 = vector.shape_cast %27 : vector<4x16x128xf32> to vector<64x128xf32>
    %c1_27 = arith.constant 1 : index
    %c0_28 = arith.constant 0 : index
    %c0_29 = arith.constant 0 : index
    %29 = vector.load %arg4[%c1_27, %c0_28, %c0_29] : memref<9x128x128xf32, #tpu.memory_space<vmem>>, vector<1x128x128xf32>
    %30 = vector.shape_cast %29 : vector<1x128x128xf32> to vector<128x128xf32>
    %cst_30 = arith.constant dense<0.000000e+00> : vector<64x128xf32>
    %31 = tpu.matmul %28, %30, %cst_30 {dimension_numbers = #tpu.dot_dimension_numbers<[1], [0], [0], [1], [0, 0, 1, 1], [], []>, precision = #tpu.contract_precision<fp32>} : vector<64x128xf32>, vector<128x128xf32>, vector<64x128xf32> -> vector<64x128xf32>
    %32 = arith.addf %25, %31 : vector<64x128xf32>
    %33 = vector.extract_strided_slice %26 {offsets = [1, 0, 0], sizes = [4, 16, 128], strides = [1, 1, 1]} : vector<6x16x128xf32> to vector<4x16x128xf32>
    %34 = vector.shape_cast %33 : vector<4x16x128xf32> to vector<64x128xf32>
    %c4_31 = arith.constant 4 : index
    %c0_32 = arith.constant 0 : index
    %c0_33 = arith.constant 0 : index
    %35 = vector.load %arg4[%c4_31, %c0_32, %c0_33] : memref<9x128x128xf32, #tpu.memory_space<vmem>>, vector<1x128x128xf32>
    %36 = vector.shape_cast %35 : vector<1x128x128xf32> to vector<128x128xf32>
    %cst_34 = arith.constant dense<0.000000e+00> : vector<64x128xf32>
    %37 = tpu.matmul %34, %36, %cst_34 {dimension_numbers = #tpu.dot_dimension_numbers<[1], [0], [0], [1], [0, 0, 1, 1], [], []>, precision = #tpu.contract_precision<fp32>} : vector<64x128xf32>, vector<128x128xf32>, vector<64x128xf32> -> vector<64x128xf32>
    %38 = arith.addf %32, %37 : vector<64x128xf32>
    %39 = vector.extract_strided_slice %26 {offsets = [2, 0, 0], sizes = [4, 16, 128], strides = [1, 1, 1]} : vector<6x16x128xf32> to vector<4x16x128xf32>
    %40 = vector.shape_cast %39 : vector<4x16x128xf32> to vector<64x128xf32>
    %c7 = arith.constant 7 : index
    %c0_35 = arith.constant 0 : index
    %c0_36 = arith.constant 0 : index
    %41 = vector.load %arg4[%c7, %c0_35, %c0_36] : memref<9x128x128xf32, #tpu.memory_space<vmem>>, vector<1x128x128xf32>
    %42 = vector.shape_cast %41 : vector<1x128x128xf32> to vector<128x128xf32>
    %cst_37 = arith.constant dense<0.000000e+00> : vector<64x128xf32>
    %43 = tpu.matmul %40, %42, %cst_37 {dimension_numbers = #tpu.dot_dimension_numbers<[1], [0], [0], [1], [0, 0, 1, 1], [], []>, precision = #tpu.contract_precision<fp32>} : vector<64x128xf32>, vector<128x128xf32>, vector<64x128xf32> -> vector<64x128xf32>
    %44 = arith.addf %38, %43 : vector<64x128xf32>
    %c0_38 = arith.constant 0 : index
    %c2 = arith.constant 2 : index
    %c0_39 = arith.constant 0 : index
    %45 = vector.load %arg8[%c0_38, %c2, %c0_39] : memref<6x18x128xf32, #tpu.memory_space<vmem>>, vector<6x16x128xf32>
    %46 = vector.extract_strided_slice %45 {offsets = [0, 0, 0], sizes = [4, 16, 128], strides = [1, 1, 1]} : vector<6x16x128xf32> to vector<4x16x128xf32>
    %47 = vector.shape_cast %46 : vector<4x16x128xf32> to vector<64x128xf32>
    %c2_40 = arith.constant 2 : index
    %c0_41 = arith.constant 0 : index
    %c0_42 = arith.constant 0 : index
    %48 = vector.load %arg4[%c2_40, %c0_41, %c0_42] : memref<9x128x128xf32, #tpu.memory_space<vmem>>, vector<1x128x128xf32>
    %49 = vector.shape_cast %48 : vector<1x128x128xf32> to vector<128x128xf32>
    %cst_43 = arith.constant dense<0.000000e+00> : vector<64x128xf32>
    %50 = tpu.matmul %47, %49, %cst_43 {dimension_numbers = #tpu.dot_dimension_numbers<[1], [0], [0], [1], [0, 0, 1, 1], [], []>, precision = #tpu.contract_precision<fp32>} : vector<64x128xf32>, vector<128x128xf32>, vector<64x128xf32> -> vector<64x128xf32>
    %51 = arith.addf %44, %50 : vector<64x128xf32>
    %52 = vector.extract_strided_slice %45 {offsets = [1, 0, 0], sizes = [4, 16, 128], strides = [1, 1, 1]} : vector<6x16x128xf32> to vector<4x16x128xf32>
    %53 = vector.shape_cast %52 : vector<4x16x128xf32> to vector<64x128xf32>
    %c5 = arith.constant 5 : index
    %c0_44 = arith.constant 0 : index
    %c0_45 = arith.constant 0 : index
    %54 = vector.load %arg4[%c5, %c0_44, %c0_45] : memref<9x128x128xf32, #tpu.memory_space<vmem>>, vector<1x128x128xf32>
    %55 = vector.shape_cast %54 : vector<1x128x128xf32> to vector<128x128xf32>
    %cst_46 = arith.constant dense<0.000000e+00> : vector<64x128xf32>
    %56 = tpu.matmul %53, %55, %cst_46 {dimension_numbers = #tpu.dot_dimension_numbers<[1], [0], [0], [1], [0, 0, 1, 1], [], []>, precision = #tpu.contract_precision<fp32>} : vector<64x128xf32>, vector<128x128xf32>, vector<64x128xf32> -> vector<64x128xf32>
    %57 = arith.addf %51, %56 : vector<64x128xf32>
    %58 = vector.extract_strided_slice %45 {offsets = [2, 0, 0], sizes = [4, 16, 128], strides = [1, 1, 1]} : vector<6x16x128xf32> to vector<4x16x128xf32>
    %59 = vector.shape_cast %58 : vector<4x16x128xf32> to vector<64x128xf32>
    %c8 = arith.constant 8 : index
    %c0_47 = arith.constant 0 : index
    %c0_48 = arith.constant 0 : index
    %60 = vector.load %arg4[%c8, %c0_47, %c0_48] : memref<9x128x128xf32, #tpu.memory_space<vmem>>, vector<1x128x128xf32>
    %61 = vector.shape_cast %60 : vector<1x128x128xf32> to vector<128x128xf32>
    %cst_49 = arith.constant dense<0.000000e+00> : vector<64x128xf32>
    %62 = tpu.matmul %59, %61, %cst_49 {dimension_numbers = #tpu.dot_dimension_numbers<[1], [0], [0], [1], [0, 0, 1, 1], [], []>, precision = #tpu.contract_precision<fp32>} : vector<64x128xf32>, vector<128x128xf32>, vector<64x128xf32> -> vector<64x128xf32>
    %63 = arith.addf %57, %62 : vector<64x128xf32>
    %c0_50 = arith.constant 0 : index
    %c0_51 = arith.constant 0 : index
    %64 = vector.load %arg5[%c0_50, %c0_51] : memref<1x128xf32, #tpu.memory_space<vmem>>, vector<1x128xf32>
    %65 = vector.broadcast %64 : vector<1x128xf32> to vector<64x128xf32>
    %66 = arith.addf %63, %65 : vector<64x128xf32>
    %cst_52 = arith.constant 0.000000e+00 : f32
    %67 = vector.broadcast %cst_52 : f32 to vector<64x128xf32>
    %68 = arith.maximumf %66, %67 : vector<64x128xf32>
    %c0_53 = arith.constant 0 : index
    %c0_54 = arith.constant 0 : index
    %69 = vector.load %arg9[%c0_53, %c0_54] : memref<64x128xf32, #tpu.memory_space<vmem>>, vector<64x128xf32>
    tpu.vector_store %arg9[%c0_53, %c0_54], %68 {strides = array<i32>} : memref<64x128xf32, #tpu.memory_space<vmem>>, vector<64x128xf32>,
    %c0_55 = arith.constant 0 : index
    %c0_56 = arith.constant 0 : index
    %70 = tpu.strided_load %arg9[%c0_55, %c0_56] {strides = array<i32: 2, 1>} : memref<64x128xf32, #tpu.memory_space<vmem>>, vector<32x128xf32>
    %c1_57 = arith.constant 1 : index
    %c0_58 = arith.constant 0 : index
    %71 = tpu.strided_load %arg9[%c1_57, %c0_58] {strides = array<i32: 2, 1>} : memref<64x128xf32, #tpu.memory_space<vmem>>, vector<32x128xf32>
    %72 = arith.maximumf %70, %71 : vector<32x128xf32>
    %73 = vector.extract_strided_slice %72 {offsets = [0, 0], sizes = [8, 128], strides = [1, 1]} : vector<32x128xf32> to vector<8x128xf32>
    %74 = vector.extract_strided_slice %72 {offsets = [8, 0], sizes = [8, 128], strides = [1, 1]} : vector<32x128xf32> to vector<8x128xf32>
    %75 = arith.maximumf %73, %74 : vector<8x128xf32>
    %c0_59 = arith.constant 0 : index
    %c0_60 = arith.constant 0 : index
    %c0_61 = arith.constant 0 : index
    %76 = vector.load %arg6[%c0_59, %c0_60, %c0_61] : memref<2x128x64xf32, #tpu.memory_space<vmem>>, vector<1x128x64xf32>
    %77 = vector.shape_cast %76 : vector<1x128x64xf32> to vector<128x64xf32>
    %cst_62 = arith.constant dense<0.000000e+00> : vector<8x64xf32>
    %78 = tpu.matmul %75, %77, %cst_62 {dimension_numbers = #tpu.dot_dimension_numbers<[1], [0], [0], [1], [0, 0, 1, 1], [], []>, precision = #tpu.contract_precision<fp32>} : vector<8x128xf32>, vector<128x64xf32>, vector<8x64xf32> -> vector<8x64xf32>
    %c1_63 = arith.constant 1 : index
    %c0_64 = arith.constant 0 : index
    %c0_65 = arith.constant 0 : index
    %79 = vector.load %arg6[%c1_63, %c0_64, %c0_65] : memref<2x128x64xf32, #tpu.memory_space<vmem>>, vector<1x128x64xf32>
    %80 = vector.shape_cast %79 : vector<1x128x64xf32> to vector<128x64xf32>
    %cst_66 = arith.constant dense<0.000000e+00> : vector<8x64xf32>
    %81 = tpu.matmul %75, %80, %cst_66 {dimension_numbers = #tpu.dot_dimension_numbers<[1], [0], [0], [1], [0, 0, 1, 1], [], []>, precision = #tpu.contract_precision<fp32>} : vector<8x128xf32>, vector<128x64xf32>, vector<8x64xf32> -> vector<8x64xf32>
    %82 = arith.maximumf %78, %81 : vector<8x64xf32>
    %c0_67 = arith.constant 0 : index
    %c0_68 = arith.constant 0 : index
    %c0_69 = arith.constant 0 : index
    %c0_70 = arith.constant 0 : index
    %83 = vector.load %arg7[%c0_67, %c0_68, %c0_69, %c0_70] : memref<1x2x8x64xf32, #tpu.memory_space<vmem>>, vector<1x1x8x64xf32>
    %84 = vector.shape_cast %83 : vector<1x1x8x64xf32> to vector<8x64xf32>
    %85 = vector.shape_cast %82 : vector<8x64xf32> to vector<1x1x8x64xf32>
    tpu.vector_store %arg7[%c0_67, %c0_68, %c0_69, %c0_70], %85 {strides = array<i32>} : memref<1x2x8x64xf32, #tpu.memory_space<vmem>>, vector<1x1x8x64xf32>,
    %86 = vector.extract_strided_slice %72 {offsets = [16, 0], sizes = [8, 128], strides = [1, 1]} : vector<32x128xf32> to vector<8x128xf32>
    %87 = vector.extract_strided_slice %72 {offsets = [24, 0], sizes = [8, 128], strides = [1, 1]} : vector<32x128xf32> to vector<8x128xf32>
    %88 = arith.maximumf %86, %87 : vector<8x128xf32>
    %c0_71 = arith.constant 0 : index
    %c0_72 = arith.constant 0 : index
    %c0_73 = arith.constant 0 : index
    %89 = vector.load %arg6[%c0_71, %c0_72, %c0_73] : memref<2x128x64xf32, #tpu.memory_space<vmem>>, vector<1x128x64xf32>
    %90 = vector.shape_cast %89 : vector<1x128x64xf32> to vector<128x64xf32>
    %cst_74 = arith.constant dense<0.000000e+00> : vector<8x64xf32>
    %91 = tpu.matmul %88, %90, %cst_74 {dimension_numbers = #tpu.dot_dimension_numbers<[1], [0], [0], [1], [0, 0, 1, 1], [], []>, precision = #tpu.contract_precision<fp32>} : vector<8x128xf32>, vector<128x64xf32>, vector<8x64xf32> -> vector<8x64xf32>
    %c1_75 = arith.constant 1 : index
    %c0_76 = arith.constant 0 : index
    %c0_77 = arith.constant 0 : index
    %92 = vector.load %arg6[%c1_75, %c0_76, %c0_77] : memref<2x128x64xf32, #tpu.memory_space<vmem>>, vector<1x128x64xf32>
    %93 = vector.shape_cast %92 : vector<1x128x64xf32> to vector<128x64xf32>
    %cst_78 = arith.constant dense<0.000000e+00> : vector<8x64xf32>
    %94 = tpu.matmul %88, %93, %cst_78 {dimension_numbers = #tpu.dot_dimension_numbers<[1], [0], [0], [1], [0, 0, 1, 1], [], []>, precision = #tpu.contract_precision<fp32>} : vector<8x128xf32>, vector<128x64xf32>, vector<8x64xf32> -> vector<8x64xf32>
    %95 = arith.maximumf %91, %94 : vector<8x64xf32>
    %c0_79 = arith.constant 0 : index
    %c1_80 = arith.constant 1 : index
    %c0_81 = arith.constant 0 : index
    %c0_82 = arith.constant 0 : index
    %96 = vector.load %arg7[%c0_79, %c1_80, %c0_81, %c0_82] : memref<1x2x8x64xf32, #tpu.memory_space<vmem>>, vector<1x1x8x64xf32>
    %97 = vector.shape_cast %96 : vector<1x1x8x64xf32> to vector<8x64xf32>
    %98 = vector.shape_cast %95 : vector<8x64xf32> to vector<1x1x8x64xf32>
    tpu.vector_store %arg7[%c0_79, %c1_80, %c0_81, %c0_82], %98 {strides = array<i32>} : memref<1x2x8x64xf32, #tpu.memory_space<vmem>>, vector<1x1x8x64xf32>,
    return
  }
  func.func @transform_0(%arg0: i32, %arg1: i32) -> (i32, i32, i32, i32) {
    %c0_i32 = arith.constant 0 : i32
    %c0_i32_0 = arith.constant 0 : i32
    %c0_i32_1 = arith.constant 0 : i32
    return %arg0, %arg1, %c0_i32, %c0_i32_0 : i32, i32, i32, i32
  }
  func.func @transform_1(%arg0: i32, %arg1: i32) -> (i32, i32, i32, i32) {
    %c1_i32 = arith.constant 1 : i32
    %0 = arith.addi %arg1, %c1_i32 : i32
    %c2_i32 = arith.constant 2 : i32
    %1 = arith.muli %0, %c2_i32 : i32
    %c0_i32 = arith.constant 0 : i32
    %c0_i32_0 = arith.constant 0 : i32
    %c0_i32_1 = arith.constant 0 : i32
    return %arg0, %1, %c0_i32, %c0_i32_0 : i32, i32, i32, i32
  }
  func.func @transform_2(%arg0: i32, %arg1: i32) -> (i32, i32, i32) {
    %c0_i32 = arith.constant 0 : i32
    %c0_i32_0 = arith.constant 0 : i32
    %c0_i32_1 = arith.constant 0 : i32
    %c0_i32_2 = arith.constant 0 : i32
    return %c0_i32, %c0_i32_0, %c0_i32_1 : i32, i32, i32
  }
  func.func @transform_3(%arg0: i32, %arg1: i32) -> (i32, i32) {
    %c0_i32 = arith.constant 0 : i32
    %c0_i32_0 = arith.constant 0 : i32
    %c0_i32_1 = arith.constant 0 : i32
    return %c0_i32, %c0_i32_0 : i32, i32
  }
  func.func @transform_4(%arg0: i32, %arg1: i32) -> (i32, i32, i32) {
    %c0_i32 = arith.constant 0 : i32
    %c0_i32_0 = arith.constant 0 : i32
    %c0_i32_1 = arith.constant 0 : i32
    %c0_i32_2 = arith.constant 0 : i32
    return %c0_i32, %c0_i32_0, %c0_i32_1 : i32, i32, i32
  }
  func.func @transform_5(%arg0: i32, %arg1: i32) -> (i32, i32, i32, i32) {
    %c0_i32 = arith.constant 0 : i32
    %c0_i32_0 = arith.constant 0 : i32
    %c0_i32_1 = arith.constant 0 : i32
    return %arg0, %arg1, %c0_i32, %c0_i32_0 : i32, i32, i32, i32
  }
}

</mosaic_0001>

<bundles_post_ra>
// kernel: tile.13
= control target key start
LH: loop header
LB: loop body
LE: loop exit
PB: predicated region body
PF: predicated region fallthrough
CT: control target
= control target key end

     0   :  { %s28_s0 = inlined_call_operand.vmem [shape: f32[8], index: 0, kind: input, shape index: {}]   ;;  %s29_s1 = inlined_call_operand.vmem [shape: f32[16,8], index: 1, kind: output, shape index: {}]  }
   0x1   :  { %v4_v0 = vld [vmem:[%s28_s0] ss:$0 sm:$0xff] }
   0x2   :  { %5 = vst [vmem:[%s29_s1] sm:$0xff] %v4_v0  ;;  %8 = vst [vmem:[%s29_s1 + $0x8] sm:$0xff] %v4_v0 }

// kernel: tile.14
= control target key start
LH: loop header
LB: loop body
LE: loop exit
PB: predicated region body
PF: predicated region fallthrough
CT: control target
= control target key end

     0   :  { %s131_s10 = smov 120   ;;  %s132_s11 = smov 104   ;;  %vm3_vm0 = vcmask 64512   ;;  %vm9_vm1 = vcmask 1048512   ;;  %vm15_vm2 = vcmask 982912   ;;  %vm21_vm3 = vcmask 917312   ;;  %s207_s0 = inlined_call_operand.vmem [shape: f32[16,8], index: 0, kind: input, shape index: {}]   ;;  %s208_s1 = inlined_call_operand.vmem [shape: f32[1,128], index: 1, kind: output, shape index: {}]  }
   0x1   :  { %v101_v0 = vld [vmem:[%s207_s0 + $0xf] sm:$0x1]   ;;  %v103_v1 = vld [vmem:[%s207_s0 + $0xd] sm:$0x1]   ;;  %v102_v2 = vld [vmem:[%s207_s0 + $0xe] sm:$0x1]  }
   0x2   :  { %7 = vrot.lane.b32.xlu0 %v101_v0, %s131_s10  ;;  %19 = vrot.lane.b32.xlu1 %v103_v1, %s132_s11  ;;  %v104_v3 = vld [vmem:[%s207_s0 + $0xc] sm:$0x1]   ;;  %s133_s16 = smov 112   ;;  %s134_s17 = smov 96   ;;  %v105_v4 = vld [vmem:[%s207_s0 + $0xb] sm:$0x1]  }
   0x3   :  { %v106_v5 = vld [vmem:[%s207_s0 + $0xa] sm:$0x1]   ;;  %v2_v6 = vld [vmem:[%s207_s0] sm:$0x1]   ;;  %s135_s24 = smov 88   ;;  %s136_s25 = smov 80  }
   0x4   :  { %4 = vst.msk [vmem:[#allocation0] sm:$0x1] %vm3_vm0, %v2_v6   ;;  %v107_v7 = vld [vmem:[%s207_s0 + $0x9] sm:$0x1]   ;;  %v108_v8 = vld [vmem:[%s207_s0 + $0x8] sm:$0x1]  }
   0x5   :  { %s137_s30 = smov 72   ;;  %s138_s2 = smov 64   ;;  %v109_v9 = vld [vmem:[%s207_s0 + $0x7] sm:$0x1]   ;;  %v110_v10 = vld [vmem:[%s207_s0 + $0x6] sm:$0x1]  }
   0x6   :  { %13 = vrot.lane.b32.xlu0 %v102_v2, %s133_s16  ;;  %25 = vrot.lane.b32.xlu1 %v104_v3, %s134_s17  ;;  %s139_s7 = smov 56   ;;  %s140_s8 = smov 48   ;;  %v111_v11 = vld [vmem:[%s207_s0 + $0x5] sm:$0x1]   ;;  %v112_v12 = vld [vmem:[%s207_s0 + $0x4] sm:$0x1]  }
   0x7   :  { %s141_s13 = smov 40   ;;  %s142_s14 = smov 32   ;;  %v113_v13 = vld [vmem:[%s207_s0 + $0x3] sm:$0x1]   ;;  %v114_v14 = vld [vmem:[%s207_s0 + $0x2] sm:$0x1]  }
   0x8   :  { %s143_s19 = smov 24   ;;  %s144_s20 = smov 16   ;;  %v115_v15 = vld [vmem:[%s207_s0 + $0x1] sm:$0x1]   ;;  %vm27_vm4 = vcmask 851712   ;;  %vm33_vm5 = vcmask 786112  }
   0x9   :  { %s145_s0 = smov 8   ;;  %vm39_vm6 = vcmask 720512   ;;  %vm45_vm7 = vcmask 654912   ;;  %vm51_vm8 = vcmask 589312   ;;  %vm57_vm9 = vcmask 523712  }
   0xa   :  { %31 = vrot.lane.b32.xlu0 %v105_v4, %s135_s24  ;;  %37 = vrot.lane.b32.xlu1 %v106_v5, %s136_s25  ;;  %vm63_vm10 = vcmask 458112   ;;  %vm69_vm11 = vcmask 392512   ;;  %vm75_vm12 = vcmask 326912   ;;  %vm81_vm13 = vcmask 261312  }
   0xb   :  { %vm87_vm14 = vcmask 195712   ;;  %vm93_vm15 = vcmask 130112  }
   0xe   :  { %43 = vrot.lane.b32.xlu0 %v107_v7, %s137_s30  ;;  %49 = vrot.lane.b32.xlu1 %v108_v8, %s138_s2 }
  0x12   :  { %55 = vrot.lane.b32.xlu0 %v109_v9, %s139_s7  ;;  %61 = vrot.lane.b32.xlu1 %v110_v10, %s140_s8 }
  0x16   :  { %67 = vrot.lane.b32.xlu0 %v111_v11, %s141_s13  ;;  %73 = vrot.lane.b32.xlu1 %v112_v12, %s142_s14 }
  0x1a   :  { %79 = vrot.lane.b32.xlu0 %v113_v13, %s143_s19  ;;  %85 = vrot.lane.b32.xlu1 %v114_v14, %s144_s20 }
  0x1e   :  { %91 = vrot.lane.b32.xlu0 %v115_v15, %s145_s0 }
  0x74   :  { %v8_v16 = vpop.permute.xlu0 %7   ;;  %v20_v17 = vpop.permute.xlu1 %19  }
  0x75   :  { %10 = vst.msk [vmem:[#allocation0] sm:$0x1] %vm9_vm1, %v8_v16  }
  0x78   :  { %v14_v18 = vpop.permute.xlu0 %13   ;;  %v26_v19 = vpop.permute.xlu1 %25  }
  0x79   :  { %16 = vst.msk [vmem:[#allocation0] sm:$0x1] %vm15_vm2, %v14_v18  }
  0x7a   :  { %22 = vst.msk [vmem:[#allocation0] sm:$0x1] %vm21_vm3, %v20_v17  }
  0x7b   :  { %28 = vst.msk [vmem:[#allocation0] sm:$0x1] %vm27_vm4, %v26_v19  }
  0x7c   :  { %v32_v20 = vpop.permute.xlu0 %31   ;;  %v38_v21 = vpop.permute.xlu1 %37  }
  0x7d   :  { %34 = vst.msk [vmem:[#allocation0] sm:$0x1] %vm33_vm5, %v32_v20  }
  0x7e   :  { %40 = vst.msk [vmem:[#allocation0] sm:$0x1] %vm39_vm6, %v38_v21  }
  0x80   :  { %v44_v22 = vpop.permute.xlu0 %43   ;;  %v50_v23 = vpop.permute.xlu1 %49  }
  0x81   :  { %46 = vst.msk [vmem:[#allocation0] sm:$0x1] %vm45_vm7, %v44_v22  }
  0x82   :  { %52 = vst.msk [vmem:[#allocation0] sm:$0x1] %vm51_vm8, %v50_v23  }
  0x84   :  { %v56_v24 = vpop.permute.xlu0 %55   ;;  %v62_v25 = vpop.permute.xlu1 %61  }
  0x85   :  { %58 = vst.msk [vmem:[#allocation0] sm:$0x1] %vm57_vm9, %v56_v24  }
  0x86   :  { %64 = vst.msk [vmem:[#allocation0] sm:$0x1] %vm63_vm10, %v62_v25  }
  0x88   :  { %v68_v26 = vpop.permute.xlu0 %67   ;;  %v74_v27 = vpop.permute.xlu1 %73  }
  0x89   :  { %70 = vst.msk [vmem:[#allocation0] sm:$0x1] %vm69_vm11, %v68_v26  }
  0x8a   :  { %76 = vst.msk [vmem:[#allocation0] sm:$0x1] %vm75_vm12, %v74_v27  }
  0x8c   :  { %v80_v28 = vpop.permute.xlu0 %79   ;;  %v86_v29 = vpop.permute.xlu1 %85  }
  0x8d   :  { %82 = vst.msk [vmem:[#allocation0] sm:$0x1] %vm81_vm13, %v80_v28  }
  0x8e   :  { %88 = vst.msk [vmem:[#allocation0] sm:$0x1] %vm87_vm14, %v86_v29  }
  0x90   :  { %v92_v30 = vpop.permute.xlu0 %91  }
  0x91   :  { %94 = vst.msk [vmem:[#allocation0] sm:$0x1] %vm93_vm15, %v92_v30  }
  0x98   :  { %v98_v31 = vld [vmem:[#allocation0] sm:$0x1] }
  0x99   :  { %100 = vst [vmem:[%s208_s1] sm:$0x1] %v98_v31 }

// kernel: luna_block_forward.2
= control target key start
LH: loop header
LB: loop body
LE: loop exit
PB: predicated region body
PF: predicated region fallthrough
CT: control target
= control target key end

     0   :  { %s12196_s15 = smov 0   ;;  %s12198_s16 = smov 0   ;;  %s14449_s0 = inlined_call_operand.vmem [shape: f32[2,18,18,64], index: 0, kind: input, shape index: {}, may-alias: {0,1}]   ;;  %s14450_s1 = inlined_call_operand.vmem [shape: f32[2,18,18,64], index: 1, kind: input, shape index: {}, may-alias: {0,1}]   ;;  %s14451_s2 = inlined_call_operand.vmem [shape: f32[9,64,128], index: 2, kind: input, shape index: {}]   ;;  %s14452_s3 = inlined_call_operand.vmem [shape: f32[1,128], index: 3, kind: input, shape index: {}]   ;;  %s14453_s4 = inlined_call_operand.vmem [shape: f32[2,16,16,128], index: 4, kind: output, shape index: {}]  }
   0x1   :  { %s12200_s17 = smov 0   ;;  %s12202_s18 = smov 0  }
   0x2   :  { %s12204_s19 = smov 0  }
   0x3 LB: > { %s23_s20 = sadd.s32 1, %s12161_s17  ;;  %s26_s21 = sadd.s32 1, %s12165_s18  ;;  %s12169_s19 = sphi %s12204_s19, %s14_s19   ;;  %s12165_s18 = sphi %s12202_s18, %s15042_s18   ;;  %s12161_s17 = sphi %s12200_s17, %s15041_s17   ;;  %s12157_s16 = sphi %s12198_s16, %s15040_s16   ;;  %s12153_s15 = sphi %s12196_s15, %s15039_s15  }
   0x4   : > { %p24_p0 = scmp.ge.s32.totalorder %s23_s20, 4  ;;  %p8338_p1 = scmp.ge.s32.totalorder %s12169_s19, 1 }
   0x5   : > { %p220_p2 = scmp.lt.s32.totalorder %s12169_s19, 9 }
   0x6   : > { %s15044_s20 = smov (%p24_p0, %s23_s20), 0  ;;  %s15046_s21 = smov (!%p24_p0, %s26_s21), %s12165_s18 }
   0x7   : > { %p221_p3 = pnand %p8338_p1, %p220_p2  ;;  %p28_p4 = scmp.ge.s32.totalorder %s15046_s21, 2 }
   0x9   : > { %s15048_s21 = smov (%p28_p4, %s15046_s21), 0  ;;  %224 = sbr.rel (%p221_p3) target bundleno = 708 (0x2c4), region = 36 }
  0x10   : > { %v8372_v0 = vld [vmem:[%s14451_s2 + $0x100] sm:$0xff]  ;;  %v8373_v1 = vld [vmem:[%s14451_s2 + $0x108] sm:$0xff]  ;;  %s12237_s28 = sshll.u32 %s12153_s15, 2  ;;  %p279_p5 = scmp.lt.s32.totalorder %s12157_s16, 1  ;;  %v8374_v7 = vld [vmem:[%s14451_s2 + $0x110] sm:$0xff]  ;;  %vm332_vm0 = vcmask 523264  }
  0x11   : > { %v8348_v2 = vld [vmem:[%s14451_s2 + $0xc0] sm:$0xff]  ;;  %v3862_v3 = vand.u32 4294901760, %v8372_v0  ;;  %v3865_v4 = vand.u32 4294901760, %v8373_v1  ;;  %v8349_v5 = vld [vmem:[%s14451_s2 + $0xc8] sm:$0xff]  ;;  %v8375_v8 = vld [vmem:[%s14451_s2 + $0x118] sm:$0xff]  ;;  %v3868_v10 = vand.u32 4294901760, %v8374_v7 }
  0x12   : > { %v413_v6 = vand.u32 4294901760, %v8348_v2  ;;  %v416_v9 = vand.u32 4294901760, %v8349_v5  ;;  %v3871_v11 = vand.u32 4294901760, %v8375_v8  ;;  %v8350_v12 = vld [vmem:[%s14451_s2 + $0xd0] sm:$0xff]  ;;  %v8351_v13 = vld [vmem:[%s14451_s2 + $0xd8] sm:$0xff]  ;;  %v8376_v14 = vld [vmem:[%s14451_s2 + $0x120] sm:$0xff] }
  0x13   : > { %v12258_v15 = vpack.c.bf16 %v3865_v4, %v3862_v3  ;;  %v419_v16 = vand.u32 4294901760, %v8350_v12  ;;  %v422_v17 = vand.u32 4294901760, %v8351_v13  ;;  %v12263_v18 = vld [vmem:[%s14451_s2 + $0x128] sm:$0xff]  ;;  %v3874_v19 = vand.u32 4294901760, %v8376_v14  ;;  %v12268_v20 = vld [vmem:[%s14451_s2 + $0xe0] sm:$0xff]  ;;  %v12284_v26 = vld [vmem:[%s14451_s2 + $0x130] sm:$0xff] }
  0x14   : > { %v12273_v21 = vld [vmem:[%s14451_s2 + $0xe8] sm:$0xff]  ;;  %v12275_v22 = vpack.c.bf16 %v416_v9, %v413_v6  ;;  %v12277_v23 = vpack.c.bf16 %v3871_v11, %v3868_v10  ;;  %v3877_v24 = vand.u32 4294901760, %v12263_v18  ;;  %v425_v25 = vand.u32 4294901760, %v12268_v20  ;;  %v12289_v27 = vld [vmem:[%s14451_s2 + $0x138] sm:$0xff]  ;;  %v12294_v28 = vld [vmem:[%s14451_s2 + $0xf0] sm:$0xff]  ;;  %s15050_s16 = smov (!%p279_p5, %s12157_s16), 1 }
  0x15   : > { %14669 = vst [vmem:[#allocation3_spill] sm:$0xff] %v12258_v15  ;;  %11233 = vmatprep.subr.bf16.mxu0 %v12258_v15  ;;  %v12302_v29 = vpack.c.bf16 %v422_v17, %v419_v16  ;;  %v428_v30 = vand.u32 4294901760, %v12273_v21  ;;  %v12308_v31 = vld [vmem:[%s14451_s2 + $0xf8] sm:$0xff]  ;;  %p281_p6 = scmp.lt.s32.totalorder %s12237_s28, 17  ;;  %s8423_s10 = sadd.s32 4, %s12237_s28  ;;  %v3880_v33 = vand.u32 4294901760, %v12284_v26  ;;  %v12326_v37 = vsub.f32 %v8372_v0, %v3862_v3 }
  0x16   : > { %14670 = vst [vmem:[#allocation4_spill] sm:$0xff] %v12277_v23  ;;  %11235 = vmatpush3.bf16.msra.mxu0 %v12258_v15  ;;  %10801 = vmatprep.subr.bf16.mxu1 %v12275_v22  ;;  %v12314_v32 = vpack.c.bf16 %v3877_v24, %v3874_v19  ;;  %v3883_v34 = vand.u32 4294901760, %v12289_v27  ;;  %s12089_s11 = smul.u32 54, %s15050_s16  ;;  %p299_p7 = scmp.lt.s32.totalorder %s8423_s10, 17  ;;  %v431_v35 = vand.u32 4294901760, %v12294_v28  ;;  %v434_v36 = vand.u32 4294901760, %v12308_v31 }
  0x17   : > { %10803 = vmatpush3.bf16.msra.mxu1 %v12275_v22  ;;  %11237 = vmatprep.subr.bf16.mxu0 %v12277_v23  ;;  %s282_s12 = scalar_select %p281_p6, %s12237_s28, 17  ;;  %vm335_vm1 = vcmask 517120   ;;  %14672 = vst [vmem:[#allocation6_spill] sm:$0xff] %v12326_v37  ;;  %v12333_v38 = vpack.c.bf16 %v428_v30, %v425_v25  ;;  %v12335_v39 = vsub.f32 %v8373_v1, %v3865_v4  ;;  %v14461_v42 = vand.u32 4294901760, %v12326_v37 }
  0x18   : > { %14671 = vst [vmem:[#allocation5_spill] sm:$0xff] %v12314_v32  ;;  %10805 = vmatprep.subr.bf16.mxu1 %v12302_v29  ;;  %v12337_v40 = vsub.f32 %v8348_v2, %v413_v6  ;;  %v12339_v41 = vsub.f32 %v8349_v5, %v416_v9  ;;  %s15052_s10 = smov (!%p299_p7, %s8423_s10), 17  ;;  %v12342_v43 = vsub.f32 %v8374_v7, %v3868_v10  ;;  %p312_p8 = scmp.lt.s32.totalorder %s12237_s28, 15 }
  0x19   : > { %14673 = vst [vmem:[#allocation7_spill] sm:$0xff] %v12335_v39  ;;  %s12088_s13 = smul.u32 3, %s282_s12  ;;  %v12344_v44 = vsub.f32 %v8375_v8, %v3871_v11  ;;  %v12346_v45 = vsub.f32 %v8350_v12, %v419_v16  ;;  %v14460_v46 = vand.u32 4294901760, %v12335_v39  ;;  %v12352_v49 = vsub.f32 %v8351_v13, %v422_v17 }
  0x1a   : > { %14674 = vst [vmem:[#allocation8_spill] sm:$0xff] %v12342_v43  ;;  %11239 = vmatpush3.bf16.msra.mxu0 %v12277_v23  ;;  %v14469_v47 = vand.u32 4294901760, %v12337_v40  ;;  %v14468_v48 = vand.u32 4294901760, %v12339_v41  ;;  %s12090_s14 = smul.u32 3, %s15052_s10  ;;  %v12360_v50 = vpack.c.bf16 %v3883_v34, %v3880_v33  ;;  %v12366_v51 = vpack.c.bf16 %v434_v36, %v431_v35  ;;  %s15054_s28 = smov (!%p312_p8, %s12237_s28), 15 }
  0x1b   : > { %14675 = vst [vmem:[#allocation9_spill] sm:$0xff] %v12344_v44  ;;  %10807 = vmatpush3.bf16.msra.mxu1 %v12302_v29  ;;  %11241 = vmatprep.subr.bf16.mxu0 %v12314_v32  ;;  %s285_s15 = sadd.s32 %s12089_s11, %s12088_s13  ;;  %v14467_v52 = vand.u32 4294901760, %v12346_v45  ;;  %v12371_v53 = vsub.f32 %v8376_v14, %v3874_v19  ;;  %v14459_v56 = vand.u32 4294901760, %v12342_v43  ;;  %v14466_v57 = vand.u32 4294901760, %v12352_v49  ;;  %s8345_s30 = sshll.u32 %s15054_s28, 1 }
  0x1c   : > { %14676 = vst [vmem:[#allocation10_spill] sm:$0xff] %v12360_v50  ;;  %14677 = vst [vmem:[#allocation11_spill] sm:$0xff] %v12366_v51  ;;  %10809 = vmatprep.subr.bf16.mxu1 %v12333_v38  ;;  %s8340_s22 = sshll.u32 %s285_s15, 3  ;;  %v569_v54 = vsub.f32 %v12337_v40, %v14469_v47  ;;  %v576_v55 = vsub.f32 %v12339_v41, %v14468_v48  ;;  %s303_s23 = sadd.s32 %s12090_s14, %s12089_s11  ;;  %v12393_v58 = vpack.c.bf16 %v14460_v46, %v14461_v42 }
  0x1d   : > { %14678 = vst [vmem:[#allocation12_spill] sm:$0xff] %v12371_v53  ;;  %s12387_s26 = scalar_lea.vmem %s14449_s0, %s8340_s22  ;;  %v14458_v59 = vand.u32 4294901760, %v12344_v44  ;;  %v12399_v60 = vsub.f32 %v12346_v45, %v14467_v52  ;;  %v12402_v61 = vsub.f32 %v12263_v18, %v3877_v24  ;;  %s8343_s27 = sshll.u32 %s303_s23, 3  ;;  %v590_v3 = vsub.f32 %v12352_v49, %v14466_v57 }
  0x1e   : > { %11243 = vmatpush3.bf16.msra.mxu0 %v12314_v32  ;;  %v323_v62 = vld [vmem:[%s12387_s26 + $0x18] sm:$0xff]  ;;  %v324_v63 = vld [vmem:[%s12387_s26 + $0x20] sm:$0xff]  ;;  %v325_v0 = vld [vmem:[%s12387_s26 + $0x28] sm:$0x3]  ;;  %v570_v1 = vand.u32 4294901760, %v569_v54  ;;  %v577_v2 = vand.u32 4294901760, %v576_v55  ;;  %v12414_v4 = vsub.f32 %v12268_v20, %v425_v25  ;;  %s12419_s5 = scalar_lea.vmem %s14450_s1, %s8343_s27  ;;  %v12434_v10 = vsub.f32 %v12273_v21, %v428_v30 }
  0x1f   : > { %14679 = vst [vmem:[#allocation13_spill] sm:$0xff] %v12402_v61  ;;  %10811 = vmatpush3.bf16.msra.mxu1 %v12333_v38  ;;  %11245 = vmatprep.subr.bf16.mxu0 %v12360_v50  ;;  %337 = vst.msk [vmem:[#allocation2 + $0x18] sm:$0xff] %vm332_vm0, %v323_v62  ;;  %v326_v5 = vld [vmem:[%s12387_s26 + $0x30] sm:$0xff]  ;;  %v327_v6 = vld [vmem:[%s12387_s26 + $0x38] sm:$0xff]  ;;  %v584_v8 = vand.u32 4294901760, %v12399_v60  ;;  %v14457_v9 = vand.u32 4294901760, %v12371_v53  ;;  %v12439_v11 = vsub.f32 %v12284_v26, %v3880_v33 }
  0x20   : > { %338 = vst.msk [vmem:[#allocation2 + $0x20] sm:$0xff] %vm332_vm0, %v324_v63  ;;  %v328_v7 = vld [vmem:[%s12387_s26 + $0x40] sm:$0x3]  ;;  %10813 = vmatprep.subr.bf16.mxu1 %v12366_v51  ;;  %v12442_v12 = vpack.c.bf16 %v577_v2, %v570_v1  ;;  %340 = vst.msk [vmem:[#allocation2 + $0x30] sm:$0xff] %vm332_vm0, %v326_v5  ;;  %v329_v13 = vld [vmem:[%s12387_s26 + $0x48] sm:$0xff]  ;;  %v14456_v17 = vand.u32 4294901760, %v12402_v61  ;;  %v12455_v19 = vsub.f32 %v12289_v27, %v3883_v34 }
  0x21   : > { %339 = vst.msk [vmem:[#allocation2 + $0x28] sm:$0x3] %vm335_vm1, %v325_v0  ;;  %14680 = vst [vmem:[#allocation14_spill] sm:$0xff] %v12439_v11  ;;  %v330_v14 = vld [vmem:[%s12387_s26 + $0x50] sm:$0xff]  ;;  %v331_v16 = vld [vmem:[%s12387_s26 + $0x58] sm:$0x3]  ;;  %v12467_v27 = vsub.f32 %v12294_v28, %v431_v35  ;;  %v12483_v34 = vsub.f32 %v12308_v31, %v434_v36  ;;  %v12509_v0 = vpack.c.bf16 %v14458_v59, %v14459_v56 }
  0x22   : > { %341 = vst.msk [vmem:[#allocation2 + $0x38] sm:$0xff] %vm332_vm0, %v327_v6  ;;  %v14465_v18 = vand.u32 4294901760, %v12414_v4  ;;  %14681 = vst [vmem:[#allocation15_spill] sm:$0xff] %v12455_v19  ;;  %v591_v20 = vand.u32 4294901760, %v590_v3  ;;  %v14464_v21 = vand.u32 4294901760, %v12434_v10  ;;  %v346_v24 = vld [vmem:[%s12419_s5] sm:$0xff]  ;;  %11247 = vmatpush3.bf16.msra.mxu0 %v12360_v50  ;;  %v12517_v2 = vpack.c.bf16 %v14456_v17, %v14457_v9 }
  0x23   : > { %342 = vst.msk [vmem:[#allocation2 + $0x40] sm:$0x3] %vm335_vm1, %v328_v7  ;;  %345 = vst.msk [vmem:[#allocation2 + $0x58] sm:$0x3] %vm335_vm1, %v331_v16  ;;  %v347_v25 = vld [vmem:[%s12419_s5 + $0x8] sm:$0xff]  ;;  %v14455_v33 = vand.u32 4294901760, %v12439_v11  ;;  %10815 = vmatpush3.bf16.msra.mxu1 %v12366_v51  ;;  %11249 = vmatprep.subr.bf16.mxu0 %v12393_v58 }
  0x24   : > { %343 = vst.msk [vmem:[#allocation2 + $0x48] sm:$0xff] %vm332_vm0, %v329_v13  ;;  %344 = vst.msk [vmem:[#allocation2 + $0x50] sm:$0xff] %vm332_vm0, %v330_v14  ;;  %v348_v26 = vld [vmem:[%s12419_s5 + $0x10] sm:$0x3]  ;;  %v12473_v30 = vsub.f32 %v12414_v4, %v14465_v18  ;;  %v14454_v28 = vand.u32 4294901760, %v12455_v19  ;;  %v349_v35 = vld [vmem:[%s12419_s5 + $0x18] sm:$0xff]  ;;  %v12493_v60 = vsub.f32 %v12434_v10, %v14464_v21  ;;  %10817 = vmatprep.subr.bf16.mxu1 %v12442_v12 }
  0x25   : > { %353 = vst.msk [vmem:[#allocation2 + $0x60] sm:$0xff] %vm332_vm0, %v346_v24  ;;  %354 = vst.msk [vmem:[#allocation2 + $0x68] sm:$0xff] %vm332_vm0, %v347_v25  ;;  %v350_v54 = vld [vmem:[%s12419_s5 + $0x20] sm:$0xff]  ;;  %v351_v55 = vld [vmem:[%s12419_s5 + $0x28] sm:$0x3]  ;;  %v14463_v62 = vand.u32 4294901760, %v12467_v27  ;;  %v12511_v1 = vpack.c.bf16 %v591_v20, %v584_v8 }
  0x26   : > { %355 = vst.msk [vmem:[#allocation2 + $0x70] sm:$0x3] %vm335_vm1, %v348_v26  ;;  %358 = vst.msk [vmem:[#allocation2 + $0x88] sm:$0x3] %vm335_vm1, %v351_v55  ;;  %v320_v31 = vld [vmem:[%s12387_s26] sm:$0xff]  ;;  %v321_v36 = vld [vmem:[%s12387_s26 + $0x8] sm:$0xff]  ;;  %v12525_v14 = vpack.c.bf16 %v14454_v28, %v14455_v33 }
  0x27   : > { %356 = vst.msk [vmem:[#allocation2 + $0x78] sm:$0xff] %vm332_vm0, %v349_v35  ;;  %357 = vst.msk [vmem:[#allocation2 + $0x80] sm:$0xff] %vm332_vm0, %v350_v54  ;;  %v14462_v63 = vand.u32 4294901760, %v12483_v34  ;;  %v2957_v3 = vld [vmem:[#allocation2 + $0x19] sm:$0xff]  ;;  %v12530_v8 = vsub.f32 %v12467_v27, %v14463_v62  ;;  %v363_v28 = vld [vmem:[#allocation2 + $0x30] sm:$0xff]  ;;  %s8346_s5 = sshll.u32 %s15050_s16, 5 }
  0x28   : > { %333 = vst.msk [vmem:[#allocation2] sm:$0xff] %vm332_vm0, %v320_v31  ;;  %334 = vst.msk [vmem:[#allocation2 + $0x8] sm:$0xff] %vm332_vm0, %v321_v36  ;;  %v2958_v5 = vld [vmem:[#allocation2 + $0x21] sm:$0xff]  ;;  %v361_v6 = vld [vmem:[#allocation2 + $0x18] sm:$0xff]  ;;  %v2983_v16 = vsel %vm332_vm0, %v2957_v3, 0  ;;  %v395_v9 = vsel %vm332_vm0, %v363_v28, 0  ;;  %s316_s6 = sadd.s32 %s8346_s5, %s8345_s30 }
  0x29   : > { %v2986_v20 = vsel %vm332_vm0, %v2958_v5, 0  ;;  %v389_v24 = vsel %vm332_vm0, %v361_v6, 0  ;;  %v2959_v25 = vld [vmem:[#allocation2 + $0x31] sm:$0xff]  ;;  %v362_v26 = vld [vmem:[#allocation2 + $0x20] sm:$0xff]  ;;  %v12538_v54 = vsub.f32 %v12483_v34, %v14462_v63  ;;  %v12540_v55 = vand.u32 4294901760, %v2983_v16  ;;  %s8347_s9 = sshll.u32 %s316_s6, 3 }
  0x2a   : > { %v2960_v35 = vld [vmem:[#allocation2 + $0x39] sm:$0xff]  ;;  %v12542_v31 = vand.u32 4294901760, %v2986_v20  ;;  %v12544_v36 = vand.u32 4294901760, %v389_v24  ;;  %v2989_v3 = vsel %vm332_vm0, %v2959_v25, 0  ;;  %v392_v6 = vsel %vm332_vm0, %v362_v26, 0  ;;  %s14424_s28 = scalar_lea.vmem %s14453_s4, %s8347_s9 }
  0x2b   : > { %14682 = vst [vmem:[#allocation16_spill] sm:$0xff] %v12540_v55  ;;  %v2961_v5 = vld [vmem:[#allocation2 + $0x49] sm:$0xff]  ;;  %v12547_v33 = vand.u32 4294901760, %v2989_v3  ;;  %v2992_v17 = vsel %vm332_vm0, %v2960_v35, 0  ;;  %v12553_v59 = vsub.f32 %v2983_v16, %v12540_v55  ;;  %v12561_v25 = vand.u32 4294901760, %v392_v6  ;;  %v364_v35 = vld [vmem:[#allocation2 + $0x38] sm:$0xff] }
  0x2c   : > { %14683 = vst [vmem:[#allocation17_spill] sm:$0xff] %v12542_v31  ;;  %14684 = vst [vmem:[#allocation18_spill] sm:$0xff] %v12544_v36  ;;  %v12556_v56 = vsub.f32 %v2986_v20, %v12542_v31  ;;  %v12559_v46 = vsub.f32 %v389_v24, %v12544_v36  ;;  %v12566_v63 = vand.u32 4294901760, %v2992_v17  ;;  %v12568_v26 = vand.u32 4294901760, %v395_v9  ;;  %v2962_v16 = vld [vmem:[#allocation2 + $0x51] sm:$0xff]  ;;  %v365_v52 = vld [vmem:[#allocation2 + $0x48] sm:$0xff] }
  0x2d   : > { %14685 = vst [vmem:[#allocation19_spill] sm:$0xff] %v12547_v33  ;;  %14686 = vst [vmem:[#allocation20_spill] sm:$0xff] %v12553_v59  ;;  %v12564_v42 = vsub.f32 %v2989_v3, %v12547_v33  ;;  %v2995_v28 = vsel %vm332_vm0, %v2961_v5, 0  ;;  %v12572_v62 = vand.u32 4294901760, %v12553_v59  ;;  %v12581_v3 = vsub.f32 %v392_v6, %v12561_v25  ;;  %v2963_v13 = vld [vmem:[#allocation2 + $0x61] sm:$0xff]  ;;  %v366_v61 = vld [vmem:[#allocation2 + $0x50] sm:$0xff] }
  0x2e   : > { %14687 = vst [vmem:[#allocation21_spill] sm:$0xff] %v12556_v56  ;;  %14688 = vst [vmem:[#allocation22_spill] sm:$0xff] %v12559_v46  ;;  %v12575_v20 = vand.u32 4294901760, %v12556_v56  ;;  %v12578_v24 = vand.u32 4294901760, %v12559_v46  ;;  %v12587_v18 = vsub.f32 %v2992_v17, %v12566_v63  ;;  %v12590_v5 = vsub.f32 %v395_v9, %v12568_v26  ;;  %v322_v53 = vld [vmem:[%s12387_s26 + $0x10] sm:$0x3] }
  0x2f   : > { %14689 = vst [vmem:[#allocation23_spill] sm:$0xff] %v12561_v25  ;;  %14690 = vst [vmem:[#allocation24_spill] sm:$0xff] %v12564_v42  ;;  %v12584_v21 = vand.u32 4294901760, %v12564_v42  ;;  %v12592_v57 = vand.u32 4294901760, %v2995_v28  ;;  %10060 = vmatprep.mubr.f32.mxu0 %v12572_v62  ;;  %v12598_v6 = vand.u32 4294901760, %v12581_v3  ;;  %v398_v47 = vsel %vm332_vm0, %v364_v35, 0 }
  0x30   : > { %14691 = vst [vmem:[#allocation25_spill] sm:$0xff] %v12566_v63  ;;  %14692 = vst [vmem:[#allocation26_spill] sm:$0xff] %v12568_v26  ;;  %v488_v48 = vsub.f32 %v12559_v46, %v12578_v24  ;;  %v2998_v17 = vsel %vm332_vm0, %v2962_v16, 0  ;;  %10061 = vmatmul.mubr.f32.vlgmr.msra.gmra.mrb[0].mxu0 %v12575_v20  ;;  %v12604_v9 = vand.u32 4294901760, %v12587_v18  ;;  %v12607_v7 = vand.u32 4294901760, %v12590_v5  ;;  %v2964_v37 = vld [vmem:[#allocation2 + $0x69] sm:$0xff] }
  0x31   : > { %14693 = vst [vmem:[#allocation27_spill] sm:$0xff] %v12572_v62  ;;  %14694 = vst [vmem:[#allocation28_spill] sm:$0xff] %v12575_v20  ;;  %v12610_v19 = vsub.f32 %v2995_v28, %v12592_v57  ;;  %v12612_v11 = vand.u32 4294901760, %v398_v47  ;;  %11251 = vmatpush3.bf16.msra.mxu0 %v12393_v58  ;;  %10063 = vmatprep.mubr.f32.mxu0 %v12584_v21  ;;  %v498_v16 = vsub.f32 %v12581_v3, %v12598_v6  ;;  %v367_v56 = vld [vmem:[#allocation2 + $0x60] sm:$0xff] }
  0x32   : > { %14695 = vst [vmem:[#allocation29_spill] sm:$0xff] %v12578_v24  ;;  %14696 = vst [vmem:[#allocation30_spill] sm:$0xff] %v12581_v3  ;;  %v12616_v35 = vand.u32 4294901760, %v488_v48  ;;  %v12621_v44 = vand.u32 4294901760, %v2998_v17  ;;  %v401_v43 = vsel %vm332_vm0, %v365_v52, 0  ;;  %11253 = vmatprep.subr.bf16.mxu0 %v12509_v0  ;;  %v508_v28 = vsub.f32 %v12590_v5, %v12607_v7 }
  0x33   : > { %14697 = vst [vmem:[#allocation31_spill] sm:$0xff] %v12584_v21  ;;  %14698 = vst [vmem:[#allocation32_spill] sm:$0xff] %v12587_v18  ;;  %v12629_v58 = vand.u32 4294901760, %v12610_v19  ;;  %v12632_v48 = vsub.f32 %v398_v47, %v12612_v11  ;;  %v12634_v39 = vand.u32 4294901760, %v401_v43  ;;  %v12637_v52 = vand.u32 4294901760, %v498_v16 }
  0x34   : > { %14699 = vst [vmem:[#allocation33_spill] sm:$0xff] %v12590_v5  ;;  %14700 = vst [vmem:[#allocation34_spill] sm:$0xff] %v12592_v57  ;;  %9304 = vmatprep.mubr.f32.mxu1 %v12616_v35  ;;  %v3856_v20 = vsel %vm332_vm0, %v2963_v13, 0  ;;  %v404_v59 = vsel %vm332_vm0, %v366_v61, 0  ;;  %10064 = vmatmul.mubr.f32.gmra.mrb[2].mxu0 %v12604_v9  ;;  %v12645_v62 = vand.u32 4294901760, %v508_v28  ;;  %v407_v16 = vsel %vm332_vm0, %v367_v56, 0 }
  0x35   : > { %14701 = vst [vmem:[#allocation35_spill] sm:$0xff] %v12598_v6  ;;  %14702 = vst [vmem:[#allocation36_spill] sm:$0xff] %v12604_v9  ;;  %v12648_v47 = vand.u32 4294901760, %v12632_v48  ;;  %9305 = vmatmul.mubr.f32.vlgmr.msra.gmra.mrb[0].mxu1 %v12637_v52  ;;  %11255 = vmatpush3.bf16.msra.mxu0 %v12509_v0  ;;  %v12660_v61 = vand.u32 4294901760, %v404_v59  ;;  %v368_v6 = vld [vmem:[#allocation2 + $0x68] sm:$0xff]  ;;  %v14723_v56 = vand.u32 4294901760, %v12493_v60 }
  0x36   : > { %14703 = vst [vmem:[#allocation37_spill] sm:$0xff] %v12607_v7  ;;  %14704 = vst [vmem:[#allocation38_spill] sm:$0xff] %v12610_v19  ;;  %v12651_v7 = vsub.f32 %v401_v43, %v12634_v39  ;;  %10819 = vmatpush3.bf16.msra.mxu1 %v12442_v12  ;;  %9307 = vmatprep.mubr.f32.mxu1 %v12645_v62 }
  0x37   : > { %14705 = vst [vmem:[#allocation39_spill] sm:$0xff] %v12612_v11  ;;  %14706 = vst [vmem:[#allocation40_spill] sm:$0xff] %v12616_v35  ;;  %v12653_v35 = vand.u32 4294901760, %v3856_v20  ;;  %v518_v43 = vsub.f32 %v12632_v48, %v12648_v47  ;;  %10821 = vmatprep.subr.bf16.mxu1 %v12511_v1  ;;  %10066 = vmatprep.mubr.f32.mxu0 %v12629_v58 }
  0x38   : > { %14707 = vst [vmem:[#allocation41_spill] sm:$0xff] %v12621_v44  ;;  %336 = vst.msk [vmem:[#allocation2 + $0x10] sm:$0x3] %vm335_vm1, %v322_v53  ;;  %v12640_v53 = vsub.f32 %v2998_v17, %v12621_v44  ;;  %v3859_v17 = vsel %vm332_vm0, %v2964_v37, 0  ;;  %v12669_v28 = vand.u32 4294901760, %v12651_v7  ;;  %v14722_v37 = vand.u32 4294901760, %v12473_v30  ;;  %11257 = vmatprep.subr.bf16.mxu0 %v12517_v2 }
  0x39   : > { %14708 = vst [vmem:[#allocation42_spill] sm:$0xff] %v12629_v58  ;;  %14709 = vst [vmem:[#allocation43_spill] sm:$0xff] %v12632_v48  ;;  %v12672_v0 = vsub.f32 %v3856_v20, %v12653_v35  ;;  %v612_v20 = vand.u32 4294901760, %v12530_v8  ;;  %v12688_v24 = vand.u32 4294901760, %v518_v43  ;;  %11259 = vmatpush3.bf16.msra.mxu0 %v12517_v2  ;;  %v619_v43 = vand.u32 4294901760, %v12538_v54 }
  0x3a   : > { %14710 = vst [vmem:[#allocation44_spill] sm:$0xff] %v12634_v39  ;;  %14711 = vst [vmem:[#allocation45_spill] sm:$0xff] %v12637_v52  ;;  %v12658_v13 = vand.u32 4294901760, %v12640_v53  ;;  %v12674_v52 = vand.u32 4294901760, %v3859_v17  ;;  %v10824_v12 = vpack.c.bf16 %v14723_v56, %v14722_v37  ;;  %v528_v51 = vsub.f32 %v12651_v7, %v12669_v28  ;;  %10823 = vmatpush3.bf16.msra.mxu1 %v12511_v1 }
  0x3b   : > { %14712 = vst [vmem:[#allocation46_spill] sm:$0xff] %v12640_v53  ;;  %14713 = vst [vmem:[#allocation47_spill] sm:$0xff] %v12645_v62  ;;  %v12683_v62 = vsub.f32 %v404_v59, %v12660_v61  ;;  %v12695_v30 = vand.u32 4294901760, %v12672_v0  ;;  %v410_v37 = vsel %vm332_vm0, %v368_v6, 0  ;;  %9308 = vmatmul.mubr.f32.gmra.mrb[2].mxu1 %v12688_v24  ;;  %11261 = vmatprep.subr.bf16.mxu0 %v12525_v14 }
  0x3c   : > { %14714 = vst [vmem:[#allocation48_spill] sm:$0xff] %v12648_v47  ;;  %14715 = vst [vmem:[#allocation49_spill] sm:$0xff] %v12651_v7  ;;  %v12685_v47 = vand.u32 4294901760, %v407_v16  ;;  %10067 = vmatmul.mubr.f32.gmra.mrb[4].mxu0 %v12658_v13  ;;  %v12698_v60 = vsub.f32 %v3859_v17, %v12674_v52  ;;  %v12710_v56 = vand.u32 4294901760, %v528_v51  ;;  %v12716_v2 = vand.u32 4294901760, %v410_v37  ;;  %10825 = vmatprep.subr.bf16.mxu1 %v10824_v12 }
  0x3d   : > { %14716 = vst [vmem:[#allocation50_spill] sm:$0xff] %v12653_v35  ;;  %14717 = vst [vmem:[#allocation51_spill] sm:$0xff] %v12658_v13  ;;  %v12702_v59 = vand.u32 4294901760, %v12683_v62  ;;  %10069 = vmatprep.mubr.f32.mxu0 %v12695_v30  ;;  %11263 = vmatpush3.bf16.msra.mxu0 %v12525_v14 }
  0x3e   : > { %14718 = vst [vmem:[#allocation52_spill] sm:$0xff] %v12660_v61  ;;  %14719 = vst [vmem:[#allocation53_spill] sm:$0xff] %v12669_v28  ;;  %v12705_v8 = vsub.f32 %v407_v16, %v12685_v47  ;;  %v12714_v17 = vand.u32 4294901760, %v12698_v60  ;;  %9310 = vmatprep.mubr.f32.mxu1 %v12710_v56  ;;  %v12727_v51 = vsub.f32 %v410_v37, %v12716_v2  ;;  %11265 = vmatprep.subr.bf16.mxu0 %v12258_v15 }
  0x3f   : > { %14720 = vst [vmem:[#allocation54_spill] sm:$0xff] %v12672_v0  ;;  %14721 = vst [vmem:[#allocation55_spill] sm:$0xff] %v12674_v52  ;;  %v538_v16 = vsub.f32 %v12683_v62, %v12702_v59  ;;  %v14737_v37 = vand.u32 4294901760, %v12337_v40  ;;  %10827 = vmatpush3.bf16.msra.mxu1 %v10824_v12  ;;  %v8380_v12 = vld [vmem:[%s14451_s2 + $0x1c0] sm:$0xff] }
  0x40   : > { %14724 = vst [vmem:[#allocation56_spill] sm:$0xff] %v12683_v62  ;;  %14725 = vst [vmem:[#allocation57_spill] sm:$0xff] %v12685_v47  ;;  %v12723_v54 = vand.u32 4294901760, %v12705_v8  ;;  %10070 = vmatmul.mubr.f32.gmra.mrb[6].mxu0 %v12714_v17 }
  0x41   : > { %14726 = vst [vmem:[#allocation58_spill] sm:$0xff] %v12688_v24  ;;  %14727 = vst [vmem:[#allocation59_spill] sm:$0xff] %v12698_v60  ;;  %v12729_v6 = vand.u32 4294901760, %v538_v16  ;;  %v10828_v24 = vpack.c.bf16 %v619_v43, %v612_v20  ;;  %10088 = vmatprep.mubr.f32.mxu0 %v12540_v55  ;;  %v14738_v16 = vand.u32 4294901760, %v12339_v41  ;;  %v10832_v43 = vpack.c.bf16 %v12339_v41, %v12337_v40 }
  0x42   : > { %14728 = vst [vmem:[#allocation60_spill] sm:$0xff] %v12702_v59  ;;  %14729 = vst [vmem:[#allocation61_spill] sm:$0xff] %v12705_v8  ;;  %v548_v1 = vsub.f32 %v12705_v8, %v12723_v54  ;;  %v12737_v59 = vand.u32 4294901760, %v12727_v51  ;;  %v10836_v40 = vpack.c.bf16 %v12352_v49, %v12346_v45  ;;  %v4723_v41 = vand.u32 4294901760, %v8380_v12 }
  0x43   : > { %14730 = vst [vmem:[#allocation62_spill] sm:$0xff] %v12710_v56  ;;  %14731 = vst [vmem:[#allocation63_spill] sm:$0xff] %v12716_v2  ;;  %9311 = vmatmul.mubr.f32.gmra.mrb[4].mxu1 %v12729_v6  ;;  %v12747_v28 = vpack.c.bf16 %v14738_v16, %v14737_v37  ;;  %10829 = vmatprep.subr.bf16.mxu1 %v10828_v24  ;;  %v8382_v37 = vld [vmem:[%s14451_s2 + $0x1d0] sm:$0xff]  ;;  %v8383_v16 = vld [vmem:[%s14451_s2 + $0x1d8] sm:$0xff] }
  0x44   : > { %14732 = vst [vmem:[#allocation64_spill] sm:$0xff] %v12723_v54  ;;  %14733 = vst [vmem:[#allocation65_spill] sm:$0xff] %v12727_v51  ;;  %v12740_v56 = vand.u32 4294901760, %v548_v1  ;;  %v558_v14 = vsub.f32 %v12727_v51, %v12737_v59  ;;  %10089 = vmatmul.mubr.f32.vlgmr.msra.gmra.mrb[0].mxu0 %v12542_v31  ;;  %10831 = vmatpush3.bf16.msra.mxu1 %v10828_v24  ;;  %v8381_v1 = vld [vmem:[%s14451_s2 + $0x1c8] sm:$0xff] }
  0x45   : > { %14734 = vst [vmem:[#allocation66_spill] sm:$0xff] %v12729_v6  ;;  %14735 = vst [vmem:[#allocation67_spill] sm:$0xff] %v12737_v59  ;;  %11267 = vmatpush3.bf16.msra.mxu0 %v12258_v15  ;;  %10091 = vmatprep.mubr.f32.mxu0 %v12547_v33  ;;  %v4726_v24 = vand.u32 4294901760, %v8381_v1  ;;  %v8387_v6 = vld [vmem:[%s14451_s2 + $0x1f8] sm:$0xff] }
  0x46   : > { %14736 = vst [vmem:[#allocation68_spill] sm:$0xff] %v12740_v56  ;;  %9313 = vmatprep.mubr.f32.mxu1 %v12740_v56  ;;  %v12752_v20 = vand.u32 4294901760, %v558_v14  ;;  %11269 = vmatprep.subr.bf16.mxu0 %v12277_v23  ;;  %v10840_v14 = vpack.c.bf16 %v12434_v10, %v12414_v4  ;;  %v4732_v56 = vand.u32 4294901760, %v8383_v16 }
  0x47   : > { %10833 = vmatprep.subr.bf16.mxu1 %v10832_v43  ;;  %v12787_v15 = vsub.f32 %v8381_v1, %v4726_v24  ;;  %v8385_v1 = vld [vmem:[%s14451_s2 + $0x1e8] sm:$0xff] }
  0x48   : > { %14739 = vst [vmem:[#allocation69_spill] sm:$0xff] %v12752_v20  ;;  %9314 = vmatmul.mubr.f32.gmra.mrb[6].mxu1 %v12752_v20  ;;  %10092 = vmatmul.mubr.f32.gmra.mrb[2].mxu0 %v12566_v63  ;;  %v4729_v20 = vand.u32 4294901760, %v8382_v37 }
  0x49   : > { %9332 = vmatprep.mubr.f32.mxu1 %v12544_v36  ;;  %11271 = vmatpush3.bf16.msra.mxu0 %v12277_v23  ;;  %v12785_v23 = vsub.f32 %v8380_v12, %v4723_v41  ;;  %v8384_v12 = vld [vmem:[%s14451_s2 + $0x1e0] sm:$0xff] }
  0x4a   : > { %10094 = vmatprep.mubr.f32.mxu0 %v12592_v57  ;;  %11273 = vmatprep.subr.bf16.mxu0 %v12314_v32  ;;  %v2966_v36 = vld [vmem:[#allocation2 + $0x81] sm:$0xff] }
  0x4c   : > { %9333 = vmatmul.mubr.f32.vlgmr.msra.gmra.mrb[0].mxu1 %v12561_v25  ;;  %10095 = vmatmul.mubr.f32.gmra.mrb[4].mxu0 %v12621_v44 }
  0x4d   : > { %10835 = vmatpush3.bf16.msra.mxu1 %v10832_v43  ;;  %9335 = vmatprep.mubr.f32.mxu1 %v12568_v26  ;;  %v12793_v43 = vpack.c.bf16 %v4726_v24, %v4723_v41  ;;  %v10844_v41 = vpack.c.bf16 %v12483_v34, %v12467_v27  ;;  %v4735_v24 = vand.u32 4294901760, %v8384_v12 }
  0x4e   : > { %10837 = vmatprep.subr.bf16.mxu1 %v10836_v40  ;;  %11275 = vmatpush3.bf16.msra.mxu0 %v12314_v32  ;;  %v8386_v32 = vld [vmem:[%s14451_s2 + $0x1f0] sm:$0xff] }
  0x4f   : > { %10097 = vmatprep.mubr.f32.mxu0 %v12653_v35  ;;  %11277 = vmatprep.subr.bf16.mxu0 %v12360_v50  ;;  %v4741_v26 = vand.u32 4294901760, %v8386_v32 }
  0x50   : > { %9336 = vmatmul.mubr.f32.gmra.mrb[2].mxu1 %v12612_v11  ;;  %10098 = vmatmul.mubr.f32.gmra.mrb[6].mxu0 %v12674_v52  ;;  %v12817_v11 = vsub.f32 %v8383_v16, %v4732_v56  ;;  %v14741_v16 = vand.u32 4294901760, %v12785_v23 }
  0x51   : > { %10839 = vmatpush3.bf16.msra.mxu1 %v10836_v40  ;;  %9338 = vmatprep.mubr.f32.mxu1 %v12634_v39  ;;  %v12815_v39 = vsub.f32 %v8382_v37, %v4729_v20  ;;  %v12821_v40 = vpack.c.bf16 %v4732_v56, %v4729_v20  ;;  %v4744_v37 = vand.u32 4294901760, %v8387_v6  ;;  %v3116_v20 = vsub.f32 %v12564_v42, %v12584_v21 }
  0x52   : > { %10841 = vmatprep.subr.bf16.mxu1 %v10840_v14  ;;  %11279 = vmatpush3.bf16.msra.mxu0 %v12360_v50  ;;  %v4738_v50 = vand.u32 4294901760, %v8385_v1  ;;  %v4879_v25 = vsub.f32 %v12785_v23, %v14741_v16  ;;  %v12866_v21 = vsub.f32 %v8386_v32, %v4741_v26 }
  0x53   : > { %10116 = vmatprep.mubr.f32.mxu0 %v12540_v55  ;;  %11281 = vmatprep.subr.bf16.mxu0 %v12793_v43  ;;  %14740 = vst [vmem:[#allocation70_spill] sm:$0xff] %v12821_v40  ;;  %v2965_v55 = vld [vmem:[#allocation2 + $0x79] sm:$0xff] }
  0x54   : > { %9339 = vmatmul.mubr.f32.gmra.mrb[4].mxu1 %v12660_v61  ;;  %v14742_v61 = vand.u32 4294901760, %v12787_v15  ;;  %v12841_v16 = vsub.f32 %v8385_v1, %v4738_v50  ;;  %v14744_v1 = vand.u32 4294901760, %v12817_v11 }
  0x55   : > { %10843 = vmatpush3.bf16.msra.mxu1 %v10840_v14  ;;  %9341 = vmatprep.mubr.f32.mxu1 %v12685_v47  ;;  %v12839_v47 = vsub.f32 %v8384_v12, %v4735_v24  ;;  %v12847_v14 = vpack.c.bf16 %v4744_v37, %v4741_v26 }
  0x56   : > { %10845 = vmatprep.subr.bf16.mxu1 %v10844_v41  ;;  %10117 = vmatmul.mubr.f32.vlgmr.msra.gmra.mrb[0].mxu0 %v12542_v31  ;;  %v4886_v56 = vsub.f32 %v12787_v15, %v14742_v61  ;;  %v12837_v31 = vpack.c.bf16 %v4738_v50, %v4735_v24  ;;  %v4717_v61 = vsel %vm332_vm0, %v2965_v55, 0  ;;  %v14743_v50 = vand.u32 4294901760, %v12815_v39 }
  0x57   : > { %11283 = vmatpush3.bf16.msra.mxu0 %v12793_v43  ;;  %10119 = vmatprep.mubr.f32.mxu0 %v12547_v33  ;;  %v12859_v24 = vand.u32 4294901760, %v4717_v61 }
  0x58   : > { %9342 = vmatmul.mubr.f32.gmra.mrb[6].mxu1 %v12716_v2  ;;  %11285 = vmatprep.subr.bf16.mxu0 %v12821_v40  ;;  %v4880_v2 = vand.u32 4294901760, %v4879_v25  ;;  %v4887_v12 = vand.u32 4294901760, %v4886_v56  ;;  %v4893_v55 = vsub.f32 %v12815_v39, %v14743_v50  ;;  %v14558_v25 = vand.u32 4294901760, %v12839_v47 }
  0x59   : > { %10847 = vmatpush3.bf16.msra.mxu1 %v10844_v41  ;;  %9360 = vmatprep.mubr.f32.mxu1 %v12559_v46  ;;  %v4900_v41 = vsub.f32 %v12817_v11, %v14744_v1  ;;  %v4720_v46 = vsel %vm332_vm0, %v2966_v36, 0  ;;  %v12874_v36 = vand.u32 4294901760, %v3116_v20  ;;  %v3126_v50 = vsub.f32 %v12587_v18, %v12604_v9 }
  0x5a   : > { %10849 = vmatprep.subr.bf16.mxu1 %v12275_v22  ;;  %10120 = vmatmul.mubr.f32.gmra.mrb[2].mxu0 %v12566_v63  ;;  %v3136_v1 = vsub.f32 %v12610_v19, %v12629_v58  ;;  %v12880_v32 = vand.u32 4294901760, %v4720_v46  ;;  %v11296_v26 = vpack.c.bf16 %v4887_v12, %v4880_v2  ;;  %v12885_v56 = vsub.f32 %v4717_v61, %v12859_v24 }
  0x5b   : > { %11287 = vmatpush3.bf16.msra.mxu0 %v12821_v40  ;;  %10122 = vmatprep.mubr.f32.mxu0 %v12592_v57  ;;  %v12868_v40 = vsub.f32 %v8387_v6, %v4744_v37  ;;  %14745 = vst [vmem:[#allocation71_spill] sm:$0xff] %v12874_v36  ;;  %v4894_v6 = vand.u32 4294901760, %v4893_v55  ;;  %v4901_v37 = vand.u32 4294901760, %v4900_v41  ;;  %v4907_v20 = vsub.f32 %v12839_v47, %v14558_v25 }
  0x5c   : > { %9361 = vmatmul.mubr.f32.vlgmr.msra.gmra.mrb[0].mxu1 %v12581_v3  ;;  %11289 = vmatprep.subr.bf16.mxu0 %v12837_v31  ;;  %v12901_v61 = vand.u32 4294901760, %v3126_v50  ;;  %v3146_v12 = vsub.f32 %v12640_v53, %v12658_v13  ;;  %v12906_v55 = vsub.f32 %v4720_v46, %v12880_v32  ;;  %v3997_v25 = vsub.f32 %v12672_v0, %v12695_v30 }
  0x5d   : > { %10851 = vmatpush3.bf16.msra.mxu1 %v12275_v22  ;;  %9363 = vmatprep.mubr.f32.mxu1 %v12590_v5  ;;  %v14746_v5 = vand.u32 4294901760, %v12841_v16  ;;  %v11300_v41 = vpack.c.bf16 %v4901_v37, %v4894_v6  ;;  %v14568_v2 = vand.u32 4294901760, %v12885_v56  ;;  %v4908_v50 = vand.u32 4294901760, %v4907_v20  ;;  %v14751_v6 = vld [vmem:[#allocation11_spill] sm:$0xff] }
  0x5e   : > { %10853 = vmatprep.subr.bf16.mxu1 %v12302_v29  ;;  %10123 = vmatmul.mubr.f32.gmra.mrb[4].mxu0 %v12621_v44  ;;  %14747 = vst [vmem:[#allocation72_spill] sm:$0xff] %v12901_v61  ;;  %v14749_v46 = vand.u32 4294901760, %v12866_v21  ;;  %v12926_v37 = vand.u32 4294901760, %v3146_v12 }
  0x5f   : > { %11291 = vmatpush3.bf16.msra.mxu0 %v12837_v31  ;;  %10125 = vmatprep.mubr.f32.mxu0 %v12653_v35  ;;  %v4914_v3 = vsub.f32 %v12841_v16, %v14746_v5  ;;  %v12910_v5 = vand.u32 4294901760, %v3136_v1 }
  0x60   : > { %9364 = vmatmul.mubr.f32.gmra.mrb[2].mxu1 %v12632_v48  ;;  %11293 = vmatprep.subr.bf16.mxu0 %v12847_v14  ;;  %v14750_v48 = vand.u32 4294901760, %v12868_v40  ;;  %14752 = vst [vmem:[#allocation11_spill] sm:$0xff] %v12926_v37 }
  0x61   : > { %10855 = vmatpush3.bf16.msra.mxu1 %v12302_v29  ;;  %9366 = vmatprep.mubr.f32.mxu1 %v12651_v7  ;;  %14748 = vst [vmem:[#allocation73_spill] sm:$0xff] %v12910_v5  ;;  %v4915_v58 = vand.u32 4294901760, %v4914_v3  ;;  %v4921_v7 = vsub.f32 %v12866_v21, %v14749_v46  ;;  %v4007_v3 = vsub.f32 %v12698_v60, %v12714_v17  ;;  %v12932_v46 = vand.u32 4294901760, %v3997_v25 }
  0x62   : > { %10857 = vmatprep.subr.bf16.mxu1 %v12333_v38  ;;  %10126 = vmatmul.mubr.f32.gmra.mrb[6].mxu0 %v12674_v52  ;;  %v4928_v1 = vsub.f32 %v12868_v40, %v14750_v48  ;;  %v4858_v48 = vsub.f32 %v12885_v56, %v14568_v2  ;;  %v14755_v25 = vand.u32 4294901760, %v12346_v45  ;;  %v14760_v45 = vld [vmem:[#allocation37_spill] sm:$0xff] }
  0x63   : > { %11295 = vmatpush3.bf16.msra.mxu0 %v12847_v14  ;;  %10144 = vmatprep.mubr.f32.mxu0 %v12874_v36  ;;  %14753 = vst [vmem:[#allocation74_spill] sm:$0xff] %v12932_v46  ;;  %v4922_v12 = vand.u32 4294901760, %v4921_v7  ;;  %v12946_v2 = vand.u32 4294901760, %v4007_v3  ;;  %v14762_v3 = vand.u32 4294901760, %v12434_v10 }
  0x64   : > { %9367 = vmatmul.mubr.f32.gmra.mrb[4].mxu1 %v12683_v62  ;;  %11297 = vmatprep.subr.bf16.mxu0 %v11296_v26  ;;  %v4929_v36 = vand.u32 4294901760, %v4928_v1 }
  0x65   : > { %10859 = vmatpush3.bf16.msra.mxu1 %v12333_v38  ;;  %9369 = vmatprep.mubr.f32.mxu1 %v12705_v8  ;;  %v14754_v8 = vld [vmem:[#allocation29_spill] sm:$0xff]  ;;  %14757 = vst [vmem:[#allocation75_spill] sm:$0xff] %v12946_v2 }
  0x66   : > { %10861 = vmatprep.subr.bf16.mxu1 %v14751_v6  ;;  %10145 = vmatmul.mubr.f32.vlgmr.msra.gmra.mrb[0].mxu0 %v12901_v61  ;;  %v11304_v61 = vpack.c.bf16 %v4915_v58, %v4908_v50  ;;  %v4859_v58 = vand.u32 4294901760, %v4858_v48  ;;  %v14759_v50 = vld [vmem:[#allocation35_spill] sm:$0xff]  ;;  %v11308_v1 = vpack.c.bf16 %v4929_v36, %v4922_v12  ;;  %v14763_v48 = vld [vmem:[#allocation48_spill] sm:$0xff]  ;;  %v11312_v36 = vpack.c.bf16 %v12787_v15, %v12785_v23 }
  0x67   : > { %11299 = vmatpush3.bf16.msra.mxu0 %v11296_v26  ;;  %10147 = vmatprep.mubr.f32.mxu0 %v12910_v5  ;;  %v14756_v26 = vand.u32 4294901760, %v12352_v49  ;;  %v14758_v5 = vand.u32 4294901760, %v12906_v55  ;;  %v14761_v49 = vand.u32 4294901760, %v12414_v4  ;;  %v14765_v12 = vand.u32 4294901760, %v12467_v27 }
  0x68   : > { %9370 = vmatmul.mubr.f32.gmra.mrb[6].mxu1 %v12727_v51  ;;  %11301 = vmatprep.subr.bf16.mxu0 %v11300_v41  ;;  %v14766_v4 = vand.u32 4294901760, %v12483_v34  ;;  %v11320_v27 = vpack.c.bf16 %v12841_v16, %v12839_v47  ;;  %v14768_v34 = vld [vmem:[#allocation18_spill] sm:$0xff] }
  0x69   : > { %10863 = vmatpush3.bf16.msra.mxu1 %v14751_v6  ;;  %9388 = vmatprep.mubr.f32.mxu1 %v14754_v8  ;;  %v10868_v20 = vpack.c.bf16 %v14756_v26, %v14755_v25  ;;  %v4868_v7 = vsub.f32 %v12906_v55, %v14758_v5  ;;  %v10872_v5 = vpack.c.bf16 %v14762_v3, %v14761_v49  ;;  %v359_v49 = vld [vmem:[#allocation2] sm:$0xff]  ;;  %v14771_v3 = vld [vmem:[#allocation39_spill] sm:$0xff] }
  0x6a   : > { %10865 = vmatprep.subr.bf16.mxu1 %v12747_v28  ;;  %10148 = vmatmul.mubr.f32.gmra.mrb[2].mxu0 %v12926_v37  ;;  %v10876_v10 = vpack.c.bf16 %v14766_v4, %v14765_v12  ;;  %v11316_v25 = vpack.c.bf16 %v12817_v11, %v12815_v39  ;;  %v11324_v26 = vpack.c.bf16 %v12868_v40, %v12866_v21  ;;  %v360_v12 = vld [vmem:[#allocation2 + $0x8] sm:$0xff]  ;;  %v373_v4 = vld [vmem:[%s14451_s2 + $0x10] sm:$0xff] }
  0x6b   : > { %11303 = vmatpush3.bf16.msra.mxu0 %v11300_v41  ;;  %10150 = vmatprep.mubr.f32.mxu0 %v12932_v46  ;;  %v4869_v41 = vand.u32 4294901760, %v4868_v7  ;;  %v14770_v7 = vld [vmem:[#allocation26_spill] sm:$0xff] }
  0x6c   : > { %9389 = vmatmul.mubr.f32.vlgmr.msra.gmra.mrb[0].mxu1 %v14759_v50  ;;  %11305 = vmatprep.subr.bf16.mxu0 %v11304_v61 }
  0x6d   : > { %10867 = vmatpush3.bf16.msra.mxu1 %v12747_v28  ;;  %9391 = vmatprep.mubr.f32.mxu1 %v14760_v45  ;;  %v14764_v28 = vld [vmem:[#allocation53_spill] sm:$0xff] }
  0x6e   : > { %10869 = vmatprep.subr.bf16.mxu1 %v10868_v20  ;;  %10151 = vmatmul.mubr.f32.gmra.mrb[4].mxu0 %v12946_v2  ;;  %v1254_v2 = vsel %vm332_vm0, %v360_v12, 0  ;;  %v14776_v12 = vld [vmem:[#allocation70_spill] sm:$0xff] }
  0x6f   : > { %11307 = vmatpush3.bf16.msra.mxu0 %v11304_v61  ;;  %10153 = vmatprep.mubr.f32.mxu0 %v4859_v58  ;;  %v14767_v61 = vld [vmem:[#allocation60_spill] sm:$0xff]  ;;  %v371_v58 = vld [vmem:[%s14451_s2] sm:$0xff] }
  0x70   : > { %9392 = vmatmul.mubr.f32.gmra.mrb[2].mxu1 %v14763_v48  ;;  %11309 = vmatprep.subr.bf16.mxu0 %v11308_v1 }
  0x71   : > { %10871 = vmatpush3.bf16.msra.mxu1 %v10868_v20  ;;  %9394 = vmatprep.mubr.f32.mxu1 %v14764_v28  ;;  %v14769_v20 = vld [vmem:[#allocation23_spill] sm:$0xff] }
  0x72   : > { %10873 = vmatprep.subr.bf16.mxu1 %v10872_v5  ;;  %10154 = vmatmul.mubr.f32.gmra.mrb[6].mxu0 %v4869_v41 }
  0x73   : > { %11311 = vmatpush3.bf16.msra.mxu0 %v11308_v1  ;;  %10172 = vmatprep.mubr.f32.mxu0 %v12547_v33  ;;  %v372_v1 = vld [vmem:[%s14451_s2 + $0x8] sm:$0xff] }
  0x74   : > { %9395 = vmatmul.mubr.f32.gmra.mrb[4].mxu1 %v14767_v61  ;;  %11313 = vmatprep.subr.bf16.mxu0 %v11312_v36  ;;  %v1260_v41 = vand.u32 4294901760, %v372_v1 }
  0x75   : > { %10875 = vmatpush3.bf16.msra.mxu1 %v10872_v5  ;;  %9397 = vmatprep.mubr.f32.mxu1 %v12723_v54  ;;  %v1257_v5 = vand.u32 4294901760, %v371_v58 }
  0x76   : > { %10877 = vmatprep.subr.bf16.mxu1 %v10876_v10  ;;  %10173 = vmatmul.mubr.f32.vlgmr.msra.gmra.mrb[0].mxu0 %v12566_v63 }
  0x77   : > { %11315 = vmatpush3.bf16.msra.mxu0 %v11312_v36  ;;  %10175 = vmatprep.mubr.f32.mxu0 %v12592_v57  ;;  %v1251_v36 = vsel %vm332_vm0, %v359_v49, 0  ;;  %v13017_v49 = vsub.f32 %v372_v1, %v1260_v41  ;;  %v13022_v46 = vpack.c.bf16 %v1260_v41, %v1257_v5  ;;  %v14775_v1 = vld [vmem:[#allocation63_spill] sm:$0xff] }
  0x78   : > { %9398 = vmatmul.mubr.f32.gmra.mrb[6].mxu1 %v12737_v59  ;;  %11317 = vmatprep.subr.bf16.mxu0 %v11316_v25 }
  0x79   : > { %10879 = vmatpush3.bf16.msra.mxu1 %v10876_v10  ;;  %9416 = vmatprep.mubr.f32.mxu1 %v14768_v34  ;;  %v14773_v10 = vld [vmem:[#allocation52_spill] sm:$0xff] }
  0x7a   : > { %10881 = vmatprep.subr.bf16.mxu1 %v12275_v22  ;;  %10176 = vmatmul.mubr.f32.gmra.mrb[2].mxu0 %v12621_v44 }
  0x7b   : > { %11319 = vmatpush3.bf16.msra.mxu0 %v11316_v25  ;;  %10178 = vmatprep.mubr.f32.mxu0 %v12653_v35  ;;  %v14774_v25 = vld [vmem:[#allocation57_spill] sm:$0xff] }
  0x7c   : > { %9417 = vmatmul.mubr.f32.vlgmr.msra.gmra.mrb[0].mxu1 %v14769_v20  ;;  %11321 = vmatprep.subr.bf16.mxu0 %v11320_v27 }
  0x7d   : > { %10883 = vmatpush3.bf16.msra.mxu1 %v12275_v22  ;;  %9419 = vmatprep.mubr.f32.mxu1 %v14770_v7  ;;  %v14772_v22 = vld [vmem:[#allocation44_spill] sm:$0xff] }
  0x7e   : > { %10885 = vmatprep.subr.bf16.mxu1 %v12302_v29  ;;  %10179 = vmatmul.mubr.f32.gmra.mrb[4].mxu0 %v12674_v52 }
  0x7f   : > { %11323 = vmatpush3.bf16.msra.mxu0 %v11320_v27  ;;  %10181 = vmatprep.mubr.f32.mxu0 %v12859_v24  ;;  %v13013_v27 = vand.u32 4294901760, %v1251_v36 }
  0x80   : > { %9420 = vmatmul.mubr.f32.gmra.mrb[2].mxu1 %v14771_v3  ;;  %11325 = vmatprep.subr.bf16.mxu0 %v11324_v26 }
  0x81   : > { %10887 = vmatpush3.bf16.msra.mxu1 %v12302_v29  ;;  %9422 = vmatprep.mubr.f32.mxu1 %v14772_v22  ;;  %v374_v29 = vld [vmem:[%s14451_s2 + $0x18] sm:$0xff]  ;;  %v13047_v59 = vsub.f32 %v1251_v36, %v13013_v27 }
  0x82   : > { %10889 = vmatprep.subr.bf16.mxu1 %v12333_v38  ;;  %10182 = vmatmul.mubr.f32.gmra.mrb[6].mxu0 %v12880_v32  ;;  %v1266_v37 = vand.u32 4294901760, %v374_v29 }
  0x83   : > { %11327 = vmatpush3.bf16.msra.mxu0 %v11324_v26  ;;  %10200 = vmatprep.mubr.f32.mxu0 %v12564_v42  ;;  %v13015_v26 = vsub.f32 %v371_v58, %v1257_v5  ;;  %v1263_v42 = vand.u32 4294901760, %v373_v4  ;;  %v376_v58 = vld [vmem:[%s14451_s2 + $0x28] sm:$0xff]  ;;  %v13034_v5 = vand.u32 4294901760, %v1254_v2 }
  0x84   : > { %9423 = vmatmul.mubr.f32.gmra.mrb[4].mxu1 %v14773_v10  ;;  %11329 = vmatprep.subr.bf16.mxu0 %v12793_v43  ;;  %v1272_v61 = vand.u32 4294901760, %v376_v58  ;;  %v13055_v28 = vsub.f32 %v374_v29, %v1266_v37 }
  0x85   : > { %10891 = vmatpush3.bf16.msra.mxu1 %v12333_v38  ;;  %9425 = vmatprep.mubr.f32.mxu1 %v14774_v25  ;;  %v375_v38 = vld [vmem:[%s14451_s2 + $0x20] sm:$0xff]  ;;  %v13036_v41 = vsub.f32 %v373_v4, %v1263_v42  ;;  %v13062_v54 = vsub.f32 %v1254_v2, %v13034_v5  ;;  %v14777_v29 = vand.u32 4294901760, %v13015_v26 }
  0x86   : > { %10893 = vmatprep.subr.bf16.mxu1 %v14751_v6  ;;  %10201 = vmatmul.mubr.f32.vlgmr.msra.gmra.mrb[0].mxu0 %v12587_v18  ;;  %v378_v18 = vld [vmem:[%s14451_s2 + $0x38] sm:$0xff]  ;;  %v1269_v51 = vand.u32 4294901760, %v375_v38  ;;  %v13081_v50 = vsub.f32 %v376_v58, %v1272_v61 }
  0x87   : > { %11331 = vmatpush3.bf16.msra.mxu0 %v12793_v43  ;;  %10203 = vmatprep.mubr.f32.mxu0 %v12610_v19  ;;  %v377_v19 = vld [vmem:[%s14451_s2 + $0x30] sm:$0xff]  ;;  %v1278_v4 = vand.u32 4294901760, %v378_v18 }
  0x88   : > { %9426 = vmatmul.mubr.f32.gmra.mrb[6].mxu1 %v14775_v1  ;;  %11333 = vmatprep.subr.bf16.mxu0 %v14776_v12  ;;  %v1275_v36 = vand.u32 4294901760, %v377_v19  ;;  %v13074_v45 = vsub.f32 %v375_v38, %v1269_v51  ;;  %v13078_v2 = vpack.c.bf16 %v1272_v61, %v1269_v51  ;;  %v14779_v38 = vand.u32 4294901760, %v12785_v23 }
  0x89   : > { %10895 = vmatpush3.bf16.msra.mxu1 %v14751_v6  ;;  %9444 = vmatprep.mubr.f32.mxu1 %v14768_v34  ;;  %v13053_v6 = vpack.c.bf16 %v1266_v37, %v1263_v42  ;;  %v14781_v61 = vand.u32 4294901760, %v13036_v41  ;;  %v14782_v42 = vand.u32 4294901760, %v13047_v59  ;;  %v13111_v37 = vsub.f32 %v378_v18, %v1278_v4 }
  0x8a   : > { %10897 = vmatprep.subr.bf16.mxu1 %v13022_v46  ;;  %10204 = vmatmul.mubr.f32.gmra.mrb[2].mxu0 %v12640_v53  ;;  %v14778_v53 = vand.u32 4294901760, %v13017_v49  ;;  %v14786_v23 = vand.u32 4294901760, %v12815_v39  ;;  %v14789_v39 = vand.u32 4294901760, %v13081_v50 }
  0x8b   : > { %11335 = vmatpush3.bf16.msra.mxu0 %v14776_v12  ;;  %10206 = vmatprep.mubr.f32.mxu0 %v12672_v0  ;;  %v1413_v0 = vsub.f32 %v13015_v26, %v14777_v29  ;;  %v14780_v29 = vand.u32 4294901760, %v12787_v15  ;;  %v1427_v58 = vsub.f32 %v13036_v41, %v14781_v61  ;;  %v14783_v15 = vand.u32 4294901760, %v13055_v28 }
  0x8c   : > { %9445 = vmatmul.mubr.f32.vlgmr.msra.gmra.mrb[0].mxu1 %v14769_v20  ;;  %11337 = vmatprep.subr.bf16.mxu0 %v12837_v31  ;;  %v1420_v48 = vsub.f32 %v13017_v49, %v14778_v53  ;;  %v13087_v53 = vpack.c.bf16 %v1278_v4, %v1275_v36  ;;  %v13109_v61 = vsub.f32 %v377_v19, %v1275_v36  ;;  %v14788_v36 = vand.u32 4294901760, %v13074_v45 }
  0x8d   : > { %10899 = vmatpush3.bf16.msra.mxu1 %v13022_v46  ;;  %9447 = vmatprep.mubr.f32.mxu1 %v14770_v7  ;;  %v11344_v51 = vpack.c.bf16 %v14780_v29, %v14779_v38  ;;  %v1414_v8 = vand.u32 4294901760, %v1413_v0  ;;  %v1434_v38 = vsub.f32 %v13055_v28, %v14783_v15  ;;  %v14784_v0 = vld [vmem:[#allocation31_spill] sm:$0xff]  ;;  %v14787_v15 = vand.u32 4294901760, %v12817_v11 }
  0x8e   : > { %10901 = vmatprep.subr.bf16.mxu1 %v13053_v6  ;;  %10207 = vmatmul.mubr.f32.gmra.mrb[4].mxu0 %v12698_v60  ;;  %v1332_v60 = vsub.f32 %v13047_v59, %v14782_v42  ;;  %v1421_v62 = vand.u32 4294901760, %v1420_v48  ;;  %v14785_v48 = vand.u32 4294901760, %v13062_v54  ;;  %v1428_v4 = vand.u32 4294901760, %v1427_v58 }
  0x8f   : > { %11339 = vmatpush3.bf16.msra.mxu0 %v12837_v31  ;;  %10209 = vmatprep.mubr.f32.mxu0 %v12885_v56  ;;  %v11348_v29 = vpack.c.bf16 %v14787_v15, %v14786_v23  ;;  %v1448_v11 = vsub.f32 %v13081_v50, %v14789_v39  ;;  %v14590_v23 = vand.u32 4294901760, %v13109_v61  ;;  %v14792_v58 = vand.u32 4294901760, %v12841_v16 }
  0x90   : > { %9448 = vmatmul.mubr.f32.gmra.mrb[2].mxu1 %v14771_v3  ;;  %11341 = vmatprep.subr.bf16.mxu0 %v12847_v14  ;;  %v1342_v42 = vsub.f32 %v13062_v54, %v14785_v48  ;;  %v1333_v18 = vand.u32 4294901760, %v1332_v60  ;;  %v10912_v19 = vpack.c.bf16 %v1421_v62, %v1414_v8  ;;  %v1435_v48 = vand.u32 4294901760, %v1434_v38  ;;  %v14790_v62 = vld [vmem:[#allocation42_spill] sm:$0xff] }
  0x91   : > { %10903 = vmatpush3.bf16.msra.mxu1 %v13053_v6  ;;  %9450 = vmatprep.mubr.f32.mxu1 %v14772_v22  ;;  %v14791_v8 = vand.u32 4294901760, %v12839_v47  ;;  %v1455_v15 = vsub.f32 %v13109_v61, %v14590_v23  ;;  %v14794_v16 = vand.u32 4294901760, %v12866_v21  ;;  %v14799_v21 = vld [vmem:[#allocation47_spill] sm:$0xff] }
  0x92   : > { %10905 = vmatprep.subr.bf16.mxu1 %v13078_v2  ;;  %10210 = vmatmul.mubr.f32.gmra.mrb[6].mxu0 %v12906_v55  ;;  %v1343_v60 = vand.u32 4294901760, %v1342_v42  ;;  %v10916_v39 = vpack.c.bf16 %v1435_v48, %v1428_v4  ;;  %v14793_v42 = vand.u32 4294901760, %v13111_v37  ;;  %v14796_v4 = vld [vmem:[#allocation40_spill] sm:$0xff] }
  0x93   : > { %11343 = vmatpush3.bf16.msra.mxu0 %v12847_v14  ;;  %10228 = vmatprep.mubr.f32.mxu0 %v14784_v0  ;;  %v1441_v0 = vsub.f32 %v13074_v45, %v14788_v36  ;;  %v11352_v38 = vpack.c.bf16 %v14792_v58, %v14791_v8  ;;  %v8388_v58 = vld [vmem:[%s14451_s2 + $0x80] sm:$0xff] }
  0x94   : > { %9451 = vmatmul.mubr.f32.gmra.mrb[4].mxu1 %v14773_v10  ;;  %11345 = vmatprep.subr.bf16.mxu0 %v11344_v51  ;;  %v1462_v47 = vsub.f32 %v13111_v37, %v14793_v42  ;;  %v5569_v42 = vld [vmem:[#allocation2 + $0xa] sm:$0xff] }
  0x95   : > { %10907 = vmatpush3.bf16.msra.mxu1 %v13078_v2  ;;  %9453 = vmatprep.mubr.f32.mxu1 %v14774_v25  ;;  %v1442_v36 = vand.u32 4294901760, %v1441_v0  ;;  %v14795_v0 = vand.u32 4294901760, %v12868_v40  ;;  %v14800_v40 = vand.u32 4294901760, %v12906_v55  ;;  %v5568_v55 = vld [vmem:[#allocation2 + $0x2] sm:$0xff]  ;;  %v5573_v25 = vld [vmem:[#allocation2 + $0x3a] sm:$0xff] }
  0x96   : > { %10909 = vmatprep.subr.bf16.mxu1 %v13087_v53  ;;  %10229 = vmatmul.mubr.f32.vlgmr.msra.gmra.mrb[0].mxu0 %v12604_v9  ;;  %v1463_v8 = vand.u32 4294901760, %v1462_v47  ;;  %v5570_v47 = vld [vmem:[#allocation2 + $0x1a] sm:$0xff] }
  0x97   : > { %11347 = vmatpush3.bf16.msra.mxu0 %v11344_v51  ;;  %10231 = vmatprep.mubr.f32.mxu0 %v14790_v62  ;;  %v1449_v51 = vand.u32 4294901760, %v1448_v11  ;;  %v1456_v11 = vand.u32 4294901760, %v1455_v15  ;;  %v10928_v15 = vpack.c.bf16 %v13017_v49, %v13015_v26 }
  0x98   : > { %9454 = vmatmul.mubr.f32.gmra.mrb[6].mxu1 %v14775_v1  ;;  %11349 = vmatprep.subr.bf16.mxu0 %v11348_v29 }
  0x99   : > { %10911 = vmatpush3.bf16.msra.mxu1 %v13087_v53  ;;  %9472 = vmatprep.mubr.f32.mxu1 %v1333_v18  ;;  %v11356_v18 = vpack.c.bf16 %v14795_v0, %v14794_v16  ;;  %v10920_v48 = vpack.c.bf16 %v1449_v51, %v1442_v36  ;;  %v5590_v36 = vsel %vm332_vm0, %v5568_v55, 0  ;;  %v8390_v16 = vld [vmem:[%s14451_s2 + $0x90] sm:$0xff] }
  0x9a   : > { %10913 = vmatprep.subr.bf16.mxu1 %v10912_v19  ;;  %10232 = vmatmul.mubr.f32.gmra.mrb[2].mxu0 %v12658_v13  ;;  %v13195_v0 = vand.u32 4294901760, %v5590_v36  ;;  %v13222_v55 = vld [vmem:[%s14451_s2 + $0xb0] sm:$0xff] }
  0x9b   : > { %11351 = vmatpush3.bf16.msra.mxu0 %v11348_v29  ;;  %10234 = vmatprep.mubr.f32.mxu0 %v12695_v30  ;;  %v14797_v29 = vand.u32 4294901760, %v12885_v56  ;;  %v14798_v30 = vld [vmem:[#allocation45_spill] sm:$0xff]  ;;  %v14802_v56 = vld [vmem:[#allocation62_spill] sm:$0xff]  ;;  %v5632_v1 = vand.u32 4294901760, %v13222_v55 }
  0x9c   : > { %9473 = vmatmul.mubr.f32.vlgmr.msra.gmra.mrb[0].mxu1 %v1343_v60  ;;  %11353 = vmatprep.subr.bf16.mxu0 %v11352_v38  ;;  %v14803_v60 = vld [vmem:[#allocation66_spill] sm:$0xff] }
  0x9d   : > { %10915 = vmatpush3.bf16.msra.mxu1 %v10912_v19  ;;  %9475 = vmatprep.mubr.f32.mxu1 %v14796_v4  ;;  %v10924_v19 = vpack.c.bf16 %v1463_v8, %v1456_v11  ;;  %v5593_v11 = vsel %vm332_vm0, %v5569_v42, 0  ;;  %v5596_v8 = vsel %vm332_vm0, %v5570_v47, 0  ;;  %v5572_v42 = vld [vmem:[#allocation2 + $0x32] sm:$0xff]  ;;  %v10940_v47 = vpack.c.bf16 %v13111_v37, %v13109_v61 }
  0x9e   : > { %10917 = vmatprep.subr.bf16.mxu1 %v10916_v39  ;;  %10235 = vmatmul.mubr.f32.gmra.mrb[4].mxu0 %v12714_v17  ;;  %v14801_v17 = vld [vmem:[#allocation58_spill] sm:$0xff]  ;;  %v13239_v23 = vand.u32 4294901760, %v5596_v8 }
  0x9f   : > { %11355 = vmatpush3.bf16.msra.mxu0 %v11352_v38  ;;  %10237 = vmatprep.mubr.f32.mxu0 %v14797_v29  ;;  %v8389_v38 = vld [vmem:[%s14451_s2 + $0x88] sm:$0xff] }
  0xa0   : > { %9476 = vmatmul.mubr.f32.gmra.mrb[2].mxu1 %v14798_v30  ;;  %11357 = vmatprep.subr.bf16.mxu0 %v11356_v18  ;;  %v5617_v51 = vand.u32 4294901760, %v8389_v38  ;;  %v5620_v30 = vand.u32 4294901760, %v8390_v16 }
  0xa1   : > { %10919 = vmatpush3.bf16.msra.mxu1 %v10916_v39  ;;  %9478 = vmatprep.mubr.f32.mxu1 %v14799_v21  ;;  %v5614_v39 = vand.u32 4294901760, %v8388_v58  ;;  %v5575_v21 = vld [vmem:[#allocation2 + $0x52] sm:$0xff] }
  0xa2   : > { %10921 = vmatprep.subr.bf16.mxu1 %v10920_v48  ;;  %10238 = vmatmul.mubr.f32.gmra.mrb[6].mxu0 %v14800_v40  ;;  %v13199_v4 = vsub.f32 %v8389_v38, %v5617_v51  ;;  %v13230_v38 = vsub.f32 %v5590_v36, %v13195_v0  ;;  %v13241_v13 = vsub.f32 %v8390_v16, %v5620_v30 }
  0xa3   : > { %11359 = vmatpush3.bf16.msra.mxu0 %v11356_v18  ;;  %10256 = vmatprep.mubr.f32.mxu0 %v12547_v33  ;;  %v13197_v18 = vsub.f32 %v8388_v58, %v5614_v39  ;;  %v13210_v29 = vpack.c.bf16 %v5617_v51, %v5614_v39  ;;  %v13227_v58 = vld [vmem:[%s14451_s2 + $0xb8] sm:$0xff]  ;;  %v13232_v39 = vand.u32 4294901760, %v5593_v11 }
  0xa4   : > { %9479 = vmatmul.mubr.f32.gmra.mrb[4].mxu1 %v14801_v17  ;;  %11361 = vmatprep.subr.bf16.mxu0 %v12793_v43  ;;  %v5635_v16 = vand.u32 4294901760, %v13227_v58  ;;  %v5605_v17 = vsel %vm332_vm0, %v5573_v25, 0 }
  0xa5   : > { %10923 = vmatpush3.bf16.msra.mxu1 %v10920_v48  ;;  %9481 = vmatprep.mubr.f32.mxu1 %v14802_v56  ;;  %v10936_v48 = vpack.c.bf16 %v13081_v50, %v13074_v45  ;;  %14804 = vst [vmem:[#allocation18_spill] sm:$0xff] %v13210_v29  ;;  %v5574_v56 = vld [vmem:[#allocation2 + $0x4a] sm:$0xff] }
  0xa6   : > { %10925 = vmatprep.subr.bf16.mxu1 %v10924_v19  ;;  %10257 = vmatmul.mubr.f32.vlgmr.msra.gmra.mrb[0].mxu0 %v12566_v63 }
  0xa7   : > { %11363 = vmatpush3.bf16.msra.mxu0 %v12793_v43  ;;  %10259 = vmatprep.mubr.f32.mxu0 %v12592_v57  ;;  %v10932_v43 = vpack.c.bf16 %v13055_v28, %v13036_v41 }
  0xa8   : > { %9482 = vmatmul.mubr.f32.gmra.mrb[6].mxu1 %v14803_v60  ;;  %11365 = vmatprep.subr.bf16.mxu0 %v14776_v12 }
  0xa9   : > { %10927 = vmatpush3.bf16.msra.mxu1 %v10924_v19  ;;  %9500 = vmatprep.mubr.f32.mxu1 %v13013_v27  ;;  %v8392_v19 = vld [vmem:[%s14451_s2 + $0xa0] sm:$0xff] }
  0xaa   : > { %10929 = vmatprep.subr.bf16.mxu1 %v10928_v15  ;;  %10260 = vmatmul.mubr.f32.gmra.mrb[2].mxu0 %v12621_v44  ;;  %v5626_v36 = vand.u32 4294901760, %v8392_v19 }
  0xab   : > { %11367 = vmatpush3.bf16.msra.mxu0 %v14776_v12  ;;  %10262 = vmatprep.mubr.f32.mxu0 %v12653_v35  ;;  %v8391_v12 = vld [vmem:[%s14451_s2 + $0x98] sm:$0xff] }
  0xac   : > { %9501 = vmatmul.mubr.f32.vlgmr.msra.gmra.mrb[0].mxu1 %v13034_v5  ;;  %11369 = vmatprep.subr.bf16.mxu0 %v12837_v31  ;;  %v5623_v40 = vand.u32 4294901760, %v8391_v12 }
  0xad   : > { %10931 = vmatpush3.bf16.msra.mxu1 %v10928_v15  ;;  %9503 = vmatprep.mubr.f32.mxu1 %v14768_v34  ;;  %v5571_v15 = vld [vmem:[#allocation2 + $0x22] sm:$0xff] }
  0xae   : > { %10933 = vmatprep.subr.bf16.mxu1 %v10932_v43  ;;  %10263 = vmatmul.mubr.f32.gmra.mrb[4].mxu0 %v12674_v52  ;;  %v5599_v51 = vsel %vm332_vm0, %v5571_v15, 0  ;;  %v13250_v9 = vpack.c.bf16 %v5623_v40, %v5620_v30  ;;  %v14810_v15 = vand.u32 4294901760, %v13230_v38 }
  0xaf   : > { %11371 = vmatpush3.bf16.msra.mxu0 %v12837_v31  ;;  %10265 = vmatprep.mubr.f32.mxu0 %v12859_v24  ;;  %v8393_v31 = vld [vmem:[%s14451_s2 + $0xa8] sm:$0xff] }
  0xb0   : > { %9504 = vmatmul.mubr.f32.gmra.mrb[2].mxu1 %v14769_v20  ;;  %11373 = vmatprep.subr.bf16.mxu0 %v12847_v14  ;;  %v5629_v62 = vand.u32 4294901760, %v8393_v31  ;;  %14805 = vst [vmem:[#allocation23_spill] sm:$0xff] %v13250_v9  ;;  %v5689_v25 = vsub.f32 %v13230_v38, %v14810_v15 }
  0xb1   : > { %10935 = vmatpush3.bf16.msra.mxu1 %v10932_v43  ;;  %9506 = vmatprep.mubr.f32.mxu1 %v14770_v7  ;;  %v13246_v43 = vsub.f32 %v8391_v12, %v5623_v40  ;;  %v13258_v12 = vsub.f32 %v5593_v11, %v13232_v39  ;;  %v14807_v40 = vand.u32 4294901760, %v13199_v4 }
  0xb2   : > { %10937 = vmatprep.subr.bf16.mxu1 %v10936_v48  ;;  %10266 = vmatmul.mubr.f32.gmra.mrb[6].mxu0 %v12880_v32  ;;  %v13287_v11 = vsub.f32 %v8393_v31, %v5629_v62 }
  0xb3   : > { %11375 = vmatpush3.bf16.msra.mxu0 %v12847_v14  ;;  %10284 = vmatprep.mubr.f32.mxu0 %v12547_v33  ;;  %v5602_v14 = vsel %vm332_vm0, %v5572_v42, 0  ;;  %v14806_v33 = vand.u32 4294901760, %v13197_v18  ;;  %v5777_v60 = vsub.f32 %v13199_v4, %v14807_v40  ;;  %v13270_v42 = vand.u32 4294901760, %v5599_v51 }
  0xb4   : > { %9507 = vmatmul.mubr.f32.gmra.mrb[4].mxu1 %v14771_v3  ;;  %11377 = vmatprep.subr.bf16.mxu0 %v13210_v29  ;;  %v13278_v40 = vand.u32 4294901760, %v5602_v14 }
  0xb5   : > { %10939 = vmatpush3.bf16.msra.mxu1 %v10936_v48  ;;  %9509 = vmatprep.mubr.f32.mxu1 %v14772_v22  ;;  %v5770_v30 = vsub.f32 %v13197_v18, %v14806_v33  ;;  %v13268_v48 = vsub.f32 %v5596_v8, %v13239_v23  ;;  %v13275_v33 = vpack.c.bf16 %v5629_v62, %v5626_v36 }
  0xb6   : > { %10941 = vmatprep.subr.bf16.mxu1 %v10940_v47  ;;  %10285 = vmatmul.mubr.f32.vlgmr.msra.gmra.mrb[0].mxu0 %v12566_v63  ;;  %v13283_v8 = vpack.c.bf16 %v5635_v16, %v5632_v1  ;;  %v13285_v63 = vsub.f32 %v8392_v19, %v5626_v36  ;;  %v14813_v19 = vand.u32 4294901760, %v13241_v13  ;;  %v13314_v15 = vsub.f32 %v5602_v14, %v13278_v40  ;;  %v14816_v14 = vld [vmem:[#allocation22_spill] sm:$0xff] }
  0xb7   : > { %14808 = vst [vmem:[#allocation26_spill] sm:$0xff] %v13268_v48  ;;  %11379 = vmatpush3.bf16.msra.mxu0 %v13210_v29  ;;  %10287 = vmatprep.mubr.f32.mxu0 %v12592_v57  ;;  %14809 = vst [vmem:[#allocation70_spill] sm:$0xff] %v13275_v33  ;;  %v5608_v57 = vsel %vm332_vm0, %v5574_v56, 0  ;;  %v5771_v22 = vand.u32 4294901760, %v5770_v30  ;;  %v5778_v29 = vand.u32 4294901760, %v5777_v60  ;;  %v13298_v62 = vand.u32 4294901760, %v13268_v48 }
  0xb8   : > { %9510 = vmatmul.mubr.f32.gmra.mrb[6].mxu1 %v14773_v10  ;;  %11381 = vmatprep.subr.bf16.mxu0 %v13250_v9  ;;  %v13301_v56 = vsub.f32 %v5599_v51, %v13270_v42  ;;  %v5784_v31 = vsub.f32 %v13241_v13, %v14813_v19  ;;  %v14814_v60 = vand.u32 4294901760, %v13246_v43  ;;  %14815 = vst [vmem:[#allocation76_spill] sm:$0xff] %v13314_v15  ;;  %v13316_v30 = vand.u32 4294901760, %v5608_v57 }
  0xb9   : > { %10943 = vmatpush3.bf16.msra.mxu1 %v10940_v47  ;;  %9528 = vmatprep.mubr.f32.mxu1 %v13047_v59  ;;  %14811 = vst [vmem:[#allocation40_spill] sm:$0xff] %v13298_v62  ;;  %v13306_v47 = vand.u32 4294901760, %v5605_v17  ;;  %v5611_v51 = vsel %vm332_vm0, %v5575_v21, 0  ;;  %v14611_v19 = vand.u32 4294901760, %v13285_v63  ;;  %v14613_v10 = vand.u32 4294901760, %v13287_v11 }
  0xba   : > { %10945 = vmatprep.subr.bf16.mxu1 %v13022_v46  ;;  %10288 = vmatmul.mubr.f32.gmra.mrb[2].mxu0 %v12621_v44  ;;  %14812 = vst [vmem:[#allocation45_spill] sm:$0xff] %v13301_v56  ;;  %v5791_v36 = vsub.f32 %v13246_v43, %v14814_v60  ;;  %v13327_v60 = vsub.f32 %v13227_v58, %v5635_v16  ;;  %v5690_v44 = vand.u32 4294901760, %v5689_v25  ;;  %v14817_v21 = vand.u32 4294901760, %v13258_v12 }
  0xbb   : > { %11383 = vmatpush3.bf16.msra.mxu0 %v13250_v9  ;;  %10290 = vmatprep.mubr.f32.mxu0 %v12653_v35  ;;  %v13324_v35 = vsub.f32 %v13222_v55, %v5632_v1  ;;  %v11392_v3 = vpack.c.bf16 %v5778_v29, %v5771_v22  ;;  %v5709_v1 = vsub.f32 %v13268_v48, %v13298_v62  ;;  %v13339_v55 = vand.u32 4294901760, %v13301_v56 }
  0xbc   : > { %9529 = vmatmul.mubr.f32.vlgmr.msra.gmra.mrb[0].mxu1 %v13062_v54  ;;  %11385 = vmatprep.subr.bf16.mxu0 %v13275_v33  ;;  %v5699_v9 = vsub.f32 %v13258_v12, %v14817_v21  ;;  %v13342_v58 = vsub.f32 %v5605_v17, %v13306_v47  ;;  %v13344_v16 = vand.u32 4294901760, %v5611_v51  ;;  %v5785_v22 = vand.u32 4294901760, %v5784_v31  ;;  %v14822_v21 = vld [vmem:[#allocation30_spill] sm:$0xff] }
  0xbd   : > { %10947 = vmatpush3.bf16.msra.mxu1 %v13022_v46  ;;  %9531 = vmatprep.mubr.f32.mxu1 %v14816_v14  ;;  %14818 = vst [vmem:[#allocation22_spill] sm:$0xff] %v13339_v55  ;;  %v5792_v29 = vand.u32 4294901760, %v5791_v36  ;;  %v13349_v25 = vand.u32 4294901760, %v13314_v15  ;;  %v13352_v14 = vsub.f32 %v5608_v57, %v13316_v30  ;;  %v5798_v17 = vsub.f32 %v13285_v63, %v14611_v19  ;;  %v14823_v57 = vld [vmem:[#allocation33_spill] sm:$0xff] }
  0xbe   : > { %10949 = vmatprep.subr.bf16.mxu1 %v13053_v6  ;;  %10291 = vmatmul.mubr.f32.gmra.mrb[4].mxu0 %v12674_v52  ;;  %14819 = vst [vmem:[#allocation77_spill] sm:$0xff] %v13342_v58  ;;  %v5719_v19 = vsub.f32 %v13301_v56, %v13339_v55  ;;  %v13371_v52 = vand.u32 4294901760, %v13342_v58  ;;  %v13377_v36 = vand.u32 4294901760, %v5709_v1 }
  0xbf   : > { %11387 = vmatpush3.bf16.msra.mxu0 %v13275_v33  ;;  %10293 = vmatprep.mubr.f32.mxu0 %v12859_v24  ;;  %14820 = vst [vmem:[#allocation78_spill] sm:$0xff] %v13349_v25  ;;  %14821 = vst [vmem:[#allocation79_spill] sm:$0xff] %v13352_v14  ;;  %v5805_v24 = vsub.f32 %v13287_v11, %v14613_v10  ;;  %v13374_v10 = vsub.f32 %v5611_v51, %v13344_v16  ;;  %v5799_v55 = vand.u32 4294901760, %v5798_v17 }
  0xc0   : > { %9532 = vmatmul.mubr.f32.gmra.mrb[2].mxu1 %v14822_v21  ;;  %11389 = vmatprep.subr.bf16.mxu0 %v13283_v8  ;;  %v5700_v21 = vand.u32 4294901760, %v5699_v9  ;;  %14824 = vst [vmem:[#allocation30_spill] sm:$0xff] %v13371_v52  ;;  %14826 = vst [vmem:[#allocation81_spill] sm:$0xff] %v13377_v36  ;;  %v11396_v31 = vpack.c.bf16 %v5792_v29, %v5785_v22  ;;  %v13382_v9 = vand.u32 4294901760, %v13352_v14  ;;  %v14829_v51 = vand.u32 4294901760, %v13324_v35  ;;  %v14831_v22 = vld [vmem:[#allocation49_spill] sm:$0xff] }
  0xc1   : > { %10951 = vmatpush3.bf16.msra.mxu1 %v13053_v6  ;;  %9534 = vmatprep.mubr.f32.mxu1 %v14823_v57  ;;  %14825 = vst [vmem:[#allocation80_spill] sm:$0xff] %v13374_v10  ;;  %v5729_v57 = vsub.f32 %v13314_v15, %v13349_v25  ;;  %v5806_v62 = vand.u32 4294901760, %v5805_v24  ;;  %v14832_v29 = vand.u32 4294901760, %v13015_v26  ;;  %v14833_v17 = vand.u32 4294901760, %v13017_v49  ;;  %v14835_v26 = vld [vmem:[#allocation56_spill] sm:$0xff] }
  0xc2   : > { %10953 = vmatprep.subr.bf16.mxu1 %v13078_v2  ;;  %10294 = vmatmul.mubr.f32.gmra.mrb[6].mxu0 %v12880_v32  ;;  %14827 = vst [vmem:[#allocation82_spill] sm:$0xff] %v13382_v9  ;;  %v14828_v32 = vld [vmem:[#allocation43_spill] sm:$0xff]  ;;  %v5812_v33 = vsub.f32 %v13324_v35, %v14829_v51  ;;  %v5739_v51 = vsub.f32 %v13342_v58, %v13371_v52  ;;  %v13403_v25 = vand.u32 4294901760, %v13374_v10 }
  0xc3   : > { %11391 = vmatpush3.bf16.msra.mxu0 %v13283_v8  ;;  %10312 = vmatprep.mubr.f32.mxu0 %v5690_v44  ;;  %v14830_v44 = vand.u32 4294901760, %v13327_v60  ;;  %v10960_v24 = vpack.c.bf16 %v14833_v17, %v14832_v29  ;;  %v11400_v49 = vpack.c.bf16 %v5806_v62, %v5799_v55  ;;  %v14836_v17 = vand.u32 4294901760, %v13047_v59 }
  0xc4   : > { %9535 = vmatmul.mubr.f32.gmra.mrb[4].mxu1 %v14828_v32  ;;  %11393 = vmatprep.subr.bf16.mxu0 %v11392_v3  ;;  %v13398_v32 = vand.u32 4294901760, %v5719_v19  ;;  %14834 = vst [vmem:[#allocation83_spill] sm:$0xff] %v13403_v25  ;;  %v5813_v19 = vand.u32 4294901760, %v5812_v33  ;;  %v5759_v62 = vsub.f32 %v13374_v10, %v13403_v25  ;;  %v14839_v59 = vand.u32 4294901760, %v13062_v54  ;;  %v14844_v54 = vld [vmem:[#allocation35_spill] sm:$0xff] }
  0xc5   : > { %v5819_v1 = vsub.f32 %v13327_v60, %v14830_v44  ;;  %10955 = vmatpush3.bf16.msra.mxu1 %v13078_v2  ;;  %9537 = vmatprep.mubr.f32.mxu1 %v14831_v22  ;;  %v13406_v44 = vand.u32 4294901760, %v5729_v57  ;;  %v14838_v57 = vand.u32 4294901760, %v13055_v28  ;;  %v13419_v22 = vand.u32 4294901760, %v5739_v51 }
  0xc6   : > { %10957 = vmatprep.subr.bf16.mxu1 %v13087_v53  ;;  %10313 = vmatmul.mubr.f32.vlgmr.msra.gmra.mrb[0].mxu0 %v5700_v21  ;;  %v5749_v21 = vsub.f32 %v13352_v14, %v13382_v9  ;;  %v14841_v28 = vand.u32 4294901760, %v13074_v45  ;;  %v13434_v51 = vand.u32 4294901760, %v5759_v62  ;;  %v14847_v45 = vand.u32 4294901760, %v13111_v37  ;;  %v14850_v37 = vld [vmem:[#allocation60_spill] sm:$0xff] }
  0xc7   : > { %11395 = vmatpush3.bf16.msra.mxu0 %v11392_v3  ;;  %10315 = vmatprep.mubr.f32.mxu0 %v13377_v36  ;;  %v5820_v29 = vand.u32 4294901760, %v5819_v1  ;;  %v14837_v3 = vand.u32 4294901760, %v13036_v41  ;;  %v14840_v41 = vld [vmem:[#allocation29_spill] sm:$0xff]  ;;  %v14842_v1 = vand.u32 4294901760, %v13081_v50  ;;  %v14846_v50 = vand.u32 4294901760, %v13109_v61 }
  0xc8   : > { %9538 = vmatmul.mubr.f32.gmra.mrb[6].mxu1 %v14835_v26  ;;  %11397 = vmatprep.subr.bf16.mxu0 %v11396_v31  ;;  %v13424_v33 = vand.u32 4294901760, %v5749_v21  ;;  %14843 = vst [vmem:[#allocation56_spill] sm:$0xff] %v13434_v51  ;;  %v14845_v21 = vld [vmem:[#allocation37_spill] sm:$0xff]  ;;  %v11416_v61 = vpack.c.bf16 %v13287_v11, %v13285_v63 }
  0xc9   : > { %10959 = vmatpush3.bf16.msra.mxu1 %v13087_v53  ;;  %9556 = vmatprep.mubr.f32.mxu1 %v14836_v17  ;;  %v10964_v36 = vpack.c.bf16 %v14838_v57, %v14837_v3  ;;  %v11404_v55 = vpack.c.bf16 %v5820_v29, %v5813_v19  ;;  %v10972_v19 = vpack.c.bf16 %v14847_v45, %v14846_v50  ;;  %v8356_v3 = vld [vmem:[%s14451_s2 + $0x180] sm:$0xff]  ;;  %v8357_v57 = vld [vmem:[%s14451_s2 + $0x188] sm:$0xff] }
  0xca   : > { %10961 = vmatprep.subr.bf16.mxu1 %v10960_v24  ;;  %10316 = vmatmul.mubr.f32.gmra.mrb[2].mxu0 %v13398_v32  ;;  %v11412_v29 = vpack.c.bf16 %v13246_v43, %v13241_v13  ;;  %v11420_v17 = vpack.c.bf16 %v13327_v60, %v13324_v35  ;;  %v2113_v62 = vand.u32 4294901760, %v8357_v57 }
  0xcb   : > { %11399 = vmatpush3.bf16.msra.mxu0 %v11396_v31  ;;  %10318 = vmatprep.mubr.f32.mxu0 %v13406_v44  ;;  %v10968_v31 = vpack.c.bf16 %v14842_v1, %v14841_v28  ;;  %v14853_v28 = vld [vmem:[#allocation44_spill] sm:$0xff] }
  0xcc   : > { %9557 = vmatmul.mubr.f32.vlgmr.msra.gmra.mrb[0].mxu1 %v14839_v59  ;;  %11401 = vmatprep.subr.bf16.mxu0 %v11400_v49  ;;  %v8358_v59 = vld [vmem:[%s14451_s2 + $0x190] sm:$0xff]  ;;  %v13499_v45 = vsub.f32 %v8357_v57, %v2113_v62 }
  0xcd   : > { %10963 = vmatpush3.bf16.msra.mxu1 %v10960_v24  ;;  %9559 = vmatprep.mubr.f32.mxu1 %v14840_v41  ;;  %v11408_v24 = vpack.c.bf16 %v13199_v4, %v13197_v18  ;;  %v14852_v41 = vld [vmem:[#allocation18_spill] sm:$0xff]  ;;  %v2116_v1 = vand.u32 4294901760, %v8358_v59 }
  0xce   : > { %10965 = vmatprep.subr.bf16.mxu1 %v10964_v36  ;;  %10319 = vmatmul.mubr.f32.gmra.mrb[4].mxu0 %v13419_v22 }
  0xcf   : > { %11403 = vmatpush3.bf16.msra.mxu0 %v11400_v49  ;;  %10321 = vmatprep.mubr.f32.mxu0 %v13424_v33  ;;  %v14848_v49 = vld [vmem:[#allocation48_spill] sm:$0xff]  ;;  %v13516_v57 = vsub.f32 %v8358_v59, %v2116_v1  ;;  %v14856_v59 = vld [vmem:[#allocation70_spill] sm:$0xff] }
  0xd0   : > { %9560 = vmatmul.mubr.f32.gmra.mrb[2].mxu1 %v14844_v54  ;;  %11405 = vmatprep.subr.bf16.mxu0 %v11404_v55 }
  0xd1   : > { %10967 = vmatpush3.bf16.msra.mxu1 %v10964_v36  ;;  %9562 = vmatprep.mubr.f32.mxu1 %v14845_v21  ;;  %v14849_v36 = vld [vmem:[#allocation53_spill] sm:$0xff] }
  0xd2   : > { %10969 = vmatprep.subr.bf16.mxu1 %v10968_v31  ;;  %10322 = vmatmul.mubr.f32.gmra.mrb[6].mxu0 %v13434_v51 }
  0xd3   : > { %11407 = vmatpush3.bf16.msra.mxu0 %v11404_v55  ;;  %10340 = vmatprep.mubr.f32.mxu0 %v13195_v0  ;;  %v8359_v55 = vld [vmem:[%s14451_s2 + $0x198] sm:$0xff] }
  0xd4   : > { %9563 = vmatmul.mubr.f32.gmra.mrb[4].mxu1 %v14848_v49  ;;  %11409 = vmatprep.subr.bf16.mxu0 %v11408_v24  ;;  %v2119_v54 = vand.u32 4294901760, %v8359_v55 }
  0xd5   : > { %10971 = vmatpush3.bf16.msra.mxu1 %v10968_v31  ;;  %9565 = vmatprep.mubr.f32.mxu1 %v14849_v36 }
  0xd6   : > { %10973 = vmatprep.subr.bf16.mxu1 %v10972_v19  ;;  %10341 = vmatmul.mubr.f32.vlgmr.msra.gmra.mrb[0].mxu0 %v13232_v39 }
  0xd7   : > { %11411 = vmatpush3.bf16.msra.mxu0 %v11408_v24  ;;  %10343 = vmatprep.mubr.f32.mxu0 %v13239_v23  ;;  %v8360_v24 = vld [vmem:[%s14451_s2 + $0x1a0] sm:$0xff] }
  0xd8   : > { %9566 = vmatmul.mubr.f32.gmra.mrb[6].mxu1 %v14850_v37  ;;  %11413 = vmatprep.subr.bf16.mxu0 %v11412_v29 }
  0xd9   : > { %10975 = vmatpush3.bf16.msra.mxu1 %v10972_v19  ;;  %9584 = vmatprep.mubr.f32.mxu1 %v13013_v27  ;;  %v14854_v19 = vld [vmem:[#allocation52_spill] sm:$0xff] }
  0xda   : > { %10977 = vmatprep.subr.bf16.mxu1 %v13022_v46  ;;  %10344 = vmatmul.mubr.f32.gmra.mrb[2].mxu0 %v13270_v42 }
  0xdb   : > { %11415 = vmatpush3.bf16.msra.mxu0 %v11412_v29  ;;  %10346 = vmatprep.mubr.f32.mxu0 %v13278_v40  ;;  %v14855_v29 = vld [vmem:[#allocation23_spill] sm:$0xff] }
  0xdc   : > { %9585 = vmatmul.mubr.f32.vlgmr.msra.gmra.mrb[0].mxu1 %v13034_v5  ;;  %11417 = vmatprep.subr.bf16.mxu0 %v11416_v61 }
  0xdd   : > { %10979 = vmatpush3.bf16.msra.mxu1 %v13022_v46  ;;  %9587 = vmatprep.mubr.f32.mxu1 %v14768_v34  ;;  %v2110_v46 = vand.u32 4294901760, %v8356_v3 }
  0xde   : > { %10981 = vmatprep.subr.bf16.mxu1 %v13053_v6  ;;  %10347 = vmatmul.mubr.f32.gmra.mrb[4].mxu0 %v13306_v47 }
  0xdf   : > { %11419 = vmatpush3.bf16.msra.mxu0 %v11416_v61  ;;  %10349 = vmatprep.mubr.f32.mxu0 %v13316_v30  ;;  %v13492_v31 = vpack.c.bf16 %v2113_v62, %v2110_v46  ;;  %v13497_v50 = vsub.f32 %v8356_v3, %v2110_v46  ;;  %v2122_v61 = vand.u32 4294901760, %v8360_v24  ;;  %v8363_v3 = vld [vmem:[%s14451_s2 + $0x1b8] sm:$0xff]  ;;  %v13518_v46 = vsub.f32 %v8359_v55, %v2119_v54 }
  0xe0   : > { %9588 = vmatmul.mubr.f32.gmra.mrb[2].mxu1 %v14769_v20  ;;  %11421 = vmatprep.subr.bf16.mxu0 %v11420_v17  ;;  %v369_v62 = vld [vmem:[#allocation2 + $0x78] sm:$0xff]  ;;  %v2131_v51 = vand.u32 4294901760, %v8363_v3 }
  0xe1   : > { %10983 = vmatpush3.bf16.msra.mxu1 %v13053_v6  ;;  %9590 = vmatprep.mubr.f32.mxu1 %v14770_v7  ;;  %v14851_v6 = vld [vmem:[#allocation39_spill] sm:$0xff]  ;;  %v2104_v36 = vsel %vm332_vm0, %v369_v62, 0  ;;  %v13535_v37 = vsub.f32 %v8360_v24, %v2122_v61  ;;  %v14857_v62 = vand.u32 4294901760, %v13497_v50 }
  0xe2   : > { %10985 = vmatprep.subr.bf16.mxu1 %v13078_v2  ;;  %10350 = vmatmul.mubr.f32.gmra.mrb[6].mxu0 %v13344_v16  ;;  %v13576_v49 = vsub.f32 %v8363_v3, %v2131_v51 }
  0xe3   : > { %11423 = vmatpush3.bf16.msra.mxu0 %v11420_v17  ;;  %10368 = vmatprep.mubr.f32.mxu0 %v13230_v38  ;;  %v8362_v17 = vld [vmem:[%s14451_s2 + $0x1b0] sm:$0xff] }
  0xe4   : > { %9591 = vmatmul.mubr.f32.gmra.mrb[4].mxu1 %v14851_v6  ;;  %11425 = vmatprep.subr.bf16.mxu0 %v14852_v41  ;;  %v2128_v55 = vand.u32 4294901760, %v8362_v17 }
  0xe5   : > { %10987 = vmatpush3.bf16.msra.mxu1 %v13078_v2  ;;  %9593 = vmatprep.mubr.f32.mxu1 %v14853_v28  ;;  %v8361_v2 = vld [vmem:[%s14451_s2 + $0x1a8] sm:$0xff] }
  0xe6   : > { %10989 = vmatprep.subr.bf16.mxu1 %v13087_v53  ;;  %10369 = vmatmul.mubr.f32.vlgmr.msra.gmra.mrb[0].mxu0 %v13258_v12  ;;  %v13553_v24 = vpack.c.bf16 %v2131_v51, %v2128_v55 }
  0xe7   : > { %11427 = vmatpush3.bf16.msra.mxu0 %v14852_v41  ;;  %10371 = vmatprep.mubr.f32.mxu0 %v13268_v48 }
  0xe8   : > { %9594 = vmatmul.mubr.f32.gmra.mrb[6].mxu1 %v14854_v19  ;;  %11429 = vmatprep.subr.bf16.mxu0 %v14855_v29 }
  0xe9   : > { %10991 = vmatpush3.bf16.msra.mxu1 %v13087_v53  ;;  %9612 = vmatprep.mubr.f32.mxu1 %v13013_v27  ;;  %v13522_v53 = vpack.c.bf16 %v2119_v54, %v2116_v1  ;;  %v2125_v27 = vand.u32 4294901760, %v8361_v2 }
  0xea   : > { %10993 = vmatprep.subr.bf16.mxu1 %v13492_v31  ;;  %10372 = vmatmul.mubr.f32.gmra.mrb[2].mxu0 %v13301_v56  ;;  %v2266_v56 = vsub.f32 %v13497_v50, %v14857_v62  ;;  %v13559_v62 = vand.u32 4294901760, %v2104_v36 }
  0xeb   : > { %11431 = vmatpush3.bf16.msra.mxu0 %v14855_v29  ;;  %10374 = vmatprep.mubr.f32.mxu0 %v13314_v15  ;;  %v13537_v48 = vsub.f32 %v8361_v2, %v2125_v27  ;;  %v370_v15 = vld [vmem:[#allocation2 + $0x80] sm:$0xff]  ;;  %v14859_v2 = vand.u32 4294901760, %v13197_v18 }
  0xec   : > { %9613 = vmatmul.mubr.f32.vlgmr.msra.gmra.mrb[0].mxu1 %v13034_v5  ;;  %11433 = vmatprep.subr.bf16.mxu0 %v14856_v59  ;;  %v13541_v5 = vpack.c.bf16 %v2125_v27, %v2122_v61  ;;  %v14860_v61 = vand.u32 4294901760, %v13199_v4  ;;  %v2107_v54 = vsel %vm332_vm0, %v370_v15, 0  ;;  %v2267_v15 = vand.u32 4294901760, %v2266_v56 }
  0xed   : > { %10995 = vmatpush3.bf16.msra.mxu1 %v13492_v31  ;;  %9615 = vmatprep.mubr.f32.mxu1 %v14768_v34  ;;  %v14858_v34 = vand.u32 4294901760, %v13499_v45  ;;  %v14865_v4 = vand.u32 4294901760, %v13246_v43  ;;  %v13594_v3 = vsub.f32 %v2104_v36, %v13559_v62  ;;  %v14870_v36 = vand.u32 4294901760, %v13285_v63 }
  0xee   : > { %10997 = vmatprep.subr.bf16.mxu1 %v13522_v53  ;;  %10375 = vmatmul.mubr.f32.gmra.mrb[4].mxu0 %v13342_v58  ;;  %v11440_v27 = vpack.c.bf16 %v14860_v61, %v14859_v2  ;;  %v13574_v61 = vsub.f32 %v8362_v17, %v2128_v55  ;;  %v14866_v17 = vand.u32 4294901760, %v13535_v37  ;;  %v14868_v55 = vand.u32 4294901760, %v13537_v48 }
  0xef   : > { %v2273_v1 = vsub.f32 %v13499_v45, %v14858_v34  ;;  %11435 = vmatpush3.bf16.msra.mxu0 %v14856_v59  ;;  %10377 = vmatprep.mubr.f32.mxu0 %v13352_v14  ;;  %v14861_v34 = vand.u32 4294901760, %v13516_v57  ;;  %v14862_v14 = vand.u32 4294901760, %v13518_v46 }
  0xf0   : > { %9616 = vmatmul.mubr.f32.gmra.mrb[2].mxu1 %v14769_v20  ;;  %11437 = vmatprep.subr.bf16.mxu0 %v13283_v8 }
  0xf1   : > { %10999 = vmatpush3.bf16.msra.mxu1 %v13522_v53  ;;  %9618 = vmatprep.mubr.f32.mxu1 %v14770_v7  ;;  %v2280_v20 = vsub.f32 %v13516_v57, %v14861_v34  ;;  %v2287_v58 = vsub.f32 %v13518_v46, %v14862_v14  ;;  %v2274_v2 = vand.u32 4294901760, %v2273_v1  ;;  %v14863_v34 = vand.u32 4294901760, %v13230_v38 }
  0xf2   : > { %11001 = vmatprep.subr.bf16.mxu1 %v13541_v5  ;;  %10378 = vmatmul.mubr.f32.gmra.mrb[6].mxu0 %v13374_v10  ;;  %v14864_v14 = vand.u32 4294901760, %v13241_v13  ;;  %v13586_v10 = vand.u32 4294901760, %v2107_v54  ;;  %v2294_v38 = vsub.f32 %v13535_v37, %v14866_v17  ;;  %v14867_v13 = vand.u32 4294901760, %v13258_v12  ;;  %v14873_v17 = vld [vmem:[#allocation22_spill] sm:$0xff] }
  0xf3   : > { %11439 = vmatpush3.bf16.msra.mxu0 %v13283_v8  ;;  %10396 = vmatprep.mubr.f32.mxu0 %v14863_v34  ;;  %v2281_v56 = vand.u32 4294901760, %v2280_v20  ;;  %v2288_v51 = vand.u32 4294901760, %v2287_v58  ;;  %v11008_v43 = vpack.c.bf16 %v2274_v2, %v2267_v15  ;;  %v2301_v1 = vsub.f32 %v13537_v48, %v14868_v55  ;;  %v14872_v2 = vld [vmem:[#allocation47_spill] sm:$0xff] }
  0xf4   : > { %9619 = vmatmul.mubr.f32.gmra.mrb[4].mxu1 %v14851_v6  ;;  %11441 = vmatprep.subr.bf16.mxu0 %v11440_v27  ;;  %v11444_v18 = vpack.c.bf16 %v14865_v4, %v14864_v14  ;;  %v14638_v20 = vand.u32 4294901760, %v13574_v61  ;;  %v14635_v58 = vand.u32 4294901760, %v13576_v49  ;;  %v14869_v4 = vld [vmem:[#allocation40_spill] sm:$0xff]  ;;  %v14871_v12 = vand.u32 4294901760, %v13287_v11 }
  0xf5   : > { %11003 = vmatpush3.bf16.msra.mxu1 %v13541_v5  ;;  %9621 = vmatprep.mubr.f32.mxu1 %v14853_v28  ;;  %v13611_v15 = vsub.f32 %v2107_v54, %v13586_v10  ;;  %v2295_v14 = vand.u32 4294901760, %v2294_v38  ;;  %v2302_v55 = vand.u32 4294901760, %v2301_v1  ;;  %v14874_v54 = vld [vmem:[#allocation78_spill] sm:$0xff]  ;;  %v14876_v38 = vand.u32 4294901760, %v13324_v35 }
  0xf6   : > { %11005 = vmatprep.subr.bf16.mxu1 %v13553_v24  ;;  %10397 = vmatmul.mubr.f32.vlgmr.msra.gmra.mrb[0].mxu0 %v14867_v13  ;;  %v11448_v34 = vpack.c.bf16 %v14871_v12, %v14870_v36  ;;  %v11012_v13 = vpack.c.bf16 %v2288_v51, %v2281_v56  ;;  %v2308_v63 = vsub.f32 %v13574_v61, %v14638_v20  ;;  %v14875_v36 = vld [vmem:[#allocation58_spill] sm:$0xff]  ;;  %v14877_v12 = vand.u32 4294901760, %v13327_v60 }
  0xf7   : > { %11443 = vmatpush3.bf16.msra.mxu0 %v11440_v27  ;;  %10399 = vmatprep.mubr.f32.mxu0 %v14869_v4  ;;  %v14637_v27 = vand.u32 4294901760, %v13594_v3  ;;  %v2315_v11 = vsub.f32 %v13576_v49, %v14635_v58  ;;  %v14636_v51 = vand.u32 4294901760, %v13611_v15  ;;  %v14878_v1 = vld [vmem:[#allocation62_spill] sm:$0xff] }
  0xf8   : > { %9622 = vmatmul.mubr.f32.gmra.mrb[6].mxu1 %v14854_v19  ;;  %11445 = vmatprep.subr.bf16.mxu0 %v11444_v18  ;;  %v11452_v56 = vpack.c.bf16 %v14877_v12, %v14876_v38  ;;  %v14879_v35 = vld [vmem:[#allocation66_spill] sm:$0xff] }
  0xf9   : > { %11007 = vmatpush3.bf16.msra.mxu1 %v13553_v24  ;;  %9640 = vmatprep.mubr.f32.mxu1 %v14872_v2  ;;  %v2245_v2 = vsub.f32 %v13594_v3, %v14637_v27  ;;  %v2316_v58 = vand.u32 4294901760, %v2315_v11  ;;  %v2255_v60 = vsub.f32 %v13611_v15, %v14636_v51  ;;  %v5576_v51 = vld [vmem:[#allocation2 + $0x62] sm:$0xff] }
  0xfa   : > { %11009 = vmatprep.subr.bf16.mxu1 %v11008_v43  ;;  %10400 = vmatmul.mubr.f32.gmra.mrb[2].mxu0 %v14873_v17 }
  0xfb   : > { %11447 = vmatpush3.bf16.msra.mxu0 %v11444_v18  ;;  %10402 = vmatprep.mubr.f32.mxu0 %v14874_v54  ;;  %v11016_v18 = vpack.c.bf16 %v2302_v55, %v2295_v14  ;;  %v2246_v38 = vand.u32 4294901760, %v2245_v2  ;;  %v2256_v55 = vand.u32 4294901760, %v2255_v60 }
  0xfc   : > { %9641 = vmatmul.mubr.f32.vlgmr.msra.gmra.mrb[0].mxu1 %v14875_v36  ;;  %11449 = vmatprep.subr.bf16.mxu0 %v11448_v34  ;;  %v2309_v36 = vand.u32 4294901760, %v2308_v63  ;;  %v8397_v63 = vld [vmem:[%s14451_s2 + $0x148] sm:$0xff] }
  0xfd   : > { %11011 = vmatpush3.bf16.msra.mxu1 %v11008_v43  ;;  %9643 = vmatprep.mubr.f32.mxu1 %v14878_v1  ;;  %v14880_v43 = vld [vmem:[#allocation68_spill] sm:$0xff]  ;;  %v6478_v12 = vand.u32 4294901760, %v8397_v63 }
  0xfe   : > { %11013 = vmatprep.subr.bf16.mxu1 %v11012_v13  ;;  %10403 = vmatmul.mubr.f32.gmra.mrb[4].mxu0 %v13371_v52  ;;  %v11020_v14 = vpack.c.bf16 %v2316_v58, %v2309_v36  ;;  %v8396_v58 = vld [vmem:[%s14451_s2 + $0x140] sm:$0xff]  ;;  %v8399_v1 = vld [vmem:[%s14451_s2 + $0x158] sm:$0xff] }
  0xff   : > { %11451 = vmatpush3.bf16.msra.mxu0 %v11448_v34  ;;  %10405 = vmatprep.mubr.f32.mxu0 %v13382_v9  ;;  %v14881_v34 = vld [vmem:[#allocation69_spill] sm:$0xff]  ;;  %v6475_v11 = vand.u32 4294901760, %v8396_v58  ;;  %v6484_v60 = vand.u32 4294901760, %v8399_v1 }
 0x100   : > { %9644 = vmatmul.mubr.f32.gmra.mrb[2].mxu1 %v14879_v35  ;;  %11453 = vmatprep.subr.bf16.mxu0 %v11452_v56  ;;  %v14884_v9 = vld [vmem:[#allocation33_spill] sm:$0xff] }
 0x101   : > { %11015 = vmatpush3.bf16.msra.mxu1 %v11012_v13  ;;  %9646 = vmatprep.mubr.f32.mxu1 %v14880_v43  ;;  %v11024_v13 = vpack.c.bf16 %v13499_v45, %v13497_v50  ;;  %v13675_v2 = vsub.f32 %v8396_v58, %v6475_v11  ;;  %v13683_v36 = vpack.c.bf16 %v6478_v12, %v6475_v11  ;;  %v14882_v43 = vld [vmem:[#allocation57_spill] sm:$0xff]  ;;  %v8403_v58 = vld [vmem:[%s14451_s2 + $0x178] sm:$0xff]  ;;  %v14883_v11 = vld [vmem:[#allocation63_spill] sm:$0xff] }
 0x102   : > { %11017 = vmatprep.subr.bf16.mxu1 %v11016_v18  ;;  %10406 = vmatmul.mubr.f32.gmra.mrb[6].mxu0 %v13403_v25  ;;  %v5577_v25 = vld [vmem:[#allocation2 + $0x6a] sm:$0xff] }
 0x103   : > { %11455 = vmatpush3.bf16.msra.mxu0 %v11452_v56  ;;  %10424 = vmatprep.mubr.f32.mxu0 %v13195_v0  ;;  %v8398_v56 = vld [vmem:[%s14451_s2 + $0x150] sm:$0xff] }
 0x104   : > { %9647 = vmatmul.mubr.f32.gmra.mrb[4].mxu1 %v14881_v34  ;;  %11457 = vmatprep.subr.bf16.mxu0 %v14852_v41  ;;  %v6481_v35 = vand.u32 4294901760, %v8398_v56  ;;  %v14639_v34 = vand.u32 4294901760, %v13675_v2 }
 0x105   : > { %11019 = vmatpush3.bf16.msra.mxu1 %v11016_v18  ;;  %9649 = vmatprep.mubr.f32.mxu1 %v2246_v38  ;;  %v13677_v18 = vsub.f32 %v8397_v63, %v6478_v12  ;;  %v8400_v38 = vld [vmem:[%s14451_s2 + $0x160] sm:$0xff] }
 0x106   : > { %11021 = vmatprep.subr.bf16.mxu1 %v11020_v14  ;;  %10425 = vmatmul.mubr.f32.vlgmr.msra.gmra.mrb[0].mxu0 %v13232_v39  ;;  %v13705_v63 = vsub.f32 %v8398_v56, %v6481_v35  ;;  %v13711_v12 = vpack.c.bf16 %v6484_v60, %v6481_v35  ;;  %v6496_v56 = vand.u32 4294901760, %v8403_v58 }
 0x107   : > { %11459 = vmatpush3.bf16.msra.mxu0 %v14852_v41  ;;  %10427 = vmatprep.mubr.f32.mxu0 %v13239_v23  ;;  %v11028_v41 = vpack.c.bf16 %v13518_v46, %v13516_v57 }
 0x108   : > { %9650 = vmatmul.mubr.f32.gmra.mrb[6].mxu1 %v2256_v55  ;;  %11461 = vmatprep.subr.bf16.mxu0 %v14855_v29  ;;  %v14640_v55 = vand.u32 4294901760, %v13677_v18  ;;  %v13756_v17 = vsub.f32 %v8403_v58, %v6496_v56 }
 0x109   : > { %11023 = vmatpush3.bf16.msra.mxu1 %v11020_v14  ;;  %9668 = vmatprep.mubr.f32.mxu1 %v14770_v7  ;;  %v11036_v14 = vpack.c.bf16 %v13576_v49, %v13574_v61 }
 0x10a   : > { %11025 = vmatprep.subr.bf16.mxu1 %v11024_v13  ;;  %10428 = vmatmul.mubr.f32.gmra.mrb[2].mxu0 %v13270_v42  ;;  %v6638_v35 = vsub.f32 %v13677_v18, %v14640_v55  ;;  %v6469_v55 = vsel %vm332_vm0, %v5576_v51, 0 }
 0x10b   : > { %11463 = vmatpush3.bf16.msra.mxu0 %v14855_v29  ;;  %10430 = vmatprep.mubr.f32.mxu0 %v13278_v40  ;;  %v11032_v29 = vpack.c.bf16 %v13537_v48, %v13535_v37 }
 0x10c   : > { %9669 = vmatmul.mubr.f32.vlgmr.msra.gmra.mrb[0].mxu1 %v14851_v6  ;;  %11465 = vmatprep.subr.bf16.mxu0 %v14856_v59  ;;  %v6639_v52 = vand.u32 4294901760, %v6638_v35 }
 0x10d   : > { %11027 = vmatpush3.bf16.msra.mxu1 %v11024_v13  ;;  %9671 = vmatprep.mubr.f32.mxu1 %v14853_v28  ;;  %v8402_v13 = vld [vmem:[%s14451_s2 + $0x170] sm:$0xff] }
 0x10e   : > { %11029 = vmatprep.subr.bf16.mxu1 %v11028_v41  ;;  %10431 = vmatmul.mubr.f32.gmra.mrb[4].mxu0 %v13306_v47  ;;  %v6493_v27 = vand.u32 4294901760, %v8402_v13 }
 0x10f   : > { %11467 = vmatpush3.bf16.msra.mxu0 %v14856_v59  ;;  %10433 = vmatprep.mubr.f32.mxu0 %v13316_v30  ;;  %v8401_v59 = vld [vmem:[%s14451_s2 + $0x168] sm:$0xff] }
 0x110   : > { %9672 = vmatmul.mubr.f32.gmra.mrb[2].mxu1 %v14854_v19  ;;  %11469 = vmatprep.subr.bf16.mxu0 %v13283_v8  ;;  %v13754_v54 = vsub.f32 %v8402_v13, %v6493_v27 }
 0x111   : > { %11031 = vmatpush3.bf16.msra.mxu1 %v11028_v41  ;;  %9674 = vmatprep.mubr.f32.mxu1 %v14882_v43  ;;  %v13707_v41 = vsub.f32 %v8399_v1, %v6484_v60  ;;  %v6631_v1 = vsub.f32 %v13675_v2, %v14639_v34  ;;  %v13737_v60 = vpack.c.bf16 %v6496_v56, %v6493_v27 }
 0x112   : > { %11033 = vmatprep.subr.bf16.mxu1 %v11032_v29  ;;  %10434 = vmatmul.mubr.f32.gmra.mrb[6].mxu0 %v13344_v16 }
 0x113   : > { %11471 = vmatpush3.bf16.msra.mxu0 %v13283_v8  ;;  %10452 = vmatprep.mubr.f32.mxu0 %v13195_v0  ;;  %v6487_v8 = vand.u32 4294901760, %v8400_v38  ;;  %v6490_v0 = vand.u32 4294901760, %v8401_v59 }
 0x114   : > { %9675 = vmatmul.mubr.f32.gmra.mrb[4].mxu1 %v14883_v11  ;;  %11473 = vmatprep.subr.bf16.mxu0 %v13683_v36 }
 0x115   : > { %11035 = vmatpush3.bf16.msra.mxu1 %v11032_v29  ;;  %9677 = vmatprep.mubr.f32.mxu1 %v13559_v62  ;;  %v13729_v20 = vsub.f32 %v8400_v38, %v6487_v8  ;;  %v13731_v34 = vsub.f32 %v8401_v59, %v6490_v0  ;;  %v6632_v29 = vand.u32 4294901760, %v6631_v1  ;;  %v14885_v38 = vand.u32 4294901760, %v13705_v63 }
 0x116   : > { %11037 = vmatprep.subr.bf16.mxu1 %v11036_v14  ;;  %10453 = vmatmul.mubr.f32.vlgmr.msra.gmra.mrb[0].mxu0 %v13232_v39  ;;  %v13727_v39 = vpack.c.bf16 %v6490_v0, %v6487_v8  ;;  %v14886_v59 = vand.u32 4294901760, %v13707_v41  ;;  %v6472_v8 = vsel %vm332_vm0, %v5577_v25, 0  ;;  %v14887_v0 = vld [vmem:[#allocation43_spill] sm:$0xff] }
 0x117   : > { %11475 = vmatpush3.bf16.msra.mxu0 %v13683_v36  ;;  %10455 = vmatprep.mubr.f32.mxu0 %v13239_v23  ;;  %v6645_v51 = vsub.f32 %v13705_v63, %v14885_v38  ;;  %v14648_v1 = vand.u32 4294901760, %v13729_v20  ;;  %v14647_v35 = vand.u32 4294901760, %v13731_v34  ;;  %v14888_v38 = vld [vmem:[#allocation49_spill] sm:$0xff]  ;;  %v13762_v25 = vand.u32 4294901760, %v6472_v8 }
 0x118   : > { %9678 = vmatmul.mubr.f32.gmra.mrb[6].mxu1 %v13586_v10  ;;  %11477 = vmatprep.subr.bf16.mxu0 %v13711_v12 }
 0x119   : > { %11039 = vmatpush3.bf16.msra.mxu1 %v11036_v14  ;;  %9696 = vmatprep.mubr.f32.mxu1 %v14884_v9  ;;  %v6652_v9 = vsub.f32 %v13707_v41, %v14886_v59  ;;  %v13747_v14 = vand.u32 4294901760, %v6469_v55  ;;  %v11488_v59 = vpack.c.bf16 %v6639_v52, %v6632_v29  ;;  %v6659_v58 = vsub.f32 %v13729_v20, %v14648_v1  ;;  %v14892_v29 = vld [vmem:[#allocation81_spill] sm:$0xff] }
 0x11a   : > { %11041 = vmatprep.subr.bf16.mxu1 %v13492_v31  ;;  %10456 = vmatmul.mubr.f32.gmra.mrb[2].mxu0 %v13270_v42  ;;  %v6666_v56 = vsub.f32 %v13731_v34, %v14647_v35  ;;  %v14894_v35 = vld [vmem:[#allocation65_spill] sm:$0xff] }
 0x11b   : > { %11479 = vmatpush3.bf16.msra.mxu0 %v13711_v12  ;;  %10458 = vmatprep.mubr.f32.mxu0 %v13278_v40  ;;  %v6653_v27 = vand.u32 4294901760, %v6652_v9  ;;  %v13767_v13 = vsub.f32 %v6469_v55, %v13747_v14  ;;  %v14890_v55 = vld [vmem:[#allocation61_spill] sm:$0xff]  ;;  %v6660_v1 = vand.u32 4294901760, %v6659_v58 }
 0x11c   : > { %9697 = vmatmul.mubr.f32.vlgmr.msra.gmra.mrb[0].mxu1 %v14887_v0  ;;  %11481 = vmatprep.subr.bf16.mxu0 %v13727_v39  ;;  %v6646_v0 = vand.u32 4294901760, %v6645_v51 }
 0x11d   : > { %11043 = vmatpush3.bf16.msra.mxu1 %v13492_v31  ;;  %9699 = vmatprep.mubr.f32.mxu1 %v14888_v38  ;;  %14889 = vst [vmem:[#allocation29_spill] sm:$0xff] %v13767_v13  ;;  %v14649_v38 = vand.u32 4294901760, %v13754_v54  ;;  %v13789_v9 = vand.u32 4294901760, %v13767_v13 }
 0x11e   : > { %11045 = vmatprep.subr.bf16.mxu1 %v13522_v53  ;;  %10459 = vmatmul.mubr.f32.gmra.mrb[4].mxu0 %v13306_v47  ;;  %v11492_v51 = vpack.c.bf16 %v6653_v27, %v6646_v0  ;;  %v14897_v0 = vand.u32 4294901760, %v13499_v45  ;;  %v14900_v45 = vand.u32 4294901760, %v13518_v46  ;;  %v14904_v46 = vand.u32 4294901760, %v13535_v37 }
 0x11f   : > { %11483 = vmatpush3.bf16.msra.mxu0 %v13727_v39  ;;  %10461 = vmatprep.mubr.f32.mxu0 %v13316_v30  ;;  %14893 = vst [vmem:[#allocation37_spill] sm:$0xff] %v13789_v9  ;;  %v6673_v52 = vsub.f32 %v13754_v54, %v14649_v38  ;;  %v14909_v37 = vand.u32 4294901760, %v13576_v49  ;;  %v14912_v49 = vand.u32 4294901760, %v13611_v15 }
 0x120   : > { %9700 = vmatmul.mubr.f32.gmra.mrb[2].mxu1 %v14835_v26  ;;  %11485 = vmatprep.subr.bf16.mxu0 %v13737_v60  ;;  %v13784_v26 = vsub.f32 %v6472_v8, %v13762_v25  ;;  %v14895_v8 = vand.u32 4294901760, %v13756_v17 }
 0x121   : > { %11047 = vmatpush3.bf16.msra.mxu1 %v13522_v53  ;;  %9702 = vmatprep.mubr.f32.mxu1 %v14890_v55  ;;  %v6667_v55 = vand.u32 4294901760, %v6666_v56  ;;  %v6610_v56 = vsub.f32 %v13767_v13, %v13789_v9 }
 0x122   : > { %11049 = vmatprep.subr.bf16.mxu1 %v13541_v5  ;;  %10462 = vmatmul.mubr.f32.gmra.mrb[6].mxu0 %v13344_v16  ;;  %14891 = vst [vmem:[#allocation35_spill] sm:$0xff] %v13784_v26  ;;  %v6680_v4 = vsub.f32 %v13756_v17, %v14895_v8  ;;  %v13807_v58 = vand.u32 4294901760, %v13784_v26  ;;  %v6674_v8 = vand.u32 4294901760, %v6673_v52  ;;  %v14902_v52 = vld [vmem:[#allocation53_spill] sm:$0xff] }
 0x123   : > { %11487 = vmatpush3.bf16.msra.mxu0 %v13737_v60  ;;  %10480 = vmatprep.mubr.f32.mxu0 %v14892_v29  ;;  %v11496_v29 = vpack.c.bf16 %v6667_v55, %v6660_v1  ;;  %v13823_v1 = vand.u32 4294901760, %v6610_v56  ;;  %v14905_v55 = vand.u32 4294901760, %v13537_v48  ;;  %v14906_v56 = vld [vmem:[#allocation60_spill] sm:$0xff]  ;;  %v14908_v48 = vand.u32 4294901760, %v13574_v61 }
 0x124   : > { %9703 = vmatmul.mubr.f32.gmra.mrb[4].mxu1 %v14894_v35  ;;  %11489 = vmatprep.subr.bf16.mxu0 %v11488_v59  ;;  %v14896_v35 = vand.u32 4294901760, %v13497_v50  ;;  %14898 = vst [vmem:[#allocation39_spill] sm:$0xff] %v13807_v58  ;;  %v14899_v50 = vand.u32 4294901760, %v13516_v57  ;;  %v14903_v57 = vld [vmem:[#allocation56_spill] sm:$0xff]  ;;  %v11512_v61 = vpack.c.bf16 %v13731_v34, %v13729_v20 }
 0x125   : > { %11051 = vmatpush3.bf16.msra.mxu1 %v13541_v5  ;;  %9705 = vmatprep.mubr.f32.mxu1 %v13594_v3 }
 0x126   : > { %11053 = vmatprep.subr.bf16.mxu1 %v13553_v24  ;;  %10481 = vmatmul.mubr.f32.vlgmr.msra.gmra.mrb[0].mxu0 %v13398_v32  ;;  %v11056_v27 = vpack.c.bf16 %v14897_v0, %v14896_v35  ;;  %v6681_v32 = vand.u32 4294901760, %v6680_v4  ;;  %v6620_v35 = vsub.f32 %v13784_v26, %v13807_v58  ;;  %v14901_v4 = vld [vmem:[#allocation48_spill] sm:$0xff]  ;;  %v11064_v0 = vpack.c.bf16 %v14905_v55, %v14904_v46  ;;  %v14913_v46 = vld [vmem:[#allocation26_spill] sm:$0xff]  ;;  %v8366_v55 = vld [vmem:[%s14451_s2 + $0x50] sm:$0xff] }
 0x127   : > { %11491 = vmatpush3.bf16.msra.mxu0 %v11488_v59  ;;  %10483 = vmatprep.mubr.f32.mxu0 %v13406_v44  ;;  %v11060_v59 = vpack.c.bf16 %v14900_v45, %v14899_v50  ;;  %v11508_v50 = vpack.c.bf16 %v13707_v41, %v13705_v63  ;;  %v14911_v45 = vand.u32 4294901760, %v13594_v3  ;;  %v11516_v3 = vpack.c.bf16 %v13756_v17, %v13754_v54 }
 0x128   : > { %9706 = vmatmul.mubr.f32.gmra.mrb[6].mxu1 %v13611_v15  ;;  %11493 = vmatprep.subr.bf16.mxu0 %v11492_v51  ;;  %v2955_v15 = vld [vmem:[#allocation2 + $0x1] sm:$0xff] }
 0x129   : > { %11055 = vmatpush3.bf16.msra.mxu1 %v13553_v24  ;;  %9724 = vmatprep.mubr.f32.mxu1 %v14845_v21  ;;  %v11500_v21 = vpack.c.bf16 %v6681_v32, %v6674_v8  ;;  %v14907_v8 = vld [vmem:[#allocation64_spill] sm:$0xff]  ;;  %v11068_v32 = vpack.c.bf16 %v14909_v37, %v14908_v48  ;;  %v14914_v48 = vld [vmem:[#allocation45_spill] sm:$0xff] }
 0x12a   : > { %11057 = vmatprep.subr.bf16.mxu1 %v11056_v27  ;;  %10484 = vmatmul.mubr.f32.gmra.mrb[2].mxu0 %v13419_v22 }
 0x12b   : > { %11495 = vmatpush3.bf16.msra.mxu0 %v11492_v51  ;;  %10486 = vmatprep.mubr.f32.mxu0 %v13424_v33  ;;  %v13832_v51 = vand.u32 4294901760, %v6620_v35  ;;  %v8365_v35 = vld [vmem:[%s14451_s2 + $0x48] sm:$0xff] }
 0x12c   : > { %9725 = vmatmul.mubr.f32.vlgmr.msra.gmra.mrb[0].mxu1 %v14901_v4  ;;  %11497 = vmatprep.subr.bf16.mxu0 %v11496_v29 }
 0x12d   : > { %11059 = vmatpush3.bf16.msra.mxu1 %v11056_v27  ;;  %9727 = vmatprep.mubr.f32.mxu1 %v14902_v52  ;;  %v11504_v27 = vpack.c.bf16 %v13677_v18, %v13675_v2  ;;  %v2956_v52 = vld [vmem:[#allocation2 + $0x9] sm:$0xff] }
 0x12e   : > { %11061 = vmatprep.subr.bf16.mxu1 %v11060_v59  ;;  %10487 = vmatmul.mubr.f32.gmra.mrb[4].mxu0 %v14903_v57 }
 0x12f   : > { %11499 = vmatpush3.bf16.msra.mxu0 %v11496_v29  ;;  %10489 = vmatprep.mubr.f32.mxu0 %v13823_v1  ;;  %v14910_v29 = vld [vmem:[#allocation67_spill] sm:$0xff] }
 0x130   : > { %9728 = vmatmul.mubr.f32.gmra.mrb[2].mxu1 %v14906_v56  ;;  %11501 = vmatprep.subr.bf16.mxu0 %v11500_v21 }
 0x131   : > { %11063 = vmatpush3.bf16.msra.mxu1 %v11060_v59  ;;  %9730 = vmatprep.mubr.f32.mxu1 %v14907_v8  ;;  %v8364_v59 = vld [vmem:[%s14451_s2 + $0x40] sm:$0xff]  ;;  %v2980_v8 = vsel %vm332_vm0, %v2956_v52, 0 }
 0x132   : > { %11065 = vmatprep.subr.bf16.mxu1 %v11064_v0  ;;  %10490 = vmatmul.mubr.f32.gmra.mrb[6].mxu0 %v13832_v51  ;;  %v3001_v4 = vand.u32 4294901760, %v8364_v59 }
 0x133   : > { %11503 = vmatpush3.bf16.msra.mxu0 %v11500_v21  ;;  %10508 = vmatprep.mubr.f32.mxu0 %v13239_v23  ;;  %v3004_v21 = vand.u32 4294901760, %v8365_v35 }
 0x134   : > { %9731 = vmatmul.mubr.f32.gmra.mrb[4].mxu1 %v14910_v29  ;;  %11505 = vmatprep.subr.bf16.mxu0 %v11504_v27  ;;  %v13893_v56 = vsub.f32 %v8364_v59, %v3001_v4 }
 0x135   : > { %11067 = vmatpush3.bf16.msra.mxu1 %v11064_v0  ;;  %9733 = vmatprep.mubr.f32.mxu1 %v14911_v45  ;;  %v13900_v37 = vpack.c.bf16 %v3004_v21, %v3001_v4  ;;  %v8369_v45 = vld [vmem:[%s14451_s2 + $0x68] sm:$0xff] }
 0x136   : > { %11069 = vmatprep.subr.bf16.mxu1 %v11068_v32  ;;  %10509 = vmatmul.mubr.f32.vlgmr.msra.gmra.mrb[0].mxu0 %v13270_v42  ;;  %v14651_v59 = vand.u32 4294901760, %v13893_v56  ;;  %v3016_v52 = vand.u32 4294901760, %v8369_v45 }
 0x137   : > { %11507 = vmatpush3.bf16.msra.mxu0 %v11504_v27  ;;  %10511 = vmatprep.mubr.f32.mxu0 %v13278_v40  ;;  %v13895_v27 = vsub.f32 %v8365_v35, %v3004_v21 }
 0x138   : > { %9734 = vmatmul.mubr.f32.gmra.mrb[6].mxu1 %v14912_v49  ;;  %11509 = vmatprep.subr.bf16.mxu0 %v11508_v50 }
 0x139   : > { %11071 = vmatpush3.bf16.msra.mxu1 %v11068_v32  ;;  %9752 = vmatprep.mubr.f32.mxu1 %v14770_v7  ;;  %v3007_v32 = vand.u32 4294901760, %v8366_v55  ;;  %v14650_v35 = vand.u32 4294901760, %v13895_v27 }
 0x13a   : > { %11073 = vmatprep.subr.bf16.mxu1 %v13492_v31  ;;  %10512 = vmatmul.mubr.f32.gmra.mrb[2].mxu0 %v13306_v47 }
 0x13b   : > { %11511 = vmatpush3.bf16.msra.mxu0 %v11508_v50  ;;  %10514 = vmatprep.mubr.f32.mxu0 %v13316_v30  ;;  %v14915_v50 = vld [vmem:[#allocation76_spill] sm:$0xff] }
 0x13c   : > { %9753 = vmatmul.mubr.f32.vlgmr.msra.gmra.mrb[0].mxu1 %v14851_v6  ;;  %11513 = vmatprep.subr.bf16.mxu0 %v11512_v61 }
 0x13d   : > { %11075 = vmatpush3.bf16.msra.mxu1 %v13492_v31  ;;  %9755 = vmatprep.mubr.f32.mxu1 %v14853_v28  ;;  %v2977_v31 = vsel %vm332_vm0, %v2955_v15, 0  ;;  %v8371_v15 = vld [vmem:[%s14451_s2 + $0x78] sm:$0xff] }
 0x13e   : > { %11077 = vmatprep.subr.bf16.mxu1 %v13522_v53  ;;  %10515 = vmatmul.mubr.f32.gmra.mrb[4].mxu0 %v13344_v16  ;;  %v13889_v0 = vand.u32 4294901760, %v2977_v31 }
 0x13f   : > { %11515 = vmatpush3.bf16.msra.mxu0 %v11512_v61  ;;  %10517 = vmatprep.mubr.f32.mxu0 %v13747_v14  ;;  %v13915_v61 = vand.u32 4294901760, %v2980_v8 }
 0x140   : > { %9756 = vmatmul.mubr.f32.gmra.mrb[2].mxu1 %v14854_v19  ;;  %11517 = vmatprep.subr.bf16.mxu0 %v11516_v3  ;;  %v13913_v49 = vsub.f32 %v2977_v31, %v13889_v0  ;;  %v13927_v31 = vsub.f32 %v8366_v55, %v3007_v32 }
 0x141   : > { %11079 = vmatpush3.bf16.msra.mxu1 %v13522_v53  ;;  %9758 = vmatprep.mubr.f32.mxu1 %v14882_v43  ;;  %v8367_v53 = vld [vmem:[%s14451_s2 + $0x58] sm:$0xff]  ;;  %v13941_v38 = vsub.f32 %v2980_v8, %v13915_v61 }
 0x142   : > { %11081 = vmatprep.subr.bf16.mxu1 %v13541_v5  ;;  %10518 = vmatmul.mubr.f32.gmra.mrb[6].mxu0 %v13762_v25  ;;  %v3010_v29 = vand.u32 4294901760, %v8367_v53  ;;  %v14918_v8 = vld [vmem:[#allocation80_spill] sm:$0xff] }
 0x143   : > { %11519 = vmatpush3.bf16.msra.mxu0 %v11516_v3  ;;  %10536 = vmatprep.mubr.f32.mxu0 %v14913_v46  ;;  %v8370_v3 = vld [vmem:[%s14451_s2 + $0x70] sm:$0xff] }
 0x144   : > { %9759 = vmatmul.mubr.f32.gmra.mrb[4].mxu1 %v14883_v11  ;;  %11521 = vmatprep.subr.bf16.mxu0 %v13683_v36  ;;  %v13929_v4 = vsub.f32 %v8367_v53, %v3010_v29  ;;  %v14917_v46 = vld [vmem:[#allocation79_spill] sm:$0xff]  ;;  %v3019_v55 = vand.u32 4294901760, %v8370_v3 }
 0x145   : > { %11083 = vmatpush3.bf16.msra.mxu1 %v13541_v5  ;;  %9761 = vmatprep.mubr.f32.mxu1 %v13559_v62  ;;  %v8368_v5 = vld [vmem:[%s14451_s2 + $0x60] sm:$0xff] }
 0x146   : > { %11085 = vmatprep.subr.bf16.mxu1 %v13553_v24  ;;  %10537 = vmatmul.mubr.f32.vlgmr.msra.gmra.mrb[0].mxu0 %v14914_v48  ;;  %v3013_v21 = vand.u32 4294901760, %v8368_v5  ;;  %v3022_v48 = vand.u32 4294901760, %v8371_v15 }
 0x147   : > { %11523 = vmatpush3.bf16.msra.mxu0 %v13683_v36  ;;  %10539 = vmatprep.mubr.f32.mxu0 %v14915_v50 }
 0x148   : > { %9762 = vmatmul.mubr.f32.gmra.mrb[6].mxu1 %v13586_v10  ;;  %11525 = vmatprep.subr.bf16.mxu0 %v13711_v12  ;;  %v13955_v53 = vpack.c.bf16 %v3016_v52, %v3013_v21 }
 0x149   : > { %11087 = vmatpush3.bf16.msra.mxu1 %v13553_v24  ;;  %9780 = vmatprep.mubr.f32.mxu1 %v14770_v7  ;;  %v14916_v24 = vld [vmem:[#allocation77_spill] sm:$0xff]  ;;  %v13933_v7 = vpack.c.bf16 %v3010_v29, %v3007_v32  ;;  %v3157_v32 = vsub.f32 %v13893_v56, %v14651_v59  ;;  %v14919_v59 = vand.u32 4294901760, %v13675_v2  ;;  %v14923_v2 = vand.u32 4294901760, %v13929_v4 }
 0x14a   : > { %11089 = vmatprep.subr.bf16.mxu1 %v13900_v37  ;;  %10540 = vmatmul.mubr.f32.gmra.mrb[2].mxu0 %v14916_v24  ;;  %v13957_v24 = vsub.f32 %v8368_v5, %v3013_v21  ;;  %v14921_v5 = vand.u32 4294901760, %v13913_v49  ;;  %v14653_v21 = vand.u32 4294901760, %v13941_v38 }
 0x14b   : > { %11527 = vmatpush3.bf16.msra.mxu0 %v13711_v12  ;;  %10542 = vmatprep.mubr.f32.mxu0 %v14917_v46  ;;  %v14920_v46 = vand.u32 4294901760, %v13677_v18  ;;  %v3178_v18 = vsub.f32 %v13929_v4, %v14923_v2  ;;  %v14925_v2 = vand.u32 4294901760, %v13705_v63 }
 0x14c   : > { %9781 = vmatmul.mubr.f32.vlgmr.msra.gmra.mrb[0].mxu1 %v14851_v6  ;;  %11529 = vmatprep.subr.bf16.mxu0 %v13727_v39  ;;  %v3164_v6 = vsub.f32 %v13895_v27, %v14650_v35  ;;  %v13965_v35 = vpack.c.bf16 %v3022_v48, %v3019_v55 }
 0x14d   : > { %11091 = vmatpush3.bf16.msra.mxu1 %v13900_v37  ;;  %9783 = vmatprep.mubr.f32.mxu1 %v14853_v28  ;;  %v13959_v28 = vsub.f32 %v8369_v45, %v3016_v52  ;;  %v11536_v29 = vpack.c.bf16 %v14920_v46, %v14919_v59  ;;  %v3076_v45 = vsub.f32 %v13913_v49, %v14921_v5  ;;  %v14926_v46 = vand.u32 4294901760, %v13707_v41 }
 0x14e   : > { %11093 = vmatprep.subr.bf16.mxu1 %v13933_v7  ;;  %10543 = vmatmul.mubr.f32.gmra.mrb[4].mxu0 %v14918_v8  ;;  %v3165_v52 = vand.u32 4294901760, %v3164_v6  ;;  %v13987_v5 = vsub.f32 %v8370_v3, %v3019_v55  ;;  %v3086_v6 = vsub.f32 %v13941_v38, %v14653_v21  ;;  %v14927_v55 = vld [vmem:[#allocation27_spill] sm:$0xff]  ;;  %v3179_v59 = vand.u32 4294901760, %v3178_v18  ;;  %v14933_v18 = vld [vmem:[#allocation28_spill] sm:$0xff] }
 0x14f   : > { %11531 = vmatpush3.bf16.msra.mxu0 %v13727_v39  ;;  %10545 = vmatprep.mubr.f32.mxu0 %v13767_v13  ;;  %v14922_v13 = vand.u32 4294901760, %v13927_v31  ;;  %v11540_v3 = vpack.c.bf16 %v14926_v46, %v14925_v2  ;;  %v14930_v21 = vand.u32 4294901760, %v13957_v24  ;;  %v14931_v41 = vand.u32 4294901760, %v13959_v28  ;;  %v14934_v2 = vld [vmem:[#allocation21_spill] sm:$0xff] }
 0x150   : > { %9784 = vmatmul.mubr.f32.gmra.mrb[2].mxu1 %v14854_v19  ;;  %11533 = vmatprep.subr.bf16.mxu0 %v13737_v60  ;;  %v3158_v19 = vand.u32 4294901760, %v3157_v32  ;;  %v14924_v32 = vld [vmem:[#allocation40_spill] sm:$0xff] }
 0x151   : > { %11095 = vmatpush3.bf16.msra.mxu1 %v13933_v7  ;;  %9786 = vmatprep.mubr.f32.mxu1 %v14882_v43  ;;  %v3171_v8 = vsub.f32 %v13927_v31, %v14922_v13  ;;  %v13989_v43 = vsub.f32 %v8371_v15, %v3022_v48  ;;  %v3077_v13 = vand.u32 4294901760, %v3076_v45  ;;  %v14928_v48 = vld [vmem:[#allocation20_spill] sm:$0xff]  ;;  %v14929_v45 = vld [vmem:[#allocation22_spill] sm:$0xff]  ;;  %v3185_v63 = vsub.f32 %v13957_v24, %v14930_v21 }
 0x152   : > { %11097 = vmatprep.subr.bf16.mxu1 %v13955_v53  ;;  %10546 = vmatmul.mubr.f32.gmra.mrb[6].mxu0 %v13784_v26  ;;  %v11104_v15 = vpack.c.bf16 %v3165_v52, %v3158_v19  ;;  %v3192_v46 = vsub.f32 %v13959_v28, %v14931_v41  ;;  %v14932_v52 = vld [vmem:[#allocation78_spill] sm:$0xff]  ;;  %v14935_v21 = vand.u32 4294901760, %v13729_v20  ;;  %v14936_v26 = vand.u32 4294901760, %v13731_v34 }
 0x153   : > { %11535 = vmatpush3.bf16.msra.mxu0 %v13737_v60  ;;  %10564 = vmatprep.mubr.f32.mxu0 %v14924_v32  ;;  %v3096_v32 = vsub.f32 %v14928_v48, %v14927_v55  ;;  %v14938_v19 = vld [vmem:[#allocation30_spill] sm:$0xff]  ;;  %v14939_v20 = vand.u32 4294901760, %v13989_v43 }
 0x154   : > { %9787 = vmatmul.mubr.f32.gmra.mrb[4].mxu1 %v14883_v11  ;;  %11537 = vmatprep.subr.bf16.mxu0 %v11536_v29  ;;  %v3172_v11 = vand.u32 4294901760, %v3171_v8  ;;  %v3087_v8 = vand.u32 4294901760, %v3086_v6  ;;  %v11544_v50 = vpack.c.bf16 %v14936_v26, %v14935_v21  ;;  %v3193_v6 = vand.u32 4294901760, %v3192_v46  ;;  %v14940_v26 = vld [vmem:[#allocation82_spill] sm:$0xff] }
 0x155   : > { %11099 = vmatpush3.bf16.msra.mxu1 %v13955_v53  ;;  %9789 = vmatprep.mubr.f32.mxu1 %v13559_v62  ;;  %v14655_v62 = vand.u32 4294901760, %v13987_v5  ;;  %v14024_v41 = vand.u32 4294901760, %v3096_v32  ;;  %v3206_v34 = vsub.f32 %v13989_v43, %v14939_v20  ;;  %v14943_v32 = vand.u32 4294901760, %v13756_v17  ;;  %v14949_v20 = vld [vmem:[#allocation16_spill] sm:$0xff] }
 0x156   : > { %11101 = vmatprep.subr.bf16.mxu1 %v13965_v35  ;;  %10565 = vmatmul.mubr.f32.vlgmr.msra.gmra.mrb[0].mxu0 %v14929_v45  ;;  %v3106_v45 = vsub.f32 %v14934_v2, %v14933_v18 }
 0x157   : > { %11539 = vmatpush3.bf16.msra.mxu0 %v11536_v29  ;;  %10567 = vmatprep.mubr.f32.mxu0 %v14932_v52  ;;  %14937 = vst [vmem:[#allocation18_spill] sm:$0xff] %v14024_v41  ;;  %v11108_v29 = vpack.c.bf16 %v3179_v59, %v3172_v11  ;;  %v3199_v52 = vsub.f32 %v13987_v5, %v14655_v62  ;;  %v14942_v59 = vand.u32 4294901760, %v13754_v54  ;;  %v14945_v54 = vld [vmem:[#allocation71_spill] sm:$0xff]  ;;  %v8411_v62 = vld [vmem:[%s14451_s2 + $0x238] sm:$0xff] }
 0x158   : > { %9790 = vmatmul.mubr.f32.gmra.mrb[6].mxu1 %v13586_v10  ;;  %11541 = vmatprep.subr.bf16.mxu0 %v11540_v3  ;;  %v3186_v10 = vand.u32 4294901760, %v3185_v63  ;;  %v14944_v63 = vld [vmem:[#allocation83_spill] sm:$0xff] }
 0x159   : > { %11103 = vmatpush3.bf16.msra.mxu1 %v13965_v35  ;;  %9808 = vmatprep.mubr.f32.mxu1 %v3077_v13  ;;  %v14034_v13 = vand.u32 4294901760, %v3106_v45  ;;  %v11548_v11 = vpack.c.bf16 %v14943_v32, %v14942_v59  ;;  %v3200_v21 = vand.u32 4294901760, %v3199_v52  ;;  %v11120_v52 = vpack.c.bf16 %v13895_v27, %v13893_v56  ;;  %v8404_v45 = vld [vmem:[%s14451_s2 + $0x200] sm:$0xff]  ;;  %v8407_v59 = vld [vmem:[%s14451_s2 + $0x218] sm:$0xff] }
 0x15a   : > { %11105 = vmatprep.subr.bf16.mxu1 %v11104_v15  ;;  %10568 = vmatmul.mubr.f32.gmra.mrb[2].mxu0 %v14938_v19  ;;  %v11112_v46 = vpack.c.bf16 %v3193_v6, %v3186_v10  ;;  %v7336_v10 = vand.u32 4294901760, %v8404_v45 }
 0x15b   : > { %11543 = vmatpush3.bf16.msra.mxu0 %v11540_v3  ;;  %10570 = vmatprep.mubr.f32.mxu0 %v14940_v26  ;;  %14941 = vst [vmem:[#allocation44_spill] sm:$0xff] %v14034_v13  ;;  %v3207_v3 = vand.u32 4294901760, %v3206_v34  ;;  %v8406_v34 = vld [vmem:[%s14451_s2 + $0x210] sm:$0xff]  ;;  %v5579_v26 = vld [vmem:[#allocation2 + $0x82] sm:$0xff] }
 0x15c   : > { %9809 = vmatmul.mubr.f32.vlgmr.msra.gmra.mrb[0].mxu1 %v3087_v8  ;;  %11545 = vmatprep.subr.bf16.mxu0 %v11544_v50  ;;  %v14948_v8 = vld [vmem:[#allocation11_spill] sm:$0xff]  ;;  %v14081_v32 = vsub.f32 %v8404_v45, %v7336_v10  ;;  %v8408_v45 = vld [vmem:[%s14451_s2 + $0x220] sm:$0xff] }
 0x15d   : > { %11107 = vmatpush3.bf16.msra.mxu1 %v11104_v15  ;;  %9811 = vmatprep.mubr.f32.mxu1 %v14024_v41  ;;  %v11116_v17 = vpack.c.bf16 %v3207_v3, %v3200_v21  ;;  %v14946_v15 = vld [vmem:[#allocation72_spill] sm:$0xff]  ;;  %v7342_v3 = vand.u32 4294901760, %v8406_v34 }
 0x15e   : > { %11109 = vmatprep.subr.bf16.mxu1 %v11108_v29  ;;  %10571 = vmatmul.mubr.f32.gmra.mrb[4].mxu0 %v14944_v63  ;;  %v14957_v63 = vld [vmem:[#allocation41_spill] sm:$0xff] }
 0x15f   : > { %11547 = vmatpush3.bf16.msra.mxu0 %v11544_v50  ;;  %10573 = vmatprep.mubr.f32.mxu0 %v13789_v9  ;;  %v14947_v50 = vld [vmem:[#allocation73_spill] sm:$0xff] }
 0x160   : > { %9812 = vmatmul.mubr.f32.gmra.mrb[2].mxu1 %v14034_v13  ;;  %11549 = vmatprep.subr.bf16.mxu0 %v11548_v11 }
 0x161   : > { %11111 = vmatpush3.bf16.msra.mxu1 %v11108_v29  ;;  %9814 = vmatprep.mubr.f32.mxu1 %v14945_v54  ;;  %v8405_v29 = vld [vmem:[%s14451_s2 + $0x208] sm:$0xff] }
 0x162   : > { %11113 = vmatprep.subr.bf16.mxu1 %v11112_v46  ;;  %10574 = vmatmul.mubr.f32.gmra.mrb[6].mxu0 %v13807_v58  ;;  %v7339_v6 = vand.u32 4294901760, %v8405_v29  ;;  %v5578_v58 = vld [vmem:[#allocation2 + $0x7a] sm:$0xff] }
 0x163   : > { %11551 = vmatpush3.bf16.msra.mxu0 %v11548_v11  ;;  %10592 = vmatprep.mubr.f32.mxu0 %v13239_v23 }
 0x164   : > { %9815 = vmatmul.mubr.f32.gmra.mrb[4].mxu1 %v14946_v15  ;;  %11553 = vmatprep.subr.bf16.mxu0 %v13683_v36  ;;  %v14083_v11 = vsub.f32 %v8405_v29, %v7339_v6  ;;  %v14089_v21 = vpack.c.bf16 %v7339_v6, %v7336_v10  ;;  %v11132_v29 = vpack.c.bf16 %v13989_v43, %v13987_v5  ;;  %v8410_v6 = vld [vmem:[%s14451_s2 + $0x230] sm:$0xff]  ;;  %v14952_v15 = vld [vmem:[#allocation25_spill] sm:$0xff]  ;;  %v14954_v10 = vld [vmem:[#allocation34_spill] sm:$0xff] }
 0x165   : > { %11115 = vmatpush3.bf16.msra.mxu1 %v11112_v46  ;;  %9817 = vmatprep.mubr.f32.mxu1 %v14947_v50  ;;  %v14950_v46 = vld [vmem:[#allocation17_spill] sm:$0xff]  ;;  %v7354_v54 = vand.u32 4294901760, %v8410_v6 }
 0x166   : > { %11117 = vmatprep.subr.bf16.mxu1 %v11116_v17  ;;  %10593 = vmatmul.mubr.f32.vlgmr.msra.gmra.mrb[0].mxu0 %v13270_v42  ;;  %v14956_v9 = vand.u32 4294901760, %v14083_v11 }
 0x167   : > { %11555 = vmatpush3.bf16.msra.mxu0 %v13683_v36  ;;  %10595 = vmatprep.mubr.f32.mxu0 %v13278_v40  ;;  %v11124_v36 = vpack.c.bf16 %v13929_v4, %v13927_v31 }
 0x168   : > { %9818 = vmatmul.mubr.f32.gmra.mrb[6].mxu1 %v14948_v8  ;;  %11557 = vmatprep.subr.bf16.mxu0 %v13711_v12  ;;  %v14111_v8 = vsub.f32 %v8406_v34, %v7342_v3  ;;  %v7357_v34 = vand.u32 4294901760, %v8411_v62 }
 0x169   : > { %11119 = vmatpush3.bf16.msra.mxu1 %v11116_v17  ;;  %9836 = vmatprep.mubr.f32.mxu1 %v13889_v0  ;;  %v7345_v17 = vand.u32 4294901760, %v8407_v59 }
 0x16a   : > { %11121 = vmatprep.subr.bf16.mxu1 %v11120_v52  ;;  %10596 = vmatmul.mubr.f32.gmra.mrb[2].mxu0 %v13306_v47 }
 0x16b   : > { %11559 = vmatpush3.bf16.msra.mxu0 %v13711_v12  ;;  %10598 = vmatprep.mubr.f32.mxu0 %v13316_v30  ;;  %v11128_v12 = vpack.c.bf16 %v13959_v28, %v13957_v24  ;;  %v14113_v50 = vsub.f32 %v8407_v59, %v7345_v17  ;;  %v14955_v59 = vand.u32 4294901760, %v14081_v32 }
 0x16c   : > { %9837 = vmatmul.mubr.f32.vlgmr.msra.gmra.mrb[0].mxu1 %v13915_v61  ;;  %11561 = vmatprep.subr.bf16.mxu0 %v13727_v39 }
 0x16d   : > { %11123 = vmatpush3.bf16.msra.mxu1 %v11120_v52  ;;  %9839 = vmatprep.mubr.f32.mxu1 %v14949_v20  ;;  %v14951_v52 = vld [vmem:[#allocation19_spill] sm:$0xff]  ;;  %v7492_v13 = vsub.f32 %v14081_v32, %v14955_v59 }
 0x16e   : > { %11125 = vmatprep.subr.bf16.mxu1 %v11124_v36  ;;  %10599 = vmatmul.mubr.f32.gmra.mrb[4].mxu0 %v13344_v16 }
 0x16f   : > { %11563 = vmatpush3.bf16.msra.mxu0 %v13727_v39  ;;  %10601 = vmatprep.mubr.f32.mxu0 %v13747_v14  ;;  %v8409_v39 = vld [vmem:[%s14451_s2 + $0x228] sm:$0xff] }
 0x170   : > { %9840 = vmatmul.mubr.f32.gmra.mrb[2].mxu1 %v14950_v46  ;;  %11565 = vmatprep.subr.bf16.mxu0 %v13737_v60 }
 0x171   : > { %11127 = vmatpush3.bf16.msra.mxu1 %v11124_v36  ;;  %9842 = vmatprep.mubr.f32.mxu1 %v14951_v52  ;;  %v14117_v36 = vpack.c.bf16 %v7345_v17, %v7342_v3  ;;  %v7499_v3 = vsub.f32 %v14083_v11, %v14956_v9  ;;  %v7330_v9 = vsel %vm332_vm0, %v5578_v58, 0  ;;  %v14143_v17 = vpack.c.bf16 %v7357_v34, %v7354_v54 }
 0x172   : > { %11129 = vmatprep.subr.bf16.mxu1 %v11128_v12  ;;  %10602 = vmatmul.mubr.f32.gmra.mrb[6].mxu0 %v13762_v25 }
 0x173   : > { %11567 = vmatpush3.bf16.msra.mxu0 %v13737_v60  ;;  %10620 = vmatprep.mubr.f32.mxu0 %v13239_v23  ;;  %14953 = vst [vmem:[#allocation52_spill] sm:$0xff] %v14117_v36  ;;  %v7348_v60 = vand.u32 4294901760, %v8408_v45  ;;  %v7351_v23 = vand.u32 4294901760, %v8409_v39  ;;  %14958 = vst [vmem:[#allocation23_spill] sm:$0xff] %v14143_v17  ;;  %v7500_v19 = vand.u32 4294901760, %v7499_v3 }
 0x174   : > { %9843 = vmatmul.mubr.f32.gmra.mrb[4].mxu1 %v14952_v15  ;;  %11569 = vmatprep.subr.bf16.mxu0 %v14089_v21 }
 0x175   : > { %11131 = vmatpush3.bf16.msra.mxu1 %v11128_v12  ;;  %9845 = vmatprep.mubr.f32.mxu1 %v14954_v10  ;;  %v14135_v41 = vsub.f32 %v8408_v45, %v7348_v60  ;;  %v14137_v59 = vsub.f32 %v8409_v39, %v7351_v23  ;;  %v7493_v12 = vand.u32 4294901760, %v7492_v13  ;;  %v14959_v45 = vand.u32 4294901760, %v14111_v8 }
 0x176   : > { %11133 = vmatprep.subr.bf16.mxu1 %v11132_v29  ;;  %10621 = vmatmul.mubr.f32.vlgmr.msra.gmra.mrb[0].mxu0 %v13270_v42  ;;  %v14133_v42 = vpack.c.bf16 %v7351_v23, %v7348_v60  ;;  %v14960_v39 = vand.u32 4294901760, %v14113_v50  ;;  %v14153_v60 = vand.u32 4294901760, %v7330_v9  ;;  %v7333_v23 = vsel %vm332_vm0, %v5579_v26, 0 }
 0x177   : > { %11571 = vmatpush3.bf16.msra.mxu0 %v14089_v21  ;;  %10623 = vmatprep.mubr.f32.mxu0 %v13278_v40  ;;  %v7506_v58 = vsub.f32 %v14111_v8, %v14959_v45  ;;  %v14664_v13 = vand.u32 4294901760, %v14135_v41  ;;  %v14663_v3 = vand.u32 4294901760, %v14137_v59  ;;  %v14168_v26 = vand.u32 4294901760, %v7333_v23 }
 0x178   : > { %9846 = vmatmul.mubr.f32.gmra.mrb[6].mxu1 %v14957_v63  ;;  %11573 = vmatprep.subr.bf16.mxu0 %v14117_v36  ;;  %v14162_v63 = vsub.f32 %v8411_v62, %v7357_v34  ;;  %v11584_v45 = vpack.c.bf16 %v7500_v19, %v7493_v12  ;;  %v14173_v62 = vsub.f32 %v7330_v9, %v14153_v60  ;;  %v14961_v12 = vld [vmem:[#allocation24_spill] sm:$0xff] }
 0x179   : > { %11135 = vmatpush3.bf16.msra.mxu1 %v11132_v29  ;;  %9864 = vmatprep.mubr.f32.mxu1 %v13913_v49  ;;  %v7513_v29 = vsub.f32 %v14113_v50, %v14960_v39  ;;  %v7507_v39 = vand.u32 4294901760, %v7506_v58  ;;  %v7527_v34 = vsub.f32 %v14137_v59, %v14663_v3  ;;  %v14190_v9 = vsub.f32 %v7333_v23, %v14168_v26  ;;  %v14962_v3 = vld [vmem:[#allocation32_spill] sm:$0xff] }
 0x17a   : > { %11137 = vmatprep.subr.bf16.mxu1 %v13900_v37  ;;  %10624 = vmatmul.mubr.f32.gmra.mrb[2].mxu0 %v13306_v47 }
 0x17b   : > { %11575 = vmatpush3.bf16.msra.mxu0 %v14117_v36  ;;  %10626 = vmatprep.mubr.f32.mxu0 %v13316_v30  ;;  %v14160_v36 = vsub.f32 %v8410_v6, %v7354_v54  ;;  %v7514_v54 = vand.u32 4294901760, %v7513_v29  ;;  %v7520_v6 = vsub.f32 %v14135_v41, %v14664_v13  ;;  %v7470_v29 = vand.u32 4294901760, %v14173_v62 }
 0x17c   : > { %9865 = vmatmul.mubr.f32.vlgmr.msra.gmra.mrb[0].mxu1 %v13941_v38  ;;  %11577 = vmatprep.subr.bf16.mxu0 %v14133_v42  ;;  %v7528_v19 = vand.u32 4294901760, %v7527_v34  ;;  %v14967_v34 = vld [vmem:[#allocation46_spill] sm:$0xff] }
 0x17d   : > { %11139 = vmatpush3.bf16.msra.mxu1 %v13900_v37  ;;  %9867 = vmatprep.mubr.f32.mxu1 %v14928_v48  ;;  %v14668_v48 = vand.u32 4294901760, %v14160_v36  ;;  %v11588_v58 = vpack.c.bf16 %v7514_v54, %v7507_v39  ;;  %v7521_v13 = vand.u32 4294901760, %v7520_v6  ;;  %v14966_v39 = vand.u32 4294901760, %v13895_v27 }
 0x17e   : > { %11141 = vmatprep.subr.bf16.mxu1 %v13933_v7  ;;  %10627 = vmatmul.mubr.f32.gmra.mrb[4].mxu0 %v13344_v16  ;;  %v7480_v6 = vand.u32 4294901760, %v14190_v9  ;;  %v14970_v27 = vand.u32 4294901760, %v13929_v4 }
 0x17f   : > { %11579 = vmatpush3.bf16.msra.mxu0 %v14133_v42  ;;  %10629 = vmatprep.mubr.f32.mxu0 %v13747_v14 }
 0x180   : > { %9868 = vmatmul.mubr.f32.gmra.mrb[2].mxu1 %v14934_v2  ;;  %11581 = vmatprep.subr.bf16.mxu0 %v14143_v17  ;;  %v14963_v2 = vand.u32 4294901760, %v14162_v63 }
 0x181   : > { %11143 = vmatpush3.bf16.msra.mxu1 %v13933_v7  ;;  %9870 = vmatprep.mubr.f32.mxu1 %v14961_v12  ;;  %v7534_v12 = vsub.f32 %v14160_v36, %v14668_v48  ;;  %v11592_v48 = vpack.c.bf16 %v7528_v19, %v7521_v13  ;;  %v14971_v19 = vand.u32 4294901760, %v13941_v38  ;;  %v11600_v38 = vpack.c.bf16 %v14083_v11, %v14081_v32 }
 0x182   : > { %11145 = vmatprep.subr.bf16.mxu1 %v13955_v53  ;;  %10630 = vmatmul.mubr.f32.gmra.mrb[6].mxu0 %v13762_v25  ;;  %v7541_v23 = vsub.f32 %v14162_v63, %v14963_v2  ;;  %v7471_v2 = vsub.f32 %v14173_v62, %v7470_v29 }
 0x183   : > { %11583 = vmatpush3.bf16.msra.mxu0 %v14143_v17  ;;  %10648 = vmatprep.mubr.f32.mxu0 %v13406_v44  ;;  %v14964_v17 = vld [vmem:[#allocation38_spill] sm:$0xff]  ;;  %v14965_v44 = vand.u32 4294901760, %v13893_v56  ;;  %v14968_v56 = vand.u32 4294901760, %v13913_v49 }
 0x184   : > { %9871 = vmatmul.mubr.f32.gmra.mrb[4].mxu1 %v14962_v3  ;;  %11585 = vmatprep.subr.bf16.mxu0 %v11584_v45  ;;  %v7472_v13 = vand.u32 4294901760, %v7471_v2  ;;  %v14987_v2 = vld [vmem:[#allocation29_spill] sm:$0xff] }
 0x185   : > { %11147 = vmatpush3.bf16.msra.mxu1 %v13955_v53  ;;  %9873 = vmatprep.mubr.f32.mxu1 %v14964_v17  ;;  %v11152_v54 = vpack.c.bf16 %v14966_v39, %v14965_v44  ;;  %v7535_v17 = vand.u32 4294901760, %v7534_v12  ;;  %v7481_v44 = vsub.f32 %v14190_v9, %v7480_v6  ;;  %v14984_v39 = vld [vmem:[#allocation52_spill] sm:$0xff] }
 0x186   : > { %11149 = vmatprep.subr.bf16.mxu1 %v13965_v35  ;;  %10649 = vmatmul.mubr.f32.vlgmr.msra.gmra.mrb[0].mxu0 %v13419_v22  ;;  %v7542_v22 = vand.u32 4294901760, %v7541_v23  ;;  %v14983_v23 = vld [vmem:[#allocation41_spill] sm:$0xff] }
 0x187   : > { %11587 = vmatpush3.bf16.msra.mxu0 %v11584_v45  ;;  %10651 = vmatprep.mubr.f32.mxu0 %v13424_v33  ;;  %v14969_v33 = vand.u32 4294901760, %v13927_v31  ;;  %v14973_v31 = vand.u32 4294901760, %v13959_v28  ;;  %v7482_v12 = vand.u32 4294901760, %v7481_v44 }
 0x188   : > { %9874 = vmatmul.mubr.f32.gmra.mrb[6].mxu1 %v14967_v34  ;;  %11589 = vmatprep.subr.bf16.mxu0 %v11588_v58  ;;  %v11596_v49 = vpack.c.bf16 %v7542_v22, %v7535_v17  ;;  %v11612_v17 = vpack.c.bf16 %v14162_v63, %v14160_v36  ;;  %v14988_v22 = vld [vmem:[#allocation4_spill] sm:$0xff] }
 0x189   : > { %11151 = vmatpush3.bf16.msra.mxu1 %v13965_v35  ;;  %9892 = vmatprep.mubr.f32.mxu1 %v14968_v56  ;;  %v11156_v45 = vpack.c.bf16 %v14970_v27, %v14969_v33  ;;  %v14992_v27 = vld [vmem:[#allocation7_spill] sm:$0xff] }
 0x18a   : > { %11153 = vmatprep.subr.bf16.mxu1 %v11152_v54  ;;  %10652 = vmatmul.mubr.f32.gmra.mrb[2].mxu0 %v14903_v57  ;;  %v14972_v57 = vand.u32 4294901760, %v13957_v24  ;;  %v14976_v24 = vand.u32 4294901760, %v13989_v43  ;;  %v11608_v43 = vpack.c.bf16 %v14137_v59, %v14135_v41 }
 0x18b   : > { %11591 = vmatpush3.bf16.msra.mxu0 %v11588_v58  ;;  %10654 = vmatprep.mubr.f32.mxu0 %v13823_v1  ;;  %v14974_v1 = vld [vmem:[#allocation31_spill] sm:$0xff] }
 0x18c   : > { %9893 = vmatmul.mubr.f32.vlgmr.msra.gmra.mrb[0].mxu1 %v14971_v19  ;;  %11593 = vmatprep.subr.bf16.mxu0 %v11592_v48  ;;  %v11160_v4 = vpack.c.bf16 %v14973_v31, %v14972_v57  ;;  %v14982_v58 = vld [vmem:[#allocation79_spill] sm:$0xff]  ;;  %v14996_v19 = vand.u32 4294901760, %v14083_v11  ;;  %v14997_v57 = vld [vmem:[#allocation8_spill] sm:$0xff]  ;;  %v15002_v11 = vld [vmem:[#allocation78_spill] sm:$0xff] }
 0x18d   : > { %11155 = vmatpush3.bf16.msra.mxu1 %v11152_v54  ;;  %9895 = vmatprep.mubr.f32.mxu1 %v14927_v55  ;;  %v14977_v55 = vld [vmem:[#allocation36_spill] sm:$0xff]  ;;  %v14985_v54 = vld [vmem:[#allocation3_spill] sm:$0xff]  ;;  %v14998_v31 = vand.u32 4294901760, %v14997_v57 }
 0x18e   : > { %11157 = vmatprep.subr.bf16.mxu1 %v11156_v45  ;;  %10655 = vmatmul.mubr.f32.gmra.mrb[4].mxu0 %v13832_v51  ;;  %v14975_v51 = vand.u32 4294901760, %v13987_v5  ;;  %v14979_v5 = vld [vmem:[#allocation51_spill] sm:$0xff] }
 0x18f   : > { %11595 = vmatpush3.bf16.msra.mxu0 %v11592_v48  ;;  %10657 = vmatprep.mubr.f32.mxu0 %v7472_v13  ;;  %v11604_v48 = vpack.c.bf16 %v14113_v50, %v14111_v8  ;;  %v14995_v13 = vand.u32 4294901760, %v14081_v32 }
 0x190   : > { %9896 = vmatmul.mubr.f32.gmra.mrb[2].mxu1 %v14933_v18  ;;  %11597 = vmatprep.subr.bf16.mxu0 %v11596_v49  ;;  %v11164_v28 = vpack.c.bf16 %v14976_v24, %v14975_v51  ;;  %v14978_v18 = vld [vmem:[#allocation42_spill] sm:$0xff]  ;;  %v15001_v51 = vld [vmem:[#allocation5_spill] sm:$0xff] }
 0x191   : > { %11159 = vmatpush3.bf16.msra.mxu1 %v11156_v45  ;;  %9898 = vmatprep.mubr.f32.mxu1 %v14974_v1  ;;  %v14993_v45 = vand.u32 4294901760, %v14992_v27 }
 0x192   : > { %11161 = vmatprep.subr.bf16.mxu1 %v11160_v4  ;;  %10658 = vmatmul.mubr.f32.gmra.mrb[6].mxu0 %v7482_v12  ;;  %v14999_v12 = vld [vmem:[#allocation9_spill] sm:$0xff] }
 0x193   : > { %11599 = vmatpush3.bf16.msra.mxu0 %v11596_v49  ;;  %10676 = vmatprep.mubr.f32.mxu0 %v13278_v40  ;;  %v4025_v44 = vsub.f32 %v14992_v27, %v14993_v45  ;;  %v11632_v49 = vpack.c.bf16 %v14996_v19, %v14995_v13 }
 0x194   : > { %9899 = vmatmul.mubr.f32.gmra.mrb[4].mxu1 %v14977_v55  ;;  %11601 = vmatprep.subr.bf16.mxu0 %v11600_v38  ;;  %v15004_v55 = vand.u32 4294901760, %v14113_v50 }
 0x195   : > { %11163 = vmatpush3.bf16.msra.mxu1 %v11160_v4  ;;  %9901 = vmatprep.mubr.f32.mxu1 %v14978_v18  ;;  %v4032_v4 = vsub.f32 %v14997_v57, %v14998_v31  ;;  %v4026_v24 = vand.u32 4294901760, %v4025_v44  ;;  %v15015_v44 = vld [vmem:[#allocation83_spill] sm:$0xff] }
 0x196   : > { %11165 = vmatprep.subr.bf16.mxu1 %v11164_v28  ;;  %10677 = vmatmul.mubr.f32.vlgmr.msra.gmra.mrb[0].mxu0 %v13306_v47 }
 0x197   : > { %11603 = vmatpush3.bf16.msra.mxu0 %v11600_v38  ;;  %10679 = vmatprep.mubr.f32.mxu0 %v13316_v30  ;;  %v15000_v38 = vand.u32 4294901760, %v14999_v12  ;;  %v4033_v18 = vand.u32 4294901760, %v4032_v4 }
 0x198   : > { %9902 = vmatmul.mubr.f32.gmra.mrb[6].mxu1 %v14979_v5  ;;  %11605 = vmatprep.subr.bf16.mxu0 %v11604_v48 }
 0x199   : > { %11167 = vmatpush3.bf16.msra.mxu1 %v11164_v28  ;;  %9920 = vmatprep.mubr.f32.mxu1 %v13889_v0  ;;  %v4039_v1 = vsub.f32 %v14999_v12, %v15000_v38  ;;  %v15003_v28 = vand.u32 4294901760, %v14111_v8  ;;  %v15018_v38 = vld [vmem:[#allocation15_spill] sm:$0xff] }
 0x19a   : > { %11169 = vmatprep.subr.bf16.mxu1 %v13900_v37  ;;  %10680 = vmatmul.mubr.f32.gmra.mrb[2].mxu0 %v13344_v16 }
 0x19b   : > { %11607 = vmatpush3.bf16.msra.mxu0 %v11604_v48  ;;  %10682 = vmatprep.mubr.f32.mxu0 %v13747_v14  ;;  %v11636_v48 = vpack.c.bf16 %v15004_v55, %v15003_v28  ;;  %v4040_v5 = vand.u32 4294901760, %v4039_v1  ;;  %v15019_v1 = vand.u32 4294901760, %v15018_v38  ;;  %v15024_v28 = vld [vmem:[#allocation71_spill] sm:$0xff] }
 0x19c   : > { %9921 = vmatmul.mubr.f32.vlgmr.msra.gmra.mrb[0].mxu1 %v13915_v61  ;;  %11609 = vmatprep.subr.bf16.mxu0 %v11608_v43  ;;  %v15025_v55 = vld [vmem:[#allocation39_spill] sm:$0xff] }
 0x19d   : > { %11171 = vmatpush3.bf16.msra.mxu1 %v13900_v37  ;;  %9923 = vmatprep.mubr.f32.mxu1 %v14949_v20  ;;  %v14980_v37 = vld [vmem:[#allocation76_spill] sm:$0xff]  ;;  %v11204_v45 = vpack.c.bf16 %v4040_v5, %v4033_v18 }
 0x19e   : > { %11173 = vmatprep.subr.bf16.mxu1 %v13933_v7  ;;  %10683 = vmatmul.mubr.f32.gmra.mrb[4].mxu0 %v13762_v25 }
 0x19f   : > { %11611 = vmatpush3.bf16.msra.mxu0 %v11608_v43  ;;  %10685 = vmatprep.mubr.f32.mxu0 %v14153_v60  ;;  %v15005_v43 = vld [vmem:[#allocation10_spill] sm:$0xff] }
 0x1a0   : > { %9924 = vmatmul.mubr.f32.gmra.mrb[2].mxu1 %v14950_v46  ;;  %11613 = vmatprep.subr.bf16.mxu0 %v11612_v17 }
 0x1a1   : > { %11175 = vmatpush3.bf16.msra.mxu1 %v13933_v7  ;;  %9926 = vmatprep.mubr.f32.mxu1 %v14951_v52  ;;  %v14981_v7 = vld [vmem:[#allocation77_spill] sm:$0xff] }
 0x1a2   : > { %11177 = vmatprep.subr.bf16.mxu1 %v13955_v53  ;;  %10686 = vmatmul.mubr.f32.gmra.mrb[6].mxu0 %v14168_v26 }
 0x1a3   : > { %11615 = vmatpush3.bf16.msra.mxu0 %v11612_v17  ;;  %10704 = vmatprep.mubr.f32.mxu0 %v14980_v37  ;;  %v15006_v17 = vld [vmem:[#allocation30_spill] sm:$0xff] }
 0x1a4   : > { %9927 = vmatmul.mubr.f32.gmra.mrb[4].mxu1 %v14952_v15  ;;  %11617 = vmatprep.subr.bf16.mxu0 %v14089_v21 }
 0x1a5   : > { %11179 = vmatpush3.bf16.msra.mxu1 %v13955_v53  ;;  %9929 = vmatprep.mubr.f32.mxu1 %v14954_v10  ;;  %v14986_v53 = vld [vmem:[#allocation80_spill] sm:$0xff] }
 0x1a6   : > { %11181 = vmatprep.subr.bf16.mxu1 %v13965_v35  ;;  %10705 = vmatmul.mubr.f32.vlgmr.msra.gmra.mrb[0].mxu0 %v14981_v7  ;;  %v15007_v7 = vld [vmem:[#allocation12_spill] sm:$0xff] }
 0x1a7   : > { %11619 = vmatpush3.bf16.msra.mxu0 %v14089_v21  ;;  %10707 = vmatprep.mubr.f32.mxu0 %v14982_v58  ;;  %v15008_v58 = vand.u32 4294901760, %v15007_v7 }
 0x1a8   : > { %9930 = vmatmul.mubr.f32.gmra.mrb[6].mxu1 %v14983_v23  ;;  %11621 = vmatprep.subr.bf16.mxu0 %v14984_v39 }
 0x1a9   : > { %11183 = vmatpush3.bf16.msra.mxu1 %v13965_v35  ;;  %9948 = vmatprep.mubr.f32.mxu1 %v13889_v0  ;;  %v14989_v35 = vld [vmem:[#allocation35_spill] sm:$0xff]  ;;  %v14990_v0 = vld [vmem:[#allocation6_spill] sm:$0xff] }
 0x1aa   : > { %11185 = vmatprep.subr.bf16.mxu1 %v14985_v54  ;;  %10708 = vmatmul.mubr.f32.gmra.mrb[2].mxu0 %v14986_v53  ;;  %v14991_v56 = vand.u32 4294901760, %v14990_v0  ;;  %v15009_v53 = vld [vmem:[#allocation13_spill] sm:$0xff] }
 0x1ab   : > { %11623 = vmatpush3.bf16.msra.mxu0 %v14984_v39  ;;  %10710 = vmatprep.mubr.f32.mxu0 %v14987_v2  ;;  %v15010_v8 = vand.u32 4294901760, %v15009_v53  ;;  %v15011_v2 = vld [vmem:[#allocation82_spill] sm:$0xff] }
 0x1ac   : > { %9949 = vmatmul.mubr.f32.vlgmr.msra.gmra.mrb[0].mxu1 %v13915_v61  ;;  %11625 = vmatprep.subr.bf16.mxu0 %v14133_v42  ;;  %v4018_v33 = vsub.f32 %v14990_v0, %v14991_v56  ;;  %v14994_v61 = vld [vmem:[#allocation23_spill] sm:$0xff] }
 0x1ad   : > { %11187 = vmatpush3.bf16.msra.mxu1 %v14985_v54  ;;  %9951 = vmatprep.mubr.f32.mxu1 %v14949_v20  ;;  %v4046_v54 = vsub.f32 %v15007_v7, %v15008_v58  ;;  %v4053_v50 = vsub.f32 %v15009_v53, %v15010_v8 }
 0x1ae   : > { %11189 = vmatprep.subr.bf16.mxu1 %v14988_v22  ;;  %10711 = vmatmul.mubr.f32.gmra.mrb[4].mxu0 %v14989_v35  ;;  %v4019_v32 = vand.u32 4294901760, %v4018_v33  ;;  %v15013_v35 = vand.u32 4294901760, %v14137_v59  ;;  %v15014_v33 = vld [vmem:[#allocation18_spill] sm:$0xff]  ;;  %v15020_v59 = vld [vmem:[#allocation37_spill] sm:$0xff] }
 0x1af   : > { %11627 = vmatpush3.bf16.msra.mxu0 %v14133_v42  ;;  %10713 = vmatprep.mubr.f32.mxu0 %v14173_v62  ;;  %v4047_v13 = vand.u32 4294901760, %v4046_v54  ;;  %v4054_v19 = vand.u32 4294901760, %v4053_v50  ;;  %v15029_v62 = vld [vmem:[#allocation74_spill] sm:$0xff] }
 0x1b0   : > { %9952 = vmatmul.mubr.f32.gmra.mrb[2].mxu1 %v14950_v46  ;;  %11629 = vmatprep.subr.bf16.mxu0 %v14994_v61  ;;  %v11200_v37 = vpack.c.bf16 %v4026_v24, %v4019_v32  ;;  %v15022_v32 = vand.u32 4294901760, %v14160_v36  ;;  %v15023_v24 = vand.u32 4294901760, %v14162_v63  ;;  %v15027_v36 = vld [vmem:[#allocation73_spill] sm:$0xff] }
 0x1b1   : > { %11191 = vmatpush3.bf16.msra.mxu1 %v14988_v22  ;;  %9954 = vmatprep.mubr.f32.mxu1 %v14951_v52  ;;  %v15012_v22 = vand.u32 4294901760, %v14135_v41  ;;  %v4067_v41 = vsub.f32 %v15018_v38, %v15019_v1  ;;  %v11208_v18 = vpack.c.bf16 %v4054_v19, %v4047_v13 }
 0x1b2   : > { %11193 = vmatprep.subr.bf16.mxu1 %v15001_v51  ;;  %10714 = vmatmul.mubr.f32.gmra.mrb[6].mxu0 %v14190_v9  ;;  %v15030_v9 = vld [vmem:[#allocation75_spill] sm:$0xff] }
 0x1b3   : > { %11631 = vmatpush3.bf16.msra.mxu0 %v14994_v61  ;;  %10732 = vmatprep.mubr.f32.mxu0 %v15002_v11  ;;  %v11640_v56 = vpack.c.bf16 %v15013_v35, %v15012_v22  ;;  %v11644_v11 = vpack.c.bf16 %v15023_v24, %v15022_v32 }
 0x1b4   : > { %9955 = vmatmul.mubr.f32.gmra.mrb[4].mxu1 %v14952_v15  ;;  %11633 = vmatprep.subr.bf16.mxu0 %v11632_v49 }
 0x1b5   : > { %11195 = vmatpush3.bf16.msra.mxu1 %v15001_v51  ;;  %9957 = vmatprep.mubr.f32.mxu1 %v14954_v10  ;;  %v15021_v51 = vld [vmem:[#allocation44_spill] sm:$0xff] }
 0x1b6   : > { %11197 = vmatprep.subr.bf16.mxu1 %v15005_v43  ;;  %10733 = vmatmul.mubr.f32.vlgmr.msra.gmra.mrb[0].mxu0 %v15006_v17  ;;  %v15028_v17 = vld [vmem:[#allocation11_spill] sm:$0xff] }
 0x1b7   : > { %11635 = vmatpush3.bf16.msra.mxu0 %v11632_v49  ;;  %10735 = vmatprep.mubr.f32.mxu0 %v15011_v2  ;;  %v15016_v49 = vld [vmem:[#allocation14_spill] sm:$0xff] }
 0x1b8   : > { %9958 = vmatmul.mubr.f32.gmra.mrb[6].mxu1 %v14983_v23  ;;  %11637 = vmatprep.subr.bf16.mxu0 %v11636_v48  ;;  %v15017_v31 = vand.u32 4294901760, %v15016_v49 }
 0x1b9   : > { %11199 = vmatpush3.bf16.msra.mxu1 %v15005_v43  ;;  %9976 = vmatprep.mubr.f32.mxu1 %v15014_v33  ;;  %v4068_v43 = vand.u32 4294901760, %v4067_v41 }
 0x1ba   : > { %11201 = vmatprep.subr.bf16.mxu1 %v11200_v37  ;;  %10736 = vmatmul.mubr.f32.gmra.mrb[2].mxu0 %v15015_v44  ;;  %v4060_v4 = vsub.f32 %v15016_v49, %v15017_v31 }
 0x1bb   : > { %11639 = vmatpush3.bf16.msra.mxu0 %v11636_v48  ;;  %10738 = vmatprep.mubr.f32.mxu0 %v15020_v59  ;;  %v15026_v48 = vld [vmem:[#allocation72_spill] sm:$0xff] }
 0x1bc   : > { %9977 = vmatmul.mubr.f32.vlgmr.msra.gmra.mrb[0].mxu1 %v15021_v51  ;;  %11641 = vmatprep.subr.bf16.mxu0 %v11640_v56  ;;  %v4061_v5 = vand.u32 4294901760, %v4060_v4 }
 0x1bd   : > { %11203 = vmatpush3.bf16.msra.mxu1 %v11200_v37  ;;  %9979 = vmatprep.mubr.f32.mxu1 %v15024_v28 }
 0x1be   : > { %11205 = vmatprep.subr.bf16.mxu1 %v11204_v45  ;;  %10739 = vmatmul.mubr.f32.gmra.mrb[4].mxu0 %v15025_v55  ;;  %v11212_v63 = vpack.c.bf16 %v4068_v43, %v4061_v5 }
 0x1bf   : > { %11643 = vmatpush3.bf16.msra.mxu0 %v11640_v56  ;;  %10741 = vmatprep.mubr.f32.mxu0 %v7470_v29  ;;  %v11216_v29 = vpack.c.bf16 %v14992_v27, %v14990_v0 }
 0x1c0   : > { %9980 = vmatmul.mubr.f32.gmra.mrb[2].mxu1 %v15026_v48  ;;  %11645 = vmatprep.subr.bf16.mxu0 %v11644_v11 }
 0x1c1   : > { %11207 = vmatpush3.bf16.msra.mxu1 %v11204_v45  ;;  %9982 = vmatprep.mubr.f32.mxu1 %v15027_v36 }
 0x1c2   : > { %11209 = vmatprep.subr.bf16.mxu1 %v11208_v18  ;;  %10742 = vmatmul.mubr.f32.gmra.mrb[6].mxu0 %v7480_v6  ;;  %v11220_v6 = vpack.c.bf16 %v14999_v12, %v14997_v57 }
 0x1c3   : > { %11647 = vmatpush3.bf16.msra.mxu0 %v11644_v11  ;;  %10760 = vmatprep.mubr.f32.mxu0 %v13278_v40 }
 0x1c4   : > { %9983 = vmatmul.mubr.f32.gmra.mrb[4].mxu1 %v15028_v17  ;;  %11649 = vmatprep.subr.bf16.mxu0 %v14089_v21 }
 0x1c5   : > { %11211 = vmatpush3.bf16.msra.mxu1 %v11208_v18  ;;  %9985 = vmatprep.mubr.f32.mxu1 %v15029_v62 }
 0x1c6   : > { %11213 = vmatprep.subr.bf16.mxu1 %v11212_v63  ;;  %10761 = vmatmul.mubr.f32.vlgmr.msra.gmra.mrb[0].mxu0 %v13306_v47 }
 0x1c7   : > { %11651 = vmatpush3.bf16.msra.mxu0 %v14089_v21  ;;  %10763 = vmatprep.mubr.f32.mxu0 %v13316_v30  ;;  %v15031_v21 = vld [vmem:[#allocation50_spill] sm:$0xff] }
 0x1c8   : > { %9986 = vmatmul.mubr.f32.gmra.mrb[6].mxu1 %v15030_v9  ;;  %11653 = vmatprep.subr.bf16.mxu0 %v14984_v39 }
 0x1c9   : > { %11215 = vmatpush3.bf16.msra.mxu1 %v11212_v63  ;;  %10004 = vmatprep.mubr.f32.mxu1 %v14949_v20  ;;  %v11224_v20 = vpack.c.bf16 %v15009_v53, %v15007_v7 }
 0x1ca   : > { %11217 = vmatprep.subr.bf16.mxu1 %v11216_v29  ;;  %10764 = vmatmul.mubr.f32.gmra.mrb[2].mxu0 %v13344_v16 }
 0x1cb   : > { %11655 = vmatpush3.bf16.msra.mxu0 %v14984_v39  ;;  %10766 = vmatprep.mubr.f32.mxu0 %v13747_v14 }
 0x1cc   : > { %10005 = vmatmul.mubr.f32.vlgmr.msra.gmra.mrb[0].mxu1 %v14950_v46  ;;  %11657 = vmatprep.subr.bf16.mxu0 %v14133_v42  ;;  %v11228_v46 = vpack.c.bf16 %v15018_v38, %v15016_v49 }
 0x1cd   : > { %11219 = vmatpush3.bf16.msra.mxu1 %v11216_v29  ;;  %10007 = vmatprep.mubr.f32.mxu1 %v14951_v52  ;;  %v15033_v52 = vld [vmem:[#allocation20_spill] sm:$0xff] }
 0x1ce   : > { %11221 = vmatprep.subr.bf16.mxu1 %v11220_v6  ;;  %10767 = vmatmul.mubr.f32.gmra.mrb[4].mxu0 %v13762_v25 }
 0x1cf   : > { %11659 = vmatpush3.bf16.msra.mxu0 %v14133_v42  ;;  %10769 = vmatprep.mubr.f32.mxu0 %v14153_v60 }
 0x1d0   : > { %10008 = vmatmul.mubr.f32.gmra.mrb[2].mxu1 %v14952_v15  ;;  %11661 = vmatprep.subr.bf16.mxu0 %v14994_v61  ;;  %v15032_v15 = vld [vmem:[#allocation55_spill] sm:$0xff] }
 0x1d1   : > { %11223 = vmatpush3.bf16.msra.mxu1 %v11220_v6  ;;  %10010 = vmatprep.mubr.f32.mxu1 %v14954_v10  ;;  %v15035_v10 = vld [vmem:[#allocation24_spill] sm:$0xff] }
 0x1d2   : > { %11225 = vmatprep.subr.bf16.mxu1 %v11224_v20  ;;  %10770 = vmatmul.mubr.f32.gmra.mrb[6].mxu0 %v14168_v26 }
 0x1d3   : > { %11663 = vmatpush3.bf16.msra.mxu0 %v14994_v61  ;;  %10788 = vmatprep.mubr.f32.mxu0 %v13278_v40  ;;  %v15034_v40 = vld [vmem:[#allocation21_spill] sm:$0xff] }
 0x1d4   : > { %10011 = vmatmul.mubr.f32.gmra.mrb[4].mxu1 %v14983_v23 }
 0x1d5   : > { %11227 = vmatpush3.bf16.msra.mxu1 %v11224_v20  ;;  %10013 = vmatprep.mubr.f32.mxu1 %v15031_v21 }
 0x1d6   : > { %11229 = vmatprep.subr.bf16.mxu1 %v11228_v46  ;;  %10789 = vmatmul.mubr.f32.vlgmr.msra.gmra.mrb[0].mxu0 %v13306_v47  ;;  %v15036_v47 = vld [vmem:[#allocation38_spill] sm:$0xff] }
 0x1d7   : > { %10791 = vmatprep.mubr.f32.mxu0 %v13316_v30  ;;  %v15037_v30 = vld [vmem:[#allocation54_spill] sm:$0xff] }
 0x1d8   : > { %10014 = vmatmul.mubr.f32.gmra.mrb[6].mxu1 %v15032_v15 }
 0x1d9   : > { %11231 = vmatpush3.bf16.msra.mxu1 %v11228_v46  ;;  %10032 = vmatprep.mubr.f32.mxu1 %v15033_v52 }
 0x1da   : > { %10792 = vmatmul.mubr.f32.gmra.mrb[2].mxu0 %v13344_v16  ;;  %v15038_v16 = vld [vmem:[#allocation59_spill] sm:$0xff] }
 0x1db   : > { %10794 = vmatprep.mubr.f32.mxu0 %v13747_v14 }
 0x1dc   : > { %10033 = vmatmul.mubr.f32.vlgmr.msra.gmra.mrb[0].mxu1 %v15034_v40 }
 0x1dd   : > { %10035 = vmatprep.mubr.f32.mxu1 %v15035_v10 }
 0x1de   : > { %10795 = vmatmul.mubr.f32.gmra.mrb[4].mxu0 %v13762_v25 }
 0x1df   : > { %10797 = vmatprep.mubr.f32.mxu0 %v14153_v60 }
 0x1e0   : > { %10036 = vmatmul.mubr.f32.gmra.mrb[2].mxu1 %v14962_v3 }
 0x1e1   : > { %10038 = vmatprep.mubr.f32.mxu1 %v15036_v47 }
 0x1e2   : > { %10798 = vmatmul.mubr.f32.gmra.mrb[6].mxu0 %v14168_v26  ;;  %v8412_v26 = vld [vmem:[%s14452_s3] ss:$0 sm:$0xff] }
 0x1e4   : > { %10039 = vmatmul.mubr.f32.gmra.mrb[4].mxu1 %v14967_v34 }
 0x1e5   : > { %10041 = vmatprep.mubr.f32.mxu1 %v15037_v30 }
 0x1e8   : > { %10042 = vmatmul.mubr.f32.gmra.mrb[6].mxu1 %v15038_v16 }
 0x2a9   : > { %v10790_v14 = vpop.f32.mrb[0].mxu0 }
 0x2aa   : > { %v8127_v42 = vpop.f32.mrb[1].mxu0 }
 0x2ad   : > { %v10793_v25 = vpop.f32.mrb[2].mxu0 }
 0x2ae   : > { %v8139_v60 = vpop.f32.mrb[3].mxu0 }
 0x2af   : > { %v10034_v3 = vpop.f32.mrb[0].mxu1 }
 0x2b0   : > { %v11664_v34 = vadd.f32 %v10790_v14, %v10034_v3  ;;  %v4251_v23 = vpop.f32.mrb[1].mxu1 }
 0x2b1   : > { %v11665_v39 = vadd.f32 %v8127_v42, %v4251_v23  ;;  %v10796_v0 = vpop.f32.mrb[4].mxu0 }
 0x2b2   : > { %v8189_v27 = vadd.f32 %v11664_v34, %v8412_v26  ;;  %v8151_v61 = vpop.f32.mrb[5].mxu0 }
 0x2b3   : > { %v8188_v57 = vadd.f32 %v11665_v39, %v8412_v26  ;;  %v10037_v12 = vpop.f32.mrb[2].mxu1 }
 0x2b4   : > { %v8197_v37 = vmax.f32 %v8189_v27, 0.0  ;;  %v11666_v7 = vadd.f32 %v10793_v25, %v10037_v12  ;;  %v4265_v58 = vpop.f32.mrb[3].mxu1 }
 0x2b5   : > { %v8196_v54 = vmax.f32 %v8188_v57, 0.0  ;;  %v11667_v53 = vadd.f32 %v8139_v60, %v4265_v58  ;;  %v10799_v8 = vpop.f32.mrb[6].mxu0 }
 0x2b6   : > { %8205 = vst [vmem:[%s14424_s28 + $0x8] sm:$0xff] %v8197_v37  ;;  %v8191_v50 = vadd.f32 %v11666_v7, %v8412_v26  ;;  %v8163_v2 = vpop.f32.mrb[7].mxu0 }
 0x2b7   : > { %8204 = vst [vmem:[%s14424_s28] sm:$0xff] %v8196_v54  ;;  %v8190_v22 = vadd.f32 %v11667_v53, %v8412_v26  ;;  %v10040_v35 = vpop.f32.mrb[4].mxu1 }
 0x2b8   : > { %v8199_v56 = vmax.f32 %v8191_v50, 0.0  ;;  %v11668_v33 = vadd.f32 %v10796_v0, %v10040_v35  ;;  %v4279_v45 = vpop.f32.mrb[5].mxu1 }
 0x2b9   : > { %v8198_v44 = vmax.f32 %v8190_v22, 0.0  ;;  %v11669_v13 = vadd.f32 %v8151_v61, %v4279_v45 }
 0x2ba   : > { %8207 = vst [vmem:[%s14424_s28 + $0x18] sm:$0xff] %v8199_v56  ;;  %v8193_v19 = vadd.f32 %v11668_v33, %v8412_v26 }
 0x2bb   : > { %8206 = vst [vmem:[%s14424_s28 + $0x10] sm:$0xff] %v8198_v44  ;;  %v8192_v49 = vadd.f32 %v11669_v13, %v8412_v26  ;;  %v10043_v31 = vpop.f32.mrb[6].mxu1 }
 0x2bc   : > { %v8201_v4 = vmax.f32 %v8193_v19, 0.0  ;;  %v11670_v38 = vadd.f32 %v10799_v8, %v10043_v31  ;;  %v4293_v1 = vpop.f32.mrb[7].mxu1 }
 0x2bd   : > { %v8200_v41 = vmax.f32 %v8192_v49, 0.0  ;;  %v11671_v59 = vadd.f32 %v8163_v2, %v4293_v1 }
 0x2be   : > { %8209 = vst [vmem:[%s14424_s28 + $0x28] sm:$0xff] %v8201_v4  ;;  %v8195_v51 = vadd.f32 %v11670_v38, %v8412_v26 }
 0x2bf   : > { %8208 = vst [vmem:[%s14424_s28 + $0x20] sm:$0xff] %v8200_v41  ;;  %v8194_v32 = vadd.f32 %v11671_v59, %v8412_v26 }
 0x2c0   : > { %v8203_v24 = vmax.f32 %v8195_v51, 0.0 }
 0x2c1   : > { %v8202_v11 = vmax.f32 %v8194_v32, 0.0 }
 0x2c2   : > { %8211 = vst [vmem:[%s14424_s28 + $0x38] sm:$0xff] %v8203_v24 }
 0x2c3   : > { %8210 = vst [vmem:[%s14424_s28 + $0x30] sm:$0xff] %v8202_v11 }
 0x2c4 PF: > { %s14_s19 = sadd.s32 1, %s12169_s19   ;;  %s15039_s15 = smov %s12161_s17 }
 0x2c5   : > { %p11_p9 = scmp.ge.s32.totalorder %s14_s19, 10   ;;  %s15040_s16 = smov %s12165_s18 }
 0x2c6   : > { %s15041_s17 = smov %s15044_s20  ;;  %s15042_s18 = smov %s15048_s21 }
 0x2c7   :  { %13 = sbr.rel (!%p11_p9) target bundleno = 3 (0x3), region = 78 }

// kernel: luna_block_forward.3
= control target key start
LH: loop header
LB: loop body
LE: loop exit
PB: predicated region body
PF: predicated region fallthrough
CT: control target
= control target key end

     0   :  { %s19900_s18 = smov 0   ;;  %s19902_s19 = smov 0   ;;  %s25139_s0 = inlined_call_operand.vmem [shape: f32[2,18,18,128], index: 0, kind: input, shape index: {}, may-alias: {0,1}]   ;;  %s25140_s1 = inlined_call_operand.vmem [shape: f32[2,18,18,128], index: 1, kind: input, shape index: {}, may-alias: {0,1}]   ;;  %s25141_s2 = inlined_call_operand.vmem [shape: f32[9,128,128], index: 2, kind: input, shape index: {}]   ;;  %s25142_s3 = inlined_call_operand.vmem [shape: f32[1,128], index: 3, kind: input, shape index: {}]   ;;  %s25143_s4 = inlined_call_operand.vmem [shape: f32[2,128,64], index: 4, kind: input, shape index: {}]   ;;  %s25144_s5 = inlined_call_operand.vmem [shape: f32[2,8,8,64], index: 5, kind: output, shape index: {}]  }
   0x1   :  { %s19904_s20 = smov 0   ;;  %s19906_s21 = smov 0  }
   0x2   :  { %s19908_s22 = smov 0  }
   0x3 LB: > { %s24_s23 = sadd.s32 1, %s19857_s20  ;;  %s27_s24 = sadd.s32 1, %s19861_s21  ;;  %s19865_s22 = sphi %s19908_s22, %s15_s22   ;;  %s19861_s21 = sphi %s19906_s21, %s26371_s21   ;;  %s19857_s20 = sphi %s19904_s20, %s26370_s20   ;;  %s19853_s19 = sphi %s19902_s19, %s26369_s19   ;;  %s19849_s18 = sphi %s19900_s18, %s26368_s18  }
   0x4   : > { %p25_p0 = scmp.ge.s32.totalorder %s24_s23, 4  ;;  %p11911_p1 = scmp.ge.s32.totalorder %s19865_s22, 1 }
   0x5   : > { %p245_p2 = scmp.lt.s32.totalorder %s19865_s22, 9 }
   0x6   : > { %s26373_s23 = smov (%p25_p0, %s24_s23), 0  ;;  %s26375_s24 = smov (!%p25_p0, %s27_s24), %s19861_s21 }
   0x7   : > { %p246_p3 = pnand %p11911_p1, %p245_p2  ;;  %p29_p4 = scmp.ge.s32.totalorder %s26375_s24, 2 }
   0x9   : > { %s26377_s24 = smov (%p29_p4, %s26375_s24), 0  ;;  %249 = sbr.rel (%p246_p3) target bundleno = 2465 (0x9a1), region = 40 }
  0x10   : > { %v19937_v0 = vld [vmem:[%s25141_s2 + $0x300] sm:$0xff]  ;;  %v19942_v1 = vld [vmem:[%s25141_s2 + $0x308] sm:$0xff]  ;;  %v19947_v2 = vld [vmem:[%s25141_s2 + $0x310] sm:$0xff]  ;;  %p305_p5 = scmp.lt.s32.totalorder %s19853_s19, 1  ;;  %s11912_s12 = sshll.u32 %s19849_s18, 2  ;;  %vm19868_vm0 = vmmov 0  }
  0x11   : > { %v2329_v3 = vand.u32 4294901760, %v19937_v0  ;;  %v2332_v4 = vand.u32 4294901760, %v19942_v1  ;;  %v19955_v5 = vld [vmem:[%s25141_s2 + $0x318] sm:$0xff]  ;;  %v2335_v6 = vand.u32 4294901760, %v19947_v2  ;;  %v19961_v7 = vld [vmem:[%s25141_s2 + $0x320] sm:$0xff]  ;;  %v19966_v8 = vld [vmem:[%s25141_s2 + $0x328] sm:$0xff] }
  0x12   : > { %v2338_v9 = vand.u32 4294901760, %v19955_v5  ;;  %v2341_v11 = vand.u32 4294901760, %v19961_v7  ;;  %v2344_v12 = vand.u32 4294901760, %v19966_v8  ;;  %v19987_v14 = vld [vmem:[%s25141_s2 + $0x330] sm:$0xff]  ;;  %v19992_v15 = vld [vmem:[%s25141_s2 + $0x338] sm:$0xff]  ;;  %s26379_s19 = smov (!%p305_p5, %s19853_s19), 1 }
  0x13   : > { %v19974_v10 = vpack.c.bf16 %v2332_v4, %v2329_v3  ;;  %p307_p6 = scmp.lt.s32.totalorder %s11912_s12, 17  ;;  %s12092_s17 = sadd.s32 4, %s11912_s12  ;;  %v2347_v17 = vand.u32 4294901760, %v19987_v14  ;;  %v2350_v18 = vand.u32 4294901760, %v19992_v15  ;;  %v20014_v19 = vld [vmem:[%s25141_s2 + $0x340] sm:$0xff]  ;;  %v20019_v20 = vld [vmem:[%s25141_s2 + $0x348] sm:$0xff]  ;;  %v20156_v58 = vsub.f32 %v19937_v0, %v2329_v3 }
  0x14   : > { %v19982_v13 = vpack.c.bf16 %v2338_v9, %v2335_v6  ;;  %s19782_s25 = smul.u32 54, %s26379_s19  ;;  %p325_p7 = scmp.lt.s32.totalorder %s12092_s17, 17  ;;  %v20007_v16 = vpack.c.bf16 %v2344_v12, %v2341_v11  ;;  %v2353_v22 = vand.u32 4294901760, %v20014_v19  ;;  %v2356_v23 = vand.u32 4294901760, %v20019_v20  ;;  %v20034_v24 = vld [vmem:[%s25141_s2 + $0x350] sm:$0xff]  ;;  %v20039_v25 = vld [vmem:[%s25141_s2 + $0x358] sm:$0xff] }
  0x15   : > { %25615 = vst [vmem:[#allocation4_spill] sm:$0xff] %v19974_v10  ;;  %17494 = vmatprep.subr.bf16.mxu0 %v19974_v10  ;;  %s26381_s12 = smov (!%p307_p6, %s11912_s12), 17  ;;  %v20027_v21 = vpack.c.bf16 %v2350_v18, %v2347_v17  ;;  %v20050_v26 = vld [vmem:[%s25141_s2 + $0x360] sm:$0xff]  ;;  %v2359_v31 = vand.u32 4294901760, %v20034_v24  ;;  %v2362_v32 = vand.u32 4294901760, %v20039_v25  ;;  %v20089_v37 = vld [vmem:[%s25141_s2 + $0x368] sm:$0xff]  ;;  %v20161_v59 = vsub.f32 %v19942_v1, %v2332_v4 }
  0x16   : > { %25616 = vst [vmem:[#allocation5_spill] sm:$0xff] %v19982_v13  ;;  %17496 = vmatpush3.bf16.msra.mxu0 %v19974_v10  ;;  %25617 = vst [vmem:[#allocation6_spill] sm:$0xff] %v20007_v16  ;;  %s26383_s17 = smov (!%p325_p7, %s12092_s17), 17  ;;  %s19781_s30 = smul.u32 3, %s26381_s12  ;;  %v20069_v30 = vpack.c.bf16 %v2356_v23, %v2353_v22  ;;  %v2365_v48 = vand.u32 4294901760, %v20050_v26  ;;  %v2368_v49 = vand.u32 4294901760, %v20089_v37  ;;  %v20170_v61 = vsub.f32 %v19947_v2, %v2335_v6 }
  0x17   : > { %17498 = vmatprep.subr.bf16.mxu0 %v19982_v13  ;;  %s19783_s6 = smul.u32 3, %s26383_s17  ;;  %25618 = vst [vmem:[#allocation7_spill] sm:$0xff] %v20027_v21  ;;  %v20121_v47 = vpack.c.bf16 %v2362_v32, %v2359_v31  ;;  %v20128_v50 = vld [vmem:[%s25141_s2 + $0x370] sm:$0xff]  ;;  %v20139_v53 = vld [vmem:[%s25141_s2 + $0x378] sm:$0xff]  ;;  %25626 = vst [vmem:[#allocation15_spill] sm:$0xff] %v20156_v58  ;;  %v25150_v0 = vand.u32 4294901760, %v20156_v58  ;;  %v20187_v2 = vsub.f32 %v19955_v5, %v2338_v9 }
  0x18   : > { %s311_s7 = sadd.s32 %s19782_s25, %s19781_s30  ;;  %25619 = vst [vmem:[#allocation8_spill] sm:$0xff] %v20069_v30  ;;  %v2371_v55 = vand.u32 4294901760, %v20128_v50  ;;  %v20150_v56 = vpack.c.bf16 %v2368_v49, %v2365_v48  ;;  %v2374_v57 = vand.u32 4294901760, %v20139_v53  ;;  %25627 = vst [vmem:[#allocation16_spill] sm:$0xff] %v20161_v59  ;;  %v25147_v1 = vand.u32 4294901760, %v20161_v59  ;;  %s11917_s27 = sshll.u32 %s19849_s18, 1 }
  0x19   : > { %s11913_s12 = sshll.u32 %s311_s7, 3  ;;  %s329_s13 = sadd.s32 %s19783_s6, %s19782_s25  ;;  %25623 = vst [vmem:[#allocation12_spill] sm:$0xff] %v20121_v47  ;;  %25629 = vst [vmem:[#allocation18_spill] sm:$0xff] %v20170_v61  ;;  %v20200_v6 = vsub.f32 %v19961_v7, %v2341_v11  ;;  %v20219_v7 = vsub.f32 %v19966_v8, %v2344_v12  ;;  %vm10471_vm1 = vcmask 523264  }
  0x1a   : > { %17500 = vmatpush3.bf16.msra.mxu0 %v19982_v13  ;;  %s20044_s16 = scalar_lea.vmem %s25139_s0, %s11913_s12  ;;  %s11916_s17 = sshll.u32 %s329_s13, 3  ;;  %25625 = vst [vmem:[#allocation14_spill] sm:$0xff] %v20150_v56  ;;  %v20180_v63 = vpack.c.bf16 %v2374_v57, %v2371_v55  ;;  %25632 = vst [vmem:[#allocation21_spill] sm:$0xff] %v20187_v2  ;;  %v17525_v9 = vpack.c.bf16 %v25147_v1, %v25150_v0 }
  0x1b   : > { %17502 = vmatprep.subr.bf16.mxu0 %v20007_v16  ;;  %v351_v27 = vld [vmem:[%s20044_s16 + $0x30] sm:$0xff]  ;;  %v20054_v28 = vld [vmem:[%s20044_s16 + $0x38] sm:$0xff]  ;;  %v20057_v29 = vld [vmem:[%s20044_s16 + $0x48] sm:$0xff]  ;;  %s20062_s29 = scalar_lea.vmem %s25140_s1, %s11916_s17  ;;  %25635 = vst [vmem:[#allocation24_spill] sm:$0xff] %v20200_v6  ;;  %p338_p8 = scmp.lt.s32.totalorder %s11917_s27, 7 }
  0x1c   : > { %363 = vst [vmem:[#allocation2 + $0x30] sm:$0xff] %v351_v27  ;;  %v20073_v33 = vand.u32 4294901760, %v351_v27  ;;  %364 = vst [vmem:[#allocation2 + $0x38] sm:$0xff] %v20054_v28  ;;  %v20078_v34 = vld [vmem:[%s20044_s16 + $0x50] sm:$0xff]  ;;  %v20081_v35 = vld [vmem:[%s20062_s29] sm:$0xff]  ;;  %v20164_v60 = vand.u32 4294901760, %v20054_v28 }
  0x1d   : > { %366 = vst [vmem:[#allocation2 + $0x48] sm:$0xff] %v20057_v29  ;;  %v20084_v36 = vld [vmem:[%s20062_s29 + $0x8] sm:$0xff]  ;;  %367 = vst [vmem:[#allocation2 + $0x50] sm:$0xff] %v20078_v34  ;;  %v20095_v38 = vld [vmem:[%s20062_s29 + $0x18] sm:$0xff]  ;;  %v20173_v62 = vand.u32 4294901760, %v20057_v29  ;;  %v20194_v4 = vand.u32 4294901760, %v20078_v34 }
  0x1e   : > { %17504 = vmatpush3.bf16.msra.mxu0 %v20007_v16  ;;  %25620 = vst [vmem:[#allocation9_spill] sm:$0xff] %v20073_v33  ;;  %376 = vst [vmem:[#allocation2 + $0x60] sm:$0xff] %v20081_v35  ;;  %v20098_v39 = vld [vmem:[%s20062_s29 + $0x20] sm:$0xff]  ;;  %v20101_v40 = vsub.f32 %v351_v27, %v20073_v33  ;;  %v346_v42 = vld [vmem:[%s20044_s16 + $0x8] sm:$0xff]  ;;  %v20191_v3 = vsub.f32 %v20054_v28, %v20164_v60  ;;  %v20207_v5 = vand.u32 4294901760, %v20081_v35  ;;  %v25146_v28 = vand.u32 4294901760, %v20170_v61 }
  0x1f   : > { %17506 = vmatprep.subr.bf16.mxu0 %v20027_v21  ;;  %377 = vst [vmem:[#allocation2 + $0x68] sm:$0xff] %v20084_v36  ;;  %379 = vst [vmem:[#allocation2 + $0x78] sm:$0xff] %v20095_v38  ;;  %v345_v41 = vld [vmem:[%s20044_s16] sm:$0xff]  ;;  %v347_v43 = vld [vmem:[%s20044_s16 + $0x10] sm:$0x3]  ;;  %v20204_v27 = vsub.f32 %v20057_v29, %v20173_v62  ;;  %v20226_v29 = vsub.f32 %v20078_v34, %v20194_v4  ;;  %v20245_v34 = vand.u32 4294901760, %v20095_v38 }
  0x20   : > { %25621 = vst [vmem:[#allocation10_spill] sm:$0xff] %v20101_v40  ;;  %380 = vst [vmem:[#allocation2 + $0x80] sm:$0xff] %v20098_v39  ;;  %v20110_v44 = vld [vmem:[%s20044_s16 + $0x18] sm:$0xff]  ;;  %v20113_v45 = vld [vmem:[%s20044_s16 + $0x20] sm:$0xff]  ;;  %v20131_v51 = vand.u32 4294901760, %v20101_v40  ;;  %v20222_v11 = vand.u32 4294901760, %v20191_v3  ;;  %v20242_v12 = vsub.f32 %v20081_v35, %v20207_v5 }
  0x21   : > { %357 = vst [vmem:[#allocation2] sm:$0xff] %v345_v41  ;;  %358 = vst [vmem:[#allocation2 + $0x8] sm:$0xff] %v346_v42  ;;  %v350_v46 = vld [vmem:[%s20044_s16 + $0x28] sm:$0x3]  ;;  %v353_v52 = vld [vmem:[%s20044_s16 + $0x40] sm:$0x3] }
  0x22   : > { %17508 = vmatpush3.bf16.msra.mxu0 %v20027_v21  ;;  %359 = vst [vmem:[#allocation2 + $0x10] sm:$0x3] %v347_v43  ;;  %25622 = vst [vmem:[#allocation11_spill] sm:$0xff] %v20113_v45  ;;  %v356_v54 = vld [vmem:[%s20044_s16 + $0x58] sm:$0x3]  ;;  %14489 = vmatprep.mubr.f32.mxu0 %v20131_v51  ;;  %v25145_v41 = vand.u32 4294901760, %v20187_v2  ;;  %v20235_v43 = vsub.f32 %v19987_v14, %v2347_v17  ;;  %v20256_v17 = vsub.f32 %v19992_v15, %v2350_v18 }
  0x23   : > { %17510 = vmatprep.subr.bf16.mxu0 %v20069_v30  ;;  %25624 = vst [vmem:[#allocation13_spill] sm:$0xff] %v20131_v51  ;;  %360 = vst [vmem:[#allocation2 + $0x18] sm:$0xff] %v20110_v44  ;;  %v20229_v42 = vand.u32 4294901760, %v20084_v36  ;;  %v20238_v8 = vand.u32 4294901760, %v20204_v27  ;;  %v25148_v14 = vand.u32 4294901760, %v20219_v7  ;;  %v20260_v35 = vand.u32 4294901760, %v20226_v29 }
  0x24   : > { %361 = vst [vmem:[#allocation2 + $0x20] sm:$0xff] %v20113_v45  ;;  %362 = vst [vmem:[#allocation2 + $0x28] sm:$0x3] %v350_v46  ;;  %v17529_v46 = vpack.c.bf16 %v25145_v41, %v25146_v28  ;;  %v20267_v41 = vand.u32 4294901760, %v20098_v39  ;;  %v20272_v28 = vsub.f32 %v20014_v19, %v2353_v22  ;;  %v20276_v15 = vand.u32 4294901760, %v20242_v12  ;;  %v20498_v61 = vld [vmem:[%s25141_s2 + $0xe0] sm:$0xff] }
  0x25   : > { %365 = vst [vmem:[#allocation2 + $0x40] sm:$0x3] %v353_v52  ;;  %368 = vst [vmem:[#allocation2 + $0x58] sm:$0x3] %v356_v54  ;;  %v25149_v52 = vand.u32 4294901760, %v20200_v6  ;;  %v20264_v54 = vsub.f32 %v20084_v36, %v20229_v42  ;;  %v20280_v18 = vsub.f32 %v20095_v38, %v20245_v34  ;;  %v25151_v19 = vand.u32 4294901760, %v20256_v17 }
  0x26   : > { %17512 = vmatpush3.bf16.msra.mxu0 %v20069_v30  ;;  %25628 = vst [vmem:[#allocation17_spill] sm:$0xff] %v20164_v60  ;;  %25630 = vst [vmem:[#allocation19_spill] sm:$0xff] %v20173_v62  ;;  %v20291_v22 = vsub.f32 %v20019_v20, %v2356_v23  ;;  %v20299_v1 = vsub.f32 %v20098_v39, %v20267_v41  ;;  %v20312_v39 = vsub.f32 %v20034_v24, %v2359_v31  ;;  %s26385_s27 = smov (!%p338_p8, %s11917_s27), 7  ;;  %s11918_s25 = sshll.u32 %s26379_s19, 3 }
  0x27   : > { %17514 = vmatprep.subr.bf16.mxu0 %v20121_v47  ;;  %25631 = vst [vmem:[#allocation20_spill] sm:$0xff] %v20180_v63  ;;  %25633 = vst [vmem:[#allocation22_spill] sm:$0xff] %v20191_v3  ;;  %v17533_v36 = vpack.c.bf16 %v25148_v14, %v25149_v52  ;;  %v20295_v38 = vand.u32 4294901760, %v20264_v54  ;;  %v25161_v14 = vand.u32 4294901760, %v20272_v28  ;;  %v25153_v52 = vand.u32 4294901760, %v20280_v18  ;;  %s341_s28 = sadd.s32 %s11918_s25, %s26385_s27 }
  0x28   : > { %25634 = vst [vmem:[#allocation23_spill] sm:$0xff] %v20194_v4  ;;  %25636 = vst [vmem:[#allocation25_spill] sm:$0xff] %v20204_v27  ;;  %v25160_v23 = vand.u32 4294901760, %v20291_v22  ;;  %v25152_v0 = vand.u32 4294901760, %v20299_v1  ;;  %s11919_s30 = sshll.u32 %s341_s28, 3 }
  0x29   : > { %25637 = vst [vmem:[#allocation26_spill] sm:$0xff] %v20207_v5  ;;  %25638 = vst [vmem:[#allocation27_spill] sm:$0xff] %v20219_v7  ;;  %v20476_v7 = vld [vmem:[%s25141_s2 + $0xd0] sm:$0xff]  ;;  %s25016_s7 = scalar_lea.vmem %s25144_s5, %s11919_s30 }
  0x2a   : > { %17516 = vmatpush3.bf16.msra.mxu0 %v20121_v47  ;;  %25639 = vst [vmem:[#allocation28_spill] sm:$0xff] %v20222_v11  ;;  %25640 = vst [vmem:[#allocation29_spill] sm:$0xff] %v20226_v29  ;;  %v17541_v24 = vpack.c.bf16 %v25160_v23, %v25161_v14  ;;  %v3279_v6 = vld [vmem:[#allocation2 + $0x9] sm:$0xff] }
  0x2b   : > { %17518 = vmatprep.subr.bf16.mxu0 %v20150_v56  ;;  %25641 = vst [vmem:[#allocation30_spill] sm:$0xff] %v20229_v42  ;;  %25642 = vst [vmem:[#allocation31_spill] sm:$0xff] %v20235_v43 }
  0x2c   : > { %25643 = vst [vmem:[#allocation32_spill] sm:$0xff] %v20238_v8  ;;  %25644 = vst [vmem:[#allocation33_spill] sm:$0xff] %v20242_v12 }
  0x2d   : > { %25645 = vst [vmem:[#allocation34_spill] sm:$0xff] %v20245_v34  ;;  %25646 = vst [vmem:[#allocation35_spill] sm:$0xff] %v20256_v17 }
  0x2e   : > { %17520 = vmatpush3.bf16.msra.mxu0 %v20150_v56  ;;  %25647 = vst [vmem:[#allocation36_spill] sm:$0xff] %v20260_v35  ;;  %25648 = vst [vmem:[#allocation37_spill] sm:$0xff] %v20264_v54 }
  0x2f   : > { %17522 = vmatprep.subr.bf16.mxu0 %v20180_v63  ;;  %25649 = vst [vmem:[#allocation38_spill] sm:$0xff] %v20267_v41  ;;  %25650 = vst [vmem:[#allocation39_spill] sm:$0xff] %v20272_v28 }
  0x30   : > { %25651 = vst [vmem:[#allocation40_spill] sm:$0xff] %v20276_v15  ;;  %25652 = vst [vmem:[#allocation41_spill] sm:$0xff] %v20280_v18  ;;  %v20432_v18 = vld [vmem:[%s25141_s2 + $0xb0] sm:$0xff] }
  0x31   : > { %25653 = vst [vmem:[#allocation42_spill] sm:$0xff] %v20291_v22  ;;  %25654 = vst [vmem:[#allocation43_spill] sm:$0xff] %v20295_v38 }
  0x32   : > { %17524 = vmatpush3.bf16.msra.mxu0 %v20180_v63  ;;  %25655 = vst [vmem:[#allocation44_spill] sm:$0xff] %v20299_v1  ;;  %25656 = vst [vmem:[#allocation45_spill] sm:$0xff] %v20312_v39 }
  0x33   : > { %17526 = vmatprep.subr.bf16.mxu0 %v17525_v9 }
  0x35   : > { %14490 = vmatmul.mubr.f32.vlgmr.msra.gmra.mrb[0].mxu0 %v20222_v11 }
  0x36   : > { %17528 = vmatpush3.bf16.msra.mxu0 %v17525_v9  ;;  %14492 = vmatprep.mubr.f32.mxu0 %v20238_v8  ;;  %v25162_v9 = vand.u32 4294901760, %v20235_v43 }
  0x37   : > { %17530 = vmatprep.subr.bf16.mxu0 %v17529_v46 }
  0x38   : > { %v17537_v20 = vpack.c.bf16 %v25151_v19, %v25162_v9  ;;  %v20324_v19 = vsub.f32 %v20050_v26, %v2365_v48  ;;  %v20344_v26 = vsub.f32 %v20128_v50, %v2371_v55 }
  0x39   : > { %14493 = vmatmul.mubr.f32.gmra.mrb[2].mxu0 %v20260_v35 }
  0x3a   : > { %17532 = vmatpush3.bf16.msra.mxu0 %v17529_v46  ;;  %14495 = vmatprep.mubr.f32.mxu0 %v20276_v15  ;;  %v20317_v46 = vsub.f32 %v20039_v25, %v2362_v32  ;;  %25658 = vst [vmem:[#allocation47_spill] sm:$0xff] %v20324_v19  ;;  %v25159_v25 = vand.u32 4294901760, %v20312_v39  ;;  %v20337_v32 = vsub.f32 %v20089_v37, %v2368_v49  ;;  %25660 = vst [vmem:[#allocation49_spill] sm:$0xff] %v20344_v26  ;;  %v20456_v39 = vld [vmem:[%s25141_s2 + $0xc8] sm:$0xff] }
  0x3b   : > { %17534 = vmatprep.subr.bf16.mxu0 %v17533_v36  ;;  %v25157_v37 = vand.u32 4294901760, %v20324_v19  ;;  %v25155_v55 = vand.u32 4294901760, %v20344_v26 }
  0x3c   : > { %25657 = vst [vmem:[#allocation46_spill] sm:$0xff] %v20317_v46  ;;  %v25158_v31 = vand.u32 4294901760, %v20317_v46  ;;  %25659 = vst [vmem:[#allocation48_spill] sm:$0xff] %v20337_v32  ;;  %v25156_v49 = vand.u32 4294901760, %v20337_v32  ;;  %v25192_v32 = vand.u32 4294901760, %v20432_v18  ;;  %v20451_v46 = vld [vmem:[%s25141_s2 + $0xc0] sm:$0xff] }
  0x3d   : > { %14496 = vmatmul.mubr.f32.gmra.mrb[4].mxu0 %v20295_v38  ;;  %v25202_v17 = vand.u32 4294901760, %v20451_v46  ;;  %v25687_v12 = vand.u32 4294901760, %v20451_v46 }
  0x3e   : > { %17536 = vmatpush3.bf16.msra.mxu0 %v17533_v36  ;;  %14498 = vmatprep.mubr.f32.mxu0 %v25153_v52  ;;  %v17545_v48 = vpack.c.bf16 %v25158_v31, %v25159_v25  ;;  %v20356_v36 = vsub.f32 %v20139_v53, %v2374_v57  ;;  %v17549_v50 = vpack.c.bf16 %v25156_v49, %v25157_v37  ;;  %v11952_v53 = vld [vmem:[%s25141_s2 + $0x80] sm:$0xff]  ;;  %v11953_v57 = vld [vmem:[%s25141_s2 + $0x88] sm:$0xff]  ;;  %v20401_v52 = vld [vmem:[%s25141_s2 + $0x98] sm:$0xff] }
  0x3f   : > { %17538 = vmatprep.subr.bf16.mxu0 %v17537_v20  ;;  %v3317_v37 = vand.u32 4294901760, %v20401_v52  ;;  %v20413_v31 = vld [vmem:[%s25141_s2 + $0xa0] sm:$0xff]  ;;  %v20418_v25 = vld [vmem:[%s25141_s2 + $0xa8] sm:$0xff]  ;;  %v20625_v15 = vsub.f32 %v20451_v46, %v25687_v12 }
  0x40   : > { %25661 = vst [vmem:[#allocation50_spill] sm:$0xff] %v20356_v36  ;;  %v3320_v9 = vand.u32 4294901760, %v20413_v31  ;;  %v3323_v1 = vand.u32 4294901760, %v20418_v25 }
  0x41   : > { %14499 = vmatmul.mubr.f32.gmra.mrb[6].mxu0 %v25152_v0 }
  0x42   : > { %17540 = vmatpush3.bf16.msra.mxu0 %v17537_v20  ;;  %14533 = vmatprep.mubr.f32.mxu0 %v20073_v33  ;;  %v25154_v20 = vand.u32 4294901760, %v20356_v36  ;;  %v20437_v36 = vld [vmem:[%s25141_s2 + $0xb8] sm:$0xff]  ;;  %v20444_v26 = vpack.c.bf16 %v3323_v1, %v3320_v9  ;;  %v20547_v58 = vsub.f32 %v20413_v31, %v3320_v9 }
  0x43   : > { %17542 = vmatprep.subr.bf16.mxu0 %v17541_v24  ;;  %v25662_v22 = vand.u32 4294901760, %v20437_v36  ;;  %v3283_v31 = vld [vmem:[#allocation2 + $0x39] sm:$0xff] }
  0x44   : > { %v17553_v0 = vpack.c.bf16 %v25154_v20, %v25155_v55  ;;  %v25686_v54 = vand.u32 4294901760, %v20547_v58 }
  0x45   : > { %v20469_v28 = vpack.c.bf16 %v25662_v22, %v25192_v32  ;;  %v20503_v32 = vld [vmem:[%s25141_s2 + $0xe8] sm:$0xff] }
  0x46   : > { %17544 = vmatpush3.bf16.msra.mxu0 %v17541_v24  ;;  %v3311_v24 = vand.u32 4294901760, %v11953_v57 }
  0x47   : > { %17546 = vmatprep.subr.bf16.mxu0 %v17545_v48 }
  0x4a   : > { %17548 = vmatpush3.bf16.msra.mxu0 %v17545_v48  ;;  %v3278_v48 = vld [vmem:[#allocation2 + $0x1] sm:$0xff] }
  0x4b   : > { %17550 = vmatprep.subr.bf16.mxu0 %v17549_v50  ;;  %v20404_v20 = vand.u32 4294901760, %v3278_v48 }
  0x4d   : > { %v20422_v23 = vsub.f32 %v3278_v48, %v20404_v20 }
  0x4e   : > { %17552 = vmatpush3.bf16.msra.mxu0 %v17549_v50  ;;  %v11954_v50 = vld [vmem:[%s25141_s2 + $0x90] sm:$0xff] }
  0x4f   : > { %17554 = vmatprep.subr.bf16.mxu0 %v17553_v0  ;;  %v3314_v49 = vand.u32 4294901760, %v11954_v50  ;;  %v25189_v48 = vand.u32 4294901760, %v20422_v23 }
  0x51   : > { %v20425_v14 = vpack.c.bf16 %v3317_v37, %v3314_v49  ;;  %v3391_v19 = vsub.f32 %v20422_v23, %v25189_v48  ;;  %v20481_v48 = vld [vmem:[%s25141_s2 + $0xd8] sm:$0xff]  ;;  %v20522_v59 = vsub.f32 %v11954_v50, %v3314_v49  ;;  %v20551_v49 = vsub.f32 %v20418_v25, %v3323_v1 }
  0x52   : > { %17556 = vmatpush3.bf16.msra.mxu0 %v17553_v0  ;;  %v3308_v0 = vand.u32 4294901760, %v11952_v53 }
  0x53   : > { %17558 = vmatprep.subr.bf16.mxu0 %v19974_v10  ;;  %v3392_v43 = vand.u32 4294901760, %v3391_v19  ;;  %v20507_v19 = vsub.f32 %v11953_v57, %v3311_v24  ;;  %v25666_v57 = vand.u32 4294901760, %v20481_v48  ;;  %v25694_v35 = vand.u32 4294901760, %v20551_v49 }
  0x54   : > { %v20407_v55 = vpack.c.bf16 %v3311_v24, %v3308_v0  ;;  %v20505_v22 = vsub.f32 %v11952_v53, %v3308_v0  ;;  %v25665_v53 = vand.u32 4294901760, %v20476_v7 }
  0x55   : > { %14534 = vmatmul.mubr.f32.vlgmr.msra.gmra.mrb[0].mxu0 %v20164_v60  ;;  %v3507_v27 = vsub.f32 %v20551_v49, %v25694_v35 }
  0x56   : > { %17560 = vmatpush3.bf16.msra.mxu0 %v19974_v10  ;;  %14536 = vmatprep.mubr.f32.mxu0 %v20173_v62  ;;  %v20529_v0 = vpack.c.bf16 %v25666_v57, %v25665_v53  ;;  %v20542_v53 = vsub.f32 %v20401_v52, %v3317_v37  ;;  %v3282_v57 = vld [vmem:[#allocation2 + $0x31] sm:$0xff]  ;;  %v25669_v52 = vand.u32 4294901760, %v20503_v32  ;;  %v25672_v1 = vand.u32 4294901760, %v20505_v22 }
  0x57   : > { %17562 = vmatprep.subr.bf16.mxu0 %v19982_v13  ;;  %v20565_v9 = vand.u32 4294901760, %v3282_v57  ;;  %v3508_v51 = vand.u32 4294901760, %v3507_v27 }
  0x58   : > { %25667 = vst [vmem:[#allocation52_spill] sm:$0xff] %v20529_v0  ;;  %v3472_v25 = vsub.f32 %v20505_v22, %v25672_v1 }
  0x59   : > { %14537 = vmatmul.mubr.f32.gmra.mrb[2].mxu0 %v20194_v4 }
  0x5a   : > { %17564 = vmatpush3.bf16.msra.mxu0 %v19982_v13  ;;  %14539 = vmatprep.mubr.f32.mxu0 %v20207_v5 }
  0x5b   : > { %17566 = vmatprep.subr.bf16.mxu0 %v20007_v16 }
  0x5d   : > { %14540 = vmatmul.mubr.f32.gmra.mrb[4].mxu0 %v20229_v42 }
  0x5e   : > { %17568 = vmatpush3.bf16.msra.mxu0 %v20007_v16  ;;  %14542 = vmatprep.mubr.f32.mxu0 %v20245_v34 }
  0x5f   : > { %17570 = vmatprep.subr.bf16.mxu0 %v20027_v21 }
  0x61   : > { %14543 = vmatmul.mubr.f32.gmra.mrb[6].mxu0 %v20267_v41 }
  0x62   : > { %17572 = vmatpush3.bf16.msra.mxu0 %v20027_v21  ;;  %14577 = vmatprep.mubr.f32.mxu0 %v20073_v33  ;;  %v25673_v21 = vand.u32 4294901760, %v20507_v19 }
  0x63   : > { %17574 = vmatprep.subr.bf16.mxu0 %v20069_v30 }
  0x64   : > { %v3479_v24 = vsub.f32 %v20507_v19, %v25673_v21  ;;  %v25678_v21 = vand.u32 4294901760, %v20522_v59 }
  0x66   : > { %17576 = vmatpush3.bf16.msra.mxu0 %v20069_v30  ;;  %v3281_v30 = vld [vmem:[#allocation2 + $0x21] sm:$0xff]  ;;  %v3486_v16 = vsub.f32 %v20522_v59, %v25678_v21 }
  0x67   : > { %17578 = vmatprep.subr.bf16.mxu0 %v20121_v47  ;;  %v20553_v50 = vand.u32 4294901760, %v3281_v30 }
  0x6a   : > { %17580 = vmatpush3.bf16.msra.mxu0 %v20121_v47 }
  0x6b   : > { %17582 = vmatprep.subr.bf16.mxu0 %v20150_v56 }
  0x6e   : > { %17584 = vmatpush3.bf16.msra.mxu0 %v20150_v56  ;;  %v3280_v56 = vld [vmem:[#allocation2 + $0x19] sm:$0xff] }
  0x6f   : > { %17586 = vmatprep.subr.bf16.mxu0 %v20180_v63  ;;  %v20533_v47 = vand.u32 4294901760, %v3280_v56 }
  0x72   : > { %17588 = vmatpush3.bf16.msra.mxu0 %v20180_v63  ;;  %v25663_v63 = vand.u32 4294901760, %v20456_v39 }
  0x73   : > { %17590 = vmatprep.subr.bf16.mxu0 %v20407_v55 }
  0x74   : > { %v20493_v2 = vpack.c.bf16 %v25663_v63, %v25202_v17  ;;  %v20514_v63 = vld [vmem:[%s25141_s2 + $0xf0] sm:$0xff]  ;;  %v20519_v17 = vld [vmem:[%s25141_s2 + $0xf8] sm:$0xff] }
  0x75   : > { %14578 = vmatmul.mubr.f32.vlgmr.msra.gmra.mrb[0].mxu0 %v20164_v60  ;;  %v25675_v13 = vand.u32 4294901760, %v20519_v17 }
  0x76   : > { %17592 = vmatpush3.bf16.msra.mxu0 %v20407_v55  ;;  %14580 = vmatprep.mubr.f32.mxu0 %v20173_v62  ;;  %25664 = vst [vmem:[#allocation51_spill] sm:$0xff] %v20493_v2  ;;  %v20595_v62 = vand.u32 4294901760, %v3283_v31 }
  0x77   : > { %17594 = vmatprep.subr.bf16.mxu0 %v20425_v14 }
  0x79   : > { %14581 = vmatmul.mubr.f32.gmra.mrb[2].mxu0 %v20194_v4  ;;  %v20593_v4 = vsub.f32 %v3281_v30, %v20553_v50  ;;  %v3473_v30 = vand.u32 4294901760, %v3472_v25 }
  0x7a   : > { %17596 = vmatpush3.bf16.msra.mxu0 %v20425_v14  ;;  %14583 = vmatprep.mubr.f32.mxu0 %v20207_v5  ;;  %v25677_v5 = vand.u32 4294901760, %v20432_v18 }
  0x7b   : > { %17598 = vmatprep.subr.bf16.mxu0 %v20444_v26  ;;  %25679 = vst [vmem:[#allocation56_spill] sm:$0xff] %v20593_v4  ;;  %v20633_v29 = vand.u32 4294901760, %v20593_v4 }
  0x7c   : > { %v20586_v1 = vsub.f32 %v20432_v18, %v25677_v5  ;;  %v20607_v18 = vsub.f32 %v3282_v57, %v20565_v9  ;;  %v3500_v57 = vsub.f32 %v20547_v58, %v25686_v54 }
  0x7d   : > { %14584 = vmatmul.mubr.f32.gmra.mrb[4].mxu0 %v20229_v42  ;;  %v3480_v42 = vand.u32 4294901760, %v3479_v24  ;;  %v25688_v24 = vand.u32 4294901760, %v20456_v39  ;;  %25689 = vst [vmem:[#allocation60_spill] sm:$0xff] %v20633_v29  ;;  %v3421_v35 = vsub.f32 %v20593_v4, %v20633_v29  ;;  %v25703_v29 = vand.u32 4294901760, %v20625_v15 }
  0x7e   : > { %17600 = vmatpush3.bf16.msra.mxu0 %v20444_v26  ;;  %14586 = vmatprep.mubr.f32.mxu0 %v20245_v34  ;;  %v20509_v34 = vand.u32 4294901760, %v3279_v6  ;;  %25682 = vst [vmem:[#allocation58_spill] sm:$0xff] %v20607_v18  ;;  %v20645_v46 = vand.u32 4294901760, %v20607_v18  ;;  %v25695_v38 = vand.u32 4294901760, %v20586_v1  ;;  %v3501_v3 = vand.u32 4294901760, %v3500_v57 }
  0x7f   : > { %17602 = vmatprep.subr.bf16.mxu0 %v20469_v28  ;;  %v20630_v25 = vsub.f32 %v20456_v39, %v25688_v24  ;;  %v17621_v39 = vpack.c.bf16 %v3480_v42, %v3473_v30 }
  0x80   : > { %25692 = vst [vmem:[#allocation63_spill] sm:$0xff] %v20645_v46  ;;  %v3514_v8 = vsub.f32 %v20586_v1, %v25695_v38 }
  0x81   : > { %14587 = vmatmul.mubr.f32.gmra.mrb[6].mxu0 %v20267_v41  ;;  %v20539_v41 = vsub.f32 %v3279_v6, %v20509_v34  ;;  %v25668_v6 = vand.u32 4294901760, %v20498_v61 }
  0x82   : > { %17604 = vmatpush3.bf16.msra.mxu0 %v20469_v28  ;;  %14621 = vmatprep.mubr.f32.mxu0 %v3392_v43  ;;  %v20563_v43 = vsub.f32 %v3280_v56, %v20533_v47  ;;  %v25674_v56 = vand.u32 4294901760, %v20514_v63 }
  0x83   : > { %17606 = vmatprep.subr.bf16.mxu0 %v20493_v2  ;;  %v20560_v37 = vpack.c.bf16 %v25669_v52, %v25668_v6  ;;  %v3284_v52 = vld [vmem:[#allocation2 + $0x49] sm:$0xff]  ;;  %v3285_v6 = vld [vmem:[#allocation2 + $0x51] sm:$0xff]  ;;  %v25684_v60 = vand.u32 4294901760, %v20539_v41 }
  0x84   : > { %25671 = vst [vmem:[#allocation54_spill] sm:$0xff] %v20563_v43  ;;  %v20580_v10 = vpack.c.bf16 %v25675_v13, %v25674_v56  ;;  %v25680_v13 = vand.u32 4294901760, %v20437_v36  ;;  %v20604_v5 = vand.u32 4294901760, %v20563_v43  ;;  %v20609_v21 = vand.u32 4294901760, %v3284_v52 }
  0x85   : > { %25670 = vst [vmem:[#allocation53_spill] sm:$0xff] %v20560_v37  ;;  %v3401_v33 = vsub.f32 %v20539_v41, %v25684_v60  ;;  %v3487_v60 = vand.u32 4294901760, %v3486_v16  ;;  %v20638_v54 = vand.u32 4294901760, %v3285_v6 }
  0x86   : > { %17608 = vmatpush3.bf16.msra.mxu0 %v20493_v2  ;;  %25676 = vst [vmem:[#allocation55_spill] sm:$0xff] %v20580_v10  ;;  %v20601_v56 = vsub.f32 %v20437_v36, %v25680_v13  ;;  %25681 = vst [vmem:[#allocation57_spill] sm:$0xff] %v20604_v5  ;;  %v25685_v36 = vand.u32 4294901760, %v20542_v53  ;;  %v3411_v12 = vsub.f32 %v20563_v43, %v20604_v5 }
  0x87   : > { %17610 = vmatprep.subr.bf16.mxu0 %v20529_v0  ;;  %25683 = vst [vmem:[#allocation59_spill] sm:$0xff] %v20609_v21  ;;  %25691 = vst [vmem:[#allocation62_spill] sm:$0xff] %v20638_v54  ;;  %v20648_v16 = vsub.f32 %v3284_v52, %v20609_v21  ;;  %v25696_v52 = vand.u32 4294901760, %v20476_v7  ;;  %v20675_v38 = vsub.f32 %v3285_v6, %v20638_v54  ;;  %v3515_v6 = vand.u32 4294901760, %v3514_v8 }
  0x88   : > { %v3493_v13 = vsub.f32 %v20542_v53, %v25685_v36  ;;  %v20636_v36 = vsub.f32 %v3283_v31, %v20595_v62  ;;  %v3402_v31 = vand.u32 4294901760, %v3401_v33  ;;  %v25697_v33 = vand.u32 4294901760, %v20481_v48 }
  0x89   : > { %25693 = vst [vmem:[#allocation64_spill] sm:$0xff] %v20648_v16  ;;  %v20662_v40 = vsub.f32 %v20476_v7, %v25696_v52  ;;  %25699 = vst [vmem:[#allocation66_spill] sm:$0xff] %v20675_v38  ;;  %v20681_v52 = vand.u32 4294901760, %v3411_v12  ;;  %v3528_v5 = vsub.f32 %v20625_v15, %v25703_v29  ;;  %v25704_v12 = vand.u32 4294901760, %v20630_v25 }
  0x8a   : > { %17612 = vmatpush3.bf16.msra.mxu0 %v20529_v0  ;;  %25690 = vst [vmem:[#allocation61_spill] sm:$0xff] %v20636_v36  ;;  %v3494_v24 = vand.u32 4294901760, %v3493_v13  ;;  %v20667_v42 = vsub.f32 %v20481_v48, %v25697_v33  ;;  %v20672_v30 = vand.u32 4294901760, %v20636_v36  ;;  %v25700_v13 = vand.u32 4294901760, %v20601_v56 }
  0x8b   : > { %17614 = vmatprep.subr.bf16.mxu0 %v20560_v37  ;;  %25701 = vst [vmem:[#allocation67_spill] sm:$0xff] %v20681_v52  ;;  %v3431_v48 = vsub.f32 %v20607_v18, %v20645_v46  ;;  %v20686_v33 = vand.u32 4294901760, %v20648_v16  ;;  %v25266_v45 = vand.u32 4294901760, %v20662_v40  ;;  %v20695_v46 = vand.u32 4294901760, %v3421_v35 }
  0x8c   : > { %25698 = vst [vmem:[#allocation65_spill] sm:$0xff] %v20672_v30  ;;  %v3521_v7 = vsub.f32 %v20601_v56, %v25700_v13  ;;  %v17625_v11 = vpack.c.bf16 %v3494_v24, %v3487_v60  ;;  %v3535_v13 = vsub.f32 %v20630_v25, %v25704_v12  ;;  %v20700_v57 = vand.u32 4294901760, %v20675_v38 }
  0x8d   : > { %25702 = vst [vmem:[#allocation68_spill] sm:$0xff] %v20686_v33  ;;  %25705 = vst [vmem:[#allocation69_spill] sm:$0xff] %v20695_v46  ;;  %v20704_v8 = vand.u32 4294901760, %v3431_v48  ;;  %v3451_v60 = vsub.f32 %v20648_v16, %v20686_v33  ;;  %v25708_v24 = vand.u32 4294901760, %v20498_v61  ;;  %v25709_v12 = vand.u32 4294901760, %v20503_v32 }
  0x8e   : > { %17616 = vmatpush3.bf16.msra.mxu0 %v20560_v37  ;;  %25706 = vst [vmem:[#allocation70_spill] sm:$0xff] %v20700_v57  ;;  %v3522_v27 = vand.u32 4294901760, %v3521_v7  ;;  %v3529_v7 = vand.u32 4294901760, %v3528_v5  ;;  %v3542_v48 = vsub.f32 %v20662_v40, %v25266_v45  ;;  %v25713_v45 = vand.u32 4294901760, %v20514_v63 }
  0x8f   : > { %17618 = vmatprep.subr.bf16.mxu0 %v20580_v10  ;;  %25707 = vst [vmem:[#allocation71_spill] sm:$0xff] %v20704_v8  ;;  %v20711_v35 = vsub.f32 %v20498_v61, %v25708_v24  ;;  %v25711_v24 = vand.u32 4294901760, %v20667_v42  ;;  %v20730_v5 = vand.u32 4294901760, %v3451_v60 }
  0x90   : > { %v17633_v61 = vpack.c.bf16 %v3522_v27, %v3515_v6  ;;  %v3543_v60 = vand.u32 4294901760, %v3542_v48 }
  0x91   : > { %25712 = vst [vmem:[#allocation73_spill] sm:$0xff] %v20730_v5 }
  0x92   : > { %17620 = vmatpush3.bf16.msra.mxu0 %v20580_v10  ;;  %v3441_v10 = vsub.f32 %v20636_v36, %v20672_v30 }
  0x93   : > { %17622 = vmatprep.subr.bf16.mxu0 %v17621_v39 }
  0x94   : > { %v20722_v29 = vand.u32 4294901760, %v3441_v10 }
  0x95   : > { %14622 = vmatmul.mubr.f32.vlgmr.msra.gmra.mrb[0].mxu0 %v3402_v31  ;;  %v17629_v31 = vpack.c.bf16 %v3508_v51, %v3501_v3  ;;  %v3461_v51 = vsub.f32 %v20675_v38, %v20700_v57  ;;  %v3536_v3 = vand.u32 4294901760, %v3535_v13 }
  0x96   : > { %17624 = vmatpush3.bf16.msra.mxu0 %v17621_v39  ;;  %14624 = vmatprep.mubr.f32.mxu0 %v20681_v52  ;;  %v20716_v39 = vsub.f32 %v20503_v32, %v25709_v12  ;;  %25710 = vst [vmem:[#allocation72_spill] sm:$0xff] %v20722_v29  ;;  %v3549_v32 = vsub.f32 %v20667_v42, %v25711_v24  ;;  %v25269_v12 = vand.u32 4294901760, %v20711_v35  ;;  %v25728_v52 = vand.u32 4294901760, %v20507_v19 }
  0x97   : > { %17626 = vmatprep.subr.bf16.mxu0 %v17625_v11  ;;  %v20745_v13 = vand.u32 4294901760, %v3461_v51  ;;  %v17637_v27 = vpack.c.bf16 %v3536_v3, %v3529_v7 }
  0x98   : > { %v25268_v10 = vand.u32 4294901760, %v20716_v39  ;;  %v3550_v24 = vand.u32 4294901760, %v3549_v32 }
  0x99   : > { %14625 = vmatmul.mubr.f32.gmra.mrb[2].mxu0 %v20695_v46  ;;  %v20737_v46 = vsub.f32 %v20514_v63, %v25713_v45  ;;  %25715 = vst [vmem:[#allocation74_spill] sm:$0xff] %v20745_v13  ;;  %v3556_v45 = vsub.f32 %v20711_v35, %v25269_v12 }
  0x9a   : > { %17628 = vmatpush3.bf16.msra.mxu0 %v17625_v11  ;;  %14627 = vmatprep.mubr.f32.mxu0 %v20704_v8  ;;  %v25714_v11 = vand.u32 4294901760, %v20519_v17  ;;  %v20960_v8 = vld [vmem:[%s25141_s2 + $0x1f0] sm:$0xff] }
  0x9b   : > { %17630 = vmatprep.subr.bf16.mxu0 %v17629_v31  ;;  %v25271_v63 = vand.u32 4294901760, %v20737_v46  ;;  %v3557_v7 = vand.u32 4294901760, %v3556_v45  ;;  %v17673_v45 = vpack.c.bf16 %v20667_v42, %v20662_v40 }
  0x9c   : > { %v20742_v6 = vsub.f32 %v20519_v17, %v25714_v11  ;;  %v3563_v17 = vsub.f32 %v20716_v39, %v25268_v10 }
  0x9d   : > { %14628 = vmatmul.mubr.f32.gmra.mrb[4].mxu0 %v20722_v29  ;;  %v3570_v3 = vsub.f32 %v20737_v46, %v25271_v63  ;;  %v20858_v63 = vld [vmem:[%s25141_s2 + $0x1b0] sm:$0xff] }
  0x9e   : > { %17632 = vmatpush3.bf16.msra.mxu0 %v17629_v31  ;;  %14630 = vmatprep.mubr.f32.mxu0 %v20730_v5  ;;  %v25270_v51 = vand.u32 4294901760, %v20742_v6  ;;  %v17641_v31 = vpack.c.bf16 %v3550_v24, %v3543_v60  ;;  %v3564_v48 = vand.u32 4294901760, %v3563_v17  ;;  %v17653_v60 = vpack.c.bf16 %v20507_v19, %v20505_v22 }
  0x9f   : > { %17634 = vmatprep.subr.bf16.mxu0 %v17633_v61  ;;  %v3571_v10 = vand.u32 4294901760, %v3570_v3  ;;  %v17657_v24 = vpack.c.bf16 %v20542_v53, %v20522_v59  ;;  %v17677_v17 = vpack.c.bf16 %v20716_v39, %v20711_v35 }
  0xa0   : > { %v3577_v32 = vsub.f32 %v20742_v6, %v25270_v51  ;;  %v17645_v11 = vpack.c.bf16 %v3564_v48, %v3557_v7  ;;  %v20791_v7 = vld [vmem:[%s25141_s2 + $0x180] sm:$0xff]  ;;  %v20796_v48 = vld [vmem:[%s25141_s2 + $0x188] sm:$0xff] }
  0xa1   : > { %14631 = vmatmul.mubr.f32.gmra.mrb[6].mxu0 %v20745_v13  ;;  %v25277_v3 = vand.u32 4294901760, %v20791_v7  ;;  %v25724_v5 = vand.u32 4294901760, %v20791_v7 }
  0xa2   : > { %17636 = vmatpush3.bf16.msra.mxu0 %v17633_v61  ;;  %14665 = vmatprep.mubr.f32.mxu0 %v20404_v20  ;;  %v3578_v12 = vand.u32 4294901760, %v3577_v32  ;;  %v25274_v32 = vand.u32 4294901760, %v20796_v48 }
  0xa3   : > { %17638 = vmatprep.subr.bf16.mxu0 %v17637_v27  ;;  %v20955_v29 = vsub.f32 %v20791_v7, %v25724_v5  ;;  %v25731_v7 = vand.u32 4294901760, %v20796_v48 }
  0xa4   : > { %v17649_v61 = vpack.c.bf16 %v3578_v12, %v3571_v10  ;;  %v17665_v12 = vpack.c.bf16 %v20601_v56, %v20586_v1  ;;  %v17669_v10 = vpack.c.bf16 %v20630_v25, %v20625_v15 }
  0xa6   : > { %17640 = vmatpush3.bf16.msra.mxu0 %v17637_v27  ;;  %v17661_v27 = vpack.c.bf16 %v20551_v49, %v20547_v58 }
  0xa7   : > { %17642 = vmatprep.subr.bf16.mxu0 %v17641_v31 }
  0xaa   : > { %17644 = vmatpush3.bf16.msra.mxu0 %v17641_v31  ;;  %v17681_v31 = vpack.c.bf16 %v20742_v6, %v20737_v46 }
  0xab   : > { %17646 = vmatprep.subr.bf16.mxu0 %v17645_v11 }
  0xae   : > { %17648 = vmatpush3.bf16.msra.mxu0 %v17645_v11  ;;  %v20805_v11 = vpack.c.bf16 %v25274_v32, %v25277_v3  ;;  %v20883_v3 = vld [vmem:[%s25141_s2 + $0x1c0] sm:$0xff] }
  0xaf   : > { %17650 = vmatprep.subr.bf16.mxu0 %v17649_v61 }
  0xb0   : > { %25716 = vst [vmem:[#allocation75_spill] sm:$0xff] %v20805_v11  ;;  %17014 = vmatprep.subr.bf16.mxu1 %v20805_v11 }
  0xb1   : > { %17016 = vmatpush3.bf16.msra.mxu1 %v20805_v11  ;;  %v20994_v11 = vsub.f32 %v20796_v48, %v25731_v7 }
  0xb2   : > { %17652 = vmatpush3.bf16.msra.mxu0 %v17649_v61  ;;  %v20810_v61 = vld [vmem:[%s25141_s2 + $0x190] sm:$0xff] }
  0xb3   : > { %17654 = vmatprep.subr.bf16.mxu0 %v17653_v60 }
  0xb5   : > { %14666 = vmatmul.mubr.f32.vlgmr.msra.gmra.mrb[0].mxu0 %v20509_v34 }
  0xb6   : > { %17656 = vmatpush3.bf16.msra.mxu0 %v17653_v60  ;;  %14668 = vmatprep.mubr.f32.mxu0 %v20533_v47  ;;  %v20815_v60 = vld [vmem:[%s25141_s2 + $0x198] sm:$0xff] }
  0xb7   : > { %17658 = vmatprep.subr.bf16.mxu0 %v17657_v24  ;;  %v25736_v48 = vand.u32 4294901760, %v20815_v60 }
  0xb9   : > { %14669 = vmatmul.mubr.f32.gmra.mrb[2].mxu0 %v20553_v50  ;;  %v21014_v7 = vsub.f32 %v20815_v60, %v25736_v48 }
  0xba   : > { %17660 = vmatpush3.bf16.msra.mxu0 %v17657_v24  ;;  %14671 = vmatprep.mubr.f32.mxu0 %v20565_v9  ;;  %v25273_v24 = vand.u32 4294901760, %v20810_v61 }
  0xbb   : > { %17662 = vmatprep.subr.bf16.mxu0 %v17661_v27 }
  0xbd   : > { %14672 = vmatmul.mubr.f32.gmra.mrb[4].mxu0 %v20595_v62 }
  0xbe   : > { %17664 = vmatpush3.bf16.msra.mxu0 %v17661_v27  ;;  %14674 = vmatprep.mubr.f32.mxu0 %v20609_v21  ;;  %v25272_v27 = vand.u32 4294901760, %v20815_v60 }
  0xbf   : > { %17666 = vmatprep.subr.bf16.mxu0 %v17665_v12 }
  0xc1   : > { %14675 = vmatmul.mubr.f32.gmra.mrb[6].mxu0 %v20638_v54 }
  0xc2   : > { %17668 = vmatpush3.bf16.msra.mxu0 %v17665_v12  ;;  %14709 = vmatprep.mubr.f32.mxu0 %v20422_v23  ;;  %v20829_v12 = vpack.c.bf16 %v25272_v27, %v25273_v24  ;;  %v20863_v27 = vld [vmem:[%s25141_s2 + $0x1b8] sm:$0xff]  ;;  %v25283_v24 = vand.u32 4294901760, %v20858_v63 }
  0xc3   : > { %17670 = vmatprep.subr.bf16.mxu0 %v17669_v10  ;;  %v25282_v32 = vand.u32 4294901760, %v20863_v27 }
  0xc4   : > { %25717 = vst [vmem:[#allocation76_spill] sm:$0xff] %v20829_v12  ;;  %17018 = vmatprep.subr.bf16.mxu1 %v20829_v12 }
  0xc5   : > { %17020 = vmatpush3.bf16.msra.mxu1 %v20829_v12 }
  0xc6   : > { %17672 = vmatpush3.bf16.msra.mxu0 %v17669_v10  ;;  %v20834_v10 = vld [vmem:[%s25141_s2 + $0x1a0] sm:$0xff] }
  0xc7   : > { %17674 = vmatprep.subr.bf16.mxu0 %v17673_v45 }
  0xca   : > { %17676 = vmatpush3.bf16.msra.mxu0 %v17673_v45  ;;  %v20839_v45 = vld [vmem:[%s25141_s2 + $0x1a8] sm:$0xff] }
  0xcb   : > { %17678 = vmatprep.subr.bf16.mxu0 %v17677_v17 }
  0xce   : > { %17680 = vmatpush3.bf16.msra.mxu0 %v17677_v17  ;;  %v25276_v17 = vand.u32 4294901760, %v20834_v10 }
  0xcf   : > { %17682 = vmatprep.subr.bf16.mxu0 %v17681_v31 }
  0xd2   : > { %17684 = vmatpush3.bf16.msra.mxu0 %v17681_v31  ;;  %v25275_v31 = vand.u32 4294901760, %v20839_v45 }
  0xd3   : > { %17686 = vmatprep.subr.bf16.mxu0 %v20407_v55 }
  0xd4   : > { %v20853_v51 = vpack.c.bf16 %v25275_v31, %v25276_v17  ;;  %v20877_v31 = vpack.c.bf16 %v25282_v32, %v25283_v24  ;;  %v371_v17 = vld [vmem:[%s20062_s29 + $0x10] sm:$0x3]  ;;  %v25720_v24 = vand.u32 4294901760, %v20422_v23  ;;  %v20913_v23 = vld [vmem:[%s25141_s2 + $0x1d8] sm:$0xff] }
  0xd5   : > { %14710 = vmatmul.mubr.f32.vlgmr.msra.gmra.mrb[0].mxu0 %v20539_v41  ;;  %378 = vst [vmem:[#allocation2 + $0x70] sm:$0x3] %v371_v17 }
  0xd6   : > { %17688 = vmatpush3.bf16.msra.mxu0 %v20407_v55  ;;  %14712 = vmatprep.mubr.f32.mxu0 %v20563_v43  ;;  %25718 = vst [vmem:[#allocation77_spill] sm:$0xff] %v20853_v51  ;;  %25719 = vst [vmem:[#allocation78_spill] sm:$0xff] %v20877_v31 }
  0xd7   : > { %17690 = vmatprep.subr.bf16.mxu0 %v20425_v14  ;;  %17022 = vmatprep.subr.bf16.mxu1 %v20853_v51 }
  0xd8   : > { %17024 = vmatpush3.bf16.msra.mxu1 %v20853_v51 }
  0xd9   : > { %14713 = vmatmul.mubr.f32.gmra.mrb[2].mxu0 %v20593_v4  ;;  %17026 = vmatprep.subr.bf16.mxu1 %v20877_v31  ;;  %v20935_v4 = vld [vmem:[%s25141_s2 + $0x1e8] sm:$0xff] }
  0xda   : > { %17692 = vmatpush3.bf16.msra.mxu0 %v20425_v14  ;;  %14715 = vmatprep.mubr.f32.mxu0 %v20607_v18  ;;  %v25294_v18 = vand.u32 4294901760, %v20913_v23  ;;  %v25304_v13 = vand.u32 4294901760, %v20935_v4 }
  0xdb   : > { %17694 = vmatprep.subr.bf16.mxu0 %v20444_v26 }
  0xdc   : > { %17028 = vmatpush3.bf16.msra.mxu1 %v20877_v31  ;;  %v25727_v31 = vand.u32 4294901760, %v20505_v22  ;;  %v25732_v22 = vand.u32 4294901760, %v20955_v29 }
  0xdd   : > { %14716 = vmatmul.mubr.f32.gmra.mrb[4].mxu0 %v20636_v36  ;;  %v25289_v36 = vand.u32 4294901760, %v20883_v3 }
  0xde   : > { %17696 = vmatpush3.bf16.msra.mxu0 %v20444_v26  ;;  %14718 = vmatprep.mubr.f32.mxu0 %v20648_v16  ;;  %v20888_v16 = vld [vmem:[%s25141_s2 + $0x1c8] sm:$0xff]  ;;  %v17717_v51 = vpack.c.bf16 %v25728_v52, %v25727_v31  ;;  %v592_v19 = vsub.f32 %v20955_v29, %v25732_v22  ;;  %v25737_v22 = vand.u32 4294901760, %v20522_v59 }
  0xdf   : > { %17698 = vmatprep.subr.bf16.mxu0 %v20469_v28  ;;  %v25288_v32 = vand.u32 4294901760, %v20888_v16  ;;  %v25733_v52 = vld [vmem:[#allocation11_spill] sm:$0xff] }
  0xe0   : > { %v21000_v31 = vand.u32 4294901760, %v25733_v52 }
  0xe1   : > { %14719 = vmatmul.mubr.f32.gmra.mrb[6].mxu0 %v20675_v38  ;;  %v20903_v17 = vpack.c.bf16 %v25288_v32, %v25289_v36  ;;  %v20908_v38 = vld [vmem:[%s25141_s2 + $0x1d0] sm:$0xff]  ;;  %v20930_v36 = vld [vmem:[%s25141_s2 + $0x1e0] sm:$0xff] }
  0xe2   : > { %17700 = vmatpush3.bf16.msra.mxu0 %v20469_v28  ;;  %14753 = vmatprep.mubr.f32.mxu0 %v25720_v24  ;;  %v25295_v24 = vand.u32 4294901760, %v20908_v38  ;;  %v25305_v43 = vand.u32 4294901760, %v20930_v36  ;;  %25734 = vst [vmem:[#allocation11_spill] sm:$0xff] %v21000_v31 }
  0xe3   : > { %17702 = vmatprep.subr.bf16.mxu0 %v20493_v2  ;;  %25721 = vst [vmem:[#allocation79_spill] sm:$0xff] %v20903_v17  ;;  %17030 = vmatprep.subr.bf16.mxu1 %v20903_v17 }
  0xe4   : > { %17032 = vmatpush3.bf16.msra.mxu1 %v20903_v17  ;;  %v20925_v32 = vpack.c.bf16 %v25294_v18, %v25295_v24  ;;  %v20947_v18 = vpack.c.bf16 %v25304_v13, %v25305_v43  ;;  %v20950_v24 = vand.u32 4294901760, %v20110_v44  ;;  %v25318_v13 = vand.u32 4294901760, %v20960_v8  ;;  %v25726_v17 = vld [vmem:[#allocation55_spill] sm:$0xff] }
  0xe6   : > { %17704 = vmatpush3.bf16.msra.mxu0 %v20493_v2  ;;  %25722 = vst [vmem:[#allocation80_spill] sm:$0xff] %v20925_v32  ;;  %17034 = vmatprep.subr.bf16.mxu1 %v20925_v32  ;;  %25723 = vst [vmem:[#allocation81_spill] sm:$0xff] %v20947_v18  ;;  %v20972_v5 = vsub.f32 %v20110_v44, %v20950_v24 }
  0xe7   : > { %17706 = vmatprep.subr.bf16.mxu0 %v20529_v0 }
  0xe8   : > { %17036 = vmatpush3.bf16.msra.mxu1 %v20925_v32  ;;  %v20965_v32 = vld [vmem:[%s25141_s2 + $0x1f8] sm:$0xff]  ;;  %25725 = vst [vmem:[#allocation82_spill] sm:$0xff] %v20972_v5  ;;  %v20989_v44 = vand.u32 4294901760, %v20972_v5 }
  0xe9   : > { %17038 = vmatprep.subr.bf16.mxu1 %v20947_v18  ;;  %v25317_v43 = vand.u32 4294901760, %v20965_v32 }
  0xea   : > { %17708 = vmatpush3.bf16.msra.mxu0 %v20529_v0  ;;  %25730 = vst [vmem:[#allocation84_spill] sm:$0xff] %v20989_v44  ;;  %v25738_v0 = vand.u32 4294901760, %v20542_v53  ;;  %v25743_v53 = vand.u32 4294901760, %v20834_v10 }
  0xeb   : > { %17710 = vmatprep.subr.bf16.mxu0 %v20560_v37  ;;  %v20986_v12 = vpack.c.bf16 %v25317_v43, %v25318_v13  ;;  %v511_v43 = vsub.f32 %v20972_v5, %v20989_v44  ;;  %v593_v44 = vand.u32 4294901760, %v592_v19  ;;  %v21023_v13 = vsub.f32 %v25733_v52, %v21000_v31 }
  0xec   : > { %17040 = vmatpush3.bf16.msra.mxu1 %v20947_v18  ;;  %v25735_v18 = vand.u32 4294901760, %v20810_v61  ;;  %v17721_v2 = vpack.c.bf16 %v25738_v0, %v25737_v22  ;;  %v21039_v19 = vsub.f32 %v20834_v10, %v25743_v53  ;;  %v25744_v52 = vand.u32 4294901760, %v20839_v45 }
  0xed   : > { %25729 = vst [vmem:[#allocation83_spill] sm:$0xff] %v20986_v12  ;;  %17042 = vmatprep.subr.bf16.mxu1 %v20986_v12  ;;  %25739 = vst [vmem:[#allocation85_spill] sm:$0xff] %v21023_v13  ;;  %v21034_v0 = vand.u32 4294901760, %v21023_v13  ;;  %v25745_v22 = vand.u32 4294901760, %v20539_v41  ;;  %v25747_v53 = vand.u32 4294901760, %v20547_v58 }
  0xee   : > { %17712 = vmatpush3.bf16.msra.mxu0 %v20560_v37  ;;  %v21009_v37 = vsub.f32 %v20810_v61, %v25735_v18  ;;  %v21026_v18 = vand.u32 4294901760, %v511_v43  ;;  %v25741_v61 = vand.u32 4294901760, %v20994_v11  ;;  %v21044_v43 = vsub.f32 %v20839_v45, %v25744_v52 }
  0xef   : > { %17714 = vmatprep.subr.bf16.mxu0 %v25726_v17  ;;  %25742 = vst [vmem:[#allocation87_spill] sm:$0xff] %v21034_v0  ;;  %v25748_v45 = vand.u32 4294901760, %v20551_v49  ;;  %v521_v41 = vsub.f32 %v21023_v13, %v21034_v0 }
  0xf0   : > { %17044 = vmatpush3.bf16.msra.mxu1 %v20986_v12  ;;  %25740 = vst [vmem:[#allocation86_spill] sm:$0xff] %v21026_v18  ;;  %v599_v60 = vsub.f32 %v20994_v11, %v25741_v61  ;;  %v25332_v48 = vand.u32 4294901760, %v21009_v37  ;;  %13829 = vmatprep.mubr.f32.mxu1 %v21026_v18  ;;  %v25746_v12 = vand.u32 4294901760, %v21014_v7 }
  0xf1   : > { %v17725_v52 = vpack.c.bf16 %v25748_v45, %v25747_v53  ;;  %v21069_v49 = vand.u32 4294901760, %v521_v41  ;;  %v25752_v45 = vand.u32 4294901760, %v20863_v27  ;;  %v25755_v41 = vand.u32 4294901760, %v20601_v56 }
  0xf2   : > { %17716 = vmatpush3.bf16.msra.mxu0 %v25726_v17  ;;  %v600_v61 = vand.u32 4294901760, %v599_v60  ;;  %v606_v59 = vsub.f32 %v21009_v37, %v25332_v48  ;;  %v613_v10 = vsub.f32 %v21014_v7, %v25746_v12  ;;  %v25749_v17 = vld [vmem:[#allocation57_spill] sm:$0xff]  ;;  %v25336_v60 = vand.u32 4294901760, %v21039_v19 }
  0xf3   : > { %17718 = vmatprep.subr.bf16.mxu0 %v17717_v51  ;;  %25751 = vst [vmem:[#allocation88_spill] sm:$0xff] %v21069_v49  ;;  %13830 = vmatmul.mubr.f32.vlgmr.msra.gmra.mrb[0].mxu1 %v21069_v49  ;;  %v25758_v56 = vand.u32 4294901760, %v20888_v16 }
  0xf4   : > { %v17045_v48 = vpack.c.bf16 %v600_v61, %v593_v44  ;;  %v607_v18 = vand.u32 4294901760, %v606_v59  ;;  %v614_v5 = vand.u32 4294901760, %v613_v10  ;;  %v620_v12 = vsub.f32 %v21039_v19, %v25336_v60  ;;  %v25753_v59 = vld [vmem:[#allocation60_spill] sm:$0xff]  ;;  %v25756_v60 = vld [vmem:[#allocation63_spill] sm:$0xff] }
  0xf5   : > { %14754 = vmatmul.mubr.f32.vlgmr.msra.gmra.mrb[0].mxu0 %v25745_v22  ;;  %v25337_v22 = vand.u32 4294901760, %v21044_v43  ;;  %v21080_v44 = vsub.f32 %v20863_v27, %v25752_v45  ;;  %v25754_v10 = vand.u32 4294901760, %v20586_v1 }
  0xf6   : > { %17720 = vmatpush3.bf16.msra.mxu0 %v17717_v51  ;;  %14756 = vmatprep.mubr.f32.mxu0 %v25749_v17  ;;  %v25750_v51 = vand.u32 4294901760, %v20858_v63 }
  0xf7   : > { %17722 = vmatprep.subr.bf16.mxu0 %v17721_v2  ;;  %v627_v53 = vsub.f32 %v21044_v43, %v25337_v22  ;;  %17046 = vmatprep.subr.bf16.mxu1 %v17045_v48  ;;  %v621_v22 = vand.u32 4294901760, %v620_v12  ;;  %v25346_v0 = vand.u32 4294901760, %v21080_v44 }
  0xf8   : > { %v21067_v58 = vsub.f32 %v20858_v63, %v25750_v51  ;;  %v17049_v63 = vpack.c.bf16 %v614_v5, %v607_v18  ;;  %v17729_v51 = vpack.c.bf16 %v25755_v41, %v25754_v10  ;;  %v21102_v5 = vsub.f32 %v20888_v16, %v25758_v56  ;;  %17048 = vmatpush3.bf16.msra.mxu1 %v17045_v48 }
  0xf9   : > { %14757 = vmatmul.mubr.f32.gmra.mrb[2].mxu0 %v25753_v59  ;;  %v628_v17 = vand.u32 4294901760, %v627_v53  ;;  %v641_v18 = vsub.f32 %v21080_v44, %v25346_v0  ;;  %v25759_v10 = vand.u32 4294901760, %v20625_v15  ;;  %v25760_v16 = vand.u32 4294901760, %v20630_v25  ;;  %v25780_v0 = vld [vmem:[#allocation29_spill] sm:$0xff]  ;;  %v25805_v59 = vld [vmem:[#allocation75_spill] sm:$0xff] }
  0xfa   : > { %v25347_v61 = vand.u32 4294901760, %v21067_v58  ;;  %17724 = vmatpush3.bf16.msra.mxu0 %v17721_v2  ;;  %14759 = vmatprep.mubr.f32.mxu0 %v25756_v60  ;;  %v25757_v2 = vand.u32 4294901760, %v20883_v3  ;;  %v25762_v15 = vand.u32 4294901760, %v20913_v23 }
  0xfb   : > { %17726 = vmatprep.subr.bf16.mxu0 %v17725_v52  ;;  %17050 = vmatprep.subr.bf16.mxu1 %v17049_v63  ;;  %v17053_v12 = vpack.c.bf16 %v628_v17, %v621_v22  ;;  %v17733_v41 = vpack.c.bf16 %v25760_v16, %v25759_v10  ;;  %v642_v48 = vand.u32 4294901760, %v641_v18  ;;  %v25761_v22 = vand.u32 4294901760, %v20908_v38 }
  0xfc   : > { %v634_v27 = vsub.f32 %v21067_v58, %v25347_v61  ;;  %v21097_v1 = vsub.f32 %v20883_v3, %v25757_v2  ;;  %v25342_v3 = vand.u32 4294901760, %v21102_v5  ;;  %v21129_v25 = vsub.f32 %v20913_v23, %v25762_v15  ;;  %17052 = vmatpush3.bf16.msra.mxu1 %v17049_v63  ;;  %v25768_v15 = vld [vmem:[#allocation10_spill] sm:$0xff] }
  0xfd   : > { %14760 = vmatmul.mubr.f32.gmra.mrb[4].mxu0 %v20672_v30  ;;  %17054 = vmatprep.subr.bf16.mxu1 %v17053_v12  ;;  %v25764_v23 = vand.u32 4294901760, %v20667_v42 }
  0xfe   : > { %v635_v53 = vand.u32 4294901760, %v634_v27  ;;  %v25343_v45 = vand.u32 4294901760, %v21097_v1  ;;  %17728 = vmatpush3.bf16.msra.mxu0 %v17725_v52  ;;  %14762 = vmatprep.mubr.f32.mxu0 %v20686_v33  ;;  %v655_v17 = vsub.f32 %v21102_v5, %v25342_v3  ;;  %v21124_v52 = vsub.f32 %v20908_v38, %v25761_v22  ;;  %v25769_v3 = vld [vmem:[#allocation28_spill] sm:$0xff] }
  0xff   : > { %17730 = vmatprep.subr.bf16.mxu0 %v17729_v51  ;;  %v25341_v16 = vand.u32 4294901760, %v21129_v25  ;;  %v25763_v38 = vand.u32 4294901760, %v20662_v40  ;;  %v25766_v40 = vand.u32 4294901760, %v20935_v4 }
 0x100   : > { %v648_v2 = vsub.f32 %v21097_v1, %v25343_v45  ;;  %v17057_v27 = vpack.c.bf16 %v642_v48, %v635_v53  ;;  %v656_v18 = vand.u32 4294901760, %v655_v17  ;;  %v25340_v10 = vand.u32 4294901760, %v21124_v52  ;;  %17056 = vmatpush3.bf16.msra.mxu1 %v17053_v12  ;;  %v25767_v17 = vld [vmem:[#allocation13_spill] sm:$0xff]  ;;  %v25770_v45 = vld [vmem:[#allocation22_spill] sm:$0xff] }
 0x101   : > { %14763 = vmatmul.mubr.f32.gmra.mrb[6].mxu0 %v20700_v57  ;;  %v17737_v22 = vpack.c.bf16 %v25764_v23, %v25763_v38  ;;  %v669_v53 = vsub.f32 %v21129_v25, %v25341_v16  ;;  %v25765_v48 = vand.u32 4294901760, %v20930_v36  ;;  %v21153_v42 = vsub.f32 %v20935_v4, %v25766_v40 }
 0x102   : > { %v649_v56 = vand.u32 4294901760, %v648_v2  ;;  %17732 = vmatpush3.bf16.msra.mxu0 %v17729_v51  ;;  %14797 = vmatprep.mubr.f32.mxu0 %v20404_v20  ;;  %v662_v63 = vsub.f32 %v21124_v52, %v25340_v10  ;;  %v531_v38 = vsub.f32 %v25768_v15, %v25767_v17  ;;  %v25772_v4 = vand.u32 4294901760, %v20716_v39 }
 0x103   : > { %17734 = vmatprep.subr.bf16.mxu0 %v17733_v41  ;;  %v21148_v51 = vsub.f32 %v20930_v36, %v25765_v48  ;;  %17058 = vmatprep.subr.bf16.mxu1 %v17057_v27  ;;  %v670_v10 = vand.u32 4294901760, %v669_v53  ;;  %v541_v36 = vsub.f32 %v25770_v45, %v25769_v3  ;;  %v25345_v12 = vand.u32 4294901760, %v21153_v42 }
 0x104   : > { %v17061_v2 = vpack.c.bf16 %v656_v18, %v649_v56  ;;  %v663_v23 = vand.u32 4294901760, %v662_v63  ;;  %v25771_v56 = vand.u32 4294901760, %v20711_v35  ;;  %v21165_v48 = vand.u32 4294901760, %v531_v38  ;;  %17060 = vmatpush3.bf16.msra.mxu1 %v17057_v27 }
 0x105   : > { %v25344_v16 = vand.u32 4294901760, %v21148_v51  ;;  %v25774_v53 = vand.u32 4294901760, %v20960_v8  ;;  %v21175_v40 = vand.u32 4294901760, %v541_v36  ;;  %v683_v35 = vsub.f32 %v21153_v42, %v25345_v12  ;;  %v25779_v12 = vld [vmem:[#allocation36_spill] sm:$0xff] }
 0x106   : > { %17736 = vmatpush3.bf16.msra.mxu0 %v17733_v41  ;;  %v17741_v18 = vpack.c.bf16 %v25772_v4, %v25771_v56  ;;  %25773 = vst [vmem:[#allocation89_spill] sm:$0xff] %v21165_v48  ;;  %v25776_v39 = vand.u32 4294901760, %v20965_v32  ;;  %17062 = vmatprep.subr.bf16.mxu1 %v17061_v2  ;;  %v17065_v56 = vpack.c.bf16 %v670_v10, %v663_v23  ;;  %v25777_v4 = vld [vmem:[#allocation32_spill] sm:$0xff]  ;;  %v25782_v10 = vand.u32 4294901760, %v20742_v6  ;;  %v25786_v6 = vld [vmem:[#allocation33_spill] sm:$0xff] }
 0x107   : > { %17738 = vmatprep.subr.bf16.mxu0 %v17737_v22  ;;  %v676_v63 = vsub.f32 %v21148_v51, %v25344_v16  ;;  %v21173_v41 = vsub.f32 %v20960_v8, %v25774_v53  ;;  %25775 = vst [vmem:[#allocation90_spill] sm:$0xff] %v21175_v40  ;;  %13832 = vmatprep.mubr.f32.mxu1 %v21165_v48  ;;  %v25778_v16 = vld [vmem:[#allocation25_spill] sm:$0xff]  ;;  %v684_v36 = vand.u32 4294901760, %v683_v35 }
 0x108   : > { %v21183_v38 = vsub.f32 %v20965_v32, %v25776_v39  ;;  %v551_v8 = vsub.f32 %v25778_v16, %v25777_v4  ;;  %13833 = vmatmul.mubr.f32.gmra.mrb[2].mxu1 %v21175_v40  ;;  %v561_v61 = vsub.f32 %v25780_v0, %v25779_v12  ;;  %v25781_v39 = vand.u32 4294901760, %v20737_v46  ;;  %v25785_v40 = vld [vmem:[#allocation40_spill] sm:$0xff] }
 0x109   : > { %v677_v53 = vand.u32 4294901760, %v676_v63  ;;  %v25352_v27 = vand.u32 4294901760, %v21173_v41  ;;  %17064 = vmatpush3.bf16.msra.mxu1 %v17061_v2  ;;  %v25788_v2 = vld [vmem:[#allocation37_spill] sm:$0xff] }
 0x10a   : > { %17740 = vmatpush3.bf16.msra.mxu0 %v17737_v22  ;;  %v25354_v32 = vand.u32 4294901760, %v21183_v38  ;;  %v17745_v23 = vpack.c.bf16 %v25782_v10, %v25781_v39  ;;  %v21197_v48 = vand.u32 4294901760, %v551_v8  ;;  %v21202_v63 = vand.u32 4294901760, %v561_v61  ;;  %17066 = vmatprep.subr.bf16.mxu1 %v17065_v56 }
 0x10b   : > { %17742 = vmatprep.subr.bf16.mxu0 %v17741_v18  ;;  %v690_v22 = vsub.f32 %v21173_v41, %v25352_v27  ;;  %v17069_v46 = vpack.c.bf16 %v684_v36, %v677_v53  ;;  %v571_v39 = vsub.f32 %v25786_v6, %v25785_v40  ;;  %v25787_v27 = vld [vmem:[#allocation43_spill] sm:$0xff]  ;;  %v17085_v36 = vpack.c.bf16 %v21044_v43, %v21039_v19 }
 0x10c   : > { %25783 = vst [vmem:[#allocation91_spill] sm:$0xff] %v21197_v48  ;;  %25784 = vst [vmem:[#allocation92_spill] sm:$0xff] %v21202_v63  ;;  %v697_v35 = vsub.f32 %v21183_v38, %v25354_v32  ;;  %13835 = vmatprep.mubr.f32.mxu1 %v21197_v48  ;;  %v581_v61 = vsub.f32 %v25788_v2, %v25787_v27  ;;  %v21294_v48 = vld [vmem:[%s25141_s2 + $0x220] sm:$0xff] }
 0x10d   : > { %v691_v8 = vand.u32 4294901760, %v690_v22  ;;  %13836 = vmatmul.mubr.f32.gmra.mrb[4].mxu1 %v21202_v63  ;;  %v21213_v49 = vand.u32 4294901760, %v571_v39  ;;  %v17089_v22 = vpack.c.bf16 %v21080_v44, %v21067_v58  ;;  %v17093_v39 = vpack.c.bf16 %v21102_v5, %v21097_v1 }
 0x10e   : > { %17744 = vmatpush3.bf16.msra.mxu0 %v17741_v18  ;;  %v698_v10 = vand.u32 4294901760, %v697_v35  ;;  %17068 = vmatpush3.bf16.msra.mxu1 %v17065_v56  ;;  %v21215_v32 = vand.u32 4294901760, %v581_v61  ;;  %v17077_v18 = vpack.c.bf16 %v20994_v11, %v20955_v29  ;;  %v17081_v56 = vpack.c.bf16 %v21014_v7, %v21009_v37  ;;  %v25795_v35 = vld [vmem:[#allocation23_spill] sm:$0xff]  ;;  %v25799_v61 = vld [vmem:[#allocation82_spill] sm:$0xff] }
 0x10f   : > { %17746 = vmatprep.subr.bf16.mxu0 %v17745_v23  ;;  %25789 = vst [vmem:[#allocation40_spill] sm:$0xff] %v21213_v49  ;;  %17070 = vmatprep.subr.bf16.mxu1 %v17069_v46  ;;  %v25370_v33 = vand.u32 4294901760, %v21294_v48 }
 0x110   : > { %25790 = vst [vmem:[#allocation43_spill] sm:$0xff] %v21215_v32  ;;  %13838 = vmatprep.mubr.f32.mxu1 %v21213_v49  ;;  %v17073_v53 = vpack.c.bf16 %v698_v10, %v691_v8  ;;  %v25797_v8 = vld [vmem:[#allocation52_spill] sm:$0xff]  ;;  %v25798_v10 = vld [vmem:[#allocation30_spill] sm:$0xff] }
 0x111   : > { %13839 = vmatmul.mubr.f32.gmra.mrb[6].mxu1 %v21215_v32  ;;  %v25801_v32 = vld [vmem:[#allocation55_spill] sm:$0xff] }
 0x112   : > { %17748 = vmatpush3.bf16.msra.mxu0 %v17745_v23  ;;  %13873 = vmatprep.mubr.f32.mxu1 %v20950_v24  ;;  %v25793_v23 = vld [vmem:[#allocation19_spill] sm:$0xff] }
 0x113   : > { %17750 = vmatprep.subr.bf16.mxu0 %v20407_v55  ;;  %17072 = vmatpush3.bf16.msra.mxu1 %v17069_v46  ;;  %v25796_v46 = vld [vmem:[#allocation26_spill] sm:$0xff] }
 0x114   : > { %17074 = vmatprep.subr.bf16.mxu1 %v17073_v53 }
 0x115   : > { %14798 = vmatmul.mubr.f32.vlgmr.msra.gmra.mrb[0].mxu0 %v20509_v34 }
 0x116   : > { %17752 = vmatpush3.bf16.msra.mxu0 %v20407_v55  ;;  %14800 = vmatprep.mubr.f32.mxu0 %v20533_v47  ;;  %v25791_v55 = vld [vmem:[#allocation9_spill] sm:$0xff] }
 0x117   : > { %17754 = vmatprep.subr.bf16.mxu0 %v20425_v14  ;;  %17076 = vmatpush3.bf16.msra.mxu1 %v17073_v53  ;;  %v17097_v53 = vpack.c.bf16 %v21129_v25, %v21124_v52 }
 0x118   : > { %17078 = vmatprep.subr.bf16.mxu1 %v17077_v18 }
 0x119   : > { %14801 = vmatmul.mubr.f32.gmra.mrb[2].mxu0 %v20553_v50 }
 0x11a   : > { %17756 = vmatpush3.bf16.msra.mxu0 %v20425_v14  ;;  %14803 = vmatprep.mubr.f32.mxu0 %v20565_v9  ;;  %v25792_v14 = vld [vmem:[#allocation17_spill] sm:$0xff] }
 0x11b   : > { %17758 = vmatprep.subr.bf16.mxu0 %v20444_v26  ;;  %13874 = vmatmul.mubr.f32.vlgmr.msra.gmra.mrb[0].mxu1 %v21000_v31  ;;  %v25838_v31 = vld [vmem:[#allocation80_spill] sm:$0xff] }
 0x11c   : > { %17080 = vmatpush3.bf16.msra.mxu1 %v17077_v18  ;;  %13876 = vmatprep.mubr.f32.mxu1 %v25791_v55  ;;  %v25800_v18 = vld [vmem:[#allocation53_spill] sm:$0xff] }
 0x11d   : > { %14804 = vmatmul.mubr.f32.gmra.mrb[4].mxu0 %v20595_v62  ;;  %17082 = vmatprep.subr.bf16.mxu1 %v17081_v56 }
 0x11e   : > { %17760 = vmatpush3.bf16.msra.mxu0 %v20444_v26  ;;  %14806 = vmatprep.mubr.f32.mxu0 %v20609_v21  ;;  %v25794_v26 = vld [vmem:[#allocation51_spill] sm:$0xff] }
 0x11f   : > { %17762 = vmatprep.subr.bf16.mxu0 %v20469_v28  ;;  %13877 = vmatmul.mubr.f32.gmra.mrb[2].mxu1 %v25792_v14 }
 0x120   : > { %17084 = vmatpush3.bf16.msra.mxu1 %v17081_v56  ;;  %13879 = vmatprep.mubr.f32.mxu1 %v25793_v23  ;;  %v25819_v23 = vld [vmem:[#allocation78_spill] sm:$0xff] }
 0x121   : > { %14807 = vmatmul.mubr.f32.gmra.mrb[6].mxu0 %v20638_v54  ;;  %17086 = vmatprep.subr.bf16.mxu1 %v17085_v36 }
 0x122   : > { %17764 = vmatpush3.bf16.msra.mxu0 %v20469_v28  ;;  %14841 = vmatprep.mubr.f32.mxu0 %v20404_v20  ;;  %v21259_v28 = vld [vmem:[%s25141_s2 + $0x200] sm:$0xff]  ;;  %v21264_v20 = vld [vmem:[%s25141_s2 + $0x208] sm:$0xff] }
 0x123   : > { %17766 = vmatprep.subr.bf16.mxu0 %v25794_v26  ;;  %13880 = vmatmul.mubr.f32.gmra.mrb[4].mxu1 %v25795_v35  ;;  %v4275_v56 = vand.u32 4294901760, %v21259_v28 }
 0x124   : > { %17088 = vmatpush3.bf16.msra.mxu1 %v17085_v36  ;;  %13882 = vmatprep.mubr.f32.mxu1 %v25796_v46  ;;  %v4278_v36 = vand.u32 4294901760, %v21264_v20 }
 0x125   : > { %17090 = vmatprep.subr.bf16.mxu1 %v17089_v22 }
 0x126   : > { %17768 = vmatpush3.bf16.msra.mxu0 %v25794_v26  ;;  %v21276_v26 = vld [vmem:[%s25141_s2 + $0x210] sm:$0xff]  ;;  %v21287_v49 = vpack.c.bf16 %v4278_v36, %v4275_v56 }
 0x127   : > { %17770 = vmatprep.subr.bf16.mxu0 %v25797_v8  ;;  %13883 = vmatmul.mubr.f32.gmra.mrb[6].mxu1 %v25798_v10 }
 0x128   : > { %17092 = vmatpush3.bf16.msra.mxu1 %v17089_v22  ;;  %13917 = vmatprep.mubr.f32.mxu1 %v25799_v61  ;;  %v21281_v22 = vld [vmem:[%s25141_s2 + $0x218] sm:$0xff]  ;;  %25802 = vst [vmem:[#allocation51_spill] sm:$0xff] %v21287_v49  ;;  %v25368_v61 = vand.u32 4294901760, %v21276_v26 }
 0x129   : > { %17094 = vmatprep.subr.bf16.mxu1 %v17093_v39  ;;  %v25367_v63 = vand.u32 4294901760, %v21281_v22 }
 0x12a   : > { %17772 = vmatpush3.bf16.msra.mxu0 %v25797_v8  ;;  %v17101_v8 = vpack.c.bf16 %v21153_v42, %v21148_v51 }
 0x12b   : > { %17774 = vmatprep.subr.bf16.mxu0 %v25800_v18  ;;  %v21309_v57 = vpack.c.bf16 %v25367_v63, %v25368_v61 }
 0x12c   : > { %17096 = vmatpush3.bf16.msra.mxu1 %v17093_v39  ;;  %v21299_v39 = vld [vmem:[%s25141_s2 + $0x228] sm:$0xff] }
 0x12d   : > { %17098 = vmatprep.subr.bf16.mxu1 %v17097_v53  ;;  %25803 = vst [vmem:[#allocation52_spill] sm:$0xff] %v21309_v57  ;;  %v25369_v30 = vand.u32 4294901760, %v21299_v39 }
 0x12e   : > { %17776 = vmatpush3.bf16.msra.mxu0 %v25800_v18  ;;  %v17105_v18 = vpack.c.bf16 %v21183_v38, %v21173_v41 }
 0x12f   : > { %17778 = vmatprep.subr.bf16.mxu0 %v25801_v32  ;;  %v21331_v63 = vpack.c.bf16 %v25369_v30, %v25370_v33  ;;  %v21386_v33 = vsub.f32 %v21259_v28, %v4275_v56  ;;  %v25811_v56 = vld [vmem:[#allocation77_spill] sm:$0xff] }
 0x130   : > { %17100 = vmatpush3.bf16.msra.mxu1 %v17097_v53  ;;  %v21316_v53 = vld [vmem:[%s25141_s2 + $0x230] sm:$0xff] }
 0x131   : > { %17102 = vmatprep.subr.bf16.mxu1 %v17101_v8  ;;  %25804 = vst [vmem:[#allocation53_spill] sm:$0xff] %v21331_v63  ;;  %v25376_v61 = vand.u32 4294901760, %v21316_v53 }
 0x132   : > { %17780 = vmatpush3.bf16.msra.mxu0 %v25801_v32  ;;  %v21321_v32 = vld [vmem:[%s25141_s2 + $0x238] sm:$0xff] }
 0x133   : > { %17782 = vmatprep.subr.bf16.mxu0 %v21287_v49  ;;  %v25375_v60 = vand.u32 4294901760, %v21321_v32 }
 0x134   : > { %17104 = vmatpush3.bf16.msra.mxu1 %v17101_v8  ;;  %v21343_v8 = vld [vmem:[%s25141_s2 + $0x248] sm:$0xff] }
 0x135   : > { %14842 = vmatmul.mubr.f32.vlgmr.msra.gmra.mrb[0].mxu0 %v20509_v34  ;;  %17106 = vmatprep.subr.bf16.mxu1 %v17105_v18  ;;  %v21338_v34 = vld [vmem:[%s25141_s2 + $0x240] sm:$0xff]  ;;  %v21354_v30 = vpack.c.bf16 %v25375_v60, %v25376_v61  ;;  %v25807_v60 = vld [vmem:[#allocation76_spill] sm:$0xff] }
 0x136   : > { %17784 = vmatpush3.bf16.msra.mxu0 %v21287_v49  ;;  %14844 = vmatprep.mubr.f32.mxu0 %v20533_v47  ;;  %v21367_v49 = vld [vmem:[%s25141_s2 + $0x258] sm:$0xff]  ;;  %v21377_v61 = vld [vmem:[%s25141_s2 + $0x260] sm:$0xff] }
 0x137   : > { %17786 = vmatprep.subr.bf16.mxu0 %v21309_v57  ;;  %25806 = vst [vmem:[#allocation55_spill] sm:$0xff] %v21354_v30  ;;  %v25382_v35 = vand.u32 4294901760, %v21367_v49 }
 0x138   : > { %17108 = vmatpush3.bf16.msra.mxu1 %v17105_v18  ;;  %v21382_v18 = vld [vmem:[%s25141_s2 + $0x268] sm:$0xff] }
 0x139   : > { %14845 = vmatmul.mubr.f32.gmra.mrb[2].mxu0 %v20553_v50  ;;  %17110 = vmatprep.subr.bf16.mxu1 %v25805_v59 }
 0x13a   : > { %17788 = vmatpush3.bf16.msra.mxu0 %v21309_v57  ;;  %14847 = vmatprep.mubr.f32.mxu0 %v20565_v9  ;;  %v21362_v57 = vld [vmem:[%s25141_s2 + $0x250] sm:$0xff] }
 0x13b   : > { %17790 = vmatprep.subr.bf16.mxu0 %v21331_v63  ;;  %13918 = vmatmul.mubr.f32.vlgmr.msra.gmra.mrb[0].mxu1 %v21023_v13  ;;  %v25808_v13 = vand.u32 4294901760, %v21338_v34  ;;  %v25383_v46 = vand.u32 4294901760, %v21362_v57 }
 0x13c   : > { %17112 = vmatpush3.bf16.msra.mxu1 %v25805_v59  ;;  %13920 = vmatprep.mubr.f32.mxu1 %v25768_v15  ;;  %v21389_v15 = vsub.f32 %v21264_v20, %v4278_v36  ;;  %v21421_v20 = vld [vmem:[%s25141_s2 + $0x270] sm:$0xff]  ;;  %v25814_v36 = vand.u32 4294901760, %v21276_v26 }
 0x13d   : > { %14848 = vmatmul.mubr.f32.gmra.mrb[4].mxu0 %v20595_v62  ;;  %17114 = vmatprep.subr.bf16.mxu1 %v25807_v60  ;;  %v21416_v28 = vpack.c.bf16 %v25382_v35, %v25383_v46  ;;  %v25816_v46 = vand.u32 4294901760, %v21377_v61 }
 0x13e   : > { %17792 = vmatpush3.bf16.msra.mxu0 %v21331_v63  ;;  %14850 = vmatprep.mubr.f32.mxu0 %v20609_v21  ;;  %v25809_v63 = vand.u32 4294901760, %v21343_v8 }
 0x13f   : > { %17794 = vmatprep.subr.bf16.mxu0 %v21354_v30  ;;  %13921 = vmatmul.mubr.f32.gmra.mrb[2].mxu1 %v25770_v45  ;;  %v25817_v45 = vand.u32 4294901760, %v21382_v18 }
 0x140   : > { %v21396_v10 = vpack.c.bf16 %v25809_v63, %v25808_v13  ;;  %17116 = vmatpush3.bf16.msra.mxu1 %v25807_v60  ;;  %13923 = vmatprep.mubr.f32.mxu1 %v25778_v16  ;;  %v25812_v13 = vld [vmem:[#allocation67_spill] sm:$0xff]  ;;  %v21431_v63 = vsub.f32 %v21276_v26, %v25814_v36  ;;  %v25815_v16 = vand.u32 4294901760, %v21281_v22 }
 0x141   : > { %14851 = vmatmul.mubr.f32.gmra.mrb[6].mxu0 %v20638_v54  ;;  %17118 = vmatprep.subr.bf16.mxu1 %v25811_v56  ;;  %25813 = vst [vmem:[#allocation67_spill] sm:$0xff] %v21416_v28 }
 0x142   : > { %25810 = vst [vmem:[#allocation75_spill] sm:$0xff] %v21396_v10  ;;  %17796 = vmatpush3.bf16.msra.mxu0 %v21354_v30  ;;  %14885 = vmatprep.mubr.f32.mxu0 %v25812_v13  ;;  %v21426_v13 = vld [vmem:[%s25141_s2 + $0x278] sm:$0xff]  ;;  %v21436_v35 = vsub.f32 %v21281_v22, %v25815_v16  ;;  %v21445_v30 = vpack.c.bf16 %v25817_v45, %v25816_v46  ;;  %v25820_v22 = vand.u32 4294901760, %v21386_v33  ;;  %v25823_v16 = vand.u32 4294901760, %v21299_v39  ;;  %v25826_v46 = vld [vmem:[#allocation84_spill] sm:$0xff]  ;;  %v25829_v45 = vld [vmem:[#allocation79_spill] sm:$0xff] }
 0x143   : > { %17798 = vmatprep.subr.bf16.mxu0 %v21396_v10  ;;  %13924 = vmatmul.mubr.f32.gmra.mrb[4].mxu1 %v25780_v0 }
 0x144   : > { %17120 = vmatpush3.bf16.msra.mxu1 %v25811_v56  ;;  %13926 = vmatprep.mubr.f32.mxu1 %v25786_v6  ;;  %25818 = vst [vmem:[#allocation93_spill] sm:$0xff] %v21445_v30  ;;  %v4439_v36 = vsub.f32 %v21386_v33, %v25820_v22  ;;  %v25821_v6 = vand.u32 4294901760, %v21389_v15  ;;  %v21468_v56 = vsub.f32 %v21299_v39, %v25823_v16  ;;  %v3286_v22 = vld [vmem:[#allocation2 + $0x61] sm:$0xff]  ;;  %v25830_v39 = vand.u32 4294901760, %v21421_v20 }
 0x145   : > { %17122 = vmatprep.subr.bf16.mxu1 %v25819_v23  ;;  %v25831_v16 = vand.u32 4294901760, %v21426_v13  ;;  %v25835_v60 = vand.u32 4294901760, %v21436_v35 }
 0x146   : > { %17800 = vmatpush3.bf16.msra.mxu0 %v21396_v10  ;;  %v4446_v0 = vsub.f32 %v21389_v15, %v25821_v6  ;;  %v25822_v10 = vand.u32 4294901760, %v21294_v48  ;;  %v25824_v6 = vand.u32 4294901760, %v21316_v53  ;;  %v25842_v21 = vand.u32 4294901760, %v21468_v56 }
 0x147   : > { %17802 = vmatprep.subr.bf16.mxu0 %v21416_v28  ;;  %13927 = vmatmul.mubr.f32.gmra.mrb[6].mxu1 %v25788_v2  ;;  %v21489_v2 = vpack.c.bf16 %v25831_v16, %v25830_v39  ;;  %v25836_v16 = vand.u32 4294901760, %v21338_v34  ;;  %v25839_v39 = vand.u32 4294901760, %v21343_v8 }
 0x148   : > { %v21463_v26 = vsub.f32 %v21294_v48, %v25822_v10  ;;  %v21474_v14 = vsub.f32 %v21316_v53, %v25824_v6  ;;  %17124 = vmatpush3.bf16.msra.mxu1 %v25819_v23  ;;  %13961 = vmatprep.mubr.f32.mxu1 %v25826_v46  ;;  %v25827_v48 = vand.u32 4294901760, %v21321_v32  ;;  %v4440_v53 = vand.u32 4294901760, %v4439_v36  ;;  %v3287_v46 = vld [vmem:[#allocation2 + $0x69] sm:$0xff] }
 0x149   : > { %17126 = vmatprep.subr.bf16.mxu1 %v25829_v45  ;;  %25832 = vst [vmem:[#allocation96_spill] sm:$0xff] %v21489_v2  ;;  %v4447_v6 = vand.u32 4294901760, %v4446_v0  ;;  %v21491_v23 = vand.u32 4294901760, %v3286_v22  ;;  %v21508_v55 = vsub.f32 %v21338_v34, %v25836_v16  ;;  %v21517_v36 = vsub.f32 %v21343_v8, %v25839_v39 }
 0x14a   : > { %25825 = vst [vmem:[#allocation94_spill] sm:$0xff] %v21474_v14  ;;  %v21481_v10 = vsub.f32 %v21321_v32, %v25827_v48  ;;  %17804 = vmatpush3.bf16.msra.mxu0 %v21416_v28  ;;  %v25834_v32 = vand.u32 4294901760, %v21431_v63  ;;  %v4460_v28 = vsub.f32 %v21436_v35, %v25835_v60  ;;  %v25841_v16 = vand.u32 4294901760, %v21463_v26 }
 0x14b   : > { %25833 = vst [vmem:[#allocation97_spill] sm:$0xff] %v21491_v23  ;;  %17806 = vmatprep.subr.bf16.mxu0 %v21445_v30  ;;  %v17813_v60 = vpack.c.bf16 %v4447_v6, %v4440_v53  ;;  %v21520_v54 = vsub.f32 %v3286_v22, %v21491_v23  ;;  %v4474_v53 = vsub.f32 %v21468_v56, %v25842_v21  ;;  %v25843_v6 = vand.u32 4294901760, %v21474_v14  ;;  %v25850_v21 = vld [vmem:[#allocation69_spill] sm:$0xff] }
 0x14c   : > { %25828 = vst [vmem:[#allocation95_spill] sm:$0xff] %v21481_v10  ;;  %v4453_v48 = vsub.f32 %v21431_v63, %v25834_v32  ;;  %17128 = vmatpush3.bf16.msra.mxu1 %v25829_v45  ;;  %v21510_v32 = vand.u32 4294901760, %v3287_v46  ;;  %v4461_v34 = vand.u32 4294901760, %v4460_v28  ;;  %v4467_v45 = vsub.f32 %v21463_v26, %v25841_v16  ;;  %v25846_v16 = vld [vmem:[#allocation81_spill] sm:$0xff] }
 0x14d   : > { %17130 = vmatprep.subr.bf16.mxu1 %v25838_v31  ;;  %25840 = vst [vmem:[#allocation99_spill] sm:$0xff] %v21520_v54  ;;  %v4481_v8 = vsub.f32 %v21474_v14, %v25843_v6  ;;  %v25844_v22 = vand.u32 4294901760, %v21481_v10  ;;  %v21554_v28 = vand.u32 4294901760, %v21520_v54  ;;  %v4475_v23 = vand.u32 4294901760, %v4474_v53 }
 0x14e   : > { %25837 = vst [vmem:[#allocation98_spill] sm:$0xff] %v21510_v32  ;;  %17808 = vmatpush3.bf16.msra.mxu0 %v21445_v30  ;;  %v4454_v0 = vand.u32 4294901760, %v4453_v48  ;;  %v21538_v48 = vsub.f32 %v3287_v46, %v21510_v32  ;;  %v25847_v30 = vand.u32 4294901760, %v21362_v57  ;;  %v4468_v32 = vand.u32 4294901760, %v4467_v45 }
 0x14f   : > { %17810 = vmatprep.subr.bf16.mxu0 %v21489_v2  ;;  %v4488_v39 = vsub.f32 %v21481_v10, %v25844_v22  ;;  %25849 = vst [vmem:[#allocation101_spill] sm:$0xff] %v21554_v28  ;;  %v25854_v14 = vand.u32 4294901760, %v20955_v29  ;;  %v25855_v45 = vand.u32 4294901760, %v20994_v11  ;;  %v25858_v29 = vand.u32 4294901760, %v21377_v61 }
 0x150   : > { %17132 = vmatpush3.bf16.msra.mxu1 %v25838_v31  ;;  %25845 = vst [vmem:[#allocation100_spill] sm:$0xff] %v21538_v48  ;;  %v21546_v6 = vsub.f32 %v21362_v57, %v25847_v30  ;;  %v25848_v31 = vand.u32 4294901760, %v21367_v49  ;;  %v17817_v46 = vpack.c.bf16 %v4461_v34, %v4454_v0  ;;  %v25851_v30 = vand.u32 4294901760, %v21508_v55 }
 0x151   : > { %17134 = vmatprep.subr.bf16.mxu1 %v25846_v16  ;;  %v4489_v10 = vand.u32 4294901760, %v4488_v39  ;;  %v17141_v0 = vpack.c.bf16 %v25855_v45, %v25854_v14  ;;  %v25856_v34 = vand.u32 4294901760, %v21517_v36  ;;  %v21580_v11 = vsub.f32 %v21377_v61, %v25858_v29 }
 0x152   : > { %17812 = vmatpush3.bf16.msra.mxu0 %v21489_v2  ;;  %v21551_v22 = vsub.f32 %v21367_v49, %v25848_v31  ;;  %v4482_v2 = vand.u32 4294901760, %v4481_v8  ;;  %v4495_v57 = vsub.f32 %v21508_v55, %v25851_v30  ;;  %v21562_v31 = vand.u32 4294901760, %v21538_v48  ;;  %v25853_v49 = vld [vmem:[#allocation83_spill] sm:$0xff] }
 0x153   : > { %17814 = vmatprep.subr.bf16.mxu0 %v17813_v60  ;;  %v4502_v53 = vsub.f32 %v21517_v36, %v25856_v34  ;;  %v25857_v8 = vld [vmem:[#allocation71_spill] sm:$0xff]  ;;  %v4418_v30 = vsub.f32 %v21520_v54, %v21554_v28  ;;  %v25859_v14 = vand.u32 4294901760, %v21382_v18  ;;  %v25862_v61 = vand.u32 4294901760, %v21014_v7 }
 0x154   : > { %17136 = vmatpush3.bf16.msra.mxu1 %v25846_v16  ;;  %25852 = vst [vmem:[#allocation69_spill] sm:$0xff] %v21562_v31  ;;  %v17821_v16 = vpack.c.bf16 %v4475_v23, %v4468_v32  ;;  %v17825_v45 = vpack.c.bf16 %v4489_v10, %v4482_v2  ;;  %v4496_v34 = vand.u32 4294901760, %v4495_v57  ;;  %v4428_v39 = vsub.f32 %v21538_v48, %v21562_v31  ;;  %v25865_v57 = vld [vmem:[#allocation73_spill] sm:$0xff] }
 0x155   : > { %14886 = vmatmul.mubr.f32.vlgmr.msra.gmra.mrb[0].mxu0 %v25850_v21  ;;  %17138 = vmatprep.subr.bf16.mxu1 %v25853_v49  ;;  %v25860_v21 = vld [vmem:[#allocation72_spill] sm:$0xff]  ;;  %v25861_v23 = vand.u32 4294901760, %v21009_v37  ;;  %v4503_v29 = vand.u32 4294901760, %v4502_v53  ;;  %v25864_v2 = vand.u32 4294901760, %v21551_v22  ;;  %v25872_v7 = vand.u32 4294901760, %v21039_v19 }
 0x156   : > { %17816 = vmatpush3.bf16.msra.mxu0 %v17813_v60  ;;  %14888 = vmatprep.mubr.f32.mxu0 %v25857_v8  ;;  %v21585_v60 = vsub.f32 %v21382_v18, %v25859_v14  ;;  %v25863_v18 = vand.u32 4294901760, %v21546_v6  ;;  %v382_v8 = vld [vmem:[#allocation2] sm:$0xff] }
 0x157   : > { %17818 = vmatprep.subr.bf16.mxu0 %v17817_v46  ;;  %v17145_v32 = vpack.c.bf16 %v25862_v61, %v25861_v23  ;;  %v4516_v10 = vsub.f32 %v21551_v22, %v25864_v2  ;;  %v25868_v23 = vand.u32 4294901760, %v21426_v13  ;;  %v21619_v2 = vand.u32 4294901760, %v4428_v39 }
 0x158   : > { %17140 = vmatpush3.bf16.msra.mxu1 %v25853_v49  ;;  %v4509_v14 = vsub.f32 %v21546_v6, %v25863_v18  ;;  %v25869_v18 = vld [vmem:[#allocation87_spill] sm:$0xff]  ;;  %v17829_v37 = vpack.c.bf16 %v4503_v29, %v4496_v34  ;;  %v25875_v39 = vand.u32 4294901760, %v21585_v60  ;;  %v25877_v34 = vand.u32 4294901760, %v21080_v44 }
 0x159   : > { %14889 = vmatmul.mubr.f32.gmra.mrb[2].mxu0 %v25860_v21  ;;  %17142 = vmatprep.subr.bf16.mxu1 %v17141_v0  ;;  %v21602_v21 = vand.u32 4294901760, %v4418_v30  ;;  %v21614_v61 = vsub.f32 %v21426_v13, %v25868_v23  ;;  %v25870_v30 = vld [vmem:[#allocation74_spill] sm:$0xff]  ;;  %25871 = vst [vmem:[#allocation102_spill] sm:$0xff] %v21619_v2  ;;  %v4517_v13 = vand.u32 4294901760, %v4516_v10  ;;  %v25879_v44 = vand.u32 4294901760, %v21102_v5 }
 0x15a   : > { %17820 = vmatpush3.bf16.msra.mxu0 %v17817_v46  ;;  %14891 = vmatprep.mubr.f32.mxu0 %v25865_v57  ;;  %v25867_v46 = vand.u32 4294901760, %v21421_v20  ;;  %v4510_v57 = vand.u32 4294901760, %v4509_v14  ;;  %v25882_v5 = vand.u32 4294901760, %v21148_v51  ;;  %v17849_v51 = vpack.c.bf16 %v21436_v35, %v21431_v63 }
 0x15b   : > { %25866 = vst [vmem:[#allocation83_spill] sm:$0xff] %v21602_v21  ;;  %17822 = vmatprep.subr.bf16.mxu0 %v17821_v16  ;;  %13962 = vmatmul.mubr.f32.vlgmr.msra.gmra.mrb[0].mxu1 %v25869_v18  ;;  %v25920_v18 = vld [vmem:[#allocation75_spill] sm:$0xff] }
 0x15c   : > { %v21609_v53 = vsub.f32 %v21421_v20, %v25867_v46  ;;  %17144 = vmatpush3.bf16.msra.mxu1 %v17141_v0  ;;  %13964 = vmatprep.mubr.f32.mxu1 %v25767_v17  ;;  %v25873_v20 = vand.u32 4294901760, %v21044_v43  ;;  %v25874_v0 = vand.u32 4294901760, %v21580_v11  ;;  %v4530_v17 = vsub.f32 %v21585_v60, %v25875_v39 }
 0x15d   : > { %14892 = vmatmul.mubr.f32.gmra.mrb[4].mxu0 %v25870_v30  ;;  %17146 = vmatprep.subr.bf16.mxu1 %v17145_v32  ;;  %v25419_v43 = vand.u32 4294901760, %v21614_v61  ;;  %v17833_v14 = vpack.c.bf16 %v4517_v13, %v4510_v57 }
 0x15e   : > { %v17149_v46 = vpack.c.bf16 %v25873_v20, %v25872_v7  ;;  %17824 = vmatpush3.bf16.msra.mxu0 %v17821_v16  ;;  %14894 = vmatprep.mubr.f32.mxu0 %v21602_v21  ;;  %v4523_v23 = vsub.f32 %v21580_v11, %v25874_v0  ;;  %v25420_v19 = vand.u32 4294901760, %v21609_v53  ;;  %v25876_v16 = vand.u32 4294901760, %v21067_v58  ;;  %v21854_v21 = vld [vmem:[%s25141_s2 + $0x60] sm:$0xff] }
 0x15f   : > { %17826 = vmatprep.subr.bf16.mxu0 %v17825_v45  ;;  %13965 = vmatmul.mubr.f32.gmra.mrb[2].mxu1 %v25769_v3  ;;  %v4531_v7 = vand.u32 4294901760, %v4530_v17  ;;  %v4544_v20 = vsub.f32 %v21614_v61, %v25419_v43  ;;  %v25878_v58 = vand.u32 4294901760, %v21097_v1  ;;  %v25913_v43 = vld [vmem:[#allocation64_spill] sm:$0xff]  ;;  %v25919_v3 = vld [vmem:[#allocation57_spill] sm:$0xff]  ;;  %v25458_v30 = vand.u32 4294901760, %v21854_v21 }
 0x160   : > { %17148 = vmatpush3.bf16.msra.mxu1 %v17145_v32  ;;  %13967 = vmatprep.mubr.f32.mxu1 %v25777_v4  ;;  %v17153_v29 = vpack.c.bf16 %v25877_v34, %v25876_v16  ;;  %v4524_v10 = vand.u32 4294901760, %v4523_v23  ;;  %v4537_v32 = vsub.f32 %v21609_v53, %v25420_v19  ;;  %v25888_v16 = vld [vmem:[#allocation95_spill] sm:$0xff]  ;;  %v25914_v19 = vld [vmem:[#allocation53_spill] sm:$0xff] }
 0x161   : > { %14895 = vmatmul.mubr.f32.gmra.mrb[6].mxu0 %v21619_v2  ;;  %17150 = vmatprep.subr.bf16.mxu1 %v17149_v46  ;;  %v4545_v13 = vand.u32 4294901760, %v4544_v20  ;;  %v17861_v20 = vpack.c.bf16 %v21517_v36, %v21508_v55  ;;  %v25922_v2 = vld [vmem:[#allocation67_spill] sm:$0xff] }
 0x162   : > { %17828 = vmatpush3.bf16.msra.mxu0 %v17825_v45  ;;  %14929 = vmatprep.mubr.f32.mxu0 %v20533_v47  ;;  %v17157_v45 = vpack.c.bf16 %v25879_v44, %v25878_v58  ;;  %v17837_v17 = vpack.c.bf16 %v4531_v7, %v4524_v10  ;;  %v4538_v57 = vand.u32 4294901760, %v4537_v32  ;;  %v25891_v10 = vld [vmem:[#allocation62_spill] sm:$0xff]  ;;  %v25892_v7 = vld [vmem:[#allocation76_spill] sm:$0xff]  ;;  %v25893_v32 = vld [vmem:[#allocation97_spill] sm:$0xff] }
 0x163   : > { %17830 = vmatprep.subr.bf16.mxu0 %v17829_v37  ;;  %13968 = vmatmul.mubr.f32.gmra.mrb[4].mxu1 %v25779_v12  ;;  %v25894_v58 = vld [vmem:[#allocation17_spill] sm:$0xff]  ;;  %v25895_v44 = vld [vmem:[#allocation19_spill] sm:$0xff] }
 0x164   : > { %17152 = vmatpush3.bf16.msra.mxu1 %v17149_v46  ;;  %13970 = vmatprep.mubr.f32.mxu1 %v25785_v40  ;;  %v25880_v46 = vand.u32 4294901760, %v21124_v52  ;;  %v25881_v40 = vand.u32 4294901760, %v21129_v25  ;;  %v17841_v1 = vpack.c.bf16 %v4545_v13, %v4538_v57  ;;  %v25884_v52 = vand.u32 4294901760, %v21173_v41  ;;  %v25886_v41 = vld [vmem:[#allocation59_spill] sm:$0xff] }
 0x165   : > { %17154 = vmatprep.subr.bf16.mxu1 %v17153_v29  ;;  %v25885_v25 = vand.u32 4294901760, %v21183_v38  ;;  %v25887_v38 = vld [vmem:[#allocation94_spill] sm:$0xff]  ;;  %v17865_v57 = vpack.c.bf16 %v21551_v22, %v21546_v6  ;;  %v25899_v13 = vld [vmem:[#allocation23_spill] sm:$0xff] }
 0x166   : > { %17832 = vmatpush3.bf16.msra.mxu0 %v17829_v37  ;;  %v17161_v0 = vpack.c.bf16 %v25881_v40, %v25880_v46  ;;  %v25883_v37 = vand.u32 4294901760, %v21153_v42  ;;  %v17853_v42 = vpack.c.bf16 %v21468_v56, %v21463_v26  ;;  %v17857_v34 = vpack.c.bf16 %v25888_v16, %v25887_v38  ;;  %v25900_v46 = vld [vmem:[#allocation26_spill] sm:$0xff]  ;;  %v374_v12 = vld [vmem:[%s20062_s29 + $0x28] sm:$0x3] }
 0x167   : > { %17834 = vmatprep.subr.bf16.mxu0 %v17833_v14  ;;  %13971 = vmatmul.mubr.f32.gmra.mrb[6].mxu1 %v25787_v27  ;;  %v17845_v27 = vpack.c.bf16 %v21389_v15, %v21386_v33  ;;  %v17169_v39 = vpack.c.bf16 %v25885_v25, %v25884_v52  ;;  %v25901_v40 = vld [vmem:[#allocation78_spill] sm:$0xff]  ;;  %v21720_v52 = vld [vmem:[%s25141_s2 + $0x8] sm:$0xff]  ;;  %v25905_v25 = vld [vmem:[#allocation81_spill] sm:$0xff]  ;;  %381 = vst [vmem:[#allocation2 + $0x88] sm:$0x3] %v374_v12 }
 0x168   : > { %17156 = vmatpush3.bf16.msra.mxu1 %v17153_v29  ;;  %14005 = vmatprep.mubr.f32.mxu1 %v20950_v24  ;;  %v17165_v23 = vpack.c.bf16 %v25883_v37, %v25882_v5  ;;  %v25889_v29 = vld [vmem:[#allocation11_spill] sm:$0xff]  ;;  %v17873_v37 = vpack.c.bf16 %v21614_v61, %v21609_v53  ;;  %v21830_v12 = vld [vmem:[%s25141_s2 + $0x50] sm:$0xff] }
 0x169   : > { %17158 = vmatprep.subr.bf16.mxu1 %v17157_v45  ;;  %v25903_v5 = vld [vmem:[#allocation79_spill] sm:$0xff] }
 0x16a   : > { %17836 = vmatpush3.bf16.msra.mxu0 %v17833_v14  ;;  %v25890_v14 = vld [vmem:[#allocation9_spill] sm:$0xff] }
 0x16b   : > { %17838 = vmatprep.subr.bf16.mxu0 %v17837_v17 }
 0x16c   : > { %17160 = vmatpush3.bf16.msra.mxu1 %v17157_v45  ;;  %v25897_v45 = vld [vmem:[#allocation77_spill] sm:$0xff] }
 0x16d   : > { %17162 = vmatprep.subr.bf16.mxu1 %v17161_v0 }
 0x16e   : > { %17840 = vmatpush3.bf16.msra.mxu0 %v17837_v17  ;;  %v25898_v17 = vld [vmem:[#allocation54_spill] sm:$0xff] }
 0x16f   : > { %17842 = vmatprep.subr.bf16.mxu0 %v17841_v1 }
 0x170   : > { %17164 = vmatpush3.bf16.msra.mxu1 %v17161_v0  ;;  %v17869_v0 = vpack.c.bf16 %v21585_v60, %v21580_v11 }
 0x171   : > { %17166 = vmatprep.subr.bf16.mxu1 %v17165_v23 }
 0x172   : > { %17844 = vmatpush3.bf16.msra.mxu0 %v17841_v1  ;;  %v25902_v1 = vld [vmem:[#allocation30_spill] sm:$0xff] }
 0x173   : > { %17846 = vmatprep.subr.bf16.mxu0 %v17845_v27 }
 0x174   : > { %17168 = vmatpush3.bf16.msra.mxu1 %v17165_v23  ;;  %v25904_v23 = vld [vmem:[#allocation80_spill] sm:$0xff] }
 0x175   : > { %14930 = vmatmul.mubr.f32.vlgmr.msra.gmra.mrb[0].mxu0 %v20553_v50  ;;  %17170 = vmatprep.subr.bf16.mxu1 %v17169_v39 }
 0x176   : > { %17848 = vmatpush3.bf16.msra.mxu0 %v17845_v27  ;;  %14932 = vmatprep.mubr.f32.mxu0 %v20565_v9  ;;  %v21715_v27 = vld [vmem:[%s25141_s2] sm:$0xff] }
 0x177   : > { %17850 = vmatprep.subr.bf16.mxu0 %v17849_v51 }
 0x178   : > { %17172 = vmatpush3.bf16.msra.mxu1 %v17169_v39  ;;  %v25424_v39 = vand.u32 4294901760, %v21715_v27 }
 0x179   : > { %14933 = vmatmul.mubr.f32.gmra.mrb[2].mxu0 %v20595_v62  ;;  %17174 = vmatprep.subr.bf16.mxu1 %v25805_v59 }
 0x17a   : > { %17852 = vmatpush3.bf16.msra.mxu0 %v17849_v51  ;;  %14935 = vmatprep.mubr.f32.mxu0 %v25886_v41  ;;  %v25423_v51 = vand.u32 4294901760, %v21720_v52 }
 0x17b   : > { %17854 = vmatprep.subr.bf16.mxu0 %v17853_v42  ;;  %14006 = vmatmul.mubr.f32.vlgmr.msra.gmra.mrb[0].mxu1 %v25889_v29 }
 0x17c   : > { %17176 = vmatpush3.bf16.msra.mxu1 %v25805_v59  ;;  %14008 = vmatprep.mubr.f32.mxu1 %v25890_v14  ;;  %v25896_v59 = vld [vmem:[#allocation98_spill] sm:$0xff] }
 0x17d   : > { %14936 = vmatmul.mubr.f32.gmra.mrb[4].mxu0 %v25891_v10  ;;  %17178 = vmatprep.subr.bf16.mxu1 %v25892_v7 }
 0x17e   : > { %17856 = vmatpush3.bf16.msra.mxu0 %v17853_v42  ;;  %14938 = vmatprep.mubr.f32.mxu0 %v25893_v32  ;;  %v25906_v42 = vld [vmem:[#allocation51_spill] sm:$0xff] }
 0x17f   : > { %17858 = vmatprep.subr.bf16.mxu0 %v17857_v34  ;;  %14009 = vmatmul.mubr.f32.gmra.mrb[2].mxu1 %v25894_v58 }
 0x180   : > { %17180 = vmatpush3.bf16.msra.mxu1 %v25892_v7  ;;  %14011 = vmatprep.mubr.f32.mxu1 %v25895_v44  ;;  %v21735_v7 = vld [vmem:[%s25141_s2 + $0x18] sm:$0xff] }
 0x181   : > { %14939 = vmatmul.mubr.f32.gmra.mrb[6].mxu0 %v25896_v59  ;;  %17182 = vmatprep.subr.bf16.mxu1 %v25897_v45  ;;  %v25939_v59 = vand.u32 4294901760, %v21436_v35 }
 0x182   : > { %17860 = vmatpush3.bf16.msra.mxu0 %v17857_v34  ;;  %14973 = vmatprep.mubr.f32.mxu0 %v25898_v17  ;;  %v21730_v34 = vld [vmem:[%s25141_s2 + $0x10] sm:$0xff] }
 0x183   : > { %17862 = vmatprep.subr.bf16.mxu0 %v17861_v20  ;;  %14012 = vmatmul.mubr.f32.gmra.mrb[4].mxu1 %v25899_v13  ;;  %v25422_v17 = vand.u32 4294901760, %v21730_v34 }
 0x184   : > { %17184 = vmatpush3.bf16.msra.mxu1 %v25897_v45  ;;  %14014 = vmatprep.mubr.f32.mxu1 %v25900_v46  ;;  %v21743_v45 = vpack.c.bf16 %v25423_v51, %v25424_v39  ;;  %v25915_v51 = vld [vmem:[#allocation66_spill] sm:$0xff] }
 0x185   : > { %17186 = vmatprep.subr.bf16.mxu1 %v25901_v40 }
 0x186   : > { %17864 = vmatpush3.bf16.msra.mxu0 %v17861_v20  ;;  %v25907_v20 = vld [vmem:[#allocation56_spill] sm:$0xff]  ;;  %25908 = vst [vmem:[#allocation59_spill] sm:$0xff] %v21743_v45 }
 0x187   : > { %17866 = vmatprep.subr.bf16.mxu0 %v17865_v57  ;;  %14015 = vmatmul.mubr.f32.gmra.mrb[6].mxu1 %v25902_v1 }
 0x188   : > { %17188 = vmatpush3.bf16.msra.mxu1 %v25901_v40  ;;  %14049 = vmatprep.mubr.f32.mxu1 %v20950_v24  ;;  %v25909_v40 = vld [vmem:[#allocation58_spill] sm:$0xff] }
 0x189   : > { %17190 = vmatprep.subr.bf16.mxu1 %v25903_v5 }
 0x18a   : > { %17868 = vmatpush3.bf16.msra.mxu0 %v17865_v57  ;;  %v25421_v57 = vand.u32 4294901760, %v21735_v7 }
 0x18b   : > { %17870 = vmatprep.subr.bf16.mxu0 %v17869_v0 }
 0x18c   : > { %17192 = vmatpush3.bf16.msra.mxu1 %v25903_v5  ;;  %v21754_v5 = vld [vmem:[%s25141_s2 + $0x20] sm:$0xff] }
 0x18d   : > { %17194 = vmatprep.subr.bf16.mxu1 %v25904_v23  ;;  %v25941_v35 = vand.u32 4294901760, %v21754_v5 }
 0x18e   : > { %17872 = vmatpush3.bf16.msra.mxu0 %v17869_v0  ;;  %v25910_v0 = vld [vmem:[#allocation52_spill] sm:$0xff] }
 0x18f   : > { %17874 = vmatprep.subr.bf16.mxu0 %v17873_v37 }
 0x190   : > { %17196 = vmatpush3.bf16.msra.mxu1 %v25904_v23  ;;  %v25911_v23 = vld [vmem:[#allocation61_spill] sm:$0xff] }
 0x191   : > { %17198 = vmatprep.subr.bf16.mxu1 %v25905_v25 }
 0x192   : > { %17876 = vmatpush3.bf16.msra.mxu0 %v17873_v37  ;;  %v21759_v37 = vld [vmem:[%s25141_s2 + $0x28] sm:$0xff] }
 0x193   : > { %17878 = vmatprep.subr.bf16.mxu0 %v25906_v42 }
 0x194   : > { %17200 = vmatpush3.bf16.msra.mxu1 %v25905_v25  ;;  %v21767_v25 = vpack.c.bf16 %v25421_v57, %v25422_v17  ;;  %v21779_v57 = vld [vmem:[%s25141_s2 + $0x30] sm:$0xff]  ;;  %v21784_v17 = vld [vmem:[%s25141_s2 + $0x38] sm:$0xff] }
 0x195   : > { %14974 = vmatmul.mubr.f32.vlgmr.msra.gmra.mrb[0].mxu0 %v25907_v20  ;;  %17202 = vmatprep.subr.bf16.mxu1 %v25853_v49  ;;  %v25426_v20 = vand.u32 4294901760, %v21759_v37 }
 0x196   : > { %17880 = vmatpush3.bf16.msra.mxu0 %v25906_v42  ;;  %14976 = vmatprep.mubr.f32.mxu0 %v25909_v40  ;;  %25912 = vst [vmem:[#allocation94_spill] sm:$0xff] %v21767_v25  ;;  %v25917_v40 = vld [vmem:[#allocation55_spill] sm:$0xff] }
 0x197   : > { %17882 = vmatprep.subr.bf16.mxu0 %v25910_v0 }
 0x198   : > { %17204 = vmatpush3.bf16.msra.mxu1 %v25853_v49  ;;  %v25427_v49 = vand.u32 4294901760, %v21754_v5 }
 0x199   : > { %14977 = vmatmul.mubr.f32.gmra.mrb[2].mxu0 %v25911_v23  ;;  %17206 = vmatprep.subr.bf16.mxu1 %v21743_v45  ;;  %v25431_v23 = vand.u32 4294901760, %v21784_v17 }
 0x19a   : > { %17884 = vmatpush3.bf16.msra.mxu0 %v25910_v0  ;;  %14979 = vmatprep.mubr.f32.mxu0 %v25913_v43  ;;  %v21793_v39 = vpack.c.bf16 %v25426_v20, %v25427_v49  ;;  %v25432_v43 = vand.u32 4294901760, %v21779_v57  ;;  %v21810_v20 = vld [vmem:[%s25141_s2 + $0x48] sm:$0xff] }
 0x19b   : > { %17886 = vmatprep.subr.bf16.mxu0 %v25914_v19  ;;  %14050 = vmatmul.mubr.f32.vlgmr.msra.gmra.mrb[0].mxu1 %v25889_v29  ;;  %v25436_v4 = vand.u32 4294901760, %v21810_v20 }
 0x19c   : > { %17208 = vmatpush3.bf16.msra.mxu1 %v21743_v45  ;;  %14052 = vmatprep.mubr.f32.mxu1 %v25890_v14  ;;  %25916 = vst [vmem:[#allocation95_spill] sm:$0xff] %v21793_v39  ;;  %v21818_v49 = vpack.c.bf16 %v25431_v23, %v25432_v43  ;;  %v21835_v23 = vld [vmem:[%s25141_s2 + $0x58] sm:$0xff]  ;;  %v25448_v43 = vand.u32 4294901760, %v21830_v12 }
 0x19d   : > { %14980 = vmatmul.mubr.f32.gmra.mrb[4].mxu0 %v25915_v51  ;;  %17210 = vmatprep.subr.bf16.mxu1 %v21767_v25  ;;  %v21805_v51 = vld [vmem:[%s25141_s2 + $0x40] sm:$0xff] }
 0x19e   : > { %17888 = vmatpush3.bf16.msra.mxu0 %v25914_v19  ;;  %14982 = vmatprep.mubr.f32.mxu0 %v21520_v54  ;;  %25918 = vst [vmem:[#allocation62_spill] sm:$0xff] %v21818_v49  ;;  %v25437_v54 = vand.u32 4294901760, %v21805_v51 }
 0x19f   : > { %17890 = vmatprep.subr.bf16.mxu0 %v25917_v40  ;;  %14053 = vmatmul.mubr.f32.gmra.mrb[2].mxu1 %v25894_v58  ;;  %v25929_v58 = vand.u32 4294901760, %v21386_v33 }
 0x1a0   : > { %17212 = vmatpush3.bf16.msra.mxu1 %v21767_v25  ;;  %14055 = vmatprep.mubr.f32.mxu1 %v25895_v44  ;;  %v25925_v25 = vand.u32 4294901760, %v21715_v27  ;;  %v25928_v44 = vld [vmem:[#allocation96_spill] sm:$0xff] }
 0x1a1   : > { %14983 = vmatmul.mubr.f32.gmra.mrb[6].mxu0 %v21538_v48  ;;  %17214 = vmatprep.subr.bf16.mxu1 %v21793_v39  ;;  %v25447_v48 = vand.u32 4294901760, %v21835_v23 }
 0x1a2   : > { %17892 = vmatpush3.bf16.msra.mxu0 %v25917_v40  ;;  %15017 = vmatprep.mubr.f32.mxu0 %v25919_v3  ;;  %v21843_v3 = vpack.c.bf16 %v25436_v4, %v25437_v54  ;;  %v21859_v4 = vld [vmem:[%s25141_s2 + $0x68] sm:$0xff]  ;;  %v21879_v45 = vsub.f32 %v21715_v27, %v25925_v25  ;;  %v25931_v25 = vand.u32 4294901760, %v21720_v52 }
 0x1a3   : > { %17894 = vmatprep.subr.bf16.mxu0 %v25920_v18  ;;  %14056 = vmatmul.mubr.f32.gmra.mrb[4].mxu1 %v25899_v13  ;;  %v21867_v54 = vpack.c.bf16 %v25447_v48, %v25448_v43  ;;  %v21885_v48 = vld [vmem:[%s25141_s2 + $0x70] sm:$0xff]  ;;  %v21890_v43 = vld [vmem:[%s25141_s2 + $0x78] sm:$0xff]  ;;  %v383_v13 = vld [vmem:[#allocation2 + $0x8] sm:$0xff] }
 0x1a4   : > { %17216 = vmatpush3.bf16.msra.mxu1 %v21793_v39  ;;  %25921 = vst [vmem:[#allocation76_spill] sm:$0xff] %v21843_v3  ;;  %14058 = vmatprep.mubr.f32.mxu1 %v25900_v46  ;;  %v25924_v39 = vld [vmem:[#allocation93_spill] sm:$0xff]  ;;  %v21874_v46 = vand.u32 4294901760, %v382_v8  ;;  %v25935_v33 = vand.u32 4294901760, %v21879_v45 }
 0x1a5   : > { %17218 = vmatprep.subr.bf16.mxu1 %v21818_v49  ;;  %25923 = vst [vmem:[#allocation97_spill] sm:$0xff] %v21867_v54 }
 0x1a6   : > { %17896 = vmatpush3.bf16.msra.mxu0 %v25920_v18  ;;  %v25930_v18 = vand.u32 4294901760, %v21389_v15  ;;  %v1534_v15 = vsub.f32 %v21879_v45, %v25935_v33  ;;  %v25938_v33 = vand.u32 4294901760, %v21431_v63 }
 0x1a7   : > { %17898 = vmatprep.subr.bf16.mxu0 %v25922_v2  ;;  %14059 = vmatmul.mubr.f32.gmra.mrb[6].mxu1 %v25902_v1  ;;  %v21915_v1 = vsub.f32 %v21720_v52, %v25931_v25  ;;  %v25936_v25 = vand.u32 4294901760, %v21730_v34 }
 0x1a8   : > { %17220 = vmatpush3.bf16.msra.mxu1 %v21818_v49  ;;  %v25457_v49 = vand.u32 4294901760, %v21859_v4  ;;  %v17913_v14 = vpack.c.bf16 %v25939_v59, %v25938_v33  ;;  %v21962_v59 = vsub.f32 %v21754_v5, %v25941_v35  ;;  %v25944_v5 = vand.u32 4294901760, %v21463_v26 }
 0x1a9   : > { %17222 = vmatprep.subr.bf16.mxu1 %v21843_v3  ;;  %v25945_v35 = vand.u32 4294901760, %v21468_v56  ;;  %v25948_v26 = vand.u32 4294901760, %v21779_v57 }
 0x1aa   : > { %17900 = vmatpush3.bf16.msra.mxu0 %v25922_v2  ;;  %v21897_v27 = vpack.c.bf16 %v25457_v49, %v25458_v30  ;;  %v17909_v49 = vpack.c.bf16 %v25930_v18, %v25929_v58  ;;  %v25933_v2 = vand.u32 4294901760, %v21890_v43  ;;  %v21927_v18 = vand.u32 4294901760, %v383_v13 }
 0x1ab   : > { %17902 = vmatprep.subr.bf16.mxu0 %v25924_v39  ;;  %v21990_v56 = vsub.f32 %v21779_v57, %v25948_v26 }
 0x1ac   : > { %17224 = vmatpush3.bf16.msra.mxu1 %v21843_v3  ;;  %25926 = vst [vmem:[#allocation77_spill] sm:$0xff] %v21897_v27  ;;  %v21902_v3 = vsub.f32 %v382_v8, %v21874_v46  ;;  %v25932_v8 = vand.u32 4294901760, %v21885_v48  ;;  %v21950_v52 = vsub.f32 %v383_v13, %v21927_v18  ;;  %v25942_v13 = vand.u32 4294901760, %v21759_v37 }
 0x1ad   : > { %17226 = vmatprep.subr.bf16.mxu1 %v21867_v54 }
 0x1ae   : > { %25927 = vst [vmem:[#allocation54_spill] sm:$0xff] %v21902_v3  ;;  %17904 = vmatpush3.bf16.msra.mxu0 %v25924_v39  ;;  %v25463_v30 = vand.u32 4294901760, %v21902_v3  ;;  %v21922_v39 = vpack.c.bf16 %v25933_v2, %v25932_v8  ;;  %v25937_v2 = vand.u32 4294901760, %v21735_v7 }
 0x1af   : > { %17906 = vmatprep.subr.bf16.mxu0 %v25928_v44 }
 0x1b0   : > { %17228 = vmatpush3.bf16.msra.mxu1 %v21867_v54  ;;  %25934 = vst [vmem:[#allocation78_spill] sm:$0xff] %v21922_v39  ;;  %v1453_v58 = vsub.f32 %v21902_v3, %v25463_v30  ;;  %v21937_v54 = vsub.f32 %v21730_v34, %v25936_v25  ;;  %v21942_v8 = vsub.f32 %v21735_v7, %v25937_v2  ;;  %v1535_v30 = vand.u32 4294901760, %v1534_v15 }
 0x1b1   : > { %17230 = vmatprep.subr.bf16.mxu1 %v21897_v27  ;;  %v25940_v34 = vand.u32 4294901760, %v21915_v1  ;;  %v21967_v15 = vsub.f32 %v21759_v37, %v25942_v13  ;;  %v17917_v37 = vpack.c.bf16 %v25945_v35, %v25944_v5  ;;  %v25946_v13 = vld [vmem:[#allocation63_spill] sm:$0xff] }
 0x1b2   : > { %17908 = vmatpush3.bf16.msra.mxu0 %v25928_v44  ;;  %v1454_v3 = vand.u32 4294901760, %v1453_v58  ;;  %v25468_v7 = vand.u32 4294901760, %v21937_v54  ;;  %v25470_v2 = vand.u32 4294901760, %v21942_v8  ;;  %v25943_v58 = vld [vmem:[#allocation60_spill] sm:$0xff] }
 0x1b3   : > { %17910 = vmatprep.subr.bf16.mxu0 %v17909_v49  ;;  %v1541_v25 = vsub.f32 %v21915_v1, %v25940_v34 }
 0x1b4   : > { %17232 = vmatpush3.bf16.msra.mxu1 %v21897_v27  ;;  %v1548_v34 = vsub.f32 %v21937_v54, %v25468_v7  ;;  %v1555_v63 = vsub.f32 %v21942_v8, %v25470_v2  ;;  %v25471_v27 = vand.u32 4294901760, %v21962_v59  ;;  %v25472_v7 = vand.u32 4294901760, %v21967_v15  ;;  %14093 = vmatprep.mubr.f32.mxu1 %v1454_v3 }
 0x1b5   : > { %15018 = vmatmul.mubr.f32.vlgmr.msra.gmra.mrb[0].mxu0 %v25943_v58  ;;  %17234 = vmatprep.subr.bf16.mxu1 %v21922_v39  ;;  %v1542_v33 = vand.u32 4294901760, %v1541_v25  ;;  %v25947_v58 = vand.u32 4294901760, %v21950_v52 }
 0x1b6   : > { %17912 = vmatpush3.bf16.msra.mxu0 %v17909_v49  ;;  %15020 = vmatprep.mubr.f32.mxu0 %v25946_v13  ;;  %v1549_v2 = vand.u32 4294901760, %v1548_v34  ;;  %v1556_v49 = vand.u32 4294901760, %v1555_v63  ;;  %v1562_v35 = vsub.f32 %v21962_v59, %v25471_v27  ;;  %v25950_v63 = vld [vmem:[#allocation65_spill] sm:$0xff]  ;;  %v25951_v34 = vand.u32 4294901760, %v25887_v38  ;;  %v25953_v27 = vld [vmem:[#allocation68_spill] sm:$0xff] }
 0x1b7   : > { %v1463_v25 = vsub.f32 %v21950_v52, %v25947_v58  ;;  %17914 = vmatprep.subr.bf16.mxu0 %v17913_v14  ;;  %v17237_v44 = vpack.c.bf16 %v1542_v33, %v1535_v30  ;;  %v1569_v58 = vsub.f32 %v21967_v15, %v25472_v7  ;;  %v25949_v30 = vand.u32 4294901760, %v21784_v17 }
 0x1b8   : > { %17236 = vmatpush3.bf16.msra.mxu1 %v21922_v39  ;;  %v17241_v57 = vpack.c.bf16 %v1556_v49, %v1549_v2  ;;  %v25484_v33 = vand.u32 4294901760, %v21990_v56  ;;  %v1563_v7 = vand.u32 4294901760, %v1562_v35  ;;  %v25954_v2 = vand.u32 4294901760, %v21805_v51  ;;  %v25957_v35 = vld [vmem:[#allocation70_spill] sm:$0xff] }
 0x1b9   : > { %v1464_v5 = vand.u32 4294901760, %v1463_v25  ;;  %v22002_v3 = vsub.f32 %v21784_v17, %v25949_v30  ;;  %15021 = vmatmul.mubr.f32.gmra.mrb[2].mxu0 %v25950_v63  ;;  %17238 = vmatprep.subr.bf16.mxu1 %v17237_v44  ;;  %v25952_v25 = vand.u32 4294901760, %v25888_v16  ;;  %v1570_v13 = vand.u32 4294901760, %v1569_v58  ;;  %v26005_v63 = vld [vmem:[#allocation25_spill] sm:$0xff] }
 0x1ba   : > { %17916 = vmatpush3.bf16.msra.mxu0 %v17913_v14  ;;  %15023 = vmatprep.mubr.f32.mxu0 %v25953_v27  ;;  %v1576_v17 = vsub.f32 %v21990_v56, %v25484_v33  ;;  %v22018_v14 = vsub.f32 %v21805_v51, %v25954_v2  ;;  %v25955_v38 = vand.u32 4294901760, %v21810_v20  ;;  %v25990_v33 = vld [vmem:[#allocation59_spill] sm:$0xff]  ;;  %v25997_v27 = vld [vmem:[#allocation85_spill] sm:$0xff] }
 0x1bb   : > { %v17921_v26 = vpack.c.bf16 %v25952_v25, %v25951_v34  ;;  %v25483_v39 = vand.u32 4294901760, %v22002_v3  ;;  %17918 = vmatprep.subr.bf16.mxu0 %v17917_v37  ;;  %14094 = vmatmul.mubr.f32.vlgmr.msra.gmra.mrb[0].mxu1 %v1464_v5  ;;  %v25956_v5 = vld [vmem:[#allocation86_spill] sm:$0xff]  ;;  %v17245_v58 = vpack.c.bf16 %v1570_v13, %v1563_v7  ;;  %v25960_v13 = vand.u32 4294901760, %v21830_v12 }
 0x1bc   : > { %v22023_v16 = vsub.f32 %v21810_v20, %v25955_v38  ;;  %17240 = vmatpush3.bf16.msra.mxu1 %v17237_v44  ;;  %14096 = vmatprep.mubr.f32.mxu1 %v25956_v5  ;;  %v1577_v30 = vand.u32 4294901760, %v1576_v17  ;;  %v25482_v51 = vand.u32 4294901760, %v22018_v14  ;;  %v25958_v20 = vand.u32 4294901760, %v21508_v55 }
 0x1bd   : > { %v1583_v49 = vsub.f32 %v22002_v3, %v25483_v39  ;;  %15024 = vmatmul.mubr.f32.gmra.mrb[4].mxu0 %v25957_v35  ;;  %17242 = vmatprep.subr.bf16.mxu1 %v17241_v57  ;;  %v25959_v44 = vand.u32 4294901760, %v21517_v36  ;;  %v25961_v55 = vand.u32 4294901760, %v21835_v23 }
 0x1be   : > { %v25481_v34 = vand.u32 4294901760, %v22023_v16  ;;  %17920 = vmatpush3.bf16.msra.mxu0 %v17917_v37  ;;  %15026 = vmatprep.mubr.f32.mxu0 %v21554_v28  ;;  %v1590_v38 = vsub.f32 %v22018_v14, %v25482_v51  ;;  %v22046_v37 = vsub.f32 %v21830_v12, %v25960_v13  ;;  %v25962_v12 = vand.u32 4294901760, %v21546_v6 }
 0x1bf   : > { %v17925_v25 = vpack.c.bf16 %v25959_v44, %v25958_v20  ;;  %v1584_v2 = vand.u32 4294901760, %v1583_v49  ;;  %17922 = vmatprep.subr.bf16.mxu0 %v17921_v26  ;;  %v22051_v36 = vsub.f32 %v21835_v23, %v25961_v55  ;;  %v25963_v23 = vand.u32 4294901760, %v21551_v22 }
 0x1c0   : > { %v1597_v7 = vsub.f32 %v22023_v16, %v25481_v34  ;;  %17244 = vmatpush3.bf16.msra.mxu1 %v17241_v57  ;;  %v1591_v49 = vand.u32 4294901760, %v1590_v38  ;;  %v25476_v20 = vand.u32 4294901760, %v22046_v37  ;;  %v25966_v38 = vand.u32 4294901760, %v21854_v21 }
 0x1c1   : > { %v17249_v17 = vpack.c.bf16 %v1584_v2, %v1577_v30  ;;  %15027 = vmatmul.mubr.f32.gmra.mrb[6].mxu0 %v21562_v31  ;;  %17246 = vmatprep.subr.bf16.mxu1 %v17245_v58  ;;  %v25475_v44 = vand.u32 4294901760, %v22051_v36  ;;  %v17929_v13 = vpack.c.bf16 %v25963_v23, %v25962_v12  ;;  %v25964_v2 = vld [vmem:[#allocation88_spill] sm:$0xff]  ;;  %v25967_v22 = vand.u32 4294901760, %v21859_v4 }
 0x1c2   : > { %v1598_v5 = vand.u32 4294901760, %v1597_v7  ;;  %17924 = vmatpush3.bf16.msra.mxu0 %v17921_v26  ;;  %15061 = vmatprep.mubr.f32.mxu0 %v20533_v47  ;;  %v1604_v57 = vsub.f32 %v22046_v37, %v25476_v20  ;;  %v25965_v26 = vld [vmem:[#allocation89_spill] sm:$0xff]  ;;  %v22072_v6 = vsub.f32 %v21854_v21, %v25966_v38  ;;  %v25969_v21 = vand.u32 4294901760, %v21585_v60  ;;  %v25970_v20 = vld [vmem:[#allocation90_spill] sm:$0xff] }
 0x1c3   : > { %17926 = vmatprep.subr.bf16.mxu0 %v17925_v25  ;;  %v1611_v30 = vsub.f32 %v22051_v36, %v25475_v44  ;;  %14097 = vmatmul.mubr.f32.gmra.mrb[2].mxu1 %v25964_v2  ;;  %v22077_v7 = vsub.f32 %v21859_v4, %v25967_v22  ;;  %v25968_v44 = vand.u32 4294901760, %v21580_v11  ;;  %v25971_v4 = vand.u32 4294901760, %v21885_v48 }
 0x1c4   : > { %17248 = vmatpush3.bf16.msra.mxu1 %v17245_v58  ;;  %14099 = vmatprep.mubr.f32.mxu1 %v25965_v26  ;;  %v17253_v55 = vpack.c.bf16 %v1598_v5, %v1591_v49  ;;  %v1605_v12 = vand.u32 4294901760, %v1604_v57  ;;  %v25480_v2 = vand.u32 4294901760, %v22072_v6  ;;  %v25972_v49 = vand.u32 4294901760, %v21890_v43  ;;  %v25973_v5 = vld [vmem:[#allocation91_spill] sm:$0xff] }
 0x1c5   : > { %17250 = vmatprep.subr.bf16.mxu1 %v17249_v17  ;;  %v1612_v23 = vand.u32 4294901760, %v1611_v30  ;;  %v25479_v58 = vand.u32 4294901760, %v22077_v7  ;;  %v17933_v38 = vpack.c.bf16 %v25969_v21, %v25968_v44  ;;  %v22089_v22 = vsub.f32 %v21885_v48, %v25971_v4 }
 0x1c6   : > { %17928 = vmatpush3.bf16.msra.mxu0 %v17925_v25  ;;  %v22094_v25 = vsub.f32 %v21890_v43, %v25972_v49  ;;  %v1618_v11 = vsub.f32 %v22072_v6, %v25480_v2  ;;  %v25975_v21 = vand.u32 4294901760, %v21614_v61 }
 0x1c7   : > { %17930 = vmatprep.subr.bf16.mxu0 %v17929_v13  ;;  %14100 = vmatmul.mubr.f32.gmra.mrb[4].mxu1 %v25970_v20  ;;  %v1625_v60 = vsub.f32 %v22077_v7, %v25479_v58  ;;  %v17257_v44 = vpack.c.bf16 %v1612_v23, %v1605_v12  ;;  %v25478_v48 = vand.u32 4294901760, %v22089_v22  ;;  %v25976_v23 = vld [vmem:[#allocation92_spill] sm:$0xff] }
 0x1c8   : > { %17252 = vmatpush3.bf16.msra.mxu1 %v17249_v17  ;;  %14102 = vmatprep.mubr.f32.mxu1 %v25973_v5  ;;  %v25477_v57 = vand.u32 4294901760, %v22094_v25  ;;  %v1619_v43 = vand.u32 4294901760, %v1618_v11  ;;  %v25974_v17 = vand.u32 4294901760, %v21609_v53 }
 0x1c9   : > { %17254 = vmatprep.subr.bf16.mxu1 %v17253_v55  ;;  %v1626_v30 = vand.u32 4294901760, %v1625_v60  ;;  %v1632_v49 = vsub.f32 %v22089_v22, %v25478_v48  ;;  %v25978_v60 = vld [vmem:[#allocation98_spill] sm:$0xff] }
 0x1ca   : > { %17932 = vmatpush3.bf16.msra.mxu0 %v17929_v13  ;;  %v17937_v4 = vpack.c.bf16 %v25975_v21, %v25974_v17  ;;  %v1639_v12 = vsub.f32 %v22094_v25, %v25477_v57  ;;  %v17285_v17 = vpack.c.bf16 %v22023_v16, %v22018_v14  ;;  %v25982_v21 = vld [vmem:[#allocation67_spill] sm:$0xff]  ;;  %v22191_v57 = vld [vmem:[%s25141_s2 + $0x3a0] sm:$0xff] }
 0x1cb   : > { %17934 = vmatprep.subr.bf16.mxu0 %v17933_v38  ;;  %14103 = vmatmul.mubr.f32.gmra.mrb[6].mxu1 %v25976_v23  ;;  %v17261_v13 = vpack.c.bf16 %v1626_v30, %v1619_v43  ;;  %v1633_v11 = vand.u32 4294901760, %v1632_v49  ;;  %v25980_v43 = vld [vmem:[#allocation17_spill] sm:$0xff]  ;;  %v25981_v30 = vld [vmem:[#allocation19_spill] sm:$0xff]  ;;  %v25984_v49 = vld [vmem:[#allocation54_spill] sm:$0xff]  ;;  %v25486_v58 = vand.u32 4294901760, %v22191_v57 }
 0x1cc   : > { %17256 = vmatpush3.bf16.msra.mxu1 %v17253_v55  ;;  %14137 = vmatprep.mubr.f32.mxu1 %v21874_v46  ;;  %v1640_v53 = vand.u32 4294901760, %v1639_v12  ;;  %v17269_v55 = vpack.c.bf16 %v21915_v1, %v21879_v45  ;;  %v17289_v12 = vpack.c.bf16 %v22051_v36, %v22046_v37 }
 0x1cd   : > { %17258 = vmatprep.subr.bf16.mxu1 %v17257_v44 }
 0x1ce   : > { %17936 = vmatpush3.bf16.msra.mxu0 %v17933_v38  ;;  %v17265_v61 = vpack.c.bf16 %v1640_v53, %v1633_v11  ;;  %v17273_v38 = vpack.c.bf16 %v21942_v8, %v21937_v54 }
 0x1cf   : > { %17938 = vmatprep.subr.bf16.mxu0 %v17937_v4 }
 0x1d0   : > { %17260 = vmatpush3.bf16.msra.mxu1 %v17257_v44  ;;  %v17281_v44 = vpack.c.bf16 %v22002_v3, %v21990_v56 }
 0x1d1   : > { %17262 = vmatprep.subr.bf16.mxu1 %v17261_v13 }
 0x1d2   : > { %17940 = vmatpush3.bf16.msra.mxu0 %v17937_v4  ;;  %v25983_v4 = vld [vmem:[#allocation23_spill] sm:$0xff] }
 0x1d3   : > { %17942 = vmatprep.subr.bf16.mxu0 %v25906_v42 }
 0x1d4   : > { %17264 = vmatpush3.bf16.msra.mxu1 %v17261_v13  ;;  %v25985_v13 = vld [vmem:[#allocation93_spill] sm:$0xff] }
 0x1d5   : > { %15062 = vmatmul.mubr.f32.vlgmr.msra.gmra.mrb[0].mxu0 %v20553_v50  ;;  %17266 = vmatprep.subr.bf16.mxu1 %v17265_v61 }
 0x1d6   : > { %17944 = vmatpush3.bf16.msra.mxu0 %v25906_v42  ;;  %15064 = vmatprep.mubr.f32.mxu0 %v20565_v9  ;;  %v17277_v42 = vpack.c.bf16 %v21967_v15, %v21962_v59 }
 0x1d7   : > { %17946 = vmatprep.subr.bf16.mxu0 %v25910_v0 }
 0x1d8   : > { %17268 = vmatpush3.bf16.msra.mxu1 %v17265_v61  ;;  %v22173_v61 = vld [vmem:[%s25141_s2 + $0x390] sm:$0xff] }
 0x1d9   : > { %15065 = vmatmul.mubr.f32.gmra.mrb[2].mxu0 %v20595_v62  ;;  %17270 = vmatprep.subr.bf16.mxu1 %v17269_v55 }
 0x1da   : > { %17948 = vmatpush3.bf16.msra.mxu0 %v25910_v0  ;;  %15067 = vmatprep.mubr.f32.mxu0 %v25886_v41  ;;  %v25977_v0 = vld [vmem:[#allocation9_spill] sm:$0xff] }
 0x1db   : > { %17950 = vmatprep.subr.bf16.mxu0 %v25914_v19  ;;  %14138 = vmatmul.mubr.f32.vlgmr.msra.gmra.mrb[0].mxu1 %v21927_v18 }
 0x1dc   : > { %17272 = vmatpush3.bf16.msra.mxu1 %v17269_v55  ;;  %14140 = vmatprep.mubr.f32.mxu1 %v20950_v24  ;;  %v22178_v55 = vld [vmem:[%s25141_s2 + $0x398] sm:$0xff] }
 0x1dd   : > { %15068 = vmatmul.mubr.f32.gmra.mrb[4].mxu0 %v25891_v10  ;;  %17274 = vmatprep.subr.bf16.mxu1 %v17273_v38 }
 0x1de   : > { %17952 = vmatpush3.bf16.msra.mxu0 %v25914_v19  ;;  %15070 = vmatprep.mubr.f32.mxu0 %v25893_v32  ;;  %v25979_v19 = vld [vmem:[#allocation75_spill] sm:$0xff] }
 0x1df   : > { %17954 = vmatprep.subr.bf16.mxu0 %v25917_v40  ;;  %14141 = vmatmul.mubr.f32.gmra.mrb[2].mxu1 %v25889_v29 }
 0x1e0   : > { %17276 = vmatpush3.bf16.msra.mxu1 %v17273_v38  ;;  %14143 = vmatprep.mubr.f32.mxu1 %v25977_v0  ;;  %v17293_v38 = vpack.c.bf16 %v22077_v7, %v22072_v6  ;;  %v26027_v0 = vld [vmem:[#allocation97_spill] sm:$0xff] }
 0x1e1   : > { %15071 = vmatmul.mubr.f32.gmra.mrb[6].mxu0 %v25978_v60  ;;  %17278 = vmatprep.subr.bf16.mxu1 %v17277_v42 }
 0x1e2   : > { %17956 = vmatpush3.bf16.msra.mxu0 %v25917_v40  ;;  %15105 = vmatprep.mubr.f32.mxu0 %v20533_v47  ;;  %v22156_v47 = vld [vmem:[%s25141_s2 + $0x380] sm:$0xff]  ;;  %v22161_v40 = vld [vmem:[%s25141_s2 + $0x388] sm:$0xff] }
 0x1e3   : > { %17958 = vmatprep.subr.bf16.mxu0 %v25979_v19  ;;  %14144 = vmatmul.mubr.f32.gmra.mrb[4].mxu1 %v25980_v43  ;;  %v5242_v11 = vand.u32 4294901760, %v22156_v47  ;;  %v5245_v53 = vand.u32 4294901760, %v22161_v40 }
 0x1e4   : > { %17280 = vmatpush3.bf16.msra.mxu1 %v17277_v42  ;;  %14146 = vmatprep.mubr.f32.mxu1 %v25981_v30  ;;  %v25986_v42 = vld [vmem:[#allocation96_spill] sm:$0xff] }
 0x1e5   : > { %17282 = vmatprep.subr.bf16.mxu1 %v17281_v44  ;;  %v22286_v23 = vsub.f32 %v22161_v40, %v5245_v53 }
 0x1e6   : > { %17960 = vmatpush3.bf16.msra.mxu0 %v25979_v19  ;;  %v25488_v19 = vand.u32 4294901760, %v22173_v61 }
 0x1e7   : > { %17962 = vmatprep.subr.bf16.mxu0 %v25982_v21  ;;  %14147 = vmatmul.mubr.f32.gmra.mrb[6].mxu1 %v25983_v4  ;;  %v26014_v4 = vld [vmem:[#allocation29_spill] sm:$0xff] }
 0x1e8   : > { %17284 = vmatpush3.bf16.msra.mxu1 %v17281_v44  ;;  %14181 = vmatprep.mubr.f32.mxu1 %v25984_v49  ;;  %v22184_v44 = vpack.c.bf16 %v5245_v53, %v5242_v11  ;;  %v25999_v53 = vld [vmem:[#allocation95_spill] sm:$0xff] }
 0x1e9   : > { %17286 = vmatprep.subr.bf16.mxu1 %v17285_v17 }
 0x1ea   : > { %17964 = vmatpush3.bf16.msra.mxu0 %v25982_v21  ;;  %25987 = vst [vmem:[#allocation79_spill] sm:$0xff] %v22184_v44  ;;  %v25487_v21 = vand.u32 4294901760, %v22178_v55 }
 0x1eb   : > { %17966 = vmatprep.subr.bf16.mxu0 %v25985_v13 }
 0x1ec   : > { %17288 = vmatpush3.bf16.msra.mxu1 %v17285_v17  ;;  %v22196_v17 = vld [vmem:[%s25141_s2 + $0x3a8] sm:$0xff]  ;;  %v22206_v48 = vpack.c.bf16 %v25487_v21, %v25488_v19  ;;  %v22259_v21 = vld [vmem:[%s25141_s2 + $0x3d0] sm:$0xff]  ;;  %v22264_v19 = vld [vmem:[%s25141_s2 + $0x3d8] sm:$0xff] }
 0x1ed   : > { %17290 = vmatprep.subr.bf16.mxu1 %v17289_v12  ;;  %v25485_v2 = vand.u32 4294901760, %v22196_v17  ;;  %v25494_v28 = vand.u32 4294901760, %v22259_v21  ;;  %v25493_v35 = vand.u32 4294901760, %v22264_v19 }
 0x1ee   : > { %17968 = vmatpush3.bf16.msra.mxu0 %v25985_v13  ;;  %v17297_v13 = vpack.c.bf16 %v22094_v25, %v22089_v22  ;;  %25988 = vst [vmem:[#allocation80_spill] sm:$0xff] %v22206_v48 }
 0x1ef   : > { %17970 = vmatprep.subr.bf16.mxu0 %v25986_v42  ;;  %v22228_v34 = vpack.c.bf16 %v25485_v2, %v25486_v58  ;;  %v22279_v58 = vld [vmem:[%s25141_s2 + $0x3e8] sm:$0xff]  ;;  %v22313_v40 = vpack.c.bf16 %v25493_v35, %v25494_v28  ;;  %v26004_v28 = vld [vmem:[#allocation22_spill] sm:$0xff] }
 0x1f0   : > { %17292 = vmatpush3.bf16.msra.mxu1 %v17289_v12  ;;  %v22213_v12 = vld [vmem:[%s25141_s2 + $0x3b0] sm:$0xff] }
 0x1f1   : > { %17294 = vmatprep.subr.bf16.mxu1 %v17293_v38  ;;  %25989 = vst [vmem:[#allocation81_spill] sm:$0xff] %v22228_v34  ;;  %v25490_v51 = vand.u32 4294901760, %v22213_v12  ;;  %26001 = vst [vmem:[#allocation52_spill] sm:$0xff] %v22313_v40 }
 0x1f2   : > { %17972 = vmatpush3.bf16.msra.mxu0 %v25986_v42  ;;  %v22218_v42 = vld [vmem:[%s25141_s2 + $0x3b8] sm:$0xff] }
 0x1f3   : > { %17974 = vmatprep.subr.bf16.mxu0 %v22184_v44  ;;  %v25489_v39 = vand.u32 4294901760, %v22218_v42 }
 0x1f4   : > { %17296 = vmatpush3.bf16.msra.mxu1 %v17293_v38  ;;  %v22240_v38 = vld [vmem:[%s25141_s2 + $0x3c8] sm:$0xff] }
 0x1f5   : > { %15106 = vmatmul.mubr.f32.vlgmr.msra.gmra.mrb[0].mxu0 %v20553_v50  ;;  %17298 = vmatprep.subr.bf16.mxu1 %v17297_v13  ;;  %v22235_v50 = vld [vmem:[%s25141_s2 + $0x3c0] sm:$0xff]  ;;  %v22251_v2 = vpack.c.bf16 %v25489_v39, %v25490_v51  ;;  %v25995_v5 = vand.u32 4294901760, %v22240_v38 }
 0x1f6   : > { %17976 = vmatpush3.bf16.msra.mxu0 %v22184_v44  ;;  %15108 = vmatprep.mubr.f32.mxu0 %v20565_v9  ;;  %v25992_v39 = vld [vmem:[#allocation82_spill] sm:$0xff]  ;;  %v25994_v31 = vand.u32 4294901760, %v22235_v50 }
 0x1f7   : > { %17978 = vmatprep.subr.bf16.mxu0 %v22206_v48  ;;  %25991 = vst [vmem:[#allocation51_spill] sm:$0xff] %v22251_v2  ;;  %v25993_v51 = vld [vmem:[#allocation94_spill] sm:$0xff] }
 0x1f8   : > { %17300 = vmatpush3.bf16.msra.mxu1 %v17297_v13  ;;  %v22274_v13 = vld [vmem:[%s25141_s2 + $0x3e0] sm:$0xff]  ;;  %v22293_v20 = vpack.c.bf16 %v25995_v5, %v25994_v31  ;;  %v26000_v31 = vld [vmem:[#allocation71_spill] sm:$0xff] }
 0x1f9   : > { %15109 = vmatmul.mubr.f32.gmra.mrb[2].mxu0 %v20595_v62  ;;  %17302 = vmatprep.subr.bf16.mxu1 %v25990_v33  ;;  %v26006_v26 = vand.u32 4294901760, %v22274_v13 }
 0x1fa   : > { %17980 = vmatpush3.bf16.msra.mxu0 %v22206_v48  ;;  %15111 = vmatprep.mubr.f32.mxu0 %v25886_v41  ;;  %25996 = vst [vmem:[#allocation56_spill] sm:$0xff] %v22293_v20  ;;  %v26009_v48 = vld [vmem:[#allocation62_spill] sm:$0xff] }
 0x1fb   : > { %17982 = vmatprep.subr.bf16.mxu0 %v22228_v34  ;;  %14182 = vmatmul.mubr.f32.vlgmr.msra.gmra.mrb[0].mxu1 %v21950_v52 }
 0x1fc   : > { %17304 = vmatpush3.bf16.msra.mxu1 %v25990_v33  ;;  %14184 = vmatprep.mubr.f32.mxu1 %v25992_v39  ;;  %v22283_v39 = vsub.f32 %v22156_v47, %v5242_v11  ;;  %v25998_v47 = vld [vmem:[#allocation10_spill] sm:$0xff]  ;;  %v22318_v11 = vld [vmem:[%s25141_s2 + $0x3f0] sm:$0xff] }
 0x1fd   : > { %15112 = vmatmul.mubr.f32.gmra.mrb[4].mxu0 %v25891_v10  ;;  %17306 = vmatprep.subr.bf16.mxu1 %v25993_v51 }
 0x1fe   : > { %17984 = vmatpush3.bf16.msra.mxu0 %v22228_v34  ;;  %15114 = vmatprep.mubr.f32.mxu0 %v25893_v32 }
 0x1ff   : > { %17986 = vmatprep.subr.bf16.mxu0 %v22251_v2  ;;  %14185 = vmatmul.mubr.f32.gmra.mrb[2].mxu1 %v25997_v27  ;;  %v26002_v27 = vand.u32 4294901760, %v22173_v61 }
 0x200   : > { %17308 = vmatpush3.bf16.msra.mxu1 %v25993_v51  ;;  %14187 = vmatprep.mubr.f32.mxu1 %v25998_v47  ;;  %v26003_v47 = vand.u32 4294901760, %v22178_v55 }
 0x201   : > { %15115 = vmatmul.mubr.f32.gmra.mrb[6].mxu0 %v25978_v60  ;;  %17310 = vmatprep.subr.bf16.mxu1 %v25999_v53  ;;  %v22328_v5 = vsub.f32 %v22173_v61, %v26002_v27 }
 0x202   : > { %17988 = vmatpush3.bf16.msra.mxu0 %v22251_v2  ;;  %15149 = vmatprep.mubr.f32.mxu0 %v26000_v31  ;;  %v22323_v31 = vld [vmem:[%s25141_s2 + $0x3f8] sm:$0xff]  ;;  %v22333_v35 = vsub.f32 %v22178_v55, %v26003_v47  ;;  %v26007_v2 = vand.u32 4294901760, %v22279_v58  ;;  %v26010_v47 = vand.u32 4294901760, %v22283_v39  ;;  %v26013_v55 = vand.u32 4294901760, %v22196_v17 }
 0x203   : > { %17990 = vmatprep.subr.bf16.mxu0 %v22293_v20  ;;  %14188 = vmatmul.mubr.f32.gmra.mrb[4].mxu1 %v26004_v28 }
 0x204   : > { %17312 = vmatpush3.bf16.msra.mxu1 %v25999_v53  ;;  %14190 = vmatprep.mubr.f32.mxu1 %v26005_v63  ;;  %v22342_v34 = vpack.c.bf16 %v26007_v2, %v26006_v26  ;;  %v5406_v27 = vsub.f32 %v22283_v39, %v26010_v47  ;;  %v26011_v63 = vand.u32 4294901760, %v22286_v23  ;;  %v22365_v44 = vsub.f32 %v22196_v17, %v26013_v55  ;;  %v3288_v47 = vld [vmem:[#allocation2 + $0x79] sm:$0xff]  ;;  %v26018_v17 = vld [vmem:[#allocation76_spill] sm:$0xff] }
 0x205   : > { %17314 = vmatprep.subr.bf16.mxu1 %v26009_v48  ;;  %v26016_v2 = vand.u32 4294901760, %v25984_v49  ;;  %v26019_v55 = vand.u32 4294901760, %v22318_v11  ;;  %v26020_v26 = vand.u32 4294901760, %v22323_v31  ;;  %v3289_v49 = vld [vmem:[#allocation2 + $0x81] sm:$0xff] }
 0x206   : > { %26008 = vst [vmem:[#allocation53_spill] sm:$0xff] %v22342_v34  ;;  %17992 = vmatpush3.bf16.msra.mxu0 %v22293_v20  ;;  %v5413_v28 = vsub.f32 %v22286_v23, %v26011_v63  ;;  %v26012_v20 = vand.u32 4294901760, %v22191_v57  ;;  %v26015_v63 = vand.u32 4294901760, %v22213_v12  ;;  %v26030_v29 = vand.u32 4294901760, %v22365_v44 }
 0x207   : > { %17994 = vmatprep.subr.bf16.mxu0 %v22313_v40  ;;  %14191 = vmatmul.mubr.f32.gmra.mrb[6].mxu1 %v26014_v4 }
 0x208   : > { %v22360_v61 = vsub.f32 %v22191_v57, %v26012_v20  ;;  %v22371_v30 = vsub.f32 %v22213_v12, %v26015_v63  ;;  %17316 = vmatpush3.bf16.msra.mxu1 %v26009_v48  ;;  %14225 = vmatprep.mubr.f32.mxu1 %v26016_v2  ;;  %v26017_v20 = vand.u32 4294901760, %v22218_v42  ;;  %v22387_v12 = vpack.c.bf16 %v26020_v26, %v26019_v55 }
 0x209   : > { %17318 = vmatprep.subr.bf16.mxu1 %v26018_v17  ;;  %v5407_v63 = vand.u32 4294901760, %v5406_v27  ;;  %v5414_v4 = vand.u32 4294901760, %v5413_v28  ;;  %v22389_v48 = vand.u32 4294901760, %v3288_v47  ;;  %v26025_v55 = vand.u32 4294901760, %v22235_v50 }
 0x20a   : > { %v22379_v57 = vsub.f32 %v22218_v42, %v26017_v20  ;;  %17996 = vmatpush3.bf16.msra.mxu0 %v22313_v40  ;;  %26021 = vst [vmem:[#allocation55_spill] sm:$0xff] %v22387_v12  ;;  %v26023_v42 = vand.u32 4294901760, %v22328_v5  ;;  %v26024_v20 = vand.u32 4294901760, %v22333_v35  ;;  %v26028_v26 = vand.u32 4294901760, %v22240_v38 }
 0x20b   : > { %26022 = vst [vmem:[#allocation57_spill] sm:$0xff] %v22389_v48  ;;  %17998 = vmatprep.subr.bf16.mxu0 %v22342_v34  ;;  %v22406_v53 = vsub.f32 %v22235_v50, %v26025_v55  ;;  %v22418_v43 = vsub.f32 %v3288_v47, %v22389_v48  ;;  %v26029_v55 = vand.u32 4294901760, %v22360_v61 }
 0x20c   : > { %v5420_v2 = vsub.f32 %v22328_v5, %v26023_v42  ;;  %v5427_v40 = vsub.f32 %v22333_v35, %v26024_v20  ;;  %17320 = vmatpush3.bf16.msra.mxu1 %v26018_v17  ;;  %v22408_v42 = vand.u32 4294901760, %v3289_v49  ;;  %v18005_v20 = vpack.c.bf16 %v5414_v4, %v5407_v63 }
 0x20d   : > { %17322 = vmatprep.subr.bf16.mxu1 %v26027_v0  ;;  %v22415_v27 = vsub.f32 %v22240_v38, %v26028_v26  ;;  %v5434_v17 = vsub.f32 %v22360_v61, %v26029_v55  ;;  %v5441_v4 = vsub.f32 %v22365_v44, %v26030_v29  ;;  %v26031_v63 = vand.u32 4294901760, %v22371_v30  ;;  %v26033_v55 = vld [vmem:[#allocation77_spill] sm:$0xff]  ;;  %v26036_v29 = vld [vmem:[#allocation72_spill] sm:$0xff] }
 0x20e   : > { %26026 = vst [vmem:[#allocation60_spill] sm:$0xff] %v22408_v42  ;;  %18000 = vmatpush3.bf16.msra.mxu0 %v22342_v34  ;;  %v5421_v28 = vand.u32 4294901760, %v5420_v2  ;;  %v5428_v50 = vand.u32 4294901760, %v5427_v40  ;;  %v26032_v47 = vand.u32 4294901760, %v22379_v57  ;;  %v22436_v2 = vsub.f32 %v3289_v49, %v22408_v42 }
 0x20f   : > { %18002 = vmatprep.subr.bf16.mxu0 %v22387_v12  ;;  %v5448_v38 = vsub.f32 %v22371_v30, %v26031_v63  ;;  %v26034_v34 = vand.u32 4294901760, %v22259_v21  ;;  %v25522_v40 = vand.u32 4294901760, %v22418_v43  ;;  %v5435_v42 = vand.u32 4294901760, %v5434_v17 }
 0x210   : > { %17324 = vmatpush3.bf16.msra.mxu1 %v26027_v0  ;;  %v5455_v26 = vsub.f32 %v22379_v57, %v26032_v47  ;;  %v26035_v0 = vand.u32 4294901760, %v22264_v19  ;;  %v18009_v49 = vpack.c.bf16 %v5428_v50, %v5421_v28  ;;  %v5442_v48 = vand.u32 4294901760, %v5441_v4 }
 0x211   : > { %17326 = vmatprep.subr.bf16.mxu1 %v26033_v55  ;;  %v22444_v63 = vsub.f32 %v22259_v21, %v26034_v34  ;;  %v5449_v51 = vand.u32 4294901760, %v5448_v38  ;;  %v26037_v34 = vand.u32 4294901760, %v22406_v53  ;;  %v25524_v60 = vand.u32 4294901760, %v22436_v2  ;;  %v26042_v38 = vld [vmem:[#allocation73_spill] sm:$0xff] }
 0x212   : > { %18004 = vmatpush3.bf16.msra.mxu0 %v22387_v12  ;;  %v22449_v47 = vsub.f32 %v22264_v19, %v26035_v0  ;;  %v5456_v12 = vand.u32 4294901760, %v5455_v26  ;;  %v26038_v0 = vld [vmem:[#allocation78_spill] sm:$0xff]  ;;  %v26039_v19 = vand.u32 4294901760, %v21879_v45  ;;  %v26040_v28 = vand.u32 4294901760, %v21915_v1 }
 0x213   : > { %18006 = vmatprep.subr.bf16.mxu0 %v18005_v20  ;;  %v5462_v21 = vsub.f32 %v22406_v53, %v26037_v34  ;;  %v26041_v50 = vand.u32 4294901760, %v22415_v27  ;;  %v25523_v26 = vand.u32 4294901760, %v22444_v63  ;;  %v5385_v34 = vsub.f32 %v22418_v43, %v25522_v40 }
 0x214   : > { %17328 = vmatpush3.bf16.msra.mxu1 %v26033_v55  ;;  %v17333_v17 = vpack.c.bf16 %v26040_v28, %v26039_v19  ;;  %v18013_v45 = vpack.c.bf16 %v5442_v48, %v5435_v42  ;;  %v26043_v1 = vand.u32 4294901760, %v22274_v13  ;;  %v26044_v19 = vand.u32 4294901760, %v22279_v58 }
 0x215   : > { %15150 = vmatmul.mubr.f32.vlgmr.msra.gmra.mrb[0].mxu0 %v26036_v29  ;;  %17330 = vmatprep.subr.bf16.mxu1 %v26038_v0  ;;  %v5469_v4 = vsub.f32 %v22415_v27, %v26041_v50  ;;  %v18017_v50 = vpack.c.bf16 %v5456_v12, %v5449_v51  ;;  %v26045_v29 = vld [vmem:[#allocation74_spill] sm:$0xff]  ;;  %v5395_v48 = vsub.f32 %v22436_v2, %v25524_v60  ;;  %v26046_v42 = vand.u32 4294901760, %v21937_v54 }
 0x216   : > { %18008 = vmatpush3.bf16.msra.mxu0 %v18005_v20  ;;  %15152 = vmatprep.mubr.f32.mxu0 %v26042_v38  ;;  %v22475_v20 = vsub.f32 %v22274_v13, %v26043_v1  ;;  %v22480_v28 = vsub.f32 %v22279_v58, %v26044_v19  ;;  %v5463_v38 = vand.u32 4294901760, %v5462_v21  ;;  %v26047_v13 = vand.u32 4294901760, %v21942_v8  ;;  %v26049_v21 = vld [vmem:[#allocation83_spill] sm:$0xff] }
 0x217   : > { %18010 = vmatprep.subr.bf16.mxu0 %v18009_v49  ;;  %v5470_v40 = vand.u32 4294901760, %v5469_v4  ;;  %v5476_v58 = vsub.f32 %v22444_v63, %v25523_v26  ;;  %v26048_v51 = vand.u32 4294901760, %v22449_v47  ;;  %v26050_v8 = vand.u32 4294901760, %v22318_v11 }
 0x218   : > { %17332 = vmatpush3.bf16.msra.mxu1 %v26038_v0  ;;  %v17337_v1 = vpack.c.bf16 %v26047_v13, %v26046_v42  ;;  %v5489_v19 = vand.u32 4294901760, %v22475_v20  ;;  %v26051_v4 = vand.u32 4294901760, %v22323_v31  ;;  %v26052_v13 = vand.u32 4294901760, %v21950_v52 }
 0x219   : > { %15153 = vmatmul.mubr.f32.gmra.mrb[2].mxu0 %v26045_v29  ;;  %17334 = vmatprep.subr.bf16.mxu1 %v17333_v17  ;;  %v5483_v12 = vsub.f32 %v22449_v47, %v26048_v51  ;;  %v5386_v29 = vand.u32 4294901760, %v5385_v34  ;;  %v26053_v34 = vld [vmem:[#allocation84_spill] sm:$0xff]  ;;  %v26054_v51 = vld [vmem:[#allocation102_spill] sm:$0xff]  ;;  %v26055_v26 = vand.u32 4294901760, %v21962_v59  ;;  %v18021_v60 = vpack.c.bf16 %v5470_v40, %v5463_v38  ;;  %v26059_v40 = vld [vmem:[#allocation13_spill] sm:$0xff] }
 0x21a   : > { %18012 = vmatpush3.bf16.msra.mxu0 %v18009_v49  ;;  %15155 = vmatprep.mubr.f32.mxu0 %v26049_v21  ;;  %v22503_v49 = vsub.f32 %v22318_v11, %v26050_v8  ;;  %v22508_v42 = vsub.f32 %v22323_v31, %v26051_v4  ;;  %v5396_v21 = vand.u32 4294901760, %v5395_v48  ;;  %v26056_v11 = vand.u32 4294901760, %v21967_v15  ;;  %v26058_v15 = vld [vmem:[#allocation87_spill] sm:$0xff] }
 0x21b   : > { %18014 = vmatprep.subr.bf16.mxu0 %v18013_v45  ;;  %14226 = vmatmul.mubr.f32.vlgmr.msra.gmra.mrb[0].mxu1 %v26052_v13  ;;  %v5477_v54 = vand.u32 4294901760, %v5476_v58  ;;  %v5484_v31 = vand.u32 4294901760, %v5483_v12  ;;  %v5490_v52 = vsub.f32 %v22475_v20, %v5489_v19 }
 0x21c   : > { %17336 = vmatpush3.bf16.msra.mxu1 %v17333_v17  ;;  %14228 = vmatprep.mubr.f32.mxu1 %v26053_v34  ;;  %v17341_v8 = vpack.c.bf16 %v26056_v11, %v26055_v26  ;;  %v26057_v17 = vand.u32 4294901760, %v22480_v28  ;;  %v5503_v4 = vand.u32 4294901760, %v22503_v49  ;;  %v5510_v59 = vand.u32 4294901760, %v22508_v42  ;;  %v26062_v34 = vld [vmem:[#allocation28_spill] sm:$0xff] }
 0x21d   : > { %15156 = vmatmul.mubr.f32.gmra.mrb[4].mxu0 %v26054_v51  ;;  %17338 = vmatprep.subr.bf16.mxu1 %v17337_v1  ;;  %v26060_v26 = vand.u32 4294901760, %v21990_v56  ;;  %v18025_v58 = vpack.c.bf16 %v5484_v31, %v5477_v54  ;;  %v5491_v12 = vand.u32 4294901760, %v5490_v52  ;;  %v26063_v56 = vld [vmem:[#allocation32_spill] sm:$0xff]  ;;  %v26068_v52 = vand.u32 4294901760, %v22051_v36 }
 0x21e   : > { %18016 = vmatpush3.bf16.msra.mxu0 %v18013_v45  ;;  %15158 = vmatprep.mubr.f32.mxu0 %v5386_v29  ;;  %v5497_v48 = vsub.f32 %v22480_v28, %v26057_v17  ;;  %v26061_v45 = vand.u32 4294901760, %v22002_v3  ;;  %v5511_v13 = vsub.f32 %v22508_v42, %v5510_v59  ;;  %v26064_v3 = vand.u32 4294901760, %v22018_v14  ;;  %v26066_v31 = vld [vmem:[#allocation36_spill] sm:$0xff] }
 0x21f   : > { %18018 = vmatprep.subr.bf16.mxu0 %v18017_v50  ;;  %14229 = vmatmul.mubr.f32.gmra.mrb[2].mxu1 %v26058_v15  ;;  %v18037_v15 = vpack.c.bf16 %v22286_v23, %v22283_v39  ;;  %v26072_v36 = vand.u32 4294901760, %v22094_v25  ;;  %v26073_v25 = vld [vmem:[#allocation98_spill] sm:$0xff] }
 0x220   : > { %17340 = vmatpush3.bf16.msra.mxu1 %v17337_v1  ;;  %14231 = vmatprep.mubr.f32.mxu1 %v26059_v40  ;;  %v17345_v38 = vpack.c.bf16 %v26061_v45, %v26060_v26  ;;  %v5498_v29 = vand.u32 4294901760, %v5497_v48  ;;  %v5504_v1 = vsub.f32 %v22503_v49, %v5503_v4  ;;  %v5512_v11 = vand.u32 4294901760, %v5511_v13  ;;  %v26074_v26 = vld [vmem:[#allocation94_spill] sm:$0xff]  ;;  %v26075_v45 = vld [vmem:[#allocation57_spill] sm:$0xff] }
 0x221   : > { %15159 = vmatmul.mubr.f32.gmra.mrb[6].mxu0 %v5396_v21  ;;  %17342 = vmatprep.subr.bf16.mxu1 %v17341_v8  ;;  %v18057_v13 = vpack.c.bf16 %v22449_v47, %v22444_v63 }
 0x222   : > { %18020 = vmatpush3.bf16.msra.mxu0 %v18017_v50  ;;  %15193 = vmatprep.mubr.f32.mxu0 %v20565_v9  ;;  %v26065_v50 = vand.u32 4294901760, %v22023_v16  ;;  %v18029_v51 = vpack.c.bf16 %v5498_v29, %v5491_v12  ;;  %v5505_v21 = vand.u32 4294901760, %v5504_v1  ;;  %v26069_v16 = vand.u32 4294901760, %v22072_v6  ;;  %v26077_v12 = vld [vmem:[#allocation9_spill] sm:$0xff]  ;;  %v26079_v29 = vld [vmem:[#allocation95_spill] sm:$0xff]  ;;  %v26080_v1 = vld [vmem:[#allocation58_spill] sm:$0xff] }
 0x223   : > { %18022 = vmatprep.subr.bf16.mxu0 %v18021_v60  ;;  %14232 = vmatmul.mubr.f32.gmra.mrb[4].mxu1 %v26062_v34  ;;  %v18041_v6 = vpack.c.bf16 %v22333_v35, %v22328_v5  ;;  %v26081_v34 = vld [vmem:[#allocation17_spill] sm:$0xff] }
 0x224   : > { %17344 = vmatpush3.bf16.msra.mxu1 %v17341_v8  ;;  %14234 = vmatprep.mubr.f32.mxu1 %v26063_v56  ;;  %v17349_v54 = vpack.c.bf16 %v26065_v50, %v26064_v3  ;;  %v26067_v8 = vand.u32 4294901760, %v22046_v37  ;;  %v18033_v14 = vpack.c.bf16 %v5512_v11, %v5505_v21  ;;  %v26071_v37 = vand.u32 4294901760, %v22089_v22  ;;  %v26082_v56 = vld [vmem:[#allocation19_spill] sm:$0xff]  ;;  %v26083_v3 = vld [vmem:[#allocation62_spill] sm:$0xff]  ;;  %v26086_v11 = vld [vmem:[#allocation97_spill] sm:$0xff] }
 0x225   : > { %17346 = vmatprep.subr.bf16.mxu1 %v17345_v38  ;;  %v18049_v22 = vpack.c.bf16 %v22379_v57, %v22371_v30  ;;  %v18061_v50 = vpack.c.bf16 %v22480_v28, %v22475_v20  ;;  %v18065_v21 = vpack.c.bf16 %v22508_v42, %v22503_v49  ;;  %v18129_v20 = vpack.c.bf16 %v5510_v59, %v5503_v4  ;;  %v26169_v42 = vld [vmem:[#allocation44_spill] sm:$0xff] }
 0x226   : > { %18024 = vmatpush3.bf16.msra.mxu0 %v18021_v60  ;;  %v17353_v17 = vpack.c.bf16 %v26068_v52, %v26067_v8  ;;  %v26070_v60 = vand.u32 4294901760, %v22077_v7  ;;  %v17361_v40 = vpack.c.bf16 %v26072_v36, %v26071_v37  ;;  %v18045_v7 = vpack.c.bf16 %v22365_v44, %v22360_v61  ;;  %v26089_v8 = vld [vmem:[#allocation64_spill] sm:$0xff]  ;;  %v26101_v37 = vld [vmem:[#allocation7_spill] sm:$0xff] }
 0x227   : > { %18026 = vmatprep.subr.bf16.mxu0 %v18025_v58  ;;  %14235 = vmatmul.mubr.f32.gmra.mrb[6].mxu1 %v26066_v31  ;;  %v26087_v31 = vld [vmem:[#allocation79_spill] sm:$0xff]  ;;  %v26090_v52 = vld [vmem:[#allocation80_spill] sm:$0xff]  ;;  %v26170_v4 = vand.u32 4294901760, %v26169_v42 }
 0x228   : > { %17348 = vmatpush3.bf16.msra.mxu1 %v17345_v38  ;;  %14269 = vmatprep.mubr.f32.mxu1 %v21874_v46  ;;  %v17357_v48 = vpack.c.bf16 %v26070_v60, %v26069_v16  ;;  %v18053_v38 = vpack.c.bf16 %v22415_v27, %v22406_v53  ;;  %v26093_v16 = vld [vmem:[#allocation99_spill] sm:$0xff]  ;;  %v26095_v60 = vld [vmem:[#allocation100_spill] sm:$0xff] }
 0x229   : > { %17350 = vmatprep.subr.bf16.mxu1 %v17349_v54  ;;  %v26102_v36 = vld [vmem:[#allocation52_spill] sm:$0xff]  ;;  %v2482_v59 = vsub.f32 %v26169_v42, %v26170_v4  ;;  %v6193_v4 = vld [vmem:[#allocation2 + $0x1a] sm:$0xff] }
 0x22a   : > { %18028 = vmatpush3.bf16.msra.mxu0 %v18025_v58  ;;  %v26076_v58 = vld [vmem:[#allocation11_spill] sm:$0xff] }
 0x22b   : > { %18030 = vmatprep.subr.bf16.mxu0 %v18029_v51 }
 0x22c   : > { %17352 = vmatpush3.bf16.msra.mxu1 %v17349_v54  ;;  %v26084_v54 = vld [vmem:[#allocation23_spill] sm:$0xff] }
 0x22d   : > { %17354 = vmatprep.subr.bf16.mxu1 %v17353_v17 }
 0x22e   : > { %18032 = vmatpush3.bf16.msra.mxu0 %v18029_v51  ;;  %v26085_v51 = vld [vmem:[#allocation76_spill] sm:$0xff] }
 0x22f   : > { %18034 = vmatprep.subr.bf16.mxu0 %v18033_v14 }
 0x230   : > { %17356 = vmatpush3.bf16.msra.mxu1 %v17353_v17  ;;  %v26091_v17 = vld [vmem:[#allocation66_spill] sm:$0xff] }
 0x231   : > { %17358 = vmatprep.subr.bf16.mxu1 %v17357_v48 }
 0x232   : > { %18036 = vmatpush3.bf16.msra.mxu0 %v18033_v14  ;;  %v26092_v14 = vld [vmem:[#allocation4_spill] sm:$0xff] }
 0x233   : > { %18038 = vmatprep.subr.bf16.mxu0 %v18037_v15 }
 0x234   : > { %17360 = vmatpush3.bf16.msra.mxu1 %v17357_v48  ;;  %v26096_v48 = vld [vmem:[#allocation5_spill] sm:$0xff] }
 0x235   : > { %15194 = vmatmul.mubr.f32.vlgmr.msra.gmra.mrb[0].mxu0 %v20595_v62  ;;  %17362 = vmatprep.subr.bf16.mxu1 %v17361_v40 }
 0x236   : > { %18040 = vmatpush3.bf16.msra.mxu0 %v18037_v15  ;;  %15196 = vmatprep.mubr.f32.mxu0 %v25886_v41  ;;  %v26100_v15 = vld [vmem:[#allocation56_spill] sm:$0xff] }
 0x237   : > { %18042 = vmatprep.subr.bf16.mxu0 %v18041_v6 }
 0x238   : > { %17364 = vmatpush3.bf16.msra.mxu1 %v17361_v40  ;;  %v26103_v40 = vld [vmem:[#allocation89_spill] sm:$0xff] }
 0x239   : > { %15197 = vmatmul.mubr.f32.gmra.mrb[2].mxu0 %v25891_v10  ;;  %17366 = vmatprep.subr.bf16.mxu1 %v25990_v33 }
 0x23a   : > { %18044 = vmatpush3.bf16.msra.mxu0 %v18041_v6  ;;  %15199 = vmatprep.mubr.f32.mxu0 %v25893_v32  ;;  %v26104_v6 = vld [vmem:[#allocation8_spill] sm:$0xff] }
 0x23b   : > { %18046 = vmatprep.subr.bf16.mxu0 %v18045_v7  ;;  %14270 = vmatmul.mubr.f32.vlgmr.msra.gmra.mrb[0].mxu1 %v21927_v18 }
 0x23c   : > { %17368 = vmatpush3.bf16.msra.mxu1 %v25990_v33  ;;  %14272 = vmatprep.mubr.f32.mxu1 %v20950_v24  ;;  %v26078_v33 = vld [vmem:[#allocation60_spill] sm:$0xff] }
 0x23d   : > { %15200 = vmatmul.mubr.f32.gmra.mrb[4].mxu0 %v26073_v25  ;;  %17370 = vmatprep.subr.bf16.mxu1 %v26074_v26 }
 0x23e   : > { %18048 = vmatpush3.bf16.msra.mxu0 %v18045_v7  ;;  %15202 = vmatprep.mubr.f32.mxu0 %v26075_v45  ;;  %v26105_v7 = vld [vmem:[#allocation53_spill] sm:$0xff] }
 0x23f   : > { %18050 = vmatprep.subr.bf16.mxu0 %v18049_v22  ;;  %14273 = vmatmul.mubr.f32.gmra.mrb[2].mxu1 %v26076_v58 }
 0x240   : > { %17372 = vmatpush3.bf16.msra.mxu1 %v26074_v26  ;;  %14275 = vmatprep.mubr.f32.mxu1 %v26077_v12  ;;  %v26107_v26 = vld [vmem:[#allocation55_spill] sm:$0xff] }
 0x241   : > { %15203 = vmatmul.mubr.f32.gmra.mrb[6].mxu0 %v26078_v33  ;;  %17374 = vmatprep.subr.bf16.mxu1 %v26079_v29 }
 0x242   : > { %18052 = vmatpush3.bf16.msra.mxu0 %v18049_v22  ;;  %15237 = vmatprep.mubr.f32.mxu0 %v26080_v1  ;;  %v26106_v22 = vld [vmem:[#allocation12_spill] sm:$0xff]  ;;  %v26110_v1 = vld [vmem:[#allocation15_spill] sm:$0xff] }
 0x243   : > { %18054 = vmatprep.subr.bf16.mxu0 %v18053_v38  ;;  %14276 = vmatmul.mubr.f32.gmra.mrb[4].mxu1 %v26081_v34 }
 0x244   : > { %17376 = vmatpush3.bf16.msra.mxu1 %v26079_v29  ;;  %14278 = vmatprep.mubr.f32.mxu1 %v26082_v56 }
 0x245   : > { %17378 = vmatprep.subr.bf16.mxu1 %v26083_v3 }
 0x246   : > { %18056 = vmatpush3.bf16.msra.mxu0 %v18053_v38  ;;  %v26108_v38 = vand.u32 4294901760, %v22283_v39  ;;  %v26116_v39 = vand.u32 4294901760, %v22333_v35  ;;  %v26123_v35 = vld [vmem:[#allocation68_spill] sm:$0xff] }
 0x247   : > { %18058 = vmatprep.subr.bf16.mxu0 %v18057_v13  ;;  %14279 = vmatmul.mubr.f32.gmra.mrb[6].mxu1 %v26084_v54 }
 0x248   : > { %17380 = vmatpush3.bf16.msra.mxu1 %v26083_v3  ;;  %14313 = vmatprep.mubr.f32.mxu1 %v21874_v46  ;;  %v26088_v46 = vld [vmem:[#allocation61_spill] sm:$0xff] }
 0x249   : > { %17382 = vmatprep.subr.bf16.mxu1 %v26085_v51 }
 0x24a   : > { %18060 = vmatpush3.bf16.msra.mxu0 %v18057_v13  ;;  %v26111_v13 = vand.u32 4294901760, %v26110_v1 }
 0x24b   : > { %18062 = vmatprep.subr.bf16.mxu0 %v18061_v50 }
 0x24c   : > { %17384 = vmatpush3.bf16.msra.mxu1 %v26085_v51  ;;  %v2493_v3 = vsub.f32 %v26110_v1, %v26111_v13 }
 0x24d   : > { %17386 = vmatprep.subr.bf16.mxu1 %v26086_v11 }
 0x24e   : > { %18064 = vmatpush3.bf16.msra.mxu0 %v18061_v50  ;;  %v26112_v50 = vld [vmem:[#allocation16_spill] sm:$0xff] }
 0x24f   : > { %18066 = vmatprep.subr.bf16.mxu0 %v18065_v21  ;;  %v26113_v51 = vand.u32 4294901760, %v26112_v50 }
 0x250   : > { %17388 = vmatpush3.bf16.msra.mxu1 %v26086_v11  ;;  %v26114_v11 = vld [vmem:[#allocation14_spill] sm:$0xff] }
 0x251   : > { %17390 = vmatprep.subr.bf16.mxu1 %v26033_v55 }
 0x252   : > { %18068 = vmatpush3.bf16.msra.mxu0 %v18065_v21  ;;  %v2500_v21 = vsub.f32 %v26112_v50, %v26113_v51 }
 0x253   : > { %18070 = vmatprep.subr.bf16.mxu0 %v26087_v31 }
 0x254   : > { %17392 = vmatpush3.bf16.msra.mxu1 %v26033_v55  ;;  %v26094_v55 = vld [vmem:[#allocation81_spill] sm:$0xff] }
 0x255   : > { %15238 = vmatmul.mubr.f32.vlgmr.msra.gmra.mrb[0].mxu0 %v26088_v46  ;;  %17394 = vmatprep.subr.bf16.mxu1 %v26038_v0  ;;  %v2494_v46 = vand.u32 4294901760, %v2493_v3  ;;  %v26126_v3 = vld [vmem:[#allocation24_spill] sm:$0xff] }
 0x256   : > { %18072 = vmatpush3.bf16.msra.mxu0 %v26087_v31  ;;  %15240 = vmatprep.mubr.f32.mxu0 %v26089_v8  ;;  %v2501_v8 = vand.u32 4294901760, %v2500_v21  ;;  %v26127_v51 = vand.u32 4294901760, %v26126_v3 }
 0x257   : > { %18074 = vmatprep.subr.bf16.mxu0 %v26090_v52 }
 0x258   : > { %17396 = vmatpush3.bf16.msra.mxu1 %v26038_v0  ;;  %v26097_v0 = vld [vmem:[#allocation51_spill] sm:$0xff]  ;;  %v2521_v21 = vsub.f32 %v26126_v3, %v26127_v51 }
 0x259   : > { %15241 = vmatmul.mubr.f32.gmra.mrb[2].mxu0 %v26091_v17  ;;  %17398 = vmatprep.subr.bf16.mxu1 %v26092_v14 }
 0x25a   : > { %18076 = vmatpush3.bf16.msra.mxu0 %v26090_v52  ;;  %15243 = vmatprep.mubr.f32.mxu0 %v26093_v16 }
 0x25b   : > { %18078 = vmatprep.subr.bf16.mxu0 %v26094_v55  ;;  %14314 = vmatmul.mubr.f32.vlgmr.msra.gmra.mrb[0].mxu1 %v21927_v18  ;;  %v26098_v18 = vld [vmem:[#allocation6_spill] sm:$0xff] }
 0x25c   : > { %17400 = vmatpush3.bf16.msra.mxu1 %v26092_v14  ;;  %14316 = vmatprep.mubr.f32.mxu1 %v20950_v24  ;;  %v26099_v24 = vld [vmem:[#allocation63_spill] sm:$0xff]  ;;  %v26117_v14 = vld [vmem:[#allocation18_spill] sm:$0xff] }
 0x25d   : > { %15244 = vmatmul.mubr.f32.gmra.mrb[4].mxu0 %v26095_v60  ;;  %17402 = vmatprep.subr.bf16.mxu1 %v26096_v48  ;;  %v26118_v16 = vand.u32 4294901760, %v26117_v14 }
 0x25e   : > { %18080 = vmatpush3.bf16.msra.mxu0 %v26094_v55  ;;  %15246 = vmatprep.mubr.f32.mxu0 %v22418_v43 }
 0x25f   : > { %18082 = vmatprep.subr.bf16.mxu0 %v26097_v0  ;;  %14317 = vmatmul.mubr.f32.gmra.mrb[2].mxu1 %v26076_v58  ;;  %v26109_v58 = vand.u32 4294901760, %v22286_v23  ;;  %v26115_v23 = vand.u32 4294901760, %v22328_v5  ;;  %v2507_v60 = vsub.f32 %v26117_v14, %v26118_v16 }
 0x260   : > { %17404 = vmatpush3.bf16.msra.mxu1 %v26096_v48  ;;  %14319 = vmatprep.mubr.f32.mxu1 %v26077_v12  ;;  %v26119_v48 = vld [vmem:[#allocation21_spill] sm:$0xff] }
 0x261   : > { %15247 = vmatmul.mubr.f32.gmra.mrb[6].mxu0 %v22436_v2  ;;  %17406 = vmatprep.subr.bf16.mxu1 %v26098_v18  ;;  %v18101_v29 = vpack.c.bf16 %v26109_v58, %v26108_v38  ;;  %v18105_v17 = vpack.c.bf16 %v26116_v39, %v26115_v23  ;;  %v26124_v38 = vand.u32 4294901760, %v22360_v61  ;;  %v26125_v58 = vand.u32 4294901760, %v22365_v44  ;;  %v26131_v61 = vld [vmem:[#allocation101_spill] sm:$0xff] }
 0x262   : > { %18084 = vmatpush3.bf16.msra.mxu0 %v26097_v0  ;;  %15281 = vmatprep.mubr.f32.mxu0 %v26099_v24  ;;  %v26132_v44 = vand.u32 4294901760, %v22371_v30 }
 0x263   : > { %18086 = vmatprep.subr.bf16.mxu0 %v26100_v15  ;;  %14320 = vmatmul.mubr.f32.gmra.mrb[4].mxu1 %v26081_v34  ;;  %v18109_v13 = vpack.c.bf16 %v26125_v58, %v26124_v38  ;;  %v26137_v38 = vld [vmem:[#allocation35_spill] sm:$0xff] }
 0x264   : > { %17408 = vmatpush3.bf16.msra.mxu1 %v26098_v18  ;;  %14322 = vmatprep.mubr.f32.mxu1 %v26082_v56  ;;  %v26120_v18 = vand.u32 4294901760, %v26119_v48  ;;  %v26138_v58 = vand.u32 4294901760, %v26137_v38 }
 0x265   : > { %17410 = vmatprep.subr.bf16.mxu1 %v26101_v37 }
 0x266   : > { %18088 = vmatpush3.bf16.msra.mxu0 %v26100_v15  ;;  %v2514_v24 = vsub.f32 %v26119_v48, %v26120_v18 }
 0x267   : > { %18090 = vmatprep.subr.bf16.mxu0 %v26102_v36  ;;  %14323 = vmatmul.mubr.f32.gmra.mrb[6].mxu1 %v26084_v54 }
 0x268   : > { %17412 = vmatpush3.bf16.msra.mxu1 %v26101_v37  ;;  %14357 = vmatprep.mubr.f32.mxu1 %v26103_v40  ;;  %v26121_v37 = vld [vmem:[#allocation65_spill] sm:$0xff]  ;;  %v26122_v40 = vld [vmem:[#allocation20_spill] sm:$0xff]  ;;  %v2515_v5 = vand.u32 4294901760, %v2514_v24  ;;  %v26134_v24 = vld [vmem:[#allocation90_spill] sm:$0xff] }
 0x269   : > { %17414 = vmatprep.subr.bf16.mxu1 %v26104_v6 }
 0x26a   : > { %18092 = vmatpush3.bf16.msra.mxu0 %v26102_v36 }
 0x26b   : > { %18094 = vmatprep.subr.bf16.mxu0 %v26105_v7 }
 0x26c   : > { %17416 = vmatpush3.bf16.msra.mxu1 %v26104_v6  ;;  %v17429_v6 = vpack.c.bf16 %v2501_v8, %v2494_v46  ;;  %v26130_v46 = vld [vmem:[#allocation70_spill] sm:$0xff]  ;;  %v2522_v8 = vand.u32 4294901760, %v2521_v21  ;;  %v26141_v21 = vand.u32 4294901760, %v22418_v43  ;;  %v26150_v43 = vand.u32 4294901760, %v22436_v2 }
 0x26d   : > { %17418 = vmatprep.subr.bf16.mxu1 %v26106_v22 }
 0x26e   : > { %18096 = vmatpush3.bf16.msra.mxu0 %v26105_v7 }
 0x26f   : > { %18098 = vmatprep.subr.bf16.mxu0 %v26107_v26 }
 0x270   : > { %17420 = vmatpush3.bf16.msra.mxu1 %v26106_v22  ;;  %v2508_v22 = vand.u32 4294901760, %v2507_v60  ;;  %v26133_v60 = vand.u32 4294901760, %v22379_v57 }
 0x271   : > { %17422 = vmatprep.subr.bf16.mxu1 %v26114_v11 }
 0x272   : > { %18100 = vmatpush3.bf16.msra.mxu0 %v26107_v26  ;;  %v18113_v18 = vpack.c.bf16 %v26133_v60, %v26132_v44  ;;  %v26146_v60 = vld [vmem:[#allocation42_spill] sm:$0xff] }
 0x273   : > { %18102 = vmatprep.subr.bf16.mxu0 %v18101_v29 }
 0x274   : > { %17424 = vmatpush3.bf16.msra.mxu1 %v26114_v11  ;;  %v26128_v11 = vld [vmem:[#allocation27_spill] sm:$0xff] }
 0x275   : > { %15282 = vmatmul.mubr.f32.vlgmr.msra.gmra.mrb[0].mxu0 %v26121_v37  ;;  %17426 = vmatprep.subr.bf16.mxu1 %v26122_v40  ;;  %v26129_v23 = vand.u32 4294901760, %v26128_v11  ;;  %v26135_v37 = vld [vmem:[#allocation31_spill] sm:$0xff] }
 0x276   : > { %18104 = vmatpush3.bf16.msra.mxu0 %v18101_v29  ;;  %15284 = vmatprep.mubr.f32.mxu0 %v26123_v35  ;;  %v17433_v29 = vpack.c.bf16 %v2515_v5, %v2508_v22  ;;  %v26136_v35 = vand.u32 4294901760, %v26135_v37  ;;  %v2542_v22 = vsub.f32 %v26137_v38, %v26138_v58  ;;  %v26140_v5 = vld [vmem:[#allocation69_spill] sm:$0xff]  ;;  %v26152_v58 = vand.u32 4294901760, %v22449_v47 }
 0x277   : > { %18106 = vmatprep.subr.bf16.mxu0 %v18105_v17  ;;  %v2528_v39 = vsub.f32 %v26128_v11, %v26129_v23  ;;  %v26142_v23 = vand.u32 4294901760, %v22406_v53 }
 0x278   : > { %17428 = vmatpush3.bf16.msra.mxu1 %v26122_v40  ;;  %v2535_v40 = vsub.f32 %v26135_v37, %v26136_v35  ;;  %v2543_v57 = vand.u32 4294901760, %v2542_v22 }
 0x279   : > { %15285 = vmatmul.mubr.f32.gmra.mrb[2].mxu0 %v26130_v46  ;;  %17430 = vmatprep.subr.bf16.mxu1 %v17429_v6  ;;  %v2529_v16 = vand.u32 4294901760, %v2528_v39  ;;  %v26143_v39 = vand.u32 4294901760, %v22415_v27 }
 0x27a   : > { %18108 = vmatpush3.bf16.msra.mxu0 %v18105_v17  ;;  %15287 = vmatprep.mubr.f32.mxu0 %v26131_v61  ;;  %v26139_v17 = vld [vmem:[#allocation91_spill] sm:$0xff]  ;;  %v2536_v51 = vand.u32 4294901760, %v2535_v40  ;;  %v26151_v40 = vand.u32 4294901760, %v22444_v63  ;;  %v26158_v63 = vand.u32 4294901760, %v22480_v28  ;;  %v26163_v28 = vld [vmem:[#allocation49_spill] sm:$0xff] }
 0x27b   : > { %18110 = vmatprep.subr.bf16.mxu0 %v18109_v13  ;;  %14358 = vmatmul.mubr.f32.vlgmr.msra.gmra.mrb[0].mxu1 %v26134_v24  ;;  %v17437_v30 = vpack.c.bf16 %v2529_v16, %v2522_v8  ;;  %v18117_v46 = vpack.c.bf16 %v26143_v39, %v26142_v23  ;;  %v26144_v61 = vld [vmem:[#allocation39_spill] sm:$0xff]  ;;  %v26147_v24 = vand.u32 4294901760, %v26146_v60  ;;  %v26148_v16 = vld [vmem:[#allocation92_spill] sm:$0xff] }
 0x27c   : > { %17432 = vmatpush3.bf16.msra.mxu1 %v17429_v6  ;;  %14360 = vmatprep.mubr.f32.mxu1 %v26139_v17  ;;  %v26145_v6 = vand.u32 4294901760, %v26144_v61  ;;  %v17441_v53 = vpack.c.bf16 %v2543_v57, %v2536_v51  ;;  %v18121_v22 = vpack.c.bf16 %v26152_v58, %v26151_v40  ;;  %v26153_v17 = vld [vmem:[#allocation45_spill] sm:$0xff]  ;;  %v26157_v51 = vld [vmem:[#allocation43_spill] sm:$0xff]  ;;  %v18125_v47 = vpack.c.bf16 %v26158_v63, %v5489_v19 }
 0x27d   : > { %15288 = vmatmul.mubr.f32.gmra.mrb[4].mxu0 %v26140_v5  ;;  %17434 = vmatprep.subr.bf16.mxu1 %v17433_v29  ;;  %v2556_v8 = vsub.f32 %v26146_v60, %v26147_v24  ;;  %v26164_v19 = vand.u32 4294901760, %v26163_v28 }
 0x27e   : > { %18112 = vmatpush3.bf16.msra.mxu0 %v18109_v13  ;;  %15290 = vmatprep.mubr.f32.mxu0 %v26141_v21  ;;  %v2549_v44 = vsub.f32 %v26144_v61, %v26145_v6  ;;  %v26149_v13 = vld [vmem:[#allocation40_spill] sm:$0xff]  ;;  %v26155_v21 = vld [vmem:[#allocation46_spill] sm:$0xff]  ;;  %v26159_v6 = vld [vmem:[#allocation47_spill] sm:$0xff] }
 0x27f   : > { %18114 = vmatprep.subr.bf16.mxu0 %v18113_v18  ;;  %14361 = vmatmul.mubr.f32.gmra.mrb[2].mxu1 %v26148_v16  ;;  %v2557_v35 = vand.u32 4294901760, %v2556_v8  ;;  %v26156_v2 = vand.u32 4294901760, %v26155_v21  ;;  %v26161_v8 = vld [vmem:[#allocation48_spill] sm:$0xff] }
 0x280   : > { %17436 = vmatpush3.bf16.msra.mxu1 %v17433_v29  ;;  %14363 = vmatprep.mubr.f32.mxu1 %v26149_v13  ;;  %v2550_v27 = vand.u32 4294901760, %v2549_v44  ;;  %v26154_v29 = vand.u32 4294901760, %v26153_v17  ;;  %v26160_v44 = vand.u32 4294901760, %v26159_v6  ;;  %v26162_v16 = vand.u32 4294901760, %v26161_v8 }
 0x281   : > { %15291 = vmatmul.mubr.f32.gmra.mrb[6].mxu0 %v26150_v43  ;;  %17438 = vmatprep.subr.bf16.mxu1 %v17437_v30  ;;  %v2570_v23 = vsub.f32 %v26155_v21, %v26156_v2 }
 0x282   : > { %18116 = vmatpush3.bf16.msra.mxu0 %v18113_v18  ;;  %15325 = vmatprep.mubr.f32.mxu0 %v20565_v9  ;;  %v2563_v5 = vsub.f32 %v26153_v17, %v26154_v29  ;;  %v17445_v18 = vpack.c.bf16 %v2557_v35, %v2550_v27  ;;  %v2577_v24 = vsub.f32 %v26159_v6, %v26160_v44  ;;  %v26165_v35 = vld [vmem:[#allocation50_spill] sm:$0xff]  ;;  %v26167_v29 = vld [vmem:[#allocation41_spill] sm:$0xff] }
 0x283   : > { %18118 = vmatprep.subr.bf16.mxu0 %v18117_v46  ;;  %14364 = vmatmul.mubr.f32.gmra.mrb[4].mxu1 %v26157_v51  ;;  %v2571_v39 = vand.u32 4294901760, %v2570_v23  ;;  %v2584_v13 = vsub.f32 %v26161_v8, %v26162_v16  ;;  %v26166_v40 = vand.u32 4294901760, %v26165_v35  ;;  %v2483_v51 = vand.u32 4294901760, %v2482_v59  ;;  %v26178_v59 = vld [vmem:[#allocation29_spill] sm:$0xff] }
 0x284   : > { %17440 = vmatpush3.bf16.msra.mxu1 %v17437_v30  ;;  %v2564_v57 = vand.u32 4294901760, %v2563_v5  ;;  %v2578_v43 = vand.u32 4294901760, %v2577_v24  ;;  %v26168_v5 = vand.u32 4294901760, %v26167_v29  ;;  %v22852_v24 = vld [vmem:[%s25141_s2 + $0x130] sm:$0xff] }
 0x285   : > { %17442 = vmatprep.subr.bf16.mxu1 %v17441_v53  ;;  %v2585_v27 = vand.u32 4294901760, %v2584_v13  ;;  %v2598_v58 = vsub.f32 %v26165_v35, %v26166_v40  ;;  %v6239_v13 = vand.u32 4294901760, %v22852_v24 }
 0x286   : > { %18120 = vmatpush3.bf16.msra.mxu0 %v18117_v46  ;;  %v17449_v30 = vpack.c.bf16 %v2571_v39, %v2564_v57  ;;  %v2591_v46 = vsub.f32 %v26163_v28, %v26164_v19  ;;  %v17461_v57 = vpack.c.bf16 %v26112_v50, %v26110_v1  ;;  %v26174_v1 = vld [vmem:[#allocation38_spill] sm:$0xff]  ;;  %v22832_v39 = vld [vmem:[%s25141_s2 + $0x128] sm:$0xff] }
 0x287   : > { %18122 = vmatprep.subr.bf16.mxu0 %v18121_v22  ;;  %v2599_v49 = vand.u32 4294901760, %v2598_v58  ;;  %v26175_v50 = vld [vmem:[#allocation10_spill] sm:$0xff]  ;;  %v6236_v44 = vand.u32 4294901760, %v22832_v39 }
 0x288   : > { %17444 = vmatpush3.bf16.msra.mxu1 %v17441_v53  ;;  %v17453_v53 = vpack.c.bf16 %v2585_v27, %v2578_v43  ;;  %v2592_v2 = vand.u32 4294901760, %v2591_v46  ;;  %v26176_v19 = vld [vmem:[#allocation22_spill] sm:$0xff]  ;;  %v22906_v46 = vld [vmem:[%s25141_s2 + $0x158] sm:$0xff] }
 0x289   : > { %17446 = vmatprep.subr.bf16.mxu1 %v17445_v18 }
 0x28a   : > { %18124 = vmatpush3.bf16.msra.mxu0 %v18121_v22  ;;  %v2472_v22 = vsub.f32 %v26167_v29, %v26168_v5 }
 0x28b   : > { %18126 = vmatprep.subr.bf16.mxu0 %v18125_v47 }
 0x28c   : > { %17448 = vmatpush3.bf16.msra.mxu1 %v17445_v18  ;;  %v2473_v23 = vand.u32 4294901760, %v2472_v22  ;;  %v17457_v18 = vpack.c.bf16 %v2599_v49, %v2592_v2  ;;  %v6254_v2 = vand.u32 4294901760, %v22906_v46  ;;  %v22930_v49 = vld [vmem:[%s25141_s2 + $0x160] sm:$0xff] }
 0x28d   : > { %17450 = vmatprep.subr.bf16.mxu1 %v17449_v30 }
 0x28e   : > { %18128 = vmatpush3.bf16.msra.mxu0 %v18125_v47  ;;  %14366 = vmatprep.mubr.f32.mxu1 %v2473_v23  ;;  %v26179_v23 = vld [vmem:[#allocation33_spill] sm:$0xff] }
 0x28f   : > { %18130 = vmatprep.subr.bf16.mxu0 %v18129_v20  ;;  %14367 = vmatmul.mubr.f32.gmra.mrb[6].mxu1 %v2483_v51  ;;  %v22942_v51 = vld [vmem:[%s25141_s2 + $0x170] sm:$0xff] }
 0x290   : > { %17452 = vmatpush3.bf16.msra.mxu1 %v17449_v30  ;;  %14401 = vmatprep.mubr.f32.mxu1 %v26077_v12  ;;  %v17465_v12 = vpack.c.bf16 %v26119_v48, %v26117_v14  ;;  %v17481_v14 = vpack.c.bf16 %v26155_v21, %v26153_v17  ;;  %v22827_v21 = vld [vmem:[%s25141_s2 + $0x120] sm:$0xff] }
 0x291   : > { %17454 = vmatprep.subr.bf16.mxu1 %v17453_v53 }
 0x292   : > { %18132 = vmatpush3.bf16.msra.mxu0 %v18129_v20 }
 0x293   : > { %18134 = vmatprep.subr.bf16.mxu0 %v26087_v31 }
 0x294   : > { %17456 = vmatpush3.bf16.msra.mxu1 %v17453_v53 }
 0x295   : > { %15326 = vmatmul.mubr.f32.vlgmr.msra.gmra.mrb[0].mxu0 %v20595_v62  ;;  %17458 = vmatprep.subr.bf16.mxu1 %v17457_v18 }
 0x296   : > { %18136 = vmatpush3.bf16.msra.mxu0 %v26087_v31  ;;  %15328 = vmatprep.mubr.f32.mxu0 %v25886_v41  ;;  %v17469_v31 = vpack.c.bf16 %v26128_v11, %v26126_v3  ;;  %v6191_v3 = vld [vmem:[#allocation2 + $0x2] sm:$0xff]  ;;  %v22807_v11 = vld [vmem:[%s25141_s2 + $0x110] sm:$0xff] }
 0x297   : > { %18138 = vmatprep.subr.bf16.mxu0 %v26090_v52 }
 0x298   : > { %17460 = vmatpush3.bf16.msra.mxu1 %v17457_v18  ;;  %v22947_v18 = vld [vmem:[%s25141_s2 + $0x178] sm:$0xff] }
 0x299   : > { %15329 = vmatmul.mubr.f32.gmra.mrb[2].mxu0 %v25891_v10  ;;  %17462 = vmatprep.subr.bf16.mxu1 %v17461_v57 }
 0x29a   : > { %18140 = vmatpush3.bf16.msra.mxu0 %v26090_v52  ;;  %15331 = vmatprep.mubr.f32.mxu0 %v25893_v32  ;;  %v26171_v52 = vld [vmem:[#allocation26_spill] sm:$0xff] }
 0x29b   : > { %18142 = vmatprep.subr.bf16.mxu0 %v26094_v55  ;;  %14402 = vmatmul.mubr.f32.vlgmr.msra.gmra.mrb[0].mxu1 %v26081_v34  ;;  %v17473_v34 = vpack.c.bf16 %v26137_v38, %v26135_v37  ;;  %v22812_v37 = vld [vmem:[%s25141_s2 + $0x118] sm:$0xff]  ;;  %v22817_v38 = vand.u32 4294901760, %v6191_v3 }
 0x29c   : > { %17464 = vmatpush3.bf16.msra.mxu1 %v17461_v57  ;;  %14404 = vmatprep.mubr.f32.mxu1 %v26082_v56  ;;  %v26172_v56 = vld [vmem:[#allocation30_spill] sm:$0xff]  ;;  %v6230_v17 = vand.u32 4294901760, %v22812_v37 }
 0x29d   : > { %15332 = vmatmul.mubr.f32.gmra.mrb[4].mxu0 %v26073_v25  ;;  %17466 = vmatprep.subr.bf16.mxu1 %v17465_v12  ;;  %v22838_v63 = vsub.f32 %v6191_v3, %v22817_v38 }
 0x29e   : > { %18144 = vmatpush3.bf16.msra.mxu0 %v26094_v55  ;;  %15334 = vmatprep.mubr.f32.mxu0 %v26075_v45  ;;  %v26173_v55 = vld [vmem:[#allocation34_spill] sm:$0xff] }
 0x29f   : > { %18146 = vmatprep.subr.bf16.mxu0 %v26097_v0  ;;  %14405 = vmatmul.mubr.f32.gmra.mrb[2].mxu1 %v26084_v54  ;;  %v17477_v54 = vpack.c.bf16 %v26146_v60, %v26144_v61  ;;  %v6227_v60 = vand.u32 4294901760, %v22807_v11 }
 0x2a0   : > { %17468 = vmatpush3.bf16.msra.mxu1 %v17465_v12  ;;  %14407 = vmatprep.mubr.f32.mxu1 %v26171_v52 }
 0x2a1   : > { %15335 = vmatmul.mubr.f32.gmra.mrb[6].mxu0 %v26078_v33  ;;  %17470 = vmatprep.subr.bf16.mxu1 %v17469_v31  ;;  %v22845_v47 = vpack.c.bf16 %v6230_v17, %v6227_v60 }
 0x2a2   : > { %18148 = vmatpush3.bf16.msra.mxu0 %v26097_v0  ;;  %15369 = vmatprep.mubr.f32.mxu0 %v20565_v9  ;;  %v12000_v9 = vld [vmem:[%s25141_s2 + $0x100] sm:$0xff]  ;;  %v12001_v0 = vld [vmem:[%s25141_s2 + $0x108] sm:$0xff] }
 0x2a3   : > { %18150 = vmatprep.subr.bf16.mxu0 %v26100_v15  ;;  %14408 = vmatmul.mubr.f32.gmra.mrb[4].mxu1 %v26172_v56  ;;  %v6224_v48 = vand.u32 4294901760, %v12001_v0  ;;  %v22958_v56 = vand.u32 4294901760, %v6193_v4 }
 0x2a4   : > { %17472 = vmatpush3.bf16.msra.mxu1 %v17469_v31  ;;  %14410 = vmatprep.mubr.f32.mxu1 %v26173_v55  ;;  %v25538_v31 = vand.u32 4294901760, %v22930_v49  ;;  %v6194_v55 = vld [vmem:[#allocation2 + $0x22] sm:$0xff] }
 0x2a5   : > { %17474 = vmatprep.subr.bf16.mxu1 %v17473_v34  ;;  %v22912_v58 = vsub.f32 %v12001_v0, %v6224_v48  ;;  %v26180_v0 = vld [vmem:[#allocation37_spill] sm:$0xff]  ;;  %v22987_v3 = vand.u32 4294901760, %v6194_v55 }
 0x2a6   : > { %18152 = vmatpush3.bf16.msra.mxu0 %v26100_v15  ;;  %v6221_v15 = vand.u32 4294901760, %v12000_v9 }
 0x2a7   : > { %18154 = vmatprep.subr.bf16.mxu0 %v26102_v36  ;;  %14411 = vmatmul.mubr.f32.gmra.mrb[6].mxu1 %v26174_v1  ;;  %v25528_v12 = vand.u32 4294901760, %v22912_v58  ;;  %v22975_v1 = vsub.f32 %v22812_v37, %v6230_v17  ;;  %v22998_v37 = vsub.f32 %v6193_v4, %v22958_v56 }
 0x2a8   : > { %17476 = vmatpush3.bf16.msra.mxu1 %v17473_v34  ;;  %14445 = vmatprep.mubr.f32.mxu1 %v26175_v50  ;;  %v22820_v61 = vpack.c.bf16 %v6224_v48, %v6221_v15  ;;  %v22910_v40 = vsub.f32 %v12000_v9, %v6221_v15  ;;  %v6195_v9 = vld [vmem:[#allocation2 + $0x32] sm:$0xff]  ;;  %v25536_v50 = vand.u32 4294901760, %v22942_v51 }
 0x2a9   : > { %17478 = vmatprep.subr.bf16.mxu1 %v17477_v54  ;;  %v6392_v48 = vsub.f32 %v22912_v58, %v25528_v12 }
 0x2aa   : > { %18156 = vmatpush3.bf16.msra.mxu0 %v26102_v36  ;;  %v17485_v36 = vpack.c.bf16 %v26161_v8, %v26159_v6  ;;  %v6233_v6 = vand.u32 4294901760, %v22827_v21  ;;  %v25530_v8 = vand.u32 4294901760, %v22838_v63  ;;  %v25529_v57 = vand.u32 4294901760, %v22910_v40 }
 0x2ab   : > { %18158 = vmatprep.subr.bf16.mxu0 %v26105_v7 }
 0x2ac   : > { %17480 = vmatpush3.bf16.msra.mxu1 %v17477_v54  ;;  %v22868_v16 = vpack.c.bf16 %v6236_v44, %v6233_v6  ;;  %v6304_v43 = vsub.f32 %v22838_v63, %v25530_v8  ;;  %v22970_v54 = vsub.f32 %v22807_v11, %v6227_v60  ;;  %v6385_v15 = vsub.f32 %v22910_v40, %v25529_v57  ;;  %v6196_v60 = vld [vmem:[#allocation2 + $0x3a] sm:$0xff] }
 0x2ad   : > { %17482 = vmatprep.subr.bf16.mxu1 %v17481_v14 }
 0x2ae   : > { %18160 = vmatpush3.bf16.msra.mxu0 %v26105_v7  ;;  %v17489_v7 = vpack.c.bf16 %v26165_v35, %v26163_v28  ;;  %v6192_v28 = vld [vmem:[#allocation2 + $0xa] sm:$0xff]  ;;  %v26177_v35 = vld [vmem:[#allocation25_spill] sm:$0xff]  ;;  %v6305_v53 = vand.u32 4294901760, %v6304_v43  ;;  %v25526_v17 = vand.u32 4294901760, %v22970_v54  ;;  %v23008_v43 = vsub.f32 %v22827_v21, %v6233_v6 }
 0x2af   : > { %18162 = vmatprep.subr.bf16.mxu0 %v26107_v26  ;;  %v22916_v5 = vand.u32 4294901760, %v6192_v28  ;;  %v6393_v6 = vand.u32 4294901760, %v6392_v48 }
 0x2b0   : > { %17484 = vmatpush3.bf16.msra.mxu1 %v17481_v14  ;;  %v25531_v14 = vand.u32 4294901760, %v22947_v18 }
 0x2b1   : > { %17486 = vmatprep.subr.bf16.mxu1 %v17485_v36  ;;  %v22956_v34 = vsub.f32 %v6192_v28, %v22916_v5  ;;  %v23013_v28 = vsub.f32 %v22832_v39, %v6236_v44  ;;  %v6386_v39 = vand.u32 4294901760, %v6385_v15  ;;  %v23035_v44 = vand.u32 4294901760, %v6196_v60 }
 0x2b2   : > { %18164 = vmatpush3.bf16.msra.mxu0 %v26107_v26  ;;  %v22857_v26 = vld [vmem:[%s25141_s2 + $0x138] sm:$0xff] }
 0x2b3   : > { %18166 = vmatprep.subr.bf16.mxu0 %v22820_v61  ;;  %v6242_v30 = vand.u32 4294901760, %v22857_v26  ;;  %v23074_v12 = vsub.f32 %v6196_v60, %v23035_v44 }
 0x2b4   : > { %17488 = vmatpush3.bf16.msra.mxu1 %v17485_v36  ;;  %v23000_v36 = vand.u32 4294901760, %v6195_v9 }
 0x2b5   : > { %15370 = vmatmul.mubr.f32.vlgmr.msra.gmra.mrb[0].mxu0 %v20595_v62  ;;  %17490 = vmatprep.subr.bf16.mxu1 %v17489_v7  ;;  %v22875_v62 = vld [vmem:[%s25141_s2 + $0x140] sm:$0xff]  ;;  %v22893_v27 = vpack.c.bf16 %v6242_v30, %v6239_v13  ;;  %v23030_v21 = vsub.f32 %v22857_v26, %v6242_v30  ;;  %v6198_v30 = vld [vmem:[#allocation2 + $0x52] sm:$0xff] }
 0x2b6   : > { %18168 = vmatpush3.bf16.msra.mxu0 %v22820_v61  ;;  %15372 = vmatprep.mubr.f32.mxu0 %v25886_v41  ;;  %v22880_v41 = vld [vmem:[%s25141_s2 + $0x148] sm:$0xff]  ;;  %v6245_v20 = vand.u32 4294901760, %v22875_v62  ;;  %v23076_v57 = vand.u32 4294901760, %v6198_v30 }
 0x2b7   : > { %18170 = vmatprep.subr.bf16.mxu0 %v22845_v47  ;;  %v25535_v15 = vand.u32 4294901760, %v23030_v21 }
 0x2b8   : > { %17492 = vmatpush3.bf16.msra.mxu1 %v17489_v7  ;;  %v25527_v7 = vand.u32 4294901760, %v22975_v1  ;;  %v23063_v48 = vsub.f32 %v22875_v62, %v6245_v20 }
 0x2b9   : > { %15373 = vmatmul.mubr.f32.gmra.mrb[2].mxu0 %v25891_v10  ;;  %v6248_v10 = vand.u32 4294901760, %v22880_v41 }
 0x2ba   : > { %18172 = vmatpush3.bf16.msra.mxu0 %v22845_v47  ;;  %15375 = vmatprep.mubr.f32.mxu0 %v25893_v32  ;;  %v22901_v32 = vld [vmem:[%s25141_s2 + $0x150] sm:$0xff] }
 0x2bb   : > { %18174 = vmatprep.subr.bf16.mxu0 %v22868_v16  ;;  %14446 = vmatmul.mubr.f32.vlgmr.msra.gmra.mrb[0].mxu1 %v26176_v19  ;;  %v22923_v22 = vpack.c.bf16 %v6248_v10, %v6245_v20  ;;  %v6197_v19 = vld [vmem:[#allocation2 + $0x4a] sm:$0xff] }
 0x2bc   : > { %14448 = vmatprep.mubr.f32.mxu1 %v26177_v35  ;;  %v23020_v35 = vpack.c.bf16 %v25531_v14, %v25536_v50  ;;  %v23047_v26 = vand.u32 4294901760, %v6197_v19  ;;  %v23121_v50 = vsub.f32 %v22906_v46, %v6254_v2 }
 0x2bd   : > { %15376 = vmatmul.mubr.f32.gmra.mrb[4].mxu0 %v26073_v25  ;;  %v6251_v25 = vand.u32 4294901760, %v22901_v32 }
 0x2be   : > { %18176 = vmatpush3.bf16.msra.mxu0 %v22868_v16  ;;  %15378 = vmatprep.mubr.f32.mxu0 %v26075_v45  ;;  %v22935_v45 = vld [vmem:[%s25141_s2 + $0x168] sm:$0xff] }
 0x2bf   : > { %18178 = vmatprep.subr.bf16.mxu0 %v22893_v27  ;;  %14449 = vmatmul.mubr.f32.gmra.mrb[2].mxu1 %v26178_v59  ;;  %v25537_v52 = vand.u32 4294901760, %v22935_v45  ;;  %v6399_v59 = vsub.f32 %v22970_v54, %v25526_v17  ;;  %v18197_v17 = vpack.c.bf16 %v6393_v6, %v6386_v39 }
 0x2c0   : > { %14451 = vmatprep.mubr.f32.mxu1 %v26179_v23  ;;  %v6406_v23 = vsub.f32 %v22975_v1, %v25527_v7 }
 0x2c1   : > { %15379 = vmatmul.mubr.f32.gmra.mrb[6].mxu0 %v26078_v33  ;;  %v22965_v33 = vpack.c.bf16 %v6254_v2, %v6251_v25  ;;  %v22994_v11 = vpack.c.bf16 %v25537_v52, %v25538_v31 }
 0x2c2   : > { %18180 = vmatpush3.bf16.msra.mxu0 %v22893_v27  ;;  %15413 = vmatprep.mubr.f32.mxu0 %v6305_v53  ;;  %v23025_v53 = vsub.f32 %v22852_v24, %v6239_v13  ;;  %v23042_v24 = vand.u32 4294901760, %v22998_v37  ;;  %v23045_v13 = vsub.f32 %v6195_v9, %v23000_v36  ;;  %v6407_v39 = vand.u32 4294901760, %v6406_v23 }
 0x2c3   : > { %18182 = vmatprep.subr.bf16.mxu0 %v22923_v22  ;;  %14452 = vmatmul.mubr.f32.gmra.mrb[4].mxu1 %v26180_v0  ;;  %v25532_v0 = vand.u32 4294901760, %v23013_v28  ;;  %v23105_v23 = vsub.f32 %v22901_v32, %v6251_v25 }
 0x2c4   : > { %14454 = vmatprep.mubr.f32.mxu1 %v26167_v29  ;;  %v25525_v29 = vand.u32 4294901760, %v22956_v34  ;;  %26181 = vst [vmem:[#allocation86_spill] sm:$0xff] %v23042_v24  ;;  %v25534_v9 = vand.u32 4294901760, %v23025_v53  ;;  %v6324_v62 = vsub.f32 %v22998_v37, %v23042_v24  ;;  %v23082_v20 = vand.u32 4294901760, %v23045_v13 }
 0x2c5   : > { %v6420_v6 = vsub.f32 %v23013_v28, %v25532_v0 }
 0x2c6   : > { %18184 = vmatpush3.bf16.msra.mxu0 %v22923_v22  ;;  %v6314_v4 = vsub.f32 %v22956_v34, %v25525_v29  ;;  %v23068_v29 = vsub.f32 %v22880_v41, %v6248_v10  ;;  %26183 = vst [vmem:[#allocation75_spill] sm:$0xff] %v23082_v20  ;;  %v23085_v41 = vsub.f32 %v6197_v19, %v23047_v26  ;;  %v6400_v10 = vand.u32 4294901760, %v6399_v59 }
 0x2c7   : > { %18186 = vmatprep.subr.bf16.mxu0 %v22965_v33  ;;  %14455 = vmatmul.mubr.f32.gmra.mrb[6].mxu1 %v26169_v42  ;;  %v23033_v42 = vsub.f32 %v6194_v55, %v22987_v3  ;;  %v25533_v55 = vand.u32 4294901760, %v23008_v43  ;;  %v6434_v19 = vsub.f32 %v23030_v21, %v25535_v15  ;;  %v23116_v15 = vand.u32 4294901760, %v6324_v62 }
 0x2c8   : > { %v6315_v8 = vand.u32 4294901760, %v6314_v4  ;;  %v6427_v4 = vsub.f32 %v23025_v53, %v25534_v9  ;;  %v23113_v9 = vsub.f32 %v6198_v30, %v23076_v57  ;;  %v6344_v32 = vsub.f32 %v23045_v13, %v23082_v20 }
 0x2c9   : > { %v23071_v7 = vand.u32 4294901760, %v23033_v42  ;;  %v6413_v60 = vsub.f32 %v23008_v43, %v25533_v55  ;;  %v23110_v55 = vand.u32 4294901760, %v23074_v12  ;;  %v23126_v25 = vand.u32 4294901760, %v23085_v41 }
 0x2ca   : > { %18188 = vmatpush3.bf16.msra.mxu0 %v22965_v33  ;;  %v18201_v52 = vpack.c.bf16 %v6407_v39, %v6400_v10  ;;  %v6421_v30 = vand.u32 4294901760, %v6420_v6  ;;  %v6428_v59 = vand.u32 4294901760, %v6427_v4  ;;  %v6435_v14 = vand.u32 4294901760, %v6434_v19 }
 0x2cb   : > { %18190 = vmatprep.subr.bf16.mxu0 %v22994_v11  ;;  %26182 = vst [vmem:[#allocation88_spill] sm:$0xff] %v23071_v7  ;;  %v6334_v0 = vsub.f32 %v23033_v42, %v23071_v7  ;;  %26184 = vst [vmem:[#allocation67_spill] sm:$0xff] %v23110_v55  ;;  %v6414_v31 = vand.u32 4294901760, %v6413_v60  ;;  %v26186_v62 = vand.u32 4294901760, %v23063_v48  ;;  %v26187_v46 = vand.u32 4294901760, %v23068_v29 }
 0x2cc   : > { %26185 = vst [vmem:[#allocation54_spill] sm:$0xff] %v23126_v25  ;;  %v6354_v20 = vsub.f32 %v23074_v12, %v23110_v55  ;;  %v23139_v10 = vand.u32 4294901760, %v23113_v9  ;;  %v6364_v6 = vsub.f32 %v23085_v41, %v23126_v25  ;;  %v26189_v4 = vand.u32 4294901760, %v22930_v49 }
 0x2cd   : > { %v6441_v7 = vsub.f32 %v23063_v48, %v26186_v62  ;;  %v6448_v2 = vsub.f32 %v23068_v29, %v26187_v46  ;;  %v23134_v24 = vand.u32 4294901760, %v6334_v0  ;;  %v18205_v0 = vpack.c.bf16 %v6421_v30, %v6414_v31 }
 0x2ce   : > { %18192 = vmatpush3.bf16.msra.mxu0 %v22994_v11  ;;  %26188 = vst [vmem:[#allocation93_spill] sm:$0xff] %v23139_v10  ;;  %v23151_v19 = vsub.f32 %v22930_v49, %v26189_v4  ;;  %v18209_v46 = vpack.c.bf16 %v6435_v14, %v6428_v59  ;;  %v6374_v60 = vsub.f32 %v23113_v9, %v23139_v10  ;;  %v26191_v30 = vand.u32 4294901760, %v23105_v23 }
 0x2cf   : > { %18194 = vmatprep.subr.bf16.mxu0 %v23020_v35  ;;  %v6442_v39 = vand.u32 4294901760, %v6441_v7  ;;  %v6449_v31 = vand.u32 4294901760, %v6448_v2  ;;  %v26192_v4 = vand.u32 4294901760, %v23121_v50  ;;  %v23170_v14 = vand.u32 4294901760, %v6364_v6 }
 0x2d0   : > { %v6455_v49 = vsub.f32 %v23105_v23, %v26191_v30  ;;  %v26195_v2 = vand.u32 4294901760, %v22947_v18  ;;  %v23185_v30 = vand.u32 4294901760, %v6374_v60 }
 0x2d1   : > { %26193 = vst [vmem:[#allocation96_spill] sm:$0xff] %v23170_v14  ;;  %v18213_v6 = vpack.c.bf16 %v6449_v31, %v6442_v39 }
 0x2d2   : > { %18196 = vmatpush3.bf16.msra.mxu0 %v23020_v35  ;;  %26196 = vst [vmem:[#allocation59_spill] sm:$0xff] %v23185_v30 }
 0x2d3   : > { %18198 = vmatprep.subr.bf16.mxu0 %v18197_v17 }
 0x2d5   : > { %15414 = vmatmul.mubr.f32.vlgmr.msra.gmra.mrb[0].mxu0 %v6315_v8  ;;  %v23144_v8 = vand.u32 4294901760, %v6344_v32  ;;  %v23159_v32 = vand.u32 4294901760, %v6354_v20  ;;  %v26197_v20 = vand.u32 4294901760, %v23151_v19 }
 0x2d6   : > { %18200 = vmatpush3.bf16.msra.mxu0 %v18197_v17  ;;  %15416 = vmatprep.mubr.f32.mxu0 %v23116_v15  ;;  %v26190_v17 = vand.u32 4294901760, %v22935_v45 }
 0x2d7   : > { %18202 = vmatprep.subr.bf16.mxu0 %v18201_v52 }
 0x2d8   : > { %v23156_v62 = vsub.f32 %v22935_v45, %v26190_v17  ;;  %v6462_v45 = vsub.f32 %v23121_v50, %v26192_v4  ;;  %v23182_v17 = vsub.f32 %v22947_v18, %v26195_v2  ;;  %v6456_v4 = vand.u32 4294901760, %v6455_v49 }
 0x2d9   : > { %15417 = vmatmul.mubr.f32.gmra.mrb[2].mxu0 %v23134_v24 }
 0x2da   : > { %18204 = vmatpush3.bf16.msra.mxu0 %v18201_v52  ;;  %15419 = vmatprep.mubr.f32.mxu0 %v23144_v8  ;;  %v26194_v52 = vand.u32 4294901760, %v22942_v51  ;;  %v6463_v7 = vand.u32 4294901760, %v6462_v45  ;;  %v6489_v60 = vand.u32 4294901760, %v23182_v17 }
 0x2db   : > { %18206 = vmatprep.subr.bf16.mxu0 %v18205_v0 }
 0x2dc   : > { %v23177_v59 = vsub.f32 %v22942_v51, %v26194_v52  ;;  %v6469_v51 = vsub.f32 %v23151_v19, %v26197_v20  ;;  %v26198_v52 = vand.u32 4294901760, %v23156_v62  ;;  %v18217_v39 = vpack.c.bf16 %v6463_v7, %v6456_v4 }
 0x2dd   : > { %15420 = vmatmul.mubr.f32.gmra.mrb[4].mxu0 %v23159_v32  ;;  %v6490_v45 = vsub.f32 %v23182_v17, %v6489_v60  ;;  %v18229_v7 = vpack.c.bf16 %v22912_v58, %v22910_v40  ;;  %v18233_v4 = vpack.c.bf16 %v22975_v1, %v22970_v54 }
 0x2de   : > { %18208 = vmatpush3.bf16.msra.mxu0 %v18205_v0  ;;  %15422 = vmatprep.mubr.f32.mxu0 %v23170_v14  ;;  %v6476_v18 = vsub.f32 %v23156_v62, %v26198_v52  ;;  %v6482_v2 = vand.u32 4294901760, %v23177_v59  ;;  %v6470_v0 = vand.u32 4294901760, %v6469_v51  ;;  %v18245_v51 = vpack.c.bf16 %v23068_v29, %v23063_v48 }
 0x2df   : > { %18210 = vmatprep.subr.bf16.mxu0 %v18209_v46 }
 0x2e0   : > { %v6477_v31 = vand.u32 4294901760, %v6476_v18  ;;  %v6483_v49 = vsub.f32 %v23177_v59, %v6482_v2  ;;  %v18249_v18 = vpack.c.bf16 %v23121_v50, %v23105_v23 }
 0x2e1   : > { %15423 = vmatmul.mubr.f32.gmra.mrb[6].mxu0 %v23185_v30  ;;  %v6491_v30 = vand.u32 4294901760, %v6490_v45  ;;  %v26201_v45 = vand.u32 4294901760, %v22912_v58  ;;  %v26207_v58 = vand.u32 4294901760, %v23013_v28 }
 0x2e2   : > { %18212 = vmatpush3.bf16.msra.mxu0 %v18209_v46  ;;  %15457 = vmatprep.mubr.f32.mxu0 %v22817_v38  ;;  %v18221_v20 = vpack.c.bf16 %v6477_v31, %v6470_v0  ;;  %v6484_v52 = vand.u32 4294901760, %v6483_v49  ;;  %v18257_v0 = vpack.c.bf16 %v23182_v17, %v23177_v59  ;;  %v26199_v31 = vand.u32 4294901760, %v22838_v63 }
 0x2e3   : > { %18214 = vmatprep.subr.bf16.mxu0 %v18213_v6  ;;  %v26200_v49 = vand.u32 4294901760, %v22910_v40  ;;  %v26206_v40 = vand.u32 4294901760, %v23008_v43 }
 0x2e4   : > { %v18225_v46 = vpack.c.bf16 %v6491_v30, %v6484_v52  ;;  %v18241_v30 = vpack.c.bf16 %v23030_v21, %v23025_v53  ;;  %v26203_v52 = vand.u32 4294901760, %v22975_v1 }
 0x2e6   : > { %18216 = vmatpush3.bf16.msra.mxu0 %v18213_v6  ;;  %v18237_v6 = vpack.c.bf16 %v23013_v28, %v23008_v43  ;;  %v26212_v43 = vand.u32 4294901760, %v23063_v48  ;;  %v26213_v28 = vand.u32 4294901760, %v23068_v29  ;;  %v26217_v48 = vand.u32 4294901760, %v23156_v62 }
 0x2e7   : > { %18218 = vmatprep.subr.bf16.mxu0 %v18217_v39  ;;  %v18321_v29 = vpack.c.bf16 %v6489_v60, %v6482_v2  ;;  %v12022_v2 = vld [vmem:[%s25141_s2 + $0x2b0] sm:$0xff]  ;;  %v12023_v60 = vld [vmem:[%s25141_s2 + $0x2b8] sm:$0xff] }
 0x2ea   : > { %18220 = vmatpush3.bf16.msra.mxu0 %v18217_v39  ;;  %v18253_v39 = vpack.c.bf16 %v23156_v62, %v23151_v19  ;;  %v12021_v62 = vld [vmem:[%s25141_s2 + $0x2a8] sm:$0xff] }
 0x2eb   : > { %18222 = vmatprep.subr.bf16.mxu0 %v18221_v20  ;;  %v7203_v17 = vand.u32 4294901760, %v12021_v62 }
 0x2ee   : > { %18224 = vmatpush3.bf16.msra.mxu0 %v18221_v20  ;;  %v26202_v20 = vand.u32 4294901760, %v22970_v54  ;;  %v26210_v54 = vand.u32 4294901760, %v23025_v53  ;;  %v26214_v53 = vand.u32 4294901760, %v23105_v23 }
 0x2ef   : > { %18226 = vmatprep.subr.bf16.mxu0 %v18225_v46 }
 0x2f2   : > { %18228 = vmatpush3.bf16.msra.mxu0 %v18225_v46  ;;  %v18297_v46 = vpack.c.bf16 %v26203_v52, %v26202_v20  ;;  %v23359_v20 = vld [vmem:[%s25141_s2 + $0x2c8] sm:$0xff] }
 0x2f3   : > { %18230 = vmatprep.subr.bf16.mxu0 %v18229_v7 }
 0x2f5   : > { %15458 = vmatmul.mubr.f32.vlgmr.msra.gmra.mrb[0].mxu0 %v22916_v5 }
 0x2f6   : > { %18232 = vmatpush3.bf16.msra.mxu0 %v18229_v7  ;;  %15460 = vmatprep.mubr.f32.mxu0 %v22958_v56  ;;  %v26204_v7 = vand.u32 4294901760, %v22956_v34 }
 0x2f7   : > { %18234 = vmatprep.subr.bf16.mxu0 %v18233_v4 }
 0x2f9   : > { %15461 = vmatmul.mubr.f32.gmra.mrb[2].mxu0 %v22987_v3 }
 0x2fa   : > { %18236 = vmatpush3.bf16.msra.mxu0 %v18233_v4  ;;  %15463 = vmatprep.mubr.f32.mxu0 %v23000_v36  ;;  %v26205_v4 = vld [vmem:[#allocation86_spill] sm:$0xff] }
 0x2fb   : > { %18238 = vmatprep.subr.bf16.mxu0 %v18237_v6 }
 0x2fd   : > { %15464 = vmatmul.mubr.f32.gmra.mrb[4].mxu0 %v23035_v44 }
 0x2fe   : > { %18240 = vmatpush3.bf16.msra.mxu0 %v18237_v6  ;;  %15466 = vmatprep.mubr.f32.mxu0 %v23047_v26  ;;  %v18301_v6 = vpack.c.bf16 %v26207_v58, %v26206_v40  ;;  %v23376_v40 = vld [vmem:[%s25141_s2 + $0x2d8] sm:$0xff]  ;;  %v23383_v58 = vld [vmem:[%s25141_s2 + $0x2e0] sm:$0xff] }
 0x2ff   : > { %18242 = vmatprep.subr.bf16.mxu0 %v18241_v30 }
 0x301   : > { %15467 = vmatmul.mubr.f32.gmra.mrb[6].mxu0 %v23076_v57 }
 0x302   : > { %18244 = vmatpush3.bf16.msra.mxu0 %v18241_v30  ;;  %15501 = vmatprep.mubr.f32.mxu0 %v22838_v63  ;;  %v18293_v63 = vpack.c.bf16 %v26201_v45, %v26200_v49  ;;  %v26208_v30 = vld [vmem:[#allocation88_spill] sm:$0xff]  ;;  %v7206_v49 = vand.u32 4294901760, %v12022_v2  ;;  %v7209_v45 = vand.u32 4294901760, %v12023_v60 }
 0x303   : > { %18246 = vmatprep.subr.bf16.mxu0 %v18245_v51 }
 0x306   : > { %18248 = vmatpush3.bf16.msra.mxu0 %v18245_v51  ;;  %v26209_v51 = vld [vmem:[#allocation75_spill] sm:$0xff] }
 0x307   : > { %18250 = vmatprep.subr.bf16.mxu0 %v18249_v18 }
 0x30a   : > { %18252 = vmatpush3.bf16.msra.mxu0 %v18249_v18  ;;  %v18309_v18 = vpack.c.bf16 %v26213_v28, %v26212_v43  ;;  %v7221_v28 = vand.u32 4294901760, %v23376_v40 }
 0x30b   : > { %18254 = vmatprep.subr.bf16.mxu0 %v18253_v39 }
 0x30e   : > { %18256 = vmatpush3.bf16.msra.mxu0 %v18253_v39 }
 0x30f   : > { %18258 = vmatprep.subr.bf16.mxu0 %v18257_v0 }
 0x312   : > { %18260 = vmatpush3.bf16.msra.mxu0 %v18257_v0  ;;  %v26216_v0 = vand.u32 4294901760, %v23151_v19  ;;  %v12020_v19 = vld [vmem:[%s25141_s2 + $0x2a0] sm:$0xff] }
 0x313   : > { %18262 = vmatprep.subr.bf16.mxu0 %v22820_v61 }
 0x315   : > { %15502 = vmatmul.mubr.f32.vlgmr.msra.gmra.mrb[0].mxu0 %v22956_v34  ;;  %v26211_v34 = vand.u32 4294901760, %v23030_v21  ;;  %v26215_v21 = vand.u32 4294901760, %v23121_v50 }
 0x316   : > { %18264 = vmatpush3.bf16.msra.mxu0 %v22820_v61  ;;  %15504 = vmatprep.mubr.f32.mxu0 %v22998_v37 }
 0x317   : > { %18266 = vmatprep.subr.bf16.mxu0 %v22845_v47  ;;  %v18305_v1 = vpack.c.bf16 %v26211_v34, %v26210_v54  ;;  %v18313_v39 = vpack.c.bf16 %v26215_v21, %v26214_v53 }
 0x319   : > { %15505 = vmatmul.mubr.f32.gmra.mrb[2].mxu0 %v23033_v42 }
 0x31a   : > { %18268 = vmatpush3.bf16.msra.mxu0 %v22845_v47  ;;  %15507 = vmatprep.mubr.f32.mxu0 %v23045_v13 }
 0x31b   : > { %18270 = vmatprep.subr.bf16.mxu0 %v22868_v16 }
 0x31d   : > { %15508 = vmatmul.mubr.f32.gmra.mrb[4].mxu0 %v23074_v12 }
 0x31e   : > { %18272 = vmatpush3.bf16.msra.mxu0 %v22868_v16  ;;  %15510 = vmatprep.mubr.f32.mxu0 %v23085_v41 }
 0x31f   : > { %18274 = vmatprep.subr.bf16.mxu0 %v22893_v27 }
 0x321   : > { %15511 = vmatmul.mubr.f32.gmra.mrb[6].mxu0 %v23113_v9 }
 0x322   : > { %18276 = vmatpush3.bf16.msra.mxu0 %v22893_v27  ;;  %15545 = vmatprep.mubr.f32.mxu0 %v26199_v31  ;;  %v18317_v31 = vpack.c.bf16 %v26217_v48, %v26216_v0  ;;  %v23413_v48 = vld [vmem:[%s25141_s2 + $0x2f0] sm:$0xff] }
 0x323   : > { %18278 = vmatprep.subr.bf16.mxu0 %v22923_v22 }
 0x326   : > { %18280 = vmatpush3.bf16.msra.mxu0 %v22923_v22 }
 0x327   : > { %18282 = vmatprep.subr.bf16.mxu0 %v22965_v33 }
 0x32a   : > { %18284 = vmatpush3.bf16.msra.mxu0 %v22965_v33 }
 0x32b   : > { %18286 = vmatprep.subr.bf16.mxu0 %v22994_v11 }
 0x32e   : > { %18288 = vmatpush3.bf16.msra.mxu0 %v22994_v11 }
 0x32f   : > { %18290 = vmatprep.subr.bf16.mxu0 %v23020_v35 }
 0x332   : > { %18292 = vmatpush3.bf16.msra.mxu0 %v23020_v35 }
 0x333   : > { %18294 = vmatprep.subr.bf16.mxu0 %v18293_v63 }
 0x335   : > { %15546 = vmatmul.mubr.f32.vlgmr.msra.gmra.mrb[0].mxu0 %v26204_v7  ;;  %v23371_v7 = vld [vmem:[%s25141_s2 + $0x2d0] sm:$0xff] }
 0x336   : > { %18296 = vmatpush3.bf16.msra.mxu0 %v18293_v63  ;;  %15548 = vmatprep.mubr.f32.mxu0 %v26205_v4  ;;  %v12024_v63 = vld [vmem:[%s25141_s2 + $0x2c0] sm:$0xff]  ;;  %v7218_v43 = vand.u32 4294901760, %v23371_v7 }
 0x337   : > { %18298 = vmatprep.subr.bf16.mxu0 %v18297_v46  ;;  %v7212_v52 = vand.u32 4294901760, %v12024_v63 }
 0x338   : > { %v23408_v0 = vpack.c.bf16 %v7221_v28, %v7218_v43 }
 0x339   : > { %15549 = vmatmul.mubr.f32.gmra.mrb[2].mxu0 %v26208_v30 }
 0x33a   : > { %18300 = vmatpush3.bf16.msra.mxu0 %v18297_v46  ;;  %15551 = vmatprep.mubr.f32.mxu0 %v26209_v51  ;;  %v7215_v46 = vand.u32 4294901760, %v23359_v20 }
 0x33b   : > { %18302 = vmatprep.subr.bf16.mxu0 %v18301_v6 }
 0x33d   : > { %15552 = vmatmul.mubr.f32.gmra.mrb[4].mxu0 %v23110_v55 }
 0x33e   : > { %18304 = vmatpush3.bf16.msra.mxu0 %v18301_v6  ;;  %15554 = vmatprep.mubr.f32.mxu0 %v23126_v25  ;;  %v23388_v6 = vld [vmem:[%s25141_s2 + $0x2e8] sm:$0xff] }
 0x33f   : > { %18306 = vmatprep.subr.bf16.mxu0 %v18305_v1  ;;  %v25547_v53 = vand.u32 4294901760, %v23388_v6 }
 0x341   : > { %15555 = vmatmul.mubr.f32.gmra.mrb[6].mxu0 %v23139_v10 }
 0x342   : > { %18308 = vmatpush3.bf16.msra.mxu0 %v18305_v1  ;;  %15589 = vmatprep.mubr.f32.mxu0 %v22817_v38  ;;  %v23396_v1 = vpack.c.bf16 %v7215_v46, %v7212_v52 }
 0x343   : > { %18310 = vmatprep.subr.bf16.mxu0 %v18309_v18 }
 0x346   : > { %18312 = vmatpush3.bf16.msra.mxu0 %v18309_v18  ;;  %v25548_v18 = vand.u32 4294901760, %v23383_v58 }
 0x347   : > { %18314 = vmatprep.subr.bf16.mxu0 %v18313_v39 }
 0x34a   : > { %18316 = vmatpush3.bf16.msra.mxu0 %v18313_v39 }
 0x34b   : > { %18318 = vmatprep.subr.bf16.mxu0 %v18317_v31 }
 0x34e   : > { %18320 = vmatpush3.bf16.msra.mxu0 %v18317_v31  ;;  %v23418_v31 = vld [vmem:[%s25141_s2 + $0x2f8] sm:$0xff] }
 0x34f   : > { %18322 = vmatprep.subr.bf16.mxu0 %v18321_v29 }
 0x352   : > { %18324 = vmatpush3.bf16.msra.mxu0 %v18321_v29 }
 0x353   : > { %18326 = vmatprep.subr.bf16.mxu0 %v22820_v61 }
 0x355   : > { %15590 = vmatmul.mubr.f32.vlgmr.msra.gmra.mrb[0].mxu0 %v22916_v5 }
 0x356   : > { %18328 = vmatpush3.bf16.msra.mxu0 %v22820_v61  ;;  %15592 = vmatprep.mubr.f32.mxu0 %v22958_v56  ;;  %v12016_v61 = vld [vmem:[%s25141_s2 + $0x280] sm:$0xff] }
 0x357   : > { %18330 = vmatprep.subr.bf16.mxu0 %v22845_v47 }
 0x359   : > { %15593 = vmatmul.mubr.f32.gmra.mrb[2].mxu0 %v22987_v3 }
 0x35a   : > { %18332 = vmatpush3.bf16.msra.mxu0 %v22845_v47  ;;  %15595 = vmatprep.mubr.f32.mxu0 %v23000_v36  ;;  %v12017_v47 = vld [vmem:[%s25141_s2 + $0x288] sm:$0xff] }
 0x35b   : > { %18334 = vmatprep.subr.bf16.mxu0 %v22868_v16 }
 0x35d   : > { %15596 = vmatmul.mubr.f32.gmra.mrb[4].mxu0 %v23035_v44 }
 0x35e   : > { %18336 = vmatpush3.bf16.msra.mxu0 %v22868_v16  ;;  %15598 = vmatprep.mubr.f32.mxu0 %v23047_v26  ;;  %v7188_v16 = vand.u32 4294901760, %v12016_v61 }
 0x35f   : > { %18338 = vmatprep.subr.bf16.mxu0 %v22893_v27 }
 0x360   : > { %v23391_v54 = vsub.f32 %v12016_v61, %v7188_v16  ;;  %v23428_v61 = vpack.c.bf16 %v25547_v53, %v25548_v18  ;;  %v23444_v53 = vsub.f32 %v12021_v62, %v7203_v17  ;;  %v6199_v18 = vld [vmem:[#allocation2 + $0x62] sm:$0xff] }
 0x361   : > { %15599 = vmatmul.mubr.f32.gmra.mrb[6].mxu0 %v23076_v57 }
 0x362   : > { %18340 = vmatpush3.bf16.msra.mxu0 %v22893_v27  ;;  %15633 = vmatprep.mubr.f32.mxu0 %v22817_v38  ;;  %v7191_v38 = vand.u32 4294901760, %v12017_v47  ;;  %v12018_v27 = vld [vmem:[%s25141_s2 + $0x290] sm:$0xff]  ;;  %v25549_v21 = vand.u32 4294901760, %v23391_v54 }
 0x363   : > { %18342 = vmatprep.subr.bf16.mxu0 %v22923_v22  ;;  %v7194_v23 = vand.u32 4294901760, %v12018_v27 }
 0x364   : > { %v23329_v50 = vpack.c.bf16 %v7191_v38, %v7188_v16  ;;  %v23393_v34 = vsub.f32 %v12017_v47, %v7191_v38  ;;  %v7352_v38 = vsub.f32 %v23391_v54, %v25549_v21  ;;  %v23446_v16 = vsub.f32 %v12022_v2, %v7206_v49 }
 0x365   : > { %v23420_v29 = vsub.f32 %v12018_v27, %v7194_v23  ;;  %v23448_v47 = vsub.f32 %v12023_v60, %v7209_v45  ;;  %v26218_v21 = vand.u32 4294901760, %v23413_v48 }
 0x366   : > { %18344 = vmatpush3.bf16.msra.mxu0 %v22923_v22  ;;  %v12019_v22 = vld [vmem:[%s25141_s2 + $0x298] sm:$0xff]  ;;  %v25550_v39 = vand.u32 4294901760, %v23393_v34 }
 0x367   : > { %18346 = vmatprep.subr.bf16.mxu0 %v22965_v33  ;;  %v26220_v62 = vand.u32 4294901760, %v23420_v29 }
 0x368   : > { %v7359_v27 = vsub.f32 %v23393_v34, %v25550_v39  ;;  %v26219_v39 = vand.u32 4294901760, %v23418_v31 }
 0x36a   : > { %18348 = vmatpush3.bf16.msra.mxu0 %v22965_v33  ;;  %v7197_v33 = vand.u32 4294901760, %v12019_v22  ;;  %v23455_v10 = vpack.c.bf16 %v26219_v39, %v26218_v21  ;;  %v7360_v25 = vand.u32 4294901760, %v7359_v27  ;;  %v23470_v39 = vsub.f32 %v12024_v63, %v7212_v52 }
 0x36b   : > { %18350 = vmatprep.subr.bf16.mxu0 %v22994_v11  ;;  %v26224_v21 = vand.u32 4294901760, %v23444_v53 }
 0x36c   : > { %v23339_v59 = vpack.c.bf16 %v7197_v33, %v7194_v23  ;;  %v23457_v23 = vand.u32 4294901760, %v6199_v18  ;;  %v26229_v30 = vand.u32 4294901760, %v23470_v39 }
 0x36e   : > { %18352 = vmatpush3.bf16.msra.mxu0 %v22994_v11  ;;  %v7200_v11 = vand.u32 4294901760, %v12020_v19 }
 0x36f   : > { %18354 = vmatprep.subr.bf16.mxu0 %v23020_v35 }
 0x372   : > { %18356 = vmatpush3.bf16.msra.mxu0 %v23020_v35  ;;  %v23351_v35 = vpack.c.bf16 %v7203_v17, %v7200_v11 }
 0x373   : > { %18358 = vmatprep.subr.bf16.mxu0 %v23329_v50 }
 0x375   : > { %15634 = vmatmul.mubr.f32.vlgmr.msra.gmra.mrb[0].mxu0 %v22916_v5  ;;  %v23365_v5 = vpack.c.bf16 %v7209_v45, %v7206_v49 }
 0x376   : > { %18360 = vmatpush3.bf16.msra.mxu0 %v23329_v50  ;;  %15636 = vmatprep.mubr.f32.mxu0 %v22958_v56 }
 0x377   : > { %18362 = vmatprep.subr.bf16.mxu0 %v23339_v59 }
 0x379   : > { %15637 = vmatmul.mubr.f32.gmra.mrb[2].mxu0 %v22987_v3 }
 0x37a   : > { %18364 = vmatpush3.bf16.msra.mxu0 %v23339_v59  ;;  %15639 = vmatprep.mubr.f32.mxu0 %v23000_v36 }
 0x37b   : > { %18366 = vmatprep.subr.bf16.mxu0 %v23351_v35 }
 0x37d   : > { %15640 = vmatmul.mubr.f32.gmra.mrb[4].mxu0 %v23035_v44 }
 0x37e   : > { %18368 = vmatpush3.bf16.msra.mxu0 %v23351_v35  ;;  %15642 = vmatprep.mubr.f32.mxu0 %v23047_v26 }
 0x37f   : > { %18370 = vmatprep.subr.bf16.mxu0 %v23365_v5 }
 0x381   : > { %15643 = vmatmul.mubr.f32.gmra.mrb[6].mxu0 %v23076_v57 }
 0x382   : > { %18372 = vmatpush3.bf16.msra.mxu0 %v23365_v5  ;;  %15677 = vmatprep.mubr.f32.mxu0 %v23116_v15  ;;  %v23422_v15 = vsub.f32 %v12019_v22, %v7197_v33  ;;  %v23442_v33 = vsub.f32 %v12020_v19, %v7200_v11  ;;  %v7353_v22 = vand.u32 4294901760, %v7352_v38  ;;  %v6200_v19 = vld [vmem:[#allocation2 + $0x6a] sm:$0xff]  ;;  %v7366_v11 = vsub.f32 %v23420_v29, %v26220_v62 }
 0x383   : > { %18374 = vmatprep.subr.bf16.mxu0 %v23396_v1  ;;  %v23472_v38 = vand.u32 4294901760, %v6200_v19  ;;  %v23476_v62 = vsub.f32 %v23359_v20, %v7215_v46  ;;  %v26226_v20 = vand.u32 4294901760, %v23446_v16 }
 0x384   : > { %v26221_v17 = vand.u32 4294901760, %v23422_v15  ;;  %v18389_v27 = vpack.c.bf16 %v7360_v25, %v7353_v22  ;;  %v7367_v45 = vand.u32 4294901760, %v7366_v11  ;;  %v26223_v63 = vand.u32 4294901760, %v23442_v33 }
 0x385   : > { %v7387_v25 = vsub.f32 %v23444_v53, %v26224_v21  ;;  %v7394_v46 = vsub.f32 %v23446_v16, %v26226_v20  ;;  %v23505_v21 = vsub.f32 %v23371_v7, %v7218_v43 }
 0x386   : > { %18376 = vmatpush3.bf16.msra.mxu0 %v23396_v1  ;;  %v7373_v2 = vsub.f32 %v23422_v15, %v26221_v17  ;;  %v23479_v17 = vsub.f32 %v6199_v18, %v23457_v23  ;;  %v7380_v52 = vsub.f32 %v23442_v33, %v26223_v63  ;;  %v26227_v18 = vand.u32 4294901760, %v23448_v47 }
 0x387   : > { %18378 = vmatprep.subr.bf16.mxu0 %v23408_v0  ;;  %v7388_v11 = vand.u32 4294901760, %v7387_v25  ;;  %v7408_v63 = vsub.f32 %v23470_v39, %v26229_v30  ;;  %v26232_v30 = vand.u32 4294901760, %v23383_v58 }
 0x388   : > { %v7374_v49 = vand.u32 4294901760, %v7373_v2  ;;  %v23500_v2 = vsub.f32 %v6200_v19, %v23472_v38  ;;  %v23511_v20 = vand.u32 4294901760, %v23479_v17  ;;  %v7381_v55 = vand.u32 4294901760, %v7380_v52 }
 0x389   : > { %v7395_v19 = vand.u32 4294901760, %v7394_v46  ;;  %v7409_v46 = vand.u32 4294901760, %v7408_v63 }
 0x38a   : > { %18380 = vmatpush3.bf16.msra.mxu0 %v23408_v0  ;;  %26228 = vst [vmem:[#allocation71_spill] sm:$0xff] %v23511_v20  ;;  %v23518_v7 = vand.u32 4294901760, %v23500_v2 }
 0x38b   : > { %18382 = vmatprep.subr.bf16.mxu0 %v23428_v61 }
 0x38c   : > { %26230 = vst [vmem:[#allocation77_spill] sm:$0xff] %v23518_v7 }
 0x38e   : > { %18384 = vmatpush3.bf16.msra.mxu0 %v23428_v61  ;;  %v23481_v60 = vpop.f32.mrb[0].mxu1 }
 0x38f   : > { %26222 = vst [vmem:[#allocation82_spill] sm:$0xff] %v23481_v60  ;;  %18386 = vmatprep.subr.bf16.mxu0 %v23455_v10  ;;  %v23490_v22 = vpop.f32.mrb[1].mxu1  ;;  %v7401_v60 = vsub.f32 %v23448_v47, %v26227_v18  ;;  %v18393_v18 = vpack.c.bf16 %v7374_v49, %v7367_v45  ;;  %v18397_v49 = vpack.c.bf16 %v7388_v11, %v7381_v55 }
 0x390   : > { %26225 = vst [vmem:[#allocation85_spill] sm:$0xff] %v23490_v22  ;;  %v23508_v22 = vsub.f32 %v23376_v40, %v7221_v28  ;;  %v26231_v40 = vand.u32 4294901760, %v23476_v62  ;;  %v25557_v28 = vand.u32 4294901760, %v23505_v21  ;;  %v23531_v45 = vsub.f32 %v23383_v58, %v26232_v30 }
 0x391   : > { %v7402_v51 = vand.u32 4294901760, %v7401_v60  ;;  %v7331_v60 = vsub.f32 %v23479_v17, %v23511_v20  ;;  %v26237_v30 = vand.u32 4294901760, %v23418_v31 }
 0x392   : > { %18388 = vmatpush3.bf16.msra.mxu0 %v23455_v10  ;;  %v7415_v43 = vsub.f32 %v23476_v62, %v26231_v40  ;;  %v7341_v40 = vsub.f32 %v23500_v2, %v23518_v7  ;;  %v7422_v55 = vsub.f32 %v23505_v21, %v25557_v28  ;;  %v26234_v58 = vand.u32 4294901760, %v23508_v22 }
 0x393   : > { %18390 = vmatprep.subr.bf16.mxu0 %v18389_v27  ;;  %v18401_v25 = vpack.c.bf16 %v7402_v51, %v7395_v19  ;;  %v23550_v51 = vpop.f32.mrb[2].mxu1  ;;  %v26236_v19 = vand.u32 4294901760, %v23413_v48 }
 0x394   : > { %v7429_v11 = vsub.f32 %v23508_v22, %v26234_v58  ;;  %26235 = vst [vmem:[#allocation72_spill] sm:$0xff] %v23550_v51  ;;  %v23564_v58 = vpop.f32.mrb[3].mxu1  ;;  %v23567_v28 = vand.u32 4294901760, %v7341_v40  ;;  %v7423_v51 = vand.u32 4294901760, %v7422_v55 }
 0x395   : > { %15678 = vmatmul.mubr.f32.vlgmr.msra.gmra.mrb[0].mxu0 %v23134_v24  ;;  %v7416_v24 = vand.u32 4294901760, %v7415_v43  ;;  %v23557_v43 = vsub.f32 %v23413_v48, %v26236_v19  ;;  %26238 = vst [vmem:[#allocation78_spill] sm:$0xff] %v23564_v58  ;;  %v26241_v48 = vand.u32 4294901760, %v23531_v45 }
 0x396   : > { %18392 = vmatpush3.bf16.msra.mxu0 %v18389_v27  ;;  %15680 = vmatprep.mubr.f32.mxu0 %v23144_v8  ;;  %v26233_v27 = vand.u32 4294901760, %v23388_v6 }
 0x397   : > { %18394 = vmatprep.subr.bf16.mxu0 %v18393_v18  ;;  %v18405_v63 = vpack.c.bf16 %v7416_v24, %v7409_v46  ;;  %v7449_v40 = vand.u32 4294901760, %v23557_v43 }
 0x398   : > { %v23536_v52 = vsub.f32 %v23388_v6, %v26233_v27  ;;  %v23548_v6 = vand.u32 4294901760, %v7331_v60  ;;  %v23562_v27 = vsub.f32 %v23418_v31, %v26237_v30  ;;  %v26239_v60 = vld [vmem:[#allocation59_spill] sm:$0xff]  ;;  %v7436_v31 = vsub.f32 %v23531_v45, %v26241_v48 }
 0x399   : > { %15681 = vmatmul.mubr.f32.gmra.mrb[2].mxu0 %v23159_v32 }
 0x39a   : > { %18396 = vmatpush3.bf16.msra.mxu0 %v18393_v18  ;;  %15683 = vmatprep.mubr.f32.mxu0 %v23170_v14  ;;  %v7430_v18 = vand.u32 4294901760, %v7429_v11  ;;  %v23570_v14 = vpop.f32.mrb[4].mxu1  ;;  %v26242_v19 = vand.u32 4294901760, %v23536_v52  ;;  %v7437_v11 = vand.u32 4294901760, %v7436_v31  ;;  %v18421_v31 = vpack.c.bf16 %v23393_v34, %v23391_v54 }
 0x39b   : > { %18398 = vmatprep.subr.bf16.mxu0 %v18397_v49  ;;  %26240 = vst [vmem:[#allocation73_spill] sm:$0xff] %v23570_v14  ;;  %v23580_v24 = vpop.f32.mrb[5].mxu1 }
 0x39c   : > { %v7443_v30 = vsub.f32 %v23536_v52, %v26242_v19  ;;  %26243 = vst [vmem:[#allocation74_spill] sm:$0xff] %v23580_v24  ;;  %v18409_v46 = vpack.c.bf16 %v7430_v18, %v7423_v51  ;;  %v23584_v55 = vpop.f32.mrb[6].mxu1  ;;  %v7450_v19 = vsub.f32 %v23557_v43, %v7449_v40 }
 0x39d   : > { %15684 = vmatmul.mubr.f32.gmra.mrb[4].mxu0 %v26239_v60  ;;  %26244 = vst [vmem:[#allocation83_spill] sm:$0xff] %v23584_v55  ;;  %v23592_v24 = vpop.f32.mrb[7].mxu1 }
 0x39e   : > { %18400 = vmatpush3.bf16.msra.mxu0 %v18397_v49  ;;  %15686 = vmatprep.mubr.f32.mxu0 %v23548_v6  ;;  %v7456_v49 = vand.u32 4294901760, %v23562_v27  ;;  %v7444_v48 = vand.u32 4294901760, %v7443_v30  ;;  %26245 = vst [vmem:[#allocation84_spill] sm:$0xff] %v23592_v24  ;;  %v7451_v51 = vand.u32 4294901760, %v7450_v19  ;;  %v18425_v30 = vpack.c.bf16 %v23422_v15, %v23420_v29 }
 0x39f   : > { %18402 = vmatprep.subr.bf16.mxu0 %v18401_v25 }
 0x3a0   : > { %v7457_v14 = vsub.f32 %v23562_v27, %v7456_v49 }
 0x3a1   : > { %15687 = vmatmul.mubr.f32.gmra.mrb[6].mxu0 %v23567_v28 }
 0x3a2   : > { %18404 = vmatpush3.bf16.msra.mxu0 %v18401_v25  ;;  %15721 = vmatprep.mubr.f32.mxu0 %v22958_v56  ;;  %v18413_v25 = vpack.c.bf16 %v7444_v48, %v7437_v11  ;;  %v7458_v18 = vand.u32 4294901760, %v7457_v14  ;;  %v18429_v14 = vpack.c.bf16 %v23444_v53, %v23442_v33  ;;  %v18445_v11 = vpack.c.bf16 %v23536_v52, %v23531_v45 }
 0x3a3   : > { %18406 = vmatprep.subr.bf16.mxu0 %v18405_v63  ;;  %v18449_v48 = vpack.c.bf16 %v23562_v27, %v23557_v43 }
 0x3a4   : > { %v18417_v55 = vpack.c.bf16 %v7458_v18, %v7451_v51  ;;  %v26250_v18 = vld [vmem:[#allocation88_spill] sm:$0xff] }
 0x3a6   : > { %18408 = vmatpush3.bf16.msra.mxu0 %v18405_v63  ;;  %v18433_v63 = vpack.c.bf16 %v23448_v47, %v23446_v16 }
 0x3a7   : > { %18410 = vmatprep.subr.bf16.mxu0 %v18409_v46 }
 0x3aa   : > { %18412 = vmatpush3.bf16.msra.mxu0 %v18409_v46  ;;  %v18437_v46 = vpack.c.bf16 %v23476_v62, %v23470_v39 }
 0x3ab   : > { %18414 = vmatprep.subr.bf16.mxu0 %v18413_v25 }
 0x3ae   : > { %18416 = vmatpush3.bf16.msra.mxu0 %v18413_v25  ;;  %v26249_v25 = vand.u32 4294901760, %v23422_v15  ;;  %v26257_v15 = vand.u32 4294901760, %v23448_v47  ;;  %v26261_v47 = vand.u32 4294901760, %v23505_v21 }
 0x3af   : > { %18418 = vmatprep.subr.bf16.mxu0 %v18417_v55 }
 0x3b2   : > { %18420 = vmatpush3.bf16.msra.mxu0 %v18417_v55  ;;  %v18441_v55 = vpack.c.bf16 %v23508_v22, %v23505_v21 }
 0x3b3   : > { %18422 = vmatprep.subr.bf16.mxu0 %v18421_v31 }
 0x3b5   : > { %15722 = vmatmul.mubr.f32.vlgmr.msra.gmra.mrb[0].mxu0 %v22987_v3 }
 0x3b6   : > { %18424 = vmatpush3.bf16.msra.mxu0 %v18421_v31  ;;  %15724 = vmatprep.mubr.f32.mxu0 %v23000_v36  ;;  %v26251_v31 = vld [vmem:[#allocation75_spill] sm:$0xff] }
 0x3b7   : > { %18426 = vmatprep.subr.bf16.mxu0 %v18425_v30 }
 0x3b9   : > { %15725 = vmatmul.mubr.f32.gmra.mrb[2].mxu0 %v23035_v44 }
 0x3ba   : > { %18428 = vmatpush3.bf16.msra.mxu0 %v18425_v30  ;;  %15727 = vmatprep.mubr.f32.mxu0 %v23047_v26  ;;  %v26252_v30 = vand.u32 4294901760, %v23442_v33  ;;  %v26260_v33 = vand.u32 4294901760, %v23476_v62  ;;  %v18513_v62 = vpack.c.bf16 %v7456_v49, %v7449_v40  ;;  %v12038_v40 = vld [vmem:[%s25141_s2 + $0x430] sm:$0xff]  ;;  %v12039_v49 = vld [vmem:[%s25141_s2 + $0x438] sm:$0xff] }
 0x3bb   : > { %18430 = vmatprep.subr.bf16.mxu0 %v18429_v14 }
 0x3bd   : > { %15728 = vmatmul.mubr.f32.gmra.mrb[4].mxu0 %v23076_v57 }
 0x3be   : > { %18432 = vmatpush3.bf16.msra.mxu0 %v18429_v14  ;;  %15730 = vmatprep.mubr.f32.mxu0 %v23457_v23  ;;  %v26254_v14 = vld [vmem:[#allocation67_spill] sm:$0xff] }
 0x3bf   : > { %18434 = vmatprep.subr.bf16.mxu0 %v18433_v63 }
 0x3c1   : > { %15731 = vmatmul.mubr.f32.gmra.mrb[6].mxu0 %v23472_v38 }
 0x3c2   : > { %18436 = vmatpush3.bf16.msra.mxu0 %v18433_v63  ;;  %15765 = vmatprep.mubr.f32.mxu0 %v22998_v37  ;;  %v26246_v37 = vand.u32 4294901760, %v23391_v54  ;;  %v26253_v54 = vand.u32 4294901760, %v23444_v53  ;;  %v26255_v63 = vld [vmem:[#allocation54_spill] sm:$0xff]  ;;  %v26259_v53 = vand.u32 4294901760, %v23470_v39  ;;  %v26264_v39 = vand.u32 4294901760, %v23536_v52  ;;  %v12037_v52 = vld [vmem:[%s25141_s2 + $0x428] sm:$0xff] }
 0x3c3   : > { %18438 = vmatprep.subr.bf16.mxu0 %v18437_v46  ;;  %v8170_v27 = vand.u32 4294901760, %v12037_v52 }
 0x3c6   : > { %18440 = vmatpush3.bf16.msra.mxu0 %v18437_v46 }
 0x3c7   : > { %18442 = vmatprep.subr.bf16.mxu0 %v18441_v55 }
 0x3ca   : > { %18444 = vmatpush3.bf16.msra.mxu0 %v18441_v55  ;;  %v26258_v55 = vld [vmem:[#allocation93_spill] sm:$0xff] }
 0x3cb   : > { %18446 = vmatprep.subr.bf16.mxu0 %v18445_v11 }
 0x3ce   : > { %18448 = vmatpush3.bf16.msra.mxu0 %v18445_v11  ;;  %v18501_v11 = vpack.c.bf16 %v26260_v33, %v26259_v53 }
 0x3cf   : > { %18450 = vmatprep.subr.bf16.mxu0 %v18449_v48 }
 0x3d2   : > { %18452 = vmatpush3.bf16.msra.mxu0 %v18449_v48 }
 0x3d3   : > { %18454 = vmatprep.subr.bf16.mxu0 %v23329_v50 }
 0x3d5   : > { %15766 = vmatmul.mubr.f32.vlgmr.msra.gmra.mrb[0].mxu0 %v23033_v42  ;;  %v26247_v42 = vand.u32 4294901760, %v23393_v34  ;;  %v18493_v34 = vpack.c.bf16 %v26253_v54, %v26252_v30  ;;  %v23759_v54 = vld [vmem:[%s25141_s2 + $0x450] sm:$0xff] }
 0x3d6   : > { %18456 = vmatpush3.bf16.msra.mxu0 %v23329_v50  ;;  %15768 = vmatprep.mubr.f32.mxu0 %v23045_v13 }
 0x3d7   : > { %18458 = vmatprep.subr.bf16.mxu0 %v23339_v59  ;;  %v18485_v19 = vpack.c.bf16 %v26247_v42, %v26246_v37  ;;  %v26263_v37 = vand.u32 4294901760, %v23531_v45  ;;  %v12036_v45 = vld [vmem:[%s25141_s2 + $0x420] sm:$0xff] }
 0x3d9   : > { %15769 = vmatmul.mubr.f32.gmra.mrb[2].mxu0 %v23074_v12  ;;  %v18509_v42 = vpack.c.bf16 %v26264_v39, %v26263_v37 }
 0x3da   : > { %18460 = vmatpush3.bf16.msra.mxu0 %v23339_v59  ;;  %15771 = vmatprep.mubr.f32.mxu0 %v23085_v41 }
 0x3db   : > { %18462 = vmatprep.subr.bf16.mxu0 %v23351_v35 }
 0x3dd   : > { %15772 = vmatmul.mubr.f32.gmra.mrb[4].mxu0 %v23113_v9 }
 0x3de   : > { %18464 = vmatpush3.bf16.msra.mxu0 %v23351_v35  ;;  %15774 = vmatprep.mubr.f32.mxu0 %v23479_v17 }
 0x3df   : > { %18466 = vmatprep.subr.bf16.mxu0 %v23365_v5 }
 0x3e1   : > { %15775 = vmatmul.mubr.f32.gmra.mrb[6].mxu0 %v23500_v2 }
 0x3e2   : > { %18468 = vmatpush3.bf16.msra.mxu0 %v23365_v5  ;;  %15809 = vmatprep.mubr.f32.mxu0 %v26205_v4  ;;  %v26248_v4 = vand.u32 4294901760, %v23420_v29  ;;  %v26256_v29 = vand.u32 4294901760, %v23446_v16  ;;  %v26262_v16 = vand.u32 4294901760, %v23508_v22 }
 0x3e3   : > { %18470 = vmatprep.subr.bf16.mxu0 %v23396_v1 }
 0x3e4   : > { %v18489_v51 = vpack.c.bf16 %v26249_v25, %v26248_v4  ;;  %v18497_v46 = vpack.c.bf16 %v26257_v15, %v26256_v29  ;;  %v18505_v48 = vpack.c.bf16 %v26262_v16, %v26261_v47  ;;  %v8176_v4 = vand.u32 4294901760, %v12039_v49  ;;  %v12040_v25 = vld [vmem:[%s25141_s2 + $0x440] sm:$0xff]  ;;  %v23776_v15 = vld [vmem:[%s25141_s2 + $0x468] sm:$0xff] }
 0x3e5   : > { %v23771_v29 = vld [vmem:[%s25141_s2 + $0x460] sm:$0xff] }
 0x3e6   : > { %18472 = vmatpush3.bf16.msra.mxu0 %v23396_v1  ;;  %v25560_v16 = vand.u32 4294901760, %v23771_v29  ;;  %v23836_v58 = vsub.f32 %v12039_v49, %v8176_v4 }
 0x3e7   : > { %18474 = vmatprep.subr.bf16.mxu0 %v23408_v0 }
 0x3ea   : > { %18476 = vmatpush3.bf16.msra.mxu0 %v23408_v0 }
 0x3eb   : > { %18478 = vmatprep.subr.bf16.mxu0 %v23428_v61 }
 0x3ee   : > { %18480 = vmatpush3.bf16.msra.mxu0 %v23428_v61 }
 0x3ef   : > { %18482 = vmatprep.subr.bf16.mxu0 %v23455_v10 }
 0x3f2   : > { %18484 = vmatpush3.bf16.msra.mxu0 %v23455_v10 }
 0x3f3   : > { %18486 = vmatprep.subr.bf16.mxu0 %v18485_v19 }
 0x3f5   : > { %15810 = vmatmul.mubr.f32.vlgmr.msra.gmra.mrb[0].mxu0 %v26250_v18  ;;  %v8179_v18 = vand.u32 4294901760, %v12040_v25 }
 0x3f6   : > { %18488 = vmatpush3.bf16.msra.mxu0 %v18485_v19  ;;  %15812 = vmatprep.mubr.f32.mxu0 %v26251_v31  ;;  %v8173_v19 = vand.u32 4294901760, %v12038_v40 }
 0x3f7   : > { %18490 = vmatprep.subr.bf16.mxu0 %v18489_v51 }
 0x3f8   : > { %v23834_v39 = vsub.f32 %v12038_v40, %v8173_v19 }
 0x3f9   : > { %15813 = vmatmul.mubr.f32.gmra.mrb[2].mxu0 %v26254_v14 }
 0x3fa   : > { %18492 = vmatpush3.bf16.msra.mxu0 %v18489_v51  ;;  %15815 = vmatprep.mubr.f32.mxu0 %v26255_v63  ;;  %v23747_v51 = vld [vmem:[%s25141_s2 + $0x448] sm:$0xff] }
 0x3fb   : > { %18494 = vmatprep.subr.bf16.mxu0 %v18493_v34  ;;  %v8182_v30 = vand.u32 4294901760, %v23747_v51 }
 0x3fd   : > { %15816 = vmatmul.mubr.f32.gmra.mrb[4].mxu0 %v26258_v55  ;;  %v23784_v33 = vpack.c.bf16 %v8182_v30, %v8179_v18 }
 0x3fe   : > { %18496 = vmatpush3.bf16.msra.mxu0 %v18493_v34  ;;  %15818 = vmatprep.mubr.f32.mxu0 %v23511_v20  ;;  %v23764_v34 = vld [vmem:[%s25141_s2 + $0x458] sm:$0xff] }
 0x3ff   : > { %18498 = vmatprep.subr.bf16.mxu0 %v18497_v46  ;;  %v8188_v47 = vand.u32 4294901760, %v23764_v34 }
 0x401   : > { %15819 = vmatmul.mubr.f32.gmra.mrb[6].mxu0 %v23518_v7 }
 0x402   : > { %18500 = vmatpush3.bf16.msra.mxu0 %v18497_v46  ;;  %15853 = vmatprep.mubr.f32.mxu0 %v22958_v56 }
 0x403   : > { %18502 = vmatprep.subr.bf16.mxu0 %v18501_v11 }
 0x406   : > { %18504 = vmatpush3.bf16.msra.mxu0 %v18501_v11  ;;  %v8185_v11 = vand.u32 4294901760, %v23759_v54 }
 0x407   : > { %18506 = vmatprep.subr.bf16.mxu0 %v18505_v48 }
 0x40a   : > { %18508 = vmatpush3.bf16.msra.mxu0 %v18505_v48  ;;  %v25559_v48 = vand.u32 4294901760, %v23776_v15 }
 0x40b   : > { %18510 = vmatprep.subr.bf16.mxu0 %v18509_v42 }
 0x40e   : > { %18512 = vmatpush3.bf16.msra.mxu0 %v18509_v42  ;;  %v23796_v42 = vpack.c.bf16 %v8188_v47, %v8185_v11 }
 0x40f   : > { %18514 = vmatprep.subr.bf16.mxu0 %v18513_v62 }
 0x412   : > { %18516 = vmatpush3.bf16.msra.mxu0 %v18513_v62  ;;  %v23801_v62 = vld [vmem:[%s25141_s2 + $0x470] sm:$0xff] }
 0x413   : > { %18518 = vmatprep.subr.bf16.mxu0 %v23329_v50 }
 0x415   : > { %15854 = vmatmul.mubr.f32.vlgmr.msra.gmra.mrb[0].mxu0 %v22987_v3 }
 0x416   : > { %18520 = vmatpush3.bf16.msra.mxu0 %v23329_v50  ;;  %15856 = vmatprep.mubr.f32.mxu0 %v23000_v36  ;;  %v12032_v50 = vld [vmem:[%s25141_s2 + $0x400] sm:$0xff] }
 0x417   : > { %18522 = vmatprep.subr.bf16.mxu0 %v23339_v59 }
 0x419   : > { %15857 = vmatmul.mubr.f32.gmra.mrb[2].mxu0 %v23035_v44 }
 0x41a   : > { %18524 = vmatpush3.bf16.msra.mxu0 %v23339_v59  ;;  %15859 = vmatprep.mubr.f32.mxu0 %v23047_v26  ;;  %v12033_v59 = vld [vmem:[%s25141_s2 + $0x408] sm:$0xff] }
 0x41b   : > { %18526 = vmatprep.subr.bf16.mxu0 %v23351_v35 }
 0x41d   : > { %15860 = vmatmul.mubr.f32.gmra.mrb[4].mxu0 %v23076_v57 }
 0x41e   : > { %18528 = vmatpush3.bf16.msra.mxu0 %v23351_v35  ;;  %15862 = vmatprep.mubr.f32.mxu0 %v23457_v23  ;;  %v8155_v35 = vand.u32 4294901760, %v12032_v50 }
 0x41f   : > { %18530 = vmatprep.subr.bf16.mxu0 %v23365_v5 }
 0x420   : > { %v23779_v46 = vsub.f32 %v12032_v50, %v8155_v35  ;;  %v23806_v50 = vld [vmem:[%s25141_s2 + $0x478] sm:$0xff] }
 0x421   : > { %15863 = vmatmul.mubr.f32.gmra.mrb[6].mxu0 %v23472_v38 }
 0x422   : > { %18532 = vmatpush3.bf16.msra.mxu0 %v23365_v5  ;;  %15897 = vmatprep.mubr.f32.mxu0 %v22958_v56  ;;  %v8158_v56 = vand.u32 4294901760, %v12033_v59  ;;  %v12034_v5 = vld [vmem:[%s25141_s2 + $0x410] sm:$0xff]  ;;  %v25561_v37 = vand.u32 4294901760, %v23779_v46 }
 0x423   : > { %18534 = vmatprep.subr.bf16.mxu0 %v23396_v1  ;;  %v8161_v21 = vand.u32 4294901760, %v12034_v5 }
 0x424   : > { %v23717_v22 = vpack.c.bf16 %v8158_v56, %v8155_v35  ;;  %v23781_v53 = vsub.f32 %v12033_v59, %v8158_v56  ;;  %v23816_v35 = vpack.c.bf16 %v25559_v48, %v25560_v16  ;;  %v8319_v24 = vsub.f32 %v23779_v46, %v25561_v37  ;;  %v6201_v56 = vld [vmem:[#allocation2 + $0x7a] sm:$0xff] }
 0x425   : > { %v23808_v59 = vsub.f32 %v12034_v5, %v8161_v21  ;;  %v23832_v16 = vsub.f32 %v12037_v52, %v8170_v27  ;;  %v26266_v37 = vand.u32 4294901760, %v23801_v62 }
 0x426   : > { %18536 = vmatpush3.bf16.msra.mxu0 %v23396_v1  ;;  %v12035_v1 = vld [vmem:[%s25141_s2 + $0x418] sm:$0xff]  ;;  %v26265_v5 = vand.u32 4294901760, %v23781_v53 }
 0x427   : > { %18538 = vmatprep.subr.bf16.mxu0 %v23408_v0  ;;  %v26268_v52 = vand.u32 4294901760, %v23808_v59 }
 0x42a   : > { %18540 = vmatpush3.bf16.msra.mxu0 %v23408_v0  ;;  %v8164_v0 = vand.u32 4294901760, %v12035_v1 }
 0x42b   : > { %18542 = vmatprep.subr.bf16.mxu0 %v23428_v61 }
 0x42c   : > { %v23727_v43 = vpack.c.bf16 %v8164_v0, %v8161_v21  ;;  %v8320_v21 = vand.u32 4294901760, %v8319_v24 }
 0x42e   : > { %18544 = vmatpush3.bf16.msra.mxu0 %v23428_v61  ;;  %v8167_v61 = vand.u32 4294901760, %v12036_v45 }
 0x42f   : > { %18546 = vmatprep.subr.bf16.mxu0 %v23455_v10 }
 0x430   : > { %v23830_v48 = vsub.f32 %v12036_v45, %v8167_v61  ;;  %v6202_v45 = vld [vmem:[#allocation2 + $0x82] sm:$0xff] }
 0x432   : > { %18548 = vmatpush3.bf16.msra.mxu0 %v23455_v10  ;;  %v23739_v10 = vpack.c.bf16 %v8170_v27, %v8167_v61  ;;  %v8333_v61 = vsub.f32 %v23808_v59, %v26268_v52  ;;  %v23864_v52 = vsub.f32 %v23747_v51, %v8182_v30  ;;  %v26270_v24 = vand.u32 4294901760, %v23830_v48 }
 0x433   : > { %18550 = vmatprep.subr.bf16.mxu0 %v23717_v22  ;;  %v26273_v30 = vand.u32 4294901760, %v23836_v58 }
 0x435   : > { %15898 = vmatmul.mubr.f32.vlgmr.msra.gmra.mrb[0].mxu0 %v22987_v3  ;;  %v23753_v3 = vpack.c.bf16 %v8176_v4, %v8173_v19  ;;  %v8334_v19 = vand.u32 4294901760, %v8333_v61 }
 0x436   : > { %18552 = vmatpush3.bf16.msra.mxu0 %v23717_v22  ;;  %15900 = vmatprep.mubr.f32.mxu0 %v23000_v36 }
 0x437   : > { %18554 = vmatprep.subr.bf16.mxu0 %v23727_v43 }
 0x439   : > { %15901 = vmatmul.mubr.f32.gmra.mrb[2].mxu0 %v23035_v44 }
 0x43a   : > { %18556 = vmatpush3.bf16.msra.mxu0 %v23727_v43  ;;  %15903 = vmatprep.mubr.f32.mxu0 %v23047_v26 }
 0x43b   : > { %18558 = vmatprep.subr.bf16.mxu0 %v23739_v10 }
 0x43d   : > { %15904 = vmatmul.mubr.f32.gmra.mrb[4].mxu0 %v23076_v57 }
 0x43e   : > { %18560 = vmatpush3.bf16.msra.mxu0 %v23739_v10  ;;  %15906 = vmatprep.mubr.f32.mxu0 %v23457_v23 }
 0x43f   : > { %18562 = vmatprep.subr.bf16.mxu0 %v23753_v3 }
 0x441   : > { %15907 = vmatmul.mubr.f32.gmra.mrb[6].mxu0 %v23472_v38 }
 0x442   : > { %18564 = vmatpush3.bf16.msra.mxu0 %v23753_v3  ;;  %15941 = vmatprep.mubr.f32.mxu0 %v23144_v8  ;;  %v23810_v8 = vsub.f32 %v12035_v1, %v8164_v0  ;;  %v8326_v1 = vsub.f32 %v23781_v53, %v26265_v5  ;;  %v26267_v5 = vand.u32 4294901760, %v23806_v50  ;;  %v23845_v0 = vand.u32 4294901760, %v6201_v56 }
 0x443   : > { %18566 = vmatprep.subr.bf16.mxu0 %v23784_v33 }
 0x444   : > { %v23843_v7 = vpack.c.bf16 %v26267_v5, %v26266_v37  ;;  %v8327_v20 = vand.u32 4294901760, %v8326_v1  ;;  %v26269_v27 = vand.u32 4294901760, %v23810_v8  ;;  %v23858_v37 = vsub.f32 %v12040_v25, %v8179_v18 }
 0x445   : > { %v23860_v1 = vand.u32 4294901760, %v6202_v45  ;;  %v8347_v25 = vsub.f32 %v23830_v48, %v26270_v24  ;;  %v26271_v18 = vand.u32 4294901760, %v23832_v16  ;;  %v23889_v24 = vsub.f32 %v23759_v54, %v8185_v11 }
 0x446   : > { %18568 = vmatpush3.bf16.msra.mxu0 %v23784_v33  ;;  %v8340_v40 = vsub.f32 %v23810_v8, %v26269_v27  ;;  %v18581_v5 = vpack.c.bf16 %v8327_v20, %v8320_v21  ;;  %v23867_v27 = vsub.f32 %v6201_v56, %v23845_v0  ;;  %v26272_v20 = vand.u32 4294901760, %v23834_v39 }
 0x447   : > { %18570 = vmatprep.subr.bf16.mxu0 %v23796_v42  ;;  %v8354_v4 = vsub.f32 %v23832_v16, %v26271_v18  ;;  %v8368_v56 = vsub.f32 %v23836_v58, %v26273_v30  ;;  %v23884_v61 = vsub.f32 %v6202_v45, %v23860_v1  ;;  %v23892_v18 = vsub.f32 %v23764_v34, %v8188_v47  ;;  %v26276_v47 = vld [vmem:[#allocation96_spill] sm:$0xff] }
 0x448   : > { %v8341_v49 = vand.u32 4294901760, %v8340_v40  ;;  %v8361_v51 = vsub.f32 %v23834_v39, %v26272_v20  ;;  %v8297_v20 = vand.u32 4294901760, %v23867_v27  ;;  %v8348_v30 = vand.u32 4294901760, %v8347_v25 }
 0x449   : > { %v8355_v63 = vand.u32 4294901760, %v8354_v4  ;;  %v8369_v21 = vand.u32 4294901760, %v8368_v56  ;;  %v26274_v14 = vand.u32 4294901760, %v23858_v37  ;;  %v8307_v54 = vand.u32 4294901760, %v23884_v61 }
 0x44a   : > { %18572 = vmatpush3.bf16.msra.mxu0 %v23796_v42  ;;  %v18585_v55 = vpack.c.bf16 %v8341_v49, %v8334_v19  ;;  %v8362_v45 = vand.u32 4294901760, %v8361_v51  ;;  %v26275_v34 = vand.u32 4294901760, %v23864_v52  ;;  %v8388_v49 = vand.u32 4294901760, %v23889_v24 }
 0x44b   : > { %18574 = vmatprep.subr.bf16.mxu0 %v23816_v35  ;;  %v8375_v40 = vsub.f32 %v23858_v37, %v26274_v14  ;;  %v25564_v19 = vand.u32 4294901760, %v23892_v18  ;;  %v18589_v4 = vpack.c.bf16 %v8355_v63, %v8348_v30  ;;  %v26277_v14 = vand.u32 4294901760, %v23771_v29 }
 0x44c   : > { %v8382_v11 = vsub.f32 %v23864_v52, %v26275_v34  ;;  %v26278_v25 = vand.u32 4294901760, %v23776_v15  ;;  %v18593_v56 = vpack.c.bf16 %v8369_v21, %v8362_v45  ;;  %v26280_v45 = vand.u32 4294901760, %v23806_v50 }
 0x44d   : > { %v8376_v34 = vand.u32 4294901760, %v8375_v40  ;;  %v8396_v30 = vsub.f32 %v23892_v18, %v25564_v19  ;;  %v26279_v40 = vand.u32 4294901760, %v23801_v62 }
 0x44e   : > { %18576 = vmatpush3.bf16.msra.mxu0 %v23816_v35  ;;  %v23917_v51 = vsub.f32 %v23776_v15, %v26278_v25  ;;  %v8383_v63 = vand.u32 4294901760, %v8382_v11  ;;  %v23940_v11 = vsub.f32 %v23806_v50, %v26280_v45  ;;  %v18617_v45 = vpack.c.bf16 %v23810_v8, %v23808_v59 }
 0x44f   : > { %18578 = vmatprep.subr.bf16.mxu0 %v23843_v7  ;;  %v8397_v25 = vand.u32 4294901760, %v8396_v30 }
 0x450   : > { %v8409_v21 = vand.u32 4294901760, %v23917_v51 }
 0x452   : > { %18580 = vmatpush3.bf16.msra.mxu0 %v23843_v7 }
 0x453   : > { %18582 = vmatprep.subr.bf16.mxu0 %v18581_v5 }
 0x455   : > { %15942 = vmatmul.mubr.f32.vlgmr.msra.gmra.mrb[0].mxu0 %v23159_v32  ;;  %v8298_v32 = vsub.f32 %v23867_v27, %v8297_v20 }
 0x456   : > { %18584 = vmatpush3.bf16.msra.mxu0 %v18581_v5  ;;  %15944 = vmatprep.mubr.f32.mxu0 %v26276_v47  ;;  %v23912_v5 = vsub.f32 %v23771_v29, %v26277_v14  ;;  %v8308_v47 = vsub.f32 %v23884_v61, %v8307_v54  ;;  %v8389_v29 = vsub.f32 %v23889_v24, %v8388_v49 }
 0x457   : > { %18586 = vmatprep.subr.bf16.mxu0 %v18585_v55  ;;  %v8299_v15 = vand.u32 4294901760, %v8298_v32 }
 0x458   : > { %v8309_v14 = vand.u32 4294901760, %v8308_v47  ;;  %v8390_v32 = vand.u32 4294901760, %v8389_v29 }
 0x459   : > { %15945 = vmatmul.mubr.f32.gmra.mrb[2].mxu0 %v26239_v60  ;;  %v8402_v60 = vand.u32 4294901760, %v23912_v5 }
 0x45a   : > { %18588 = vmatpush3.bf16.msra.mxu0 %v18585_v55  ;;  %15947 = vmatprep.mubr.f32.mxu0 %v23548_v6  ;;  %v23935_v55 = vsub.f32 %v23801_v62, %v26279_v40  ;;  %v18597_v6 = vpack.c.bf16 %v8383_v63, %v8376_v34  ;;  %v8410_v62 = vsub.f32 %v23917_v51, %v8409_v21  ;;  %v8423_v40 = vand.u32 4294901760, %v23940_v11 }
 0x45b   : > { %18590 = vmatprep.subr.bf16.mxu0 %v18589_v4  ;;  %v8403_v19 = vsub.f32 %v23912_v5, %v8402_v60 }
 0x45c   : > { %v8416_v50 = vand.u32 4294901760, %v23935_v55  ;;  %v8411_v34 = vand.u32 4294901760, %v8410_v62  ;;  %v8424_v63 = vsub.f32 %v23940_v11, %v8423_v40  ;;  %v18637_v62 = vpack.c.bf16 %v23917_v51, %v23912_v5 }
 0x45d   : > { %15948 = vmatmul.mubr.f32.gmra.mrb[4].mxu0 %v23567_v28  ;;  %v18601_v28 = vpack.c.bf16 %v8397_v25, %v8390_v32  ;;  %v18629_v32 = vpack.c.bf16 %v23864_v52, %v23858_v37  ;;  %v18633_v25 = vpack.c.bf16 %v23892_v18, %v23889_v24  ;;  %v9161_v24 = vld [vmem:[%s25143_s4 + $0x30] sm:$0xff] }
 0x45e   : > { %18592 = vmatpush3.bf16.msra.mxu0 %v18589_v4  ;;  %15950 = vmatprep.mubr.f32.mxu0 %v8299_v15  ;;  %v8404_v4 = vand.u32 4294901760, %v8403_v19  ;;  %v8417_v47 = vsub.f32 %v23935_v55, %v8416_v50  ;;  %v8425_v15 = vand.u32 4294901760, %v8424_v63  ;;  %v18613_v19 = vpack.c.bf16 %v23781_v53, %v23779_v46  ;;  %v26290_v63 = vld [vmem:[#allocation71_spill] sm:$0xff] }
 0x45f   : > { %18594 = vmatprep.subr.bf16.mxu0 %v18593_v56 }
 0x460   : > { %v18605_v29 = vpack.c.bf16 %v8411_v34, %v8404_v4  ;;  %v8418_v30 = vand.u32 4294901760, %v8417_v47  ;;  %v26286_v4 = vld [vmem:[#allocation54_spill] sm:$0xff]  ;;  %v26287_v34 = vand.u32 4294901760, %v23830_v48  ;;  %v26289_v47 = vld [vmem:[#allocation93_spill] sm:$0xff] }
 0x461   : > { %15951 = vmatmul.mubr.f32.gmra.mrb[6].mxu0 %v8309_v14  ;;  %v18621_v14 = vpack.c.bf16 %v23832_v16, %v23830_v48  ;;  %v26295_v48 = vand.u32 4294901760, %v23864_v52  ;;  %v18705_v52 = vpack.c.bf16 %v8423_v40, %v8416_v50 }
 0x462   : > { %18596 = vmatpush3.bf16.msra.mxu0 %v18593_v56  ;;  %15985 = vmatprep.mubr.f32.mxu0 %v23000_v36  ;;  %v18609_v56 = vpack.c.bf16 %v8425_v15, %v8418_v30  ;;  %v26293_v30 = vld [vmem:[#allocation77_spill] sm:$0xff] }
 0x463   : > { %18598 = vmatprep.subr.bf16.mxu0 %v18597_v6 }
 0x466   : > { %18600 = vmatpush3.bf16.msra.mxu0 %v18597_v6  ;;  %v18625_v6 = vpack.c.bf16 %v23836_v58, %v23834_v39 }
 0x467   : > { %18602 = vmatprep.subr.bf16.mxu0 %v18601_v28 }
 0x46a   : > { %18604 = vmatpush3.bf16.msra.mxu0 %v18601_v28  ;;  %v18641_v28 = vpack.c.bf16 %v23940_v11, %v23935_v55 }
 0x46b   : > { %18606 = vmatprep.subr.bf16.mxu0 %v18605_v29 }
 0x46e   : > { %18608 = vmatpush3.bf16.msra.mxu0 %v18605_v29 }
 0x46f   : > { %18610 = vmatprep.subr.bf16.mxu0 %v18609_v56 }
 0x472   : > { %18612 = vmatpush3.bf16.msra.mxu0 %v18609_v56 }
 0x473   : > { %18614 = vmatprep.subr.bf16.mxu0 %v18613_v19 }
 0x475   : > { %15986 = vmatmul.mubr.f32.vlgmr.msra.gmra.mrb[0].mxu0 %v23035_v44 }
 0x476   : > { %18616 = vmatpush3.bf16.msra.mxu0 %v18613_v19  ;;  %15988 = vmatprep.mubr.f32.mxu0 %v23047_v26  ;;  %v9165_v19 = vld [vmem:[%s25143_s4 + $0x50] sm:$0xff] }
 0x477   : > { %18618 = vmatprep.subr.bf16.mxu0 %v18617_v45 }
 0x479   : > { %15989 = vmatmul.mubr.f32.gmra.mrb[2].mxu0 %v23076_v57 }
 0x47a   : > { %18620 = vmatpush3.bf16.msra.mxu0 %v18617_v45  ;;  %15991 = vmatprep.mubr.f32.mxu0 %v23457_v23  ;;  %v9166_v45 = vld [vmem:[%s25143_s4 + $0x58] sm:$0xff] }
 0x47b   : > { %18622 = vmatprep.subr.bf16.mxu0 %v18621_v14 }
 0x47d   : > { %15992 = vmatmul.mubr.f32.gmra.mrb[4].mxu0 %v23472_v38 }
 0x47e   : > { %18624 = vmatpush3.bf16.msra.mxu0 %v18621_v14  ;;  %15994 = vmatprep.mubr.f32.mxu0 %v23845_v0  ;;  %v9202_v14 = vand.u32 4294901760, %v9165_v19 }
 0x47f   : > { %18626 = vmatprep.subr.bf16.mxu0 %v18625_v6 }
 0x481   : > { %15995 = vmatmul.mubr.f32.gmra.mrb[6].mxu0 %v23860_v1 }
 0x482   : > { %18628 = vmatpush3.bf16.msra.mxu0 %v18625_v6  ;;  %16029 = vmatprep.mubr.f32.mxu0 %v23045_v13  ;;  %v26282_v13 = vand.u32 4294901760, %v23781_v53  ;;  %v9205_v6 = vand.u32 4294901760, %v9166_v45 }
 0x483   : > { %18630 = vmatprep.subr.bf16.mxu0 %v18629_v32 }
 0x486   : > { %18632 = vmatpush3.bf16.msra.mxu0 %v18629_v32 }
 0x487   : > { %18634 = vmatprep.subr.bf16.mxu0 %v18633_v25 }
 0x48a   : > { %18636 = vmatpush3.bf16.msra.mxu0 %v18633_v25 }
 0x48b   : > { %18638 = vmatprep.subr.bf16.mxu0 %v18637_v62 }
 0x48e   : > { %18640 = vmatpush3.bf16.msra.mxu0 %v18637_v62 }
 0x48f   : > { %18642 = vmatprep.subr.bf16.mxu0 %v18641_v28 }
 0x492   : > { %18644 = vmatpush3.bf16.msra.mxu0 %v18641_v28 }
 0x493   : > { %18646 = vmatprep.subr.bf16.mxu0 %v23717_v22 }
 0x495   : > { %16030 = vmatmul.mubr.f32.vlgmr.msra.gmra.mrb[0].mxu0 %v23074_v12  ;;  %v26281_v12 = vand.u32 4294901760, %v23779_v46  ;;  %v26288_v46 = vand.u32 4294901760, %v23832_v16  ;;  %v26294_v16 = vand.u32 4294901760, %v23858_v37  ;;  %v18701_v37 = vpack.c.bf16 %v8409_v21, %v8402_v60  ;;  %v9163_v60 = vld [vmem:[%s25143_s4 + $0x40] sm:$0xff]  ;;  %v9164_v21 = vld [vmem:[%s25143_s4 + $0x48] sm:$0xff] }
 0x496   : > { %18648 = vmatpush3.bf16.msra.mxu0 %v23717_v22  ;;  %16032 = vmatprep.mubr.f32.mxu0 %v23085_v41  ;;  %v26283_v41 = vand.u32 4294901760, %v23808_v59  ;;  %v26291_v59 = vand.u32 4294901760, %v23834_v39  ;;  %v9196_v55 = vand.u32 4294901760, %v9163_v60  ;;  %v9199_v11 = vand.u32 4294901760, %v9164_v21 }
 0x497   : > { %18650 = vmatprep.subr.bf16.mxu0 %v23727_v43  ;;  %v18685_v53 = vpack.c.bf16 %v26288_v46, %v26287_v34  ;;  %v18693_v15 = vpack.c.bf16 %v26295_v48, %v26294_v16 }
 0x498   : > { %v24138_v56 = vpack.c.bf16 %v9199_v11, %v9196_v55  ;;  %v24152_v62 = vsub.f32 %v9163_v60, %v9196_v55  ;;  %v24154_v28 = vsub.f32 %v9164_v21, %v9199_v11 }
 0x499   : > { %16033 = vmatmul.mubr.f32.gmra.mrb[2].mxu0 %v23113_v9  ;;  %v18677_v9 = vpack.c.bf16 %v26282_v13, %v26281_v12  ;;  %v9167_v12 = vld [vmem:[%s25143_s4 + $0x60] sm:$0xff]  ;;  %v9168_v13 = vld [vmem:[%s25143_s4 + $0x68] sm:$0xff] }
 0x49a   : > { %18652 = vmatpush3.bf16.msra.mxu0 %v23727_v43  ;;  %16035 = vmatprep.mubr.f32.mxu0 %v23479_v17  ;;  %v26284_v17 = vand.u32 4294901760, %v23810_v8  ;;  %v26292_v8 = vand.u32 4294901760, %v23836_v58  ;;  %v26296_v58 = vand.u32 4294901760, %v23892_v18  ;;  %v9162_v18 = vld [vmem:[%s25143_s4 + $0x38] sm:$0xff]  ;;  %v9211_v34 = vand.u32 4294901760, %v9168_v13 }
 0x49b   : > { %18654 = vmatprep.subr.bf16.mxu0 %v23739_v10 }
 0x49c   : > { %v18689_v29 = vpack.c.bf16 %v26292_v8, %v26291_v59  ;;  %v18697_v39 = vpack.c.bf16 %v26296_v58, %v8388_v49  ;;  %v24180_v59 = vsub.f32 %v9168_v13, %v9211_v34 }
 0x49d   : > { %16036 = vmatmul.mubr.f32.gmra.mrb[4].mxu0 %v23500_v2  ;;  %v18681_v2 = vpack.c.bf16 %v26284_v17, %v26283_v41  ;;  %v24165_v41 = vpack.c.bf16 %v9205_v6, %v9202_v14  ;;  %v24167_v17 = vsub.f32 %v9165_v19, %v9202_v14  ;;  %v25571_v14 = vand.u32 4294901760, %v24154_v28 }
 0x49e   : > { %18656 = vmatpush3.bf16.msra.mxu0 %v23739_v10  ;;  %16038 = vmatprep.mubr.f32.mxu0 %v23867_v27 }
 0x49f   : > { %18658 = vmatprep.subr.bf16.mxu0 %v23753_v3  ;;  %v9329_v13 = vsub.f32 %v24154_v28, %v25571_v14 }
 0x4a1   : > { %16039 = vmatmul.mubr.f32.gmra.mrb[6].mxu0 %v23884_v61 }
 0x4a2   : > { %18660 = vmatpush3.bf16.msra.mxu0 %v23753_v3  ;;  %16073 = vmatprep.mubr.f32.mxu0 %v26251_v31  ;;  %v26285_v31 = vld [vmem:[#allocation67_spill] sm:$0xff] }
 0x4a3   : > { %18662 = vmatprep.subr.bf16.mxu0 %v23784_v33 }
 0x4a6   : > { %18664 = vmatpush3.bf16.msra.mxu0 %v23784_v33 }
 0x4a7   : > { %18666 = vmatprep.subr.bf16.mxu0 %v23796_v42 }
 0x4aa   : > { %18668 = vmatpush3.bf16.msra.mxu0 %v23796_v42 }
 0x4ab   : > { %18670 = vmatprep.subr.bf16.mxu0 %v23816_v35 }
 0x4ae   : > { %18672 = vmatpush3.bf16.msra.mxu0 %v23816_v35 }
 0x4af   : > { %18674 = vmatprep.subr.bf16.mxu0 %v23843_v7 }
 0x4b2   : > { %18676 = vmatpush3.bf16.msra.mxu0 %v23843_v7 }
 0x4b3   : > { %18678 = vmatprep.subr.bf16.mxu0 %v18677_v9 }
 0x4b5   : > { %16074 = vmatmul.mubr.f32.vlgmr.msra.gmra.mrb[0].mxu0 %v26285_v31  ;;  %v9208_v31 = vand.u32 4294901760, %v9167_v12 }
 0x4b6   : > { %18680 = vmatpush3.bf16.msra.mxu0 %v18677_v9  ;;  %16076 = vmatprep.mubr.f32.mxu0 %v26286_v4  ;;  %v9169_v9 = vld [vmem:[%s25143_s4 + $0x70] sm:$0xff]  ;;  %v9170_v4 = vld [vmem:[%s25143_s4 + $0x78] sm:$0xff] }
 0x4b7   : > { %18682 = vmatprep.subr.bf16.mxu0 %v18681_v2  ;;  %v9214_v46 = vand.u32 4294901760, %v9169_v9 }
 0x4b9   : > { %16077 = vmatmul.mubr.f32.gmra.mrb[2].mxu0 %v26289_v47  ;;  %v9217_v47 = vand.u32 4294901760, %v9170_v4  ;;  %v24182_v8 = vsub.f32 %v9169_v9, %v9214_v46 }
 0x4ba   : > { %18684 = vmatpush3.bf16.msra.mxu0 %v18681_v2  ;;  %16079 = vmatprep.mubr.f32.mxu0 %v26290_v63  ;;  %v24169_v2 = vsub.f32 %v9166_v45, %v9205_v6  ;;  %v24178_v63 = vpack.c.bf16 %v9211_v34, %v9208_v31  ;;  %v25572_v45 = vand.u32 4294901760, %v24152_v62 }
 0x4bb   : > { %18686 = vmatprep.subr.bf16.mxu0 %v18685_v53 }
 0x4bc   : > { %v25569_v34 = vand.u32 4294901760, %v24169_v2 }
 0x4bd   : > { %16080 = vmatmul.mubr.f32.gmra.mrb[4].mxu0 %v26293_v30  ;;  %v25581_v30 = vmov 0.0  }
 0x4be   : > { %18688 = vmatpush3.bf16.msra.mxu0 %v18685_v53  ;;  %16082 = vmatprep.mubr.f32.mxu0 %v8297_v20  ;;  %v9190_v20 = vand.u32 4294901760, %v9161_v24  ;;  %v24175_v53 = vsub.f32 %v9167_v12, %v9208_v31  ;;  %v9322_v12 = vsub.f32 %v24152_v62, %v25572_v45  ;;  %v9330_v31 = vand.u32 4294901760, %v9329_v13 }
 0x4bf   : > { %18690 = vmatprep.subr.bf16.mxu0 %v18689_v29  ;;  %16205 = vmatprep.mubr.msk.f32.mxu1 %vm19868_vm0, %v25581_v30 }
 0x4c0   : > { %v24148_v32 = vsub.f32 %v9161_v24, %v9190_v20  ;;  %v9323_v9 = vand.u32 4294901760, %v9322_v12 }
 0x4c1   : > { %16083 = vmatmul.mubr.f32.gmra.mrb[6].mxu0 %v8307_v54  ;;  %v9193_v54 = vand.u32 4294901760, %v9162_v18 }
 0x4c2   : > { %18692 = vmatpush3.bf16.msra.mxu0 %v18689_v29  ;;  %16117 = vmatprep.mubr.f32.mxu0 %v23000_v36  ;;  %v24184_v29 = vsub.f32 %v9170_v4, %v9217_v47  ;;  %v25570_v4 = vand.u32 4294901760, %v24167_v17 }
 0x4c3   : > { %18694 = vmatprep.subr.bf16.mxu0 %v18693_v15  ;;  %v24124_v51 = vpack.c.bf16 %v9193_v54, %v9190_v20  ;;  %v24150_v25 = vsub.f32 %v9162_v18, %v9193_v54  ;;  %v25574_v20 = vand.u32 4294901760, %v24148_v32 }
 0x4c5   : > { %v25573_v54 = vand.u32 4294901760, %v24150_v25  ;;  %v9308_v21 = vsub.f32 %v24148_v32, %v25574_v20  ;;  %v26308_v20 = vld [vmem:[#allocation78_spill] sm:$0xff] }
 0x4c6   : > { %18696 = vmatpush3.bf16.msra.mxu0 %v18693_v15  ;;  %v24191_v15 = vpack.c.bf16 %v9217_v47, %v9214_v46  ;;  %v24244_v46 = vpack.c.bf16 %v9330_v31, %v9323_v9  ;;  %v9336_v47 = vsub.f32 %v24167_v17, %v25570_v4  ;;  %v26307_v4 = vld [vmem:[#allocation72_spill] sm:$0xff] }
 0x4c7   : > { %18698 = vmatprep.subr.bf16.mxu0 %v18697_v39  ;;  %v9315_v55 = vsub.f32 %v24150_v25, %v25573_v54  ;;  %v9309_v11 = vand.u32 4294901760, %v9308_v21 }
 0x4c9   : > { %v9316_v19 = vand.u32 4294901760, %v9315_v55 }
 0x4ca   : > { %18700 = vmatpush3.bf16.msra.mxu0 %v18697_v39 }
 0x4cb   : > { %18702 = vmatprep.subr.bf16.mxu0 %v18701_v37  ;;  %v24234_v6 = vpack.c.bf16 %v9316_v19, %v9309_v11 }
 0x4ce   : > { %18704 = vmatpush3.bf16.msra.mxu0 %v18701_v37 }
 0x4cf   : > { %18706 = vmatprep.subr.bf16.mxu0 %v18705_v52 }
 0x4d2   : > { %18708 = vmatpush3.bf16.msra.mxu0 %v18705_v52 }
 0x4d3   : > { %18710 = vmatprep.subr.bf16.mxu0 %v23717_v22 }
 0x4d5   : > { %16118 = vmatmul.mubr.f32.vlgmr.msra.gmra.mrb[0].mxu0 %v23035_v44 }
 0x4d6   : > { %18712 = vmatpush3.bf16.msra.mxu0 %v23717_v22  ;;  %16120 = vmatprep.mubr.f32.mxu0 %v23047_v26 }
 0x4d7   : > { %18714 = vmatprep.subr.bf16.mxu0 %v23727_v43 }
 0x4d9   : > { %16121 = vmatmul.mubr.f32.gmra.mrb[2].mxu0 %v23076_v57 }
 0x4da   : > { %18716 = vmatpush3.bf16.msra.mxu0 %v23727_v43  ;;  %16123 = vmatprep.mubr.f32.mxu0 %v23457_v23 }
 0x4db   : > { %18718 = vmatprep.subr.bf16.mxu0 %v23739_v10 }
 0x4dd   : > { %16124 = vmatmul.mubr.f32.gmra.mrb[4].mxu0 %v23472_v38 }
 0x4de   : > { %18720 = vmatpush3.bf16.msra.mxu0 %v23739_v10  ;;  %16126 = vmatprep.mubr.f32.mxu0 %v23845_v0 }
 0x4df   : > { %18722 = vmatprep.subr.bf16.mxu0 %v23753_v3 }
 0x4e1   : > { %16127 = vmatmul.mubr.f32.gmra.mrb[6].mxu0 %v23860_v1 }
 0x4e2   : > { %18724 = vmatpush3.bf16.msra.mxu0 %v23753_v3  ;;  %16161 = vmatprep.mubr.f32.mxu0 %v23000_v36  ;;  %v9155_v36 = vld [vmem:[%s25143_s4] sm:$0xff] }
 0x4e3   : > { %18726 = vmatprep.subr.bf16.mxu0 %v23784_v33 }
 0x4e6   : > { %18728 = vmatpush3.bf16.msra.mxu0 %v23784_v33  ;;  %v9159_v33 = vld [vmem:[%s25143_s4 + $0x20] sm:$0xff] }
 0x4e7   : > { %18730 = vmatprep.subr.bf16.mxu0 %v23796_v42 }
 0x4ea   : > { %18732 = vmatpush3.bf16.msra.mxu0 %v23796_v42  ;;  %v9160_v42 = vld [vmem:[%s25143_s4 + $0x28] sm:$0xff] }
 0x4eb   : > { %18734 = vmatprep.subr.bf16.mxu0 %v23816_v35 }
 0x4ee   : > { %18736 = vmatpush3.bf16.msra.mxu0 %v23816_v35  ;;  %v9184_v35 = vand.u32 4294901760, %v9159_v33 }
 0x4ef   : > { %18738 = vmatprep.subr.bf16.mxu0 %v23843_v7 }
 0x4f0   : > { %v24134_v50 = vsub.f32 %v9159_v33, %v9184_v35 }
 0x4f2   : > { %18740 = vmatpush3.bf16.msra.mxu0 %v23843_v7  ;;  %v9172_v7 = vand.u32 4294901760, %v9155_v36 }
 0x4f5   : > { %16162 = vmatmul.mubr.f32.vlgmr.msra.gmra.mrb[0].mxu0 %v23035_v44  ;;  %v9156_v44 = vld [vmem:[%s25143_s4 + $0x8] sm:$0xff] }
 0x4f6   : > { %16164 = vmatprep.mubr.f32.mxu0 %v23047_v26  ;;  %v9175_v26 = vand.u32 4294901760, %v9156_v44 }
 0x4f8   : > { %v24085_v22 = vpack.c.bf16 %v9175_v26, %v9172_v7  ;;  %v24108_v27 = vsub.f32 %v9156_v44, %v9175_v26 }
 0x4f9   : > { %16165 = vmatmul.mubr.f32.gmra.mrb[2].mxu0 %v23076_v57  ;;  %v25585_v57 = vmov 0.0|0.0  }
 0x4fa   : > { %16167 = vmatprep.mubr.f32.mxu0 %v23457_v23  ;;  %18741 = vmatprep.subr.bf16.mxu1 %v25585_v57  ;;  %v9157_v23 = vld [vmem:[%s25143_s4 + $0x10] sm:$0xff]  ;;  %v25579_v48 = vand.u32 4294901760, %v24108_v27 }
 0x4fb   : > { %18743 = vmatpush3.bf16.msra.mxu1 %v24085_v22  ;;  %v9178_v43 = vand.u32 4294901760, %v9157_v23 }
 0x4fc   : > { %18744 = vmatprep.subr.bf16.mxu1 %v25585_v57  ;;  %v9273_v39 = vsub.f32 %v24108_v27, %v25579_v48 }
 0x4fd   : > { %16168 = vmatmul.mubr.f32.gmra.mrb[4].mxu0 %v23472_v38  ;;  %v9158_v38 = vld [vmem:[%s25143_s4 + $0x18] sm:$0xff]  ;;  %v24120_v49 = vsub.f32 %v9157_v23, %v9178_v43 }
 0x4fe   : > { %16170 = vmatprep.mubr.f32.mxu0 %v23845_v0  ;;  %v9181_v10 = vand.u32 4294901760, %v9158_v38  ;;  %v9187_v0 = vand.u32 4294901760, %v9160_v42  ;;  %v9274_v52 = vand.u32 4294901760, %v9273_v39  ;;  %v9337_v39 = vand.u32 4294901760, %v9336_v47 }
 0x500   : > { %v24096_v3 = vpack.c.bf16 %v9181_v10, %v9178_v43  ;;  %v24110_v61 = vpack.c.bf16 %v9187_v0, %v9184_v35  ;;  %v24122_v5 = vsub.f32 %v9158_v38, %v9181_v10  ;;  %v24136_v40 = vsub.f32 %v9160_v42, %v9187_v0 }
 0x501   : > { %16171 = vmatmul.mubr.f32.gmra.mrb[6].mxu0 %v23860_v1  ;;  %v24106_v1 = vsub.f32 %v9155_v36, %v9172_v7  ;;  %v25578_v36 = vand.u32 4294901760, %v24120_v49  ;;  %v25576_v10 = vand.u32 4294901760, %v24134_v50 }
 0x502   : > { %18746 = vmatpush3.bf16.msra.mxu1 %v24096_v3  ;;  %v25577_v44 = vand.u32 4294901760, %v24122_v5  ;;  %v25575_v33 = vand.u32 4294901760, %v24136_v40  ;;  %v24278_v31 = vpack.c.bf16 %v24122_v5, %v24120_v49  ;;  %v24282_v47 = vpack.c.bf16 %v24136_v40, %v24134_v50 }
 0x503   : > { %18747 = vmatprep.subr.bf16.mxu1 %v25585_v57  ;;  %v25580_v16 = vand.u32 4294901760, %v24106_v1  ;;  %v9280_v26 = vsub.f32 %v24120_v49, %v25578_v36  ;;  %v9294_v35 = vsub.f32 %v24134_v50, %v25576_v10  ;;  %v18790_v9 = vpack.c.bf16 %v24108_v27, %v24106_v1 }
 0x504   : > { %v9287_v23 = vsub.f32 %v24122_v5, %v25577_v44  ;;  %v9301_v0 = vsub.f32 %v24136_v40, %v25575_v33  ;;  %26298 = vst [vmem:[#allocation87_spill] sm:$0xff] %v24278_v31  ;;  %26299 = vst [vmem:[#allocation13_spill] sm:$0xff] %v24282_v47 }
 0x505   : > { %v9266_v58 = vsub.f32 %v24106_v1, %v25580_v16  ;;  %v9281_v38 = vand.u32 4294901760, %v9280_v26  ;;  %v9295_v24 = vand.u32 4294901760, %v9294_v35  ;;  %v25567_v26 = vand.u32 4294901760, %v24180_v59 }
 0x506   : > { %18749 = vmatpush3.bf16.msra.mxu1 %v24110_v61  ;;  %v9288_v43 = vand.u32 4294901760, %v9287_v23  ;;  %v9302_v18 = vand.u32 4294901760, %v9301_v0 }
 0x507   : > { %18750 = vmatprep.subr.bf16.mxu1 %v25585_v57  ;;  %v9267_v37 = vand.u32 4294901760, %v9266_v58  ;;  %v9343_v58 = vsub.f32 %v24169_v2, %v25569_v34 }
 0x508   : > { %v24214_v42 = vpack.c.bf16 %v9288_v43, %v9281_v38  ;;  %v24224_v60 = vpack.c.bf16 %v9302_v18, %v9295_v24  ;;  %v9357_v43 = vsub.f32 %v24180_v59, %v25567_v26  ;;  %v25566_v24 = vand.u32 4294901760, %v24182_v8 }
 0x509   : > { %v24204_v7 = vpack.c.bf16 %v9274_v52, %v9267_v37  ;;  %v9344_v37 = vand.u32 4294901760, %v9343_v58  ;;  %v25568_v52 = vand.u32 4294901760, %v24175_v53  ;;  %v25565_v18 = vand.u32 4294901760, %v24184_v29 }
 0x50a   : > { %18752 = vmatpush3.bf16.msra.mxu1 %v24124_v51  ;;  %v9358_v0 = vand.u32 4294901760, %v9357_v43  ;;  %v9364_v55 = vsub.f32 %v24182_v8, %v25566_v24  ;;  %v24286_v58 = vpack.c.bf16 %v24150_v25, %v24148_v32  ;;  %v24302_v43 = vpack.c.bf16 %v24184_v29, %v24182_v8 }
 0x50b   : > { %18753 = vmatprep.subr.bf16.mxu1 %v25585_v57  ;;  %v24254_v23 = vpack.c.bf16 %v9344_v37, %v9337_v39  ;;  %v9350_v38 = vsub.f32 %v24175_v53, %v25568_v52  ;;  %v9371_v11 = vsub.f32 %v24184_v29, %v25565_v18  ;;  %v24290_v39 = vpack.c.bf16 %v24154_v28, %v24152_v62 }
 0x50c   : > { %v9365_v19 = vand.u32 4294901760, %v9364_v55  ;;  %26300 = vst [vmem:[#allocation28_spill] sm:$0xff] %v24286_v58  ;;  %v24294_v37 = vpack.c.bf16 %v24169_v2, %v24167_v17  ;;  %26304 = vst [vmem:[#allocation94_spill] sm:$0xff] %v24302_v43  ;;  %v26305_v55 = vld [vmem:[#allocation82_spill] sm:$0xff] }
 0x50d   : > { %v9351_v35 = vand.u32 4294901760, %v9350_v38  ;;  %v9372_v12 = vand.u32 4294901760, %v9371_v11  ;;  %26301 = vst [vmem:[#allocation32_spill] sm:$0xff] %v24290_v39  ;;  %v24298_v38 = vpack.c.bf16 %v24180_v59, %v24175_v53 }
 0x50e   : > { %18755 = vmatpush3.bf16.msra.mxu1 %v24138_v56  ;;  %26302 = vst [vmem:[#allocation36_spill] sm:$0xff] %v24294_v37 }
 0x50f   : > { %18756 = vmatprep.subr.bf16.mxu1 %v25585_v57  ;;  %v24264_v21 = vpack.c.bf16 %v9358_v0, %v9351_v35  ;;  %v24272_v13 = vpack.c.bf16 %v9372_v12, %v9365_v19  ;;  %26303 = vst [vmem:[#allocation98_spill] sm:$0xff] %v24298_v38  ;;  %v12048_v0 = vld [vmem:[%s25142_s3] ss:$0 sm:$0xff]  ;;  %v26306_v12 = vld [vmem:[#allocation85_spill] sm:$0xff] }
 0x511   : > { %26297 = vst [vmem:[#allocation102_spill] sm:$0xff] %v24272_v13 }
 0x512   : > { %18758 = vmatpush3.bf16.msra.mxu1 %v24165_v41 }
 0x513   : > { %18759 = vmatprep.subr.bf16.mxu1 %v25585_v57 }
 0x516   : > { %18761 = vmatpush3.bf16.msra.mxu1 %v24178_v63 }
 0x517   : > { %18762 = vmatprep.subr.bf16.mxu1 %v25585_v57 }
 0x51a   : > { %18764 = vmatpush3.bf16.msra.mxu1 %v24191_v15 }
 0x51b   : > { %18765 = vmatprep.subr.bf16.mxu1 %v25585_v57 }
 0x5c8   : > { %v16163_v35 = vpop.f32.mrb[0].mxu0 }
 0x5c9   : > { %v19317_v11 = vadd.f32 %v16163_v35, %v26305_v55  ;;  %v9050_v19 = vpop.f32.mrb[1].mxu0  ;;  %v26309_v35 = vld [vmem:[#allocation73_spill] sm:$0xff] }
 0x5ca   : > { %v19318_v18 = vadd.f32 %v9050_v19, %v26306_v12  ;;  %v26311_v12 = vld [vmem:[#allocation83_spill] sm:$0xff] }
 0x5cb   : > { %v9112_v24 = vadd.f32 %v19317_v11, %v12048_v0  ;;  %v26310_v11 = vld [vmem:[#allocation74_spill] sm:$0xff] }
 0x5cc   : > { %v9111_v26 = vadd.f32 %v19318_v18, %v12048_v0  ;;  %v16166_v52 = vpop.f32.mrb[2].mxu0 }
 0x5cd   : > { %v9120_v34 = vmax.f32 %v9112_v24, 0.0  ;;  %v19319_v14 = vadd.f32 %v16166_v52, %v26307_v4  ;;  %v9062_v45 = vpop.f32.mrb[3].mxu0 }
 0x5ce   : > { %v9119_v54 = vmax.f32 %v9111_v26, 0.0  ;;  %v19320_v33 = vadd.f32 %v9062_v45, %v26308_v20 }
 0x5cf   : > { %9128 = vst [vmem:[#allocation3 + $0x8] sm:$0xff] %v9120_v34  ;;  %v9114_v10 = vadd.f32 %v19319_v14, %v12048_v0 }
 0x5d0   : > { %9127 = vst [vmem:[#allocation3] sm:$0xff] %v9119_v54  ;;  %v9113_v44 = vadd.f32 %v19320_v33, %v12048_v0  ;;  %v16169_v36 = vpop.f32.mrb[4].mxu0  ;;  %v26312_v54 = vld [vmem:[#allocation84_spill] sm:$0xff] }
 0x5d1   : > { %v9122_v48 = vmax.f32 %v9114_v10, 0.0  ;;  %v19321_v55 = vadd.f32 %v16169_v36, %v26309_v35  ;;  %v9074_v16 = vpop.f32.mrb[5].mxu0 }
 0x5d2   : > { %v9121_v19 = vmax.f32 %v9113_v44, 0.0  ;;  %v19322_v18 = vadd.f32 %v9074_v16, %v26310_v11 }
 0x5d3   : > { %9130 = vst [vmem:[#allocation3 + $0x18] sm:$0xff] %v9122_v48  ;;  %v9116_v24 = vadd.f32 %v19321_v55, %v12048_v0 }
 0x5d4   : > { %9129 = vst [vmem:[#allocation3 + $0x10] sm:$0xff] %v9121_v19  ;;  %v9115_v4 = vadd.f32 %v19322_v18, %v12048_v0  ;;  %v16172_v52 = vpop.f32.mrb[6].mxu0 }
 0x5d5   : > { %v9124_v26 = vmax.f32 %v9116_v24, 0.0  ;;  %v19323_v20 = vadd.f32 %v16172_v52, %v26311_v12  ;;  %v9086_v45 = vpop.f32.mrb[7].mxu0 }
 0x5d6   : > { %v9123_v14 = vmax.f32 %v9115_v4, 0.0  ;;  %v19324_v33 = vadd.f32 %v9086_v45, %v26312_v54  ;;  %v26316_v45 = vand.u32 4294901760, %v24122_v5  ;;  %v26322_v5 = vand.u32 4294901760, %v24150_v25 }
 0x5d7   : > { %9132 = vst [vmem:[#allocation3 + $0x28] sm:$0xff] %v9124_v26  ;;  %v9118_v10 = vadd.f32 %v19323_v20, %v12048_v0  ;;  %v9135_v44 = vld [vmem:[#allocation3] ss:$2 sm:$0xff]  ;;  %v9143_v35 = vld [vmem:[#allocation3 + $0x1] ss:$2 sm:$0xff]  ;;  %v26315_v20 = vand.u32 4294901760, %v24120_v49 }
 0x5d8   : > { %9131 = vst [vmem:[#allocation3 + $0x20] sm:$0xff] %v9123_v14  ;;  %v9117_v36 = vadd.f32 %v19324_v33, %v12048_v0  ;;  %v9150_v19 = vmax.f32 %v9135_v44, %v9143_v35  ;;  %v26321_v49 = vand.u32 4294901760, %v24148_v32  ;;  %v26327_v32 = vand.u32 4294901760, %v24167_v17  ;;  %v12052_v35 = vld [vmem:[%s25143_s4 + $0x98] sm:$0xff] }
 0x5d9   : > { %v9126_v34 = vmax.f32 %v9118_v10, 0.0  ;;  %v24395_v14 = vpack.c.bf16 %v26316_v45, %v26315_v20  ;;  %v26328_v25 = vand.u32 4294901760, %v24169_v2  ;;  %v26333_v17 = vand.u32 4294901760, %v24182_v8 }
 0x5da   : > { %v9125_v16 = vmax.f32 %v9117_v36, 0.0  ;;  %v24413_v33 = vpack.c.bf16 %v26322_v5, %v26321_v49  ;;  %v26334_v2 = vand.u32 4294901760, %v24184_v29  ;;  %v12051_v29 = vld [vmem:[%s25143_s4 + $0x90] sm:$0xff]  ;;  %v12058_v49 = vld [vmem:[%s25143_s4 + $0xc8] sm:$0xff] }
 0x5db   : > { %9134 = vst [vmem:[#allocation3 + $0x38] sm:$0xff] %v9126_v34  ;;  %v9137_v48 = vld [vmem:[#allocation3 + $0x10] ss:$2 sm:$0xff]  ;;  %v9145_v55 = vld [vmem:[#allocation3 + $0x11] ss:$2 sm:$0xff]  ;;  %26317 = vst [vmem:[#allocation57_spill] sm:$0xff] %v24395_v14  ;;  %v24429_v36 = vpack.c.bf16 %v26328_v25, %v26327_v32 }
 0x5dc   : > { %9133 = vst [vmem:[#allocation3 + $0x30] sm:$0xff] %v9125_v16  ;;  %v9151_v11 = vmax.f32 %v9137_v48, %v9145_v55  ;;  %26323 = vst [vmem:[#allocation9_spill] sm:$0xff] %v24413_v33  ;;  %v24445_v44 = vpack.c.bf16 %v26334_v2, %v26333_v17  ;;  %v9836_v48 = vand.u32 4294901760, %v12051_v29  ;;  %v9839_v55 = vand.u32 4294901760, %v12052_v35  ;;  %v12059_v32 = vld [vmem:[%s25143_s4 + $0xd0] sm:$0xff]  ;;  %v12060_v25 = vld [vmem:[%s25143_s4 + $0xd8] sm:$0xff] }
 0x5dd   : > { %26329 = vst [vmem:[#allocation95_spill] sm:$0xff] %v24429_v36  ;;  %v9860_v2 = vand.u32 4294901760, %v12059_v32 }
 0x5de   : > { %v9154_v18 = vmax.f32 %v9150_v19, %v9151_v11  ;;  %26335 = vst [vmem:[#allocation17_spill] sm:$0xff] %v24445_v44  ;;  %v12053_v19 = vld [vmem:[%s25143_s4 + $0xa0] sm:$0xff]  ;;  %v12054_v11 = vld [vmem:[%s25143_s4 + $0xa8] sm:$0xff] }
 0x5e0   : > { %v24315_v24 = vand.u32 4294901760, %v9154_v18 }
 0x5e2   : > { %v24318_v4 = vsub.f32 %v9154_v18, %v24315_v24  ;;  %v24491_v18 = vpack.c.bf16 %v9839_v55, %v9836_v48 }
 0x5e4   : > { %v24321_v52 = vand.u32 4294901760, %v24318_v4 }
 0x5e6   : > { %v9255_v0 = vsub.f32 %v24318_v4, %v24321_v52 }
 0x5e8   : > { %v24325_v26 = vand.u32 4294901760, %v9255_v0  ;;  %v9842_v0 = vand.u32 4294901760, %v12053_v19 }
 0x5ea   : > { %16206 = vmatmul.mubr.f32.vlgmr.msra.gmra.mrb[8].mxu1 %v24325_v26 }
 0x5eb   : > { %18767 = vmatpush3.bf16.msra.mxu1 %v24204_v7  ;;  %16240 = vmatprep.mubr.msk.f32.mxu1 %vm19868_vm0, %v25581_v30  ;;  %v26313_v7 = vand.u32 4294901760, %v24106_v1  ;;  %v26318_v1 = vand.u32 4294901760, %v24134_v50  ;;  %v26324_v50 = vand.u32 4294901760, %v24152_v62  ;;  %v26330_v62 = vand.u32 4294901760, %v24175_v53  ;;  %v12050_v53 = vld [vmem:[%s25143_s4 + $0x88] sm:$0xff] }
 0x5ec   : > { %18768 = vmatprep.subr.bf16.mxu1 %v25585_v57  ;;  %v9833_v8 = vand.u32 4294901760, %v12050_v53 }
 0x5ef   : > { %18770 = vmatpush3.bf16.msra.mxu1 %v24214_v42 }
 0x5f0   : > { %18771 = vmatprep.subr.bf16.mxu1 %v25585_v57 }
 0x5f3   : > { %18773 = vmatpush3.bf16.msra.mxu1 %v24224_v60 }
 0x5f4   : > { %18774 = vmatprep.subr.bf16.mxu1 %v25585_v57 }
 0x5f7   : > { %18776 = vmatpush3.bf16.msra.mxu1 %v24234_v6 }
 0x5f8   : > { %18777 = vmatprep.subr.bf16.mxu1 %v25585_v57 }
 0x5fb   : > { %18779 = vmatpush3.bf16.msra.mxu1 %v24244_v46 }
 0x5fc   : > { %18780 = vmatprep.subr.bf16.mxu1 %v25585_v57 }
 0x5ff   : > { %18782 = vmatpush3.bf16.msra.mxu1 %v24254_v23 }
 0x600   : > { %18783 = vmatprep.subr.bf16.mxu1 %v25585_v57 }
 0x603   : > { %18785 = vmatpush3.bf16.msra.mxu1 %v24264_v21 }
 0x604   : > { %18786 = vmatprep.subr.bf16.mxu1 %v25585_v57 }
 0x607   : > { %18788 = vmatpush3.bf16.msra.mxu1 %v24272_v13 }
 0x608   : > { %18789 = vmatprep.subr.bf16.mxu1 %v25585_v57 }
 0x60a   : > { %16241 = vmatmul.mubr.f32.vlgmr.msra.gmra.mrb[8].mxu1 %v24315_v24 }
 0x60b   : > { %18791 = vmatpush3.bf16.msra.mxu1 %v18790_v9  ;;  %16275 = vmatprep.mubr.msk.f32.mxu1 %vm19868_vm0, %v25581_v30  ;;  %v26314_v9 = vand.u32 4294901760, %v24108_v27  ;;  %v26319_v27 = vand.u32 4294901760, %v24136_v40  ;;  %v26325_v40 = vand.u32 4294901760, %v24154_v28  ;;  %v26331_v28 = vand.u32 4294901760, %v24180_v59 }
 0x60c   : > { %18792 = vmatprep.subr.bf16.mxu1 %v25585_v57 }
 0x60d   : > { %v18838_v12 = vpack.c.bf16 %v26314_v9, %v26313_v7  ;;  %v24405_v54 = vpack.c.bf16 %v26319_v27, %v26318_v1  ;;  %v24421_v10 = vpack.c.bf16 %v26325_v40, %v26324_v50  ;;  %v24437_v34 = vpack.c.bf16 %v26331_v28, %v26330_v62  ;;  %v12055_v9 = vld [vmem:[%s25143_s4 + $0xb0] sm:$0xff]  ;;  %v12057_v27 = vld [vmem:[%s25143_s4 + $0xc0] sm:$0xff] }
 0x60e   : > { %v9845_v7 = vand.u32 4294901760, %v12054_v11  ;;  %v9848_v45 = vand.u32 4294901760, %v12055_v9  ;;  %v9854_v50 = vand.u32 4294901760, %v12057_v27  ;;  %v9857_v40 = vand.u32 4294901760, %v12058_v49 }
 0x60f   : > { %18794 = vmatpush3.bf16.msra.mxu1 %v24278_v31  ;;  %26320 = vst [vmem:[#allocation11_spill] sm:$0xff] %v24405_v54  ;;  %26326 = vst [vmem:[#allocation60_spill] sm:$0xff] %v24421_v10  ;;  %v24524_v28 = vsub.f32 %v12050_v53, %v9833_v8  ;;  %v24540_v53 = vsub.f32 %v12052_v35, %v9839_v55  ;;  %v24555_v35 = vld [vmem:[%s25143_s4 + $0xf8] sm:$0xff] }
 0x610   : > { %18795 = vmatprep.subr.bf16.mxu1 %v25585_v57  ;;  %26332 = vst [vmem:[#allocation58_spill] sm:$0xff] %v24437_v34  ;;  %v24503_v20 = vpack.c.bf16 %v9845_v7, %v9842_v0  ;;  %v24527_v17 = vpack.c.bf16 %v9857_v40, %v9854_v50 }
 0x613   : > { %18797 = vmatpush3.bf16.msra.mxu1 %v24282_v47 }
 0x614   : > { %18798 = vmatprep.subr.bf16.mxu1 %v25585_v57 }
 0x617   : > { %18800 = vmatpush3.bf16.msra.mxu1 %v24286_v58 }
 0x618   : > { %18801 = vmatprep.subr.bf16.mxu1 %v25585_v57 }
 0x61b   : > { %18803 = vmatpush3.bf16.msra.mxu1 %v24290_v39 }
 0x61c   : > { %18804 = vmatprep.subr.bf16.mxu1 %v25585_v57 }
 0x61f   : > { %18806 = vmatpush3.bf16.msra.mxu1 %v24294_v37 }
 0x620   : > { %18807 = vmatprep.subr.bf16.mxu1 %v25585_v57 }
 0x623   : > { %18809 = vmatpush3.bf16.msra.mxu1 %v24298_v38  ;;  %v24567_v38 = vsub.f32 %v12054_v11, %v9845_v7 }
 0x624   : > { %18810 = vmatprep.subr.bf16.mxu1 %v25585_v57 }
 0x627   : > { %18812 = vmatpush3.bf16.msra.mxu1 %v24302_v43  ;;  %v25602_v43 = vand.u32 4294901760, %v24540_v53 }
 0x628   : > { %18813 = vmatprep.subr.bf16.mxu1 %v25585_v57 }
 0x629   : > { %v9945_v11 = vsub.f32 %v24540_v53, %v25602_v43 }
 0x62a   : > { %16276 = vmatmul.mubr.f32.vlgmr.msra.gmra.mrb[8].mxu1 %v24318_v4 }
 0x62b   : > { %18815 = vmatpush3.bf16.msra.mxu1 %v24085_v22  ;;  %16310 = vmatprep.mubr.msk.f32.mxu1 %vm19868_vm0, %v25581_v30  ;;  %v9946_v43 = vand.u32 4294901760, %v9945_v11 }
 0x62c   : > { %18816 = vmatprep.subr.bf16.mxu1 %v25585_v57 }
 0x62f   : > { %18818 = vmatpush3.bf16.msra.mxu1 %v24096_v3 }
 0x630   : > { %18819 = vmatprep.subr.bf16.mxu1 %v25585_v57 }
 0x633   : > { %18821 = vmatpush3.bf16.msra.mxu1 %v24110_v61 }
 0x634   : > { %18822 = vmatprep.subr.bf16.mxu1 %v25585_v57 }
 0x637   : > { %18824 = vmatpush3.bf16.msra.mxu1 %v24124_v51 }
 0x638   : > { %18825 = vmatprep.subr.bf16.mxu1 %v25585_v57 }
 0x63b   : > { %18827 = vmatpush3.bf16.msra.mxu1 %v24138_v56 }
 0x63c   : > { %18828 = vmatprep.subr.bf16.mxu1 %v25585_v57 }
 0x63f   : > { %18830 = vmatpush3.bf16.msra.mxu1 %v24165_v41 }
 0x640   : > { %18831 = vmatprep.subr.bf16.mxu1 %v25585_v57 }
 0x643   : > { %18833 = vmatpush3.bf16.msra.mxu1 %v24178_v63 }
 0x644   : > { %18834 = vmatprep.subr.bf16.mxu1 %v25585_v57 }
 0x647   : > { %18836 = vmatpush3.bf16.msra.mxu1 %v24191_v15 }
 0x648   : > { %18837 = vmatprep.subr.bf16.mxu1 %v25585_v57 }
 0x64a   : > { %16311 = vmatmul.mubr.f32.vlgmr.msra.gmra.mrb[8].mxu1 %v24321_v52 }
 0x64b   : > { %18839 = vmatpush3.bf16.msra.mxu1 %v18838_v12  ;;  %16345 = vmatprep.mubr.msk.f32.mxu1 %vm19868_vm0, %v25581_v30  ;;  %v12056_v12 = vld [vmem:[%s25143_s4 + $0xb8] sm:$0xff] }
 0x64c   : > { %18840 = vmatprep.subr.bf16.mxu1 %v25585_v57  ;;  %v9851_v1 = vand.u32 4294901760, %v12056_v12 }
 0x64e   : > { %v24513_v5 = vpack.c.bf16 %v9851_v1, %v9848_v45  ;;  %v24582_v7 = vsub.f32 %v12056_v12, %v9851_v1 }
 0x64f   : > { %18842 = vmatpush3.bf16.msra.mxu1 %v24395_v14 }
 0x650   : > { %18843 = vmatprep.subr.bf16.mxu1 %v25585_v57 }
 0x653   : > { %18845 = vmatpush3.bf16.msra.mxu1 %v24405_v54 }
 0x654   : > { %18846 = vmatprep.subr.bf16.mxu1 %v25585_v57 }
 0x657   : > { %18848 = vmatpush3.bf16.msra.mxu1 %v24413_v33  ;;  %v26336_v33 = vmov 0.0|0.0  }
 0x658   : > { %18849 = vmatprep.subr.bf16.mxu1 %v25585_v57 }
 0x65b   : > { %18851 = vmatpush3.bf16.msra.mxu1 %v24421_v10 }
 0x65c   : > { %18852 = vmatprep.subr.bf16.mxu1 %v25585_v57 }
 0x65f   : > { %18854 = vmatpush3.bf16.msra.mxu1 %v24429_v36 }
 0x660   : > { %18855 = vmatprep.subr.bf16.mxu1 %v25585_v57 }
 0x663   : > { %18857 = vmatpush3.bf16.msra.mxu1 %v24437_v34  ;;  %v24536_v34 = vld [vmem:[%s25143_s4 + $0xe8] sm:$0xff] }
 0x664   : > { %18858 = vmatprep.subr.bf16.mxu1 %v25585_v57  ;;  %v9869_v10 = vand.u32 4294901760, %v24536_v34 }
 0x667   : > { %18860 = vmatpush3.bf16.msra.mxu1 %v24445_v44  ;;  %v12061_v44 = vld [vmem:[%s25143_s4 + $0xe0] sm:$0xff] }
 0x668   : > { %18861 = vmatprep.subr.bf16.mxu1 %v25585_v57  ;;  %v9866_v36 = vand.u32 4294901760, %v12061_v44 }
 0x66a   : > { %16346 = vmatmul.mubr.f32.vlgmr.msra.gmra.mrb[8].mxu1 %v24315_v24  ;;  %v24570_v37 = vpack.c.bf16 %v9869_v10, %v9866_v36 }
 0x66b   : > { %18863 = vmatpush3.bf16.msra.mxu1 %v24085_v22  ;;  %16380 = vmatprep.mubr.msk.f32.mxu1 %vm19868_vm0, %v25581_v30  ;;  %v12049_v22 = vld [vmem:[%s25143_s4 + $0x80] sm:$0xff] }
 0x66c   : > { %18864 = vmatprep.subr.bf16.mxu1 %v25585_v57  ;;  %v9830_v59 = vand.u32 4294901760, %v12049_v22 }
 0x66e   : > { %v24480_v16 = vpack.c.bf16 %v9833_v8, %v9830_v59  ;;  %v24522_v62 = vsub.f32 %v12049_v22, %v9830_v59  ;;  %v24538_v22 = vsub.f32 %v12051_v29, %v9836_v48  ;;  %v25598_v8 = vand.u32 4294901760, %v24524_v28  ;;  %v12063_v29 = vld [vmem:[%s25143_s4 + $0xf0] sm:$0xff] }
 0x66f   : > { %18866 = vmatpush3.bf16.msra.mxu1 %v24096_v3  ;;  %v24557_v48 = vsub.f32 %v12053_v19, %v9842_v0  ;;  %v9872_v19 = vand.u32 4294901760, %v12063_v29  ;;  %v9875_v0 = vand.u32 4294901760, %v24555_v35 }
 0x670   : > { %18867 = vmatprep.subr.bf16.mxu1 %v25585_v57  ;;  %v25595_v59 = vand.u32 4294901760, %v24522_v62  ;;  %v9931_v54 = vsub.f32 %v24524_v28, %v25598_v8  ;;  %v25601_v14 = vand.u32 4294901760, %v24538_v22 }
 0x671   : > { %v24585_v47 = vpack.c.bf16 %v9875_v0, %v9872_v19  ;;  %v9951_v31 = vand.u32 4294901760, %v24557_v48 }
 0x672   : > { %v9924_v55 = vsub.f32 %v24522_v62, %v25595_v59  ;;  %v24574_v59 = vsub.f32 %v12055_v9, %v9848_v45  ;;  %v9932_v58 = vand.u32 4294901760, %v9931_v54  ;;  %v9938_v8 = vsub.f32 %v24538_v22, %v25601_v14 }
 0x673   : > { %18869 = vmatpush3.bf16.msra.mxu1 %v24110_v61  ;;  %v25604_v9 = vand.u32 4294901760, %v24567_v38  ;;  %v24590_v54 = vsub.f32 %v12057_v27, %v9854_v50  ;;  %v24592_v45 = vsub.f32 %v12058_v49, %v9857_v40  ;;  %v9952_v12 = vsub.f32 %v24557_v48, %v9951_v31 }
 0x674   : > { %18870 = vmatprep.subr.bf16.mxu1 %v25585_v57  ;;  %v9925_v39 = vand.u32 4294901760, %v9924_v55  ;;  %v9939_v14 = vand.u32 4294901760, %v9938_v8  ;;  %v25607_v13 = vand.u32 4294901760, %v24574_v59  ;;  %v25606_v27 = vand.u32 4294901760, %v24582_v7 }
 0x675   : > { %v9959_v1 = vsub.f32 %v24567_v38, %v25604_v9  ;;  %v25605_v50 = vand.u32 4294901760, %v24590_v54  ;;  %v25608_v40 = vand.u32 4294901760, %v24592_v45  ;;  %v9953_v8 = vand.u32 4294901760, %v9952_v12 }
 0x676   : > { %v24594_v55 = vpack.c.bf16 %v9932_v58, %v9925_v39  ;;  %v24606_v58 = vsub.f32 %v12059_v32, %v9860_v2  ;;  %v24611_v49 = vpack.c.bf16 %v9946_v43, %v9939_v14  ;;  %v9966_v9 = vsub.f32 %v24574_v59, %v25607_v13 }
 0x677   : > { %18872 = vmatpush3.bf16.msra.mxu1 %v24124_v51  ;;  %v9960_v11 = vand.u32 4294901760, %v9959_v1  ;;  %v26337_v32 = vmov 0.0   ;;  %v24625_v43 = vsub.f32 %v12061_v44, %v9866_v36  ;;  %v9987_v14 = vsub.f32 %v24592_v45, %v25608_v40 }
 0x678   : > { %18873 = vmatprep.subr.bf16.mxu1 %v25585_v57  ;;  %v24636_v12 = vsub.f32 %v24536_v34, %v9869_v10  ;;  %v9967_v36 = vand.u32 4294901760, %v9966_v9  ;;  %v24651_v34 = vsub.f32 %v24555_v35, %v9875_v0 }
 0x679   : > { %v24639_v1 = vpack.c.bf16 %v9960_v11, %v9953_v8  ;;  %v9988_v13 = vand.u32 4294901760, %v9987_v14 }
 0x67a   : > { %v25609_v14 = vand.u32 4294901760, %v24651_v34 }
 0x67b   : > { %18875 = vmatpush3.bf16.msra.mxu1 %v24138_v56 }
 0x67c   : > { %18876 = vmatprep.subr.bf16.mxu1 %v25585_v57 }
 0x67f   : > { %18878 = vmatpush3.bf16.msra.mxu1 %v24165_v41 }
 0x680   : > { %18879 = vmatprep.subr.bf16.mxu1 %v25585_v57 }
 0x683   : > { %18881 = vmatpush3.bf16.msra.mxu1 %v24178_v63 }
 0x684   : > { %18882 = vmatprep.subr.bf16.mxu1 %v25585_v57 }
 0x687   : > { %18884 = vmatpush3.bf16.msra.mxu1 %v24191_v15 }
 0x688   : > { %18885 = vmatprep.subr.bf16.mxu1 %v25585_v57 }
 0x68a   : > { %16381 = vmatmul.mubr.f32.vlgmr.msra.gmra.mrb[8].mxu1 %v24315_v24 }
 0x68b   : > { %18887 = vmatpush3.bf16.msra.mxu1 %v24480_v16  ;;  %16415 = vmatprep.mubr.msk.f32.mxu1 %vm19868_vm0, %v25581_v30  ;;  %v9863_v30 = vand.u32 4294901760, %v12060_v25 }
 0x68c   : > { %18888 = vmatprep.subr.bf16.mxu1 %v25585_v57 }
 0x68d   : > { %v24608_v39 = vsub.f32 %v12060_v25, %v9863_v30  ;;  %v25614_v25 = vand.u32 4294901760, %v24606_v58 }
 0x68f   : > { %18890 = vmatpush3.bf16.msra.mxu1 %v24491_v18  ;;  %v9994_v40 = vsub.f32 %v24606_v58, %v25614_v25 }
 0x690   : > { %18891 = vmatprep.subr.bf16.mxu1 %v25585_v57 }
 0x691   : > { %v9995_v11 = vand.u32 4294901760, %v9994_v40 }
 0x693   : > { %18893 = vmatpush3.bf16.msra.mxu1 %v24503_v20 }
 0x694   : > { %18894 = vmatprep.subr.bf16.mxu1 %v25585_v57 }
 0x697   : > { %18896 = vmatpush3.bf16.msra.mxu1 %v24513_v5 }
 0x698   : > { %18897 = vmatprep.subr.bf16.mxu1 %v25585_v57  ;;  %v24545_v57 = vpack.c.bf16 %v9863_v30, %v9860_v2  ;;  %v9973_v30 = vsub.f32 %v24582_v7, %v25606_v27  ;;  %v25613_v2 = vand.u32 4294901760, %v24608_v39 }
 0x69a   : > { %v9974_v44 = vand.u32 4294901760, %v9973_v30  ;;  %v10001_v10 = vsub.f32 %v24608_v39, %v25613_v2  ;;  %v26341_v2 = vand.u32 4294901760, %v24540_v53 }
 0x69b   : > { %18899 = vmatpush3.bf16.msra.mxu1 %v24527_v17 }
 0x69c   : > { %18900 = vmatprep.subr.bf16.mxu1 %v26336_v33  ;;  %v24654_v9 = vpack.c.bf16 %v9974_v44, %v9967_v36  ;;  %v10002_v30 = vand.u32 4294901760, %v10001_v10  ;;  %v10029_v44 = vsub.f32 %v24651_v34, %v25609_v14 }
 0x69f   : > { %18902 = vmatpush3.bf16.msra.mxu1 %v24545_v57 }
 0x6a0   : > { %18903 = vmatprep.subr.bf16.mxu1 %v26336_v33 }
 0x6a3   : > { %18905 = vmatpush3.bf16.msra.mxu1 %v24570_v37 }
 0x6a4   : > { %18906 = vmatprep.subr.bf16.mxu1 %v26336_v33 }
 0x6a7   : > { %18908 = vmatpush3.bf16.msra.mxu1 %v24585_v47 }
 0x6a8   : > { %18909 = vmatprep.subr.bf16.mxu1 %v26336_v33 }
 0x6aa   : > { %16416 = vmatmul.mubr.f32.vlgmr.msra.gmra.mrb[10].mxu1 %v24325_v26  ;;  %v9980_v26 = vsub.f32 %v24590_v54, %v25605_v50  ;;  %v24642_v50 = vsub.f32 %v12063_v29, %v9872_v19  ;;  %v25612_v29 = vand.u32 4294901760, %v24625_v43  ;;  %v25611_v19 = vand.u32 4294901760, %v24636_v12 }
 0x6ab   : > { %18911 = vmatpush3.bf16.msra.mxu1 %v24594_v55  ;;  %16450 = vmatprep.mubr.msk.f32.mxu1 %vm19868_vm0, %v26337_v32 }
 0x6ac   : > { %18912 = vmatprep.subr.bf16.mxu1 %v26336_v33  ;;  %v9981_v27 = vand.u32 4294901760, %v9980_v26  ;;  %v10008_v35 = vsub.f32 %v24625_v43, %v25612_v29  ;;  %v10015_v0 = vsub.f32 %v24636_v12, %v25611_v19  ;;  %v25610_v26 = vand.u32 4294901760, %v24642_v50 }
 0x6ad   : > { %v24737_v14 = vpack.c.bf16 %v24651_v34, %v24642_v50  ;;  %v26340_v29 = vand.u32 4294901760, %v24538_v22 }
 0x6ae   : > { %v24659_v8 = vpack.c.bf16 %v9988_v13, %v9981_v27  ;;  %v24671_v13 = vpack.c.bf16 %v10002_v30, %v9995_v11  ;;  %v10009_v27 = vand.u32 4294901760, %v10008_v35  ;;  %v10016_v40 = vand.u32 4294901760, %v10015_v0 }
 0x6af   : > { %18914 = vmatpush3.bf16.msra.mxu1 %v24611_v49  ;;  %v10022_v36 = vsub.f32 %v24642_v50, %v25610_v26  ;;  %v10030_v30 = vand.u32 4294901760, %v10029_v44  ;;  %v24692_v0 = vpack.c.bf16 %v24524_v28, %v24522_v62  ;;  %v24719_v44 = vpack.c.bf16 %v24592_v45, %v24590_v54 }
 0x6b0   : > { %18915 = vmatprep.subr.bf16.mxu1 %v26336_v33  ;;  %v24682_v10 = vpack.c.bf16 %v10016_v40, %v10009_v27  ;;  %v24699_v27 = vpack.c.bf16 %v24540_v53, %v24538_v22  ;;  %v24707_v40 = vpack.c.bf16 %v24567_v38, %v24557_v48  ;;  %v26339_v26 = vand.u32 4294901760, %v24524_v28 }
 0x6b1   : > { %v10023_v11 = vand.u32 4294901760, %v10022_v36  ;;  %v24713_v36 = vpack.c.bf16 %v24582_v7, %v24574_v59  ;;  %v24773_v25 = vpack.c.bf16 %v26341_v2, %v26340_v29  ;;  %v26343_v28 = vand.u32 4294901760, %v24574_v59 }
 0x6b2   : > { %v26344_v22 = vand.u32 4294901760, %v24582_v7  ;;  %v26345_v48 = vand.u32 4294901760, %v24590_v54  ;;  %v26347_v59 = vand.u32 4294901760, %v24606_v58  ;;  %v26348_v7 = vand.u32 4294901760, %v24608_v39 }
 0x6b3   : > { %18917 = vmatpush3.bf16.msra.mxu1 %v24639_v1  ;;  %v24686_v35 = vpack.c.bf16 %v10030_v30, %v10023_v11  ;;  %v24725_v11 = vpack.c.bf16 %v24608_v39, %v24606_v58  ;;  %v24731_v30 = vpack.c.bf16 %v24636_v12, %v24625_v43  ;;  %v26349_v54 = vand.u32 4294901760, %v24625_v43  ;;  %v10475_v43 = vld [vmem:[%s25143_s4 + $0x8] sm:$0xff] }
 0x6b4   : > { %18918 = vmatprep.subr.bf16.mxu1 %v26336_v33  ;;  %v24791_v53 = vpack.c.bf16 %v26344_v22, %v26343_v28  ;;  %v24807_v2 = vpack.c.bf16 %v26348_v7, %v26347_v59  ;;  %v26351_v58 = vand.u32 4294901760, %v24642_v50  ;;  %v26352_v39 = vand.u32 4294901760, %v24651_v34  ;;  %v10474_v50 = vld [vmem:[%s25143_s4] sm:$0xff]  ;;  %v9139_v22 = vld [vmem:[#allocation3 + $0x20] ss:$2 sm:$0xff] }
 0x6b5   : > { %v10494_v34 = vand.u32 4294901760, %v10475_v43  ;;  %v9149_v28 = vld [vmem:[#allocation3 + $0x31] ss:$2 sm:$0xff] }
 0x6b7   : > { %18920 = vmatpush3.bf16.msra.mxu1 %v24654_v9 }
 0x6b8   : > { %18921 = vmatprep.subr.bf16.mxu1 %v26336_v33 }
 0x6bb   : > { %18923 = vmatpush3.bf16.msra.mxu1 %v24659_v8 }
 0x6bc   : > { %18924 = vmatprep.subr.bf16.mxu1 %v26336_v33 }
 0x6bf   : > { %18926 = vmatpush3.bf16.msra.mxu1 %v24671_v13 }
 0x6c0   : > { %18927 = vmatprep.subr.bf16.mxu1 %v26336_v33 }
 0x6c3   : > { %18929 = vmatpush3.bf16.msra.mxu1 %v24682_v10 }
 0x6c4   : > { %18930 = vmatprep.subr.bf16.mxu1 %v26336_v33 }
 0x6c7   : > { %18932 = vmatpush3.bf16.msra.mxu1 %v24686_v35 }
 0x6c8   : > { %18933 = vmatprep.subr.bf16.mxu1 %v26336_v33 }
 0x6ca   : > { %16451 = vmatmul.mubr.f32.vlgmr.msra.gmra.mrb[10].mxu1 %v24315_v24 }
 0x6cb   : > { %18935 = vmatpush3.bf16.msra.mxu1 %v24692_v0  ;;  %16485 = vmatprep.mubr.msk.f32.mxu1 %vm19868_vm0, %v26337_v32 }
 0x6cc   : > { %18936 = vmatprep.subr.bf16.mxu1 %v26336_v33 }
 0x6cf   : > { %18938 = vmatpush3.bf16.msra.mxu1 %v24699_v27 }
 0x6d0   : > { %18939 = vmatprep.subr.bf16.mxu1 %v26336_v33 }
 0x6d3   : > { %18941 = vmatpush3.bf16.msra.mxu1 %v24707_v40 }
 0x6d4   : > { %18942 = vmatprep.subr.bf16.mxu1 %v26336_v33 }
 0x6d7   : > { %18944 = vmatpush3.bf16.msra.mxu1 %v24713_v36 }
 0x6d8   : > { %18945 = vmatprep.subr.bf16.mxu1 %v26336_v33 }
 0x6db   : > { %18947 = vmatpush3.bf16.msra.mxu1 %v24719_v44 }
 0x6dc   : > { %18948 = vmatprep.subr.bf16.mxu1 %v26336_v33 }
 0x6df   : > { %18950 = vmatpush3.bf16.msra.mxu1 %v24725_v11 }
 0x6e0   : > { %18951 = vmatprep.subr.bf16.mxu1 %v26336_v33 }
 0x6e3   : > { %18953 = vmatpush3.bf16.msra.mxu1 %v24731_v30 }
 0x6e4   : > { %18954 = vmatprep.subr.bf16.mxu1 %v26336_v33 }
 0x6e7   : > { %18956 = vmatpush3.bf16.msra.mxu1 %v24737_v14 }
 0x6e8   : > { %18957 = vmatprep.subr.bf16.mxu1 %v26336_v33 }
 0x6ea   : > { %16486 = vmatmul.mubr.f32.vlgmr.msra.gmra.mrb[10].mxu1 %v24318_v4  ;;  %v26338_v4 = vand.u32 4294901760, %v24522_v62  ;;  %v26342_v62 = vand.u32 4294901760, %v24567_v38  ;;  %v26346_v38 = vand.u32 4294901760, %v24592_v45  ;;  %v26350_v45 = vand.u32 4294901760, %v24636_v12 }
 0x6eb   : > { %18959 = vmatpush3.bf16.msra.mxu1 %v24480_v16  ;;  %16520 = vmatprep.mubr.msk.f32.mxu1 %vm19868_vm0, %v26337_v32  ;;  %v10491_v12 = vand.u32 4294901760, %v10474_v50 }
 0x6ec   : > { %18960 = vmatprep.subr.bf16.mxu1 %v26336_v33  ;;  %v24764_v19 = vpack.c.bf16 %v26339_v26, %v26338_v4  ;;  %v24815_v29 = vpack.c.bf16 %v26350_v45, %v26349_v54  ;;  %v24823_v26 = vpack.c.bf16 %v26352_v39, %v26351_v58  ;;  %v24866_v54 = vsub.f32 %v10475_v43, %v10494_v34 }
 0x6ed   : > { %v24852_v4 = vpack.c.bf16 %v10494_v34, %v10491_v12  ;;  %v24864_v7 = vsub.f32 %v10474_v50, %v10491_v12 }
 0x6ee   : > { %v10591_v39 = vand.u32 4294901760, %v24866_v54 }
 0x6ef   : > { %18962 = vmatpush3.bf16.msra.mxu1 %v24491_v18  ;;  %v10584_v58 = vand.u32 4294901760, %v24864_v7 }
 0x6f0   : > { %18963 = vmatprep.subr.bf16.mxu1 %v26336_v33  ;;  %v10592_v34 = vsub.f32 %v24866_v54, %v10591_v39 }
 0x6f1   : > { %v10585_v12 = vsub.f32 %v24864_v7, %v10584_v58 }
 0x6f3   : > { %18965 = vmatpush3.bf16.msra.mxu1 %v24503_v20 }
 0x6f4   : > { %18966 = vmatprep.subr.bf16.mxu1 %v26336_v33 }
 0x6f7   : > { %18968 = vmatpush3.bf16.msra.mxu1 %v24513_v5 }
 0x6f8   : > { %18969 = vmatprep.subr.bf16.mxu1 %v26336_v33 }
 0x6fb   : > { %18971 = vmatpush3.bf16.msra.mxu1 %v24527_v17 }
 0x6fc   : > { %18972 = vmatprep.subr.bf16.mxu1 %v26336_v33 }
 0x6ff   : > { %18974 = vmatpush3.bf16.msra.mxu1 %v24545_v57 }
 0x700   : > { %18975 = vmatprep.subr.bf16.mxu1 %v26336_v33 }
 0x703   : > { %18977 = vmatpush3.bf16.msra.mxu1 %v24570_v37 }
 0x704   : > { %18978 = vmatprep.subr.bf16.mxu1 %v26336_v33 }
 0x707   : > { %18980 = vmatpush3.bf16.msra.mxu1 %v24585_v47 }
 0x708   : > { %18981 = vmatprep.subr.bf16.mxu1 %v26336_v33 }
 0x70a   : > { %16521 = vmatmul.mubr.f32.vlgmr.msra.gmra.mrb[10].mxu1 %v24321_v52  ;;  %v24783_v52 = vpack.c.bf16 %v26342_v62, %v9951_v31  ;;  %v24799_v31 = vpack.c.bf16 %v26346_v38, %v26345_v48  ;;  %v9141_v62 = vld [vmem:[#allocation3 + $0x30] ss:$2 sm:$0xff]  ;;  %v9147_v48 = vld [vmem:[#allocation3 + $0x21] ss:$2 sm:$0xff] }
 0x70b   : > { %18983 = vmatpush3.bf16.msra.mxu1 %v24764_v19  ;;  %16555 = vmatprep.mubr.msk.f32.mxu1 %vm19868_vm0, %v26337_v32  ;;  %v9153_v38 = vmax.f32 %v9141_v62, %v9149_v28  ;;  %v9152_v59 = vmax.f32 %v9139_v22, %v9147_v48  ;;  %v10586_v22 = vand.u32 4294901760, %v10585_v12  ;;  %v10593_v48 = vand.u32 4294901760, %v10592_v34  ;;  %v26359_v12 = vld [vmem:[#allocation98_spill] sm:$0xff] }
 0x70c   : > { %18984 = vmatprep.subr.bf16.mxu1 %v26336_v33  ;;  %v26360_v34 = vld [vmem:[#allocation94_spill] sm:$0xff] }
 0x70f   : > { %18986 = vmatpush3.bf16.msra.mxu1 %v24773_v25 }
 0x710   : > { %18987 = vmatprep.subr.bf16.mxu1 %v26336_v33 }
 0x713   : > { %18989 = vmatpush3.bf16.msra.mxu1 %v24783_v52 }
 0x714   : > { %18990 = vmatprep.subr.bf16.mxu1 %v26336_v33 }
 0x717   : > { %18992 = vmatpush3.bf16.msra.mxu1 %v24791_v53 }
 0x718   : > { %18993 = vmatprep.subr.bf16.mxu1 %v26336_v33 }
 0x71b   : > { %18995 = vmatpush3.bf16.msra.mxu1 %v24799_v31 }
 0x71c   : > { %18996 = vmatprep.subr.bf16.mxu1 %v26336_v33 }
 0x71f   : > { %18998 = vmatpush3.bf16.msra.mxu1 %v24807_v2 }
 0x720   : > { %18999 = vmatprep.subr.bf16.mxu1 %v26336_v33 }
 0x723   : > { %19001 = vmatpush3.bf16.msra.mxu1 %v24815_v29 }
 0x724   : > { %19002 = vmatprep.subr.bf16.mxu1 %v26336_v33 }
 0x727   : > { %19004 = vmatpush3.bf16.msra.mxu1 %v24823_v26 }
 0x728   : > { %19005 = vmatprep.subr.bf16.mxu1 %v26336_v33 }
 0x72a   : > { %16556 = vmatmul.mubr.f32.vlgmr.msra.gmra.mrb[10].mxu1 %v24315_v24 }
 0x72b   : > { %19007 = vmatpush3.bf16.msra.mxu1 %v24480_v16  ;;  %16590 = vmatprep.mubr.msk.f32.mxu1 %vm19868_vm0, %v26337_v32 }
 0x72c   : > { %19008 = vmatprep.subr.bf16.mxu1 %v26336_v33 }
 0x72f   : > { %19010 = vmatpush3.bf16.msra.mxu1 %v24491_v18 }
 0x730   : > { %19011 = vmatprep.subr.bf16.mxu1 %v26336_v33 }
 0x733   : > { %19013 = vmatpush3.bf16.msra.mxu1 %v24503_v20 }
 0x734   : > { %19014 = vmatprep.subr.bf16.mxu1 %v26336_v33 }
 0x737   : > { %19016 = vmatpush3.bf16.msra.mxu1 %v24513_v5 }
 0x738   : > { %19017 = vmatprep.subr.bf16.mxu1 %v26336_v33 }
 0x73b   : > { %19019 = vmatpush3.bf16.msra.mxu1 %v24527_v17 }
 0x73c   : > { %19020 = vmatprep.subr.bf16.mxu1 %v26336_v33 }
 0x73f   : > { %19022 = vmatpush3.bf16.msra.mxu1 %v24545_v57 }
 0x740   : > { %19023 = vmatprep.subr.bf16.mxu1 %v26336_v33 }
 0x743   : > { %19025 = vmatpush3.bf16.msra.mxu1 %v24570_v37 }
 0x744   : > { %19026 = vmatprep.subr.bf16.mxu1 %v26336_v33 }
 0x747   : > { %19028 = vmatpush3.bf16.msra.mxu1 %v24585_v47 }
 0x748   : > { %19029 = vmatprep.subr.bf16.mxu1 %v26336_v33 }
 0x74a   : > { %16591 = vmatmul.mubr.f32.vlgmr.msra.gmra.mrb[10].mxu1 %v24315_v24  ;;  %v10473_v24 = vmax.f32 %v9152_v59, %v9153_v38  ;;  %v19054_v59 = vpack.c.bf16 %v10593_v48, %v10586_v22  ;;  %v19126_v22 = vpack.c.bf16 %v10591_v39, %v10584_v58  ;;  %v26361_v48 = vld [vmem:[#allocation57_spill] sm:$0xff]  ;;  %v26365_v58 = vld [vmem:[#allocation95_spill] sm:$0xff]  ;;  %v26366_v39 = vld [vmem:[#allocation58_spill] sm:$0xff] }
 0x74b   : > { %19031 = vmatpush3.bf16.msra.mxu1 %v24852_v4  ;;  %16625 = vmatprep.mubr.msk.f32.mxu1 %vm19868_vm0, %v26337_v32 }
 0x74c   : > { %19032 = vmatprep.subr.bf16.mxu1 %v26336_v33  ;;  %v24870_v45 = vand.u32 4294901760, %v10473_v24 }
 0x74e   : > { %v24877_v62 = vsub.f32 %v10473_v24, %v24870_v45 }
 0x74f   : > { %19034 = vmatpush3.bf16.msra.mxu1 %v24096_v3 }
 0x750   : > { %19035 = vmatprep.subr.bf16.mxu1 %v26336_v33  ;;  %v24890_v28 = vand.u32 4294901760, %v24877_v62 }
 0x752   : > { %v10574_v38 = vsub.f32 %v24877_v62, %v24890_v28 }
 0x753   : > { %19037 = vmatpush3.bf16.msra.mxu1 %v24110_v61 }
 0x754   : > { %19038 = vmatprep.subr.bf16.mxu1 %v26336_v33  ;;  %v24897_v24 = vand.u32 4294901760, %v10574_v38  ;;  %v26362_v38 = vld [vmem:[#allocation11_spill] sm:$0xff] }
 0x757   : > { %19040 = vmatpush3.bf16.msra.mxu1 %v24124_v51 }
 0x758   : > { %19041 = vmatprep.subr.bf16.mxu1 %v26336_v33 }
 0x75b   : > { %19043 = vmatpush3.bf16.msra.mxu1 %v24138_v56 }
 0x75c   : > { %19044 = vmatprep.subr.bf16.mxu1 %v26336_v33 }
 0x75d   : > { %v24879_v50 = vpop.f32.mrb[8].mxu1 }
 0x75e   : > { %v16382_v43 = vpop.f32.mrb[9].mxu1 }
 0x75f   : > { %19046 = vmatpush3.bf16.msra.mxu1 %v24165_v41  ;;  %v26358_v43 = vld [vmem:[#allocation36_spill] sm:$0xff] }
 0x760   : > { %19047 = vmatprep.subr.bf16.mxu1 %v26336_v33 }
 0x763   : > { %19049 = vmatpush3.bf16.msra.mxu1 %v24178_v63 }
 0x764   : > { %19050 = vmatprep.subr.bf16.mxu1 %v26336_v33 }
 0x767   : > { %19052 = vmatpush3.bf16.msra.mxu1 %v24191_v15 }
 0x768   : > { %19053 = vmatprep.subr.bf16.mxu1 %v26336_v33 }
 0x76a   : > { %16626 = vmatmul.mubr.f32.vlgmr.msra.gmra.mrb[12].mxu1 %v24897_v24 }
 0x76b   : > { %19055 = vmatpush3.bf16.msra.mxu1 %v19054_v59  ;;  %16660 = vmatprep.mubr.msk.f32.mxu1 %vm19868_vm0, %v26337_v32  ;;  %v26367_v59 = vld [vmem:[#allocation17_spill] sm:$0xff] }
 0x76c   : > { %19056 = vmatprep.subr.bf16.mxu1 %v26336_v33 }
 0x76f   : > { %19058 = vmatpush3.bf16.msra.mxu1 %v24214_v42  ;;  %v26353_v42 = vld [vmem:[#allocation102_spill] sm:$0xff] }
 0x770   : > { %19059 = vmatprep.subr.bf16.mxu1 %v26336_v33 }
 0x773   : > { %19061 = vmatpush3.bf16.msra.mxu1 %v24224_v60  ;;  %v19078_v60 = vpack.c.bf16 %v24866_v54, %v24864_v7  ;;  %v26363_v7 = vld [vmem:[#allocation9_spill] sm:$0xff]  ;;  %v26364_v54 = vld [vmem:[#allocation60_spill] sm:$0xff] }
 0x774   : > { %19062 = vmatprep.subr.bf16.mxu1 %v26336_v33 }
 0x777   : > { %19064 = vmatpush3.bf16.msra.mxu1 %v24234_v6  ;;  %v26354_v6 = vld [vmem:[#allocation87_spill] sm:$0xff] }
 0x778   : > { %19065 = vmatprep.subr.bf16.mxu1 %v26336_v33 }
 0x77b   : > { %19067 = vmatpush3.bf16.msra.mxu1 %v24244_v46  ;;  %v26355_v46 = vld [vmem:[#allocation13_spill] sm:$0xff] }
 0x77c   : > { %19068 = vmatprep.subr.bf16.mxu1 %v26336_v33 }
 0x77f   : > { %19070 = vmatpush3.bf16.msra.mxu1 %v24254_v23  ;;  %v26356_v23 = vld [vmem:[#allocation28_spill] sm:$0xff] }
 0x780   : > { %19071 = vmatprep.subr.bf16.mxu1 %v26336_v33 }
 0x783   : > { %19073 = vmatpush3.bf16.msra.mxu1 %v24264_v21  ;;  %v26357_v21 = vld [vmem:[#allocation32_spill] sm:$0xff] }
 0x784   : > { %19074 = vmatprep.subr.bf16.mxu1 %v26336_v33 }
 0x787   : > { %19076 = vmatpush3.bf16.msra.mxu1 %v26353_v42 }
 0x788   : > { %19077 = vmatprep.subr.bf16.mxu1 %v26336_v33 }
 0x78a   : > { %16661 = vmatmul.mubr.f32.vlgmr.msra.gmra.mrb[12].mxu1 %v24870_v45 }
 0x78b   : > { %19079 = vmatpush3.bf16.msra.mxu1 %v19078_v60  ;;  %16695 = vmatprep.mubr.msk.f32.mxu1 %vm19868_vm0, %v26337_v32 }
 0x78c   : > { %19080 = vmatprep.subr.bf16.mxu1 %v26336_v33 }
 0x78f   : > { %19082 = vmatpush3.bf16.msra.mxu1 %v26354_v6 }
 0x790   : > { %19083 = vmatprep.subr.bf16.mxu1 %v26336_v33 }
 0x793   : > { %19085 = vmatpush3.bf16.msra.mxu1 %v26355_v46 }
 0x794   : > { %19086 = vmatprep.subr.bf16.mxu1 %v26336_v33 }
 0x797   : > { %19088 = vmatpush3.bf16.msra.mxu1 %v26356_v23 }
 0x798   : > { %19089 = vmatprep.subr.bf16.mxu1 %v26336_v33 }
 0x79b   : > { %19091 = vmatpush3.bf16.msra.mxu1 %v26357_v21 }
 0x79c   : > { %19092 = vmatprep.subr.bf16.mxu1 %v26336_v33 }
 0x79f   : > { %19094 = vmatpush3.bf16.msra.mxu1 %v26358_v43 }
 0x7a0   : > { %19095 = vmatprep.subr.bf16.mxu1 %v26336_v33 }
 0x7a3   : > { %19097 = vmatpush3.bf16.msra.mxu1 %v26359_v12 }
 0x7a4   : > { %19098 = vmatprep.subr.bf16.mxu1 %v26336_v33 }
 0x7a7   : > { %19100 = vmatpush3.bf16.msra.mxu1 %v26360_v34 }
 0x7a8   : > { %19101 = vmatprep.subr.bf16.mxu1 %v26336_v33 }
 0x7aa   : > { %16696 = vmatmul.mubr.f32.vlgmr.msra.gmra.mrb[12].mxu1 %v24877_v62 }
 0x7ab   : > { %19103 = vmatpush3.bf16.msra.mxu1 %v24852_v4  ;;  %16730 = vmatprep.mubr.msk.f32.mxu1 %vm19868_vm0, %v26337_v32 }
 0x7ac   : > { %19104 = vmatprep.subr.bf16.mxu1 %v26336_v33 }
 0x7af   : > { %19106 = vmatpush3.bf16.msra.mxu1 %v24096_v3 }
 0x7b0   : > { %19107 = vmatprep.subr.bf16.mxu1 %v26336_v33 }
 0x7b3   : > { %19109 = vmatpush3.bf16.msra.mxu1 %v24110_v61 }
 0x7b4   : > { %19110 = vmatprep.subr.bf16.mxu1 %v26336_v33 }
 0x7b7   : > { %19112 = vmatpush3.bf16.msra.mxu1 %v24124_v51 }
 0x7b8   : > { %19113 = vmatprep.subr.bf16.mxu1 %v26336_v33 }
 0x7bb   : > { %19115 = vmatpush3.bf16.msra.mxu1 %v24138_v56 }
 0x7bc   : > { %19116 = vmatprep.subr.bf16.mxu1 %v26336_v33 }
 0x7bf   : > { %19118 = vmatpush3.bf16.msra.mxu1 %v24165_v41 }
 0x7c0   : > { %19119 = vmatprep.subr.bf16.mxu1 %v26336_v33 }
 0x7c3   : > { %19121 = vmatpush3.bf16.msra.mxu1 %v24178_v63 }
 0x7c4   : > { %19122 = vmatprep.subr.bf16.mxu1 %v26336_v33 }
 0x7c7   : > { %19124 = vmatpush3.bf16.msra.mxu1 %v24191_v15 }
 0x7c8   : > { %19125 = vmatprep.subr.bf16.mxu1 %v26336_v33 }
 0x7ca   : > { %16731 = vmatmul.mubr.f32.vlgmr.msra.gmra.mrb[12].mxu1 %v24890_v28 }
 0x7cb   : > { %19127 = vmatpush3.bf16.msra.mxu1 %v19126_v22  ;;  %16765 = vmatprep.mubr.msk.f32.mxu1 %vm19868_vm0, %v26337_v32 }
 0x7cc   : > { %19128 = vmatprep.subr.bf16.mxu1 %v26336_v33 }
 0x7cf   : > { %19130 = vmatpush3.bf16.msra.mxu1 %v26361_v48 }
 0x7d0   : > { %19131 = vmatprep.subr.bf16.mxu1 %v26336_v33 }
 0x7d3   : > { %19133 = vmatpush3.bf16.msra.mxu1 %v26362_v38 }
 0x7d4   : > { %19134 = vmatprep.subr.bf16.mxu1 %v26336_v33 }
 0x7d7   : > { %19136 = vmatpush3.bf16.msra.mxu1 %v26363_v7 }
 0x7d8   : > { %19137 = vmatprep.subr.bf16.mxu1 %v26336_v33 }
 0x7db   : > { %19139 = vmatpush3.bf16.msra.mxu1 %v26364_v54 }
 0x7dc   : > { %19140 = vmatprep.subr.bf16.mxu1 %v26336_v33 }
 0x7df   : > { %19142 = vmatpush3.bf16.msra.mxu1 %v26365_v58 }
 0x7e0   : > { %19143 = vmatprep.subr.bf16.mxu1 %v26336_v33 }
 0x7e3   : > { %19145 = vmatpush3.bf16.msra.mxu1 %v26366_v39 }
 0x7e4   : > { %19146 = vmatprep.subr.bf16.mxu1 %v26336_v33 }
 0x7e7   : > { %19148 = vmatpush3.bf16.msra.mxu1 %v26367_v59 }
 0x7e8   : > { %19149 = vmatprep.subr.bf16.mxu1 %v26336_v33 }
 0x7ea   : > { %16766 = vmatmul.mubr.f32.vlgmr.msra.gmra.mrb[12].mxu1 %v24870_v45 }
 0x7eb   : > { %19151 = vmatpush3.bf16.msra.mxu1 %v24852_v4  ;;  %16800 = vmatprep.mubr.msk.f32.mxu1 %vm19868_vm0, %v26337_v32 }
 0x7ec   : > { %19152 = vmatprep.subr.bf16.mxu1 %v26336_v33 }
 0x7ef   : > { %19154 = vmatpush3.bf16.msra.mxu1 %v24096_v3 }
 0x7f0   : > { %19155 = vmatprep.subr.bf16.mxu1 %v26336_v33 }
 0x7f3   : > { %19157 = vmatpush3.bf16.msra.mxu1 %v24110_v61 }
 0x7f4   : > { %19158 = vmatprep.subr.bf16.mxu1 %v26336_v33 }
 0x7f7   : > { %19160 = vmatpush3.bf16.msra.mxu1 %v24124_v51 }
 0x7f8   : > { %19161 = vmatprep.subr.bf16.mxu1 %v26336_v33 }
 0x7fb   : > { %19163 = vmatpush3.bf16.msra.mxu1 %v24138_v56 }
 0x7fc   : > { %19164 = vmatprep.subr.bf16.mxu1 %v26336_v33 }
 0x7ff   : > { %19166 = vmatpush3.bf16.msra.mxu1 %v24165_v41 }
 0x800   : > { %19167 = vmatprep.subr.bf16.mxu1 %v26336_v33 }
 0x803   : > { %19169 = vmatpush3.bf16.msra.mxu1 %v24178_v63 }
 0x804   : > { %19170 = vmatprep.subr.bf16.mxu1 %v26336_v33 }
 0x807   : > { %19172 = vmatpush3.bf16.msra.mxu1 %v24191_v15 }
 0x808   : > { %19173 = vmatprep.subr.bf16.mxu1 %v26336_v33 }
 0x80a   : > { %16801 = vmatmul.mubr.f32.vlgmr.msra.gmra.mrb[12].mxu1 %v24870_v45 }
 0x80b   : > { %19175 = vmatpush3.bf16.msra.mxu1 %v24480_v16  ;;  %16835 = vmatprep.mubr.msk.f32.mxu1 %vm19868_vm0, %v26337_v32 }
 0x80c   : > { %19176 = vmatprep.subr.bf16.mxu1 %v26336_v33 }
 0x80f   : > { %19178 = vmatpush3.bf16.msra.mxu1 %v24491_v18 }
 0x810   : > { %19179 = vmatprep.subr.bf16.mxu1 %v26336_v33 }
 0x813   : > { %19181 = vmatpush3.bf16.msra.mxu1 %v24503_v20 }
 0x814   : > { %19182 = vmatprep.subr.bf16.mxu1 %v26336_v33 }
 0x817   : > { %19184 = vmatpush3.bf16.msra.mxu1 %v24513_v5 }
 0x818   : > { %19185 = vmatprep.subr.bf16.mxu1 %v26336_v33 }
 0x81b   : > { %19187 = vmatpush3.bf16.msra.mxu1 %v24527_v17 }
 0x81c   : > { %19188 = vmatprep.subr.bf16.mxu1 %v26336_v33 }
 0x81d   : > { %v10466_v3 = vpop.f32.mrb[10].mxu1 }
 0x81e   : > { %v10470_v61 = vmax.f32 %v24879_v50, %v10466_v3  ;;  %v16592_v51 = vpop.f32.mrb[11].mxu1 }
 0x81f   : > { %19190 = vmatpush3.bf16.msra.mxu1 %v24545_v57 }
 0x820   : > { %10472 = vst.msk [vmem:[%s25016_s7] sm:$0xff] %vm10471_vm1, %v10470_v61  ;;  %19191 = vmatprep.subr.bf16.mxu1 %v26336_v33 }
 0x823   : > { %19193 = vmatpush3.bf16.msra.mxu1 %v24570_v37 }
 0x824   : > { %19194 = vmatprep.subr.bf16.mxu1 %v26336_v33 }
 0x827   : > { %19196 = vmatpush3.bf16.msra.mxu1 %v24585_v47 }
 0x828   : > { %19197 = vmatprep.subr.bf16.mxu1 %v26336_v33 }
 0x82a   : > { %16836 = vmatmul.mubr.f32.vlgmr.msra.gmra.mrb[14].mxu1 %v24897_v24 }
 0x82b   : > { %19199 = vmatpush3.bf16.msra.mxu1 %v24594_v55  ;;  %16870 = vmatprep.mubr.msk.f32.mxu1 %vm19868_vm0, %v26337_v32 }
 0x82c   : > { %19200 = vmatprep.subr.bf16.mxu1 %v26336_v33 }
 0x82f   : > { %19202 = vmatpush3.bf16.msra.mxu1 %v24611_v49 }
 0x830   : > { %19203 = vmatprep.subr.bf16.mxu1 %v26336_v33 }
 0x833   : > { %19205 = vmatpush3.bf16.msra.mxu1 %v24639_v1 }
 0x834   : > { %19206 = vmatprep.subr.bf16.mxu1 %v26336_v33 }
 0x837   : > { %19208 = vmatpush3.bf16.msra.mxu1 %v24654_v9 }
 0x838   : > { %19209 = vmatprep.subr.bf16.mxu1 %v26336_v33 }
 0x83b   : > { %19211 = vmatpush3.bf16.msra.mxu1 %v24659_v8 }
 0x83c   : > { %19212 = vmatprep.subr.bf16.mxu1 %v26336_v33 }
 0x83f   : > { %19214 = vmatpush3.bf16.msra.mxu1 %v24671_v13 }
 0x840   : > { %19215 = vmatprep.subr.bf16.mxu1 %v26336_v33 }
 0x843   : > { %19217 = vmatpush3.bf16.msra.mxu1 %v24682_v10 }
 0x844   : > { %19218 = vmatprep.subr.bf16.mxu1 %v26336_v33 }
 0x847   : > { %19220 = vmatpush3.bf16.msra.mxu1 %v24686_v35 }
 0x848   : > { %19221 = vmatprep.subr.bf16.mxu1 %v26336_v33 }
 0x84a   : > { %16871 = vmatmul.mubr.f32.vlgmr.msra.gmra.mrb[14].mxu1 %v24870_v45 }
 0x84b   : > { %19223 = vmatpush3.bf16.msra.mxu1 %v24692_v0  ;;  %16905 = vmatprep.mubr.msk.f32.mxu1 %vm19868_vm0, %v26337_v32 }
 0x84c   : > { %19224 = vmatprep.subr.bf16.mxu1 %v26336_v33 }
 0x84f   : > { %19226 = vmatpush3.bf16.msra.mxu1 %v24699_v27 }
 0x850   : > { %19227 = vmatprep.subr.bf16.mxu1 %v26336_v33 }
 0x853   : > { %19229 = vmatpush3.bf16.msra.mxu1 %v24707_v40 }
 0x854   : > { %19230 = vmatprep.subr.bf16.mxu1 %v26336_v33 }
 0x857   : > { %19232 = vmatpush3.bf16.msra.mxu1 %v24713_v36 }
 0x858   : > { %19233 = vmatprep.subr.bf16.mxu1 %v26336_v33 }
 0x85b   : > { %19235 = vmatpush3.bf16.msra.mxu1 %v24719_v44 }
 0x85c   : > { %19236 = vmatprep.subr.bf16.mxu1 %v26336_v33 }
 0x85f   : > { %19238 = vmatpush3.bf16.msra.mxu1 %v24725_v11 }
 0x860   : > { %19239 = vmatprep.subr.bf16.mxu1 %v26336_v33 }
 0x863   : > { %19241 = vmatpush3.bf16.msra.mxu1 %v24731_v30 }
 0x864   : > { %19242 = vmatprep.subr.bf16.mxu1 %v26336_v33 }
 0x867   : > { %19244 = vmatpush3.bf16.msra.mxu1 %v24737_v14 }
 0x868   : > { %19245 = vmatprep.subr.bf16.mxu1 %v26336_v33 }
 0x86a   : > { %16906 = vmatmul.mubr.f32.vlgmr.msra.gmra.mrb[14].mxu1 %v24877_v62 }
 0x86b   : > { %19247 = vmatpush3.bf16.msra.mxu1 %v24480_v16  ;;  %16940 = vmatprep.mubr.msk.f32.mxu1 %vm19868_vm0, %v26337_v32 }
 0x86c   : > { %19248 = vmatprep.subr.bf16.mxu1 %v26336_v33 }
 0x86f   : > { %19250 = vmatpush3.bf16.msra.mxu1 %v24491_v18 }
 0x870   : > { %19251 = vmatprep.subr.bf16.mxu1 %v26336_v33 }
 0x873   : > { %19253 = vmatpush3.bf16.msra.mxu1 %v24503_v20 }
 0x874   : > { %19254 = vmatprep.subr.bf16.mxu1 %v26336_v33 }
 0x877   : > { %19256 = vmatpush3.bf16.msra.mxu1 %v24513_v5 }
 0x878   : > { %19257 = vmatprep.subr.bf16.mxu1 %v26336_v33 }
 0x87b   : > { %19259 = vmatpush3.bf16.msra.mxu1 %v24527_v17 }
 0x87c   : > { %19260 = vmatprep.subr.bf16.mxu1 %v26336_v33 }
 0x87f   : > { %19262 = vmatpush3.bf16.msra.mxu1 %v24545_v57 }
 0x880   : > { %19263 = vmatprep.subr.bf16.mxu1 %v26336_v33 }
 0x883   : > { %19265 = vmatpush3.bf16.msra.mxu1 %v24570_v37 }
 0x884   : > { %19266 = vmatprep.subr.bf16.mxu1 %v26336_v33 }
 0x887   : > { %19268 = vmatpush3.bf16.msra.mxu1 %v24585_v47 }
 0x888   : > { %19269 = vmatprep.subr.bf16.mxu1 %v26336_v33 }
 0x88a   : > { %16941 = vmatmul.mubr.f32.vlgmr.msra.gmra.mrb[14].mxu1 %v24890_v28 }
 0x88b   : > { %19271 = vmatpush3.bf16.msra.mxu1 %v24764_v19  ;;  %16975 = vmatprep.mubr.msk.f32.mxu1 %vm19868_vm0, %v26337_v32 }
 0x88c   : > { %19272 = vmatprep.subr.bf16.mxu1 %v26336_v33 }
 0x88f   : > { %19274 = vmatpush3.bf16.msra.mxu1 %v24773_v25 }
 0x890   : > { %19275 = vmatprep.subr.bf16.mxu1 %v26336_v33 }
 0x893   : > { %19277 = vmatpush3.bf16.msra.mxu1 %v24783_v52 }
 0x894   : > { %19278 = vmatprep.subr.bf16.mxu1 %v26336_v33 }
 0x897   : > { %19280 = vmatpush3.bf16.msra.mxu1 %v24791_v53 }
 0x898   : > { %19281 = vmatprep.subr.bf16.mxu1 %v26336_v33 }
 0x89b   : > { %19283 = vmatpush3.bf16.msra.mxu1 %v24799_v31 }
 0x89c   : > { %19284 = vmatprep.subr.bf16.mxu1 %v26336_v33 }
 0x89f   : > { %19286 = vmatpush3.bf16.msra.mxu1 %v24807_v2 }
 0x8a0   : > { %19287 = vmatprep.subr.bf16.mxu1 %v26336_v33 }
 0x8a3   : > { %19289 = vmatpush3.bf16.msra.mxu1 %v24815_v29 }
 0x8a4   : > { %19290 = vmatprep.subr.bf16.mxu1 %v26336_v33 }
 0x8a7   : > { %19292 = vmatpush3.bf16.msra.mxu1 %v24823_v26 }
 0x8a8   : > { %19293 = vmatprep.subr.bf16.mxu1 %v26336_v33 }
 0x8aa   : > { %16976 = vmatmul.mubr.f32.vlgmr.msra.gmra.mrb[14].mxu1 %v24870_v45 }
 0x8ab   : > { %19295 = vmatpush3.bf16.msra.mxu1 %v24480_v16  ;;  %17010 = vmatprep.mubr.msk.f32.mxu1 %vm19868_vm0, %v26337_v32 }
 0x8ac   : > { %19296 = vmatprep.subr.bf16.mxu1 %v26336_v33 }
 0x8af   : > { %19298 = vmatpush3.bf16.msra.mxu1 %v24491_v18 }
 0x8b0   : > { %19299 = vmatprep.subr.bf16.mxu1 %v26336_v33 }
 0x8b3   : > { %19301 = vmatpush3.bf16.msra.mxu1 %v24503_v20 }
 0x8b4   : > { %19302 = vmatprep.subr.bf16.mxu1 %v26336_v33 }
 0x8b7   : > { %19304 = vmatpush3.bf16.msra.mxu1 %v24513_v5 }
 0x8b8   : > { %19305 = vmatprep.subr.bf16.mxu1 %v26336_v33 }
 0x8bb   : > { %19307 = vmatpush3.bf16.msra.mxu1 %v24527_v17 }
 0x8bc   : > { %19308 = vmatprep.subr.bf16.mxu1 %v26336_v33 }
 0x8bf   : > { %19310 = vmatpush3.bf16.msra.mxu1 %v24545_v57 }
 0x8c0   : > { %19311 = vmatprep.subr.bf16.mxu1 %v26336_v33 }
 0x8c3   : > { %19313 = vmatpush3.bf16.msra.mxu1 %v24570_v37 }
 0x8c4   : > { %19314 = vmatprep.subr.bf16.mxu1 %v26336_v33 }
 0x8c7   : > { %19316 = vmatpush3.bf16.msra.mxu1 %v24585_v47 }
 0x8ca   : > { %17011 = vmatmul.mubr.f32.vlgmr.msra.gmra.mrb[14].mxu1 %v24870_v45 }
 0x8dd   : > { %v11127_v56 = vpop.f32.mrb[12].mxu1 }
 0x8de   : > { %v16802_v41 = vpop.f32.mrb[13].mxu1 }
 0x99d   : > { %v11784_v63 = vpop.f32.mrb[14].mxu1 }
 0x99e   : > { %v11788_v15 = vmax.f32 %v11127_v56, %v11784_v63  ;;  %v17012_v16 = vpop.f32.mrb[15].mxu1 }
 0x9a0   : > { %12081 = vst.msk [vmem:[%s25016_s7 + $0x8] sm:$0xff] %vm10471_vm1, %v11788_v15 }
 0x9a1 PF: > { %s15_s22 = sadd.s32 1, %s19865_s22   ;;  %s26368_s18 = smov %s19857_s20 }
 0x9a2   : > { %p12_p9 = scmp.ge.s32.totalorder %s15_s22, 10   ;;  %s26369_s19 = smov %s19861_s21 }
 0x9a3   : > { %s26370_s20 = smov %s26373_s23  ;;  %s26371_s21 = smov %s26377_s24 }
 0x9a4   :  { %14 = sbr.rel (!%p12_p9) target bundleno = 3 (0x3), region = 91 }

</bundles_post_ra>
